<compile_context>
chip_gen: v7x
topology: tpu7x:2x2x1
jax: 0.10.0
libtpu: 0.0.40
codegen_flags: <defaults>
</compile_context>

<pallas_src>
import jax
import jax.numpy as jnp
from jax.experimental import pallas as pl
from jax.experimental.pallas import tpu as pltpu

EPS = 1e-5
N_REAL = 5096            # module's 4th hidden width (nn.Linear(1024, 5096))
N_PAD = 5120             # padded to a multiple of 128 (lane-dense)
TILE_N = 2560            # output-feature tile of the 1024 -> 5120 layer
NUM_TILES = N_PAD // TILE_N   # = 2 grid steps (one per TensorCore on v7x)


# ----------------------------- shared math ---------------------------------- #

def _bn_relu(y, gamma, beta):
    """Training-mode BatchNorm1d (biased variance, centered two-pass) + ReLU."""
    mean = jnp.mean(y, axis=0, keepdims=True)
    var = jnp.mean(jnp.square(y - mean), axis=0, keepdims=True)
    yh = (y - mean) * jax.lax.rsqrt(var + EPS)
    return jnp.maximum(yh * gamma + beta, 0.0)


def _dot_bf16(a, w):
    # bf16 operands into the MXU, f32 accumulation (int8 weights are cast to
    # bf16 here -- integers up to 127 are exact in bf16).
    return jnp.dot(a.astype(jnp.bfloat16), w.astype(jnp.bfloat16),
                   preferred_element_type=jnp.float32)


# ------------------------------- kernel ------------------------------------- #

def _generator_kernel(x_ref,
                      w1_ref, g1_ref, b1_ref,
                      w2_ref, g2_ref, b2_ref,
                      w3_ref, g3_ref, b3_ref,
                      w4q_ref, s4_ref, g4_ref, b4_ref,
                      w5t_ref,
                      o_ref):
    # Tiny front layers (32 -> 256 -> 512 -> 1024): recomputed per grid step
    # so every step is independent ("parallel" -> megacore on v7x).  Cost is
    # a few MFLOP, hidden under the ~3 MB/step weight DMA.
    h = _bn_relu(_dot_bf16(x_ref[...], w1_ref[...]), g1_ref[...], b1_ref[...])
    h = _bn_relu(_dot_bf16(h, w2_ref[...]), g2_ref[...], b2_ref[...])
    h = _bn_relu(_dot_bf16(h, w3_ref[...]), g3_ref[...], b3_ref[...])

    # Layer 4 N-tile: int8 weights -> bf16 -> MXU, dequant AFTER the matmul
    # (scale is per output column, so this is exact), then BN + ReLU.
    y4 = _dot_bf16(h, w4q_ref[...]) * s4_ref[...]
    h4 = _bn_relu(y4, g4_ref[...], b4_ref[...])

    # Partial of the final 5120 -> hidden contraction for this feature tile.
    # W5 is stored transposed -> contract both operands on their last axis.
    o_ref[0] = jax.lax.dot_general(
        h4.astype(jnp.bfloat16), w5t_ref[...],
        (((1,), (1,)), ((), ())),
        preferred_element_type=jnp.float32)


# ------------------------------- wrapper ------------------------------------ #

def generator_forward(params, x):
    B = x.shape[0]
    n_in = x.shape[1]
    n_out = params["w5t"].shape[0]

    def full(arr):
        nd = arr.ndim
        return pl.BlockSpec(arr.shape, lambda t, _nd=nd: (0,) * _nd)

    in_specs = [
        full(x),
        full(params["w1"]), full(params["g1"]), full(params["be1"]),
        full(params["w2"]), full(params["g2"]), full(params["be2"]),
        full(params["w3"]), full(params["g3"]), full(params["be3"]),
        pl.BlockSpec((1024, TILE_N), lambda t: (0, t)),   # W4 int8 N-tile
        pl.BlockSpec((1, TILE_N), lambda t: (0, t)),      # dequant scale tile
        pl.BlockSpec((1, TILE_N), lambda t: (0, t)),      # gamma4 tile
        pl.BlockSpec((1, TILE_N), lambda t: (0, t)),      # beta4 tile
        pl.BlockSpec((n_out, TILE_N), lambda t: (0, t)),  # W5^T tile (lane-dense)
    ]
    out_specs = pl.BlockSpec((1, B, n_out), lambda t: (t, 0, 0))

    flops = 2 * B * (n_in * 256 + 256 * 512 + 512 * 1024
                     + 1024 * N_PAD + N_PAD * n_out)
    bytes_accessed = (
        x.size * 4
        + (params["w1"].size + params["w2"].size + params["w3"].size) * 2
        + params["w4q"].size                                   # int8
        + params["w5t"].size * 2
        + (params["s4"].size + params["g4"].size + params["be4"].size) * 4
        + (256 + 512 + 1024) * 2 * 4                           # small gammas/betas
        + NUM_TILES * B * n_out * 4)

    partials = pl.pallas_call(
        _generator_kernel,
        out_shape=jax.ShapeDtypeStruct((NUM_TILES, B, n_out), jnp.float32),
        grid=(NUM_TILES,),
        in_specs=in_specs,
        out_specs=out_specs,
        compiler_params=pltpu.CompilerParams(
            dimension_semantics=("parallel",),   # independent tiles -> megacore on v7x
            vmem_limit_bytes=32 << 20,           # working set ~12 MB, fits every gen
        ),
        cost_estimate=pl.CostEstimate(
            flops=int(flops), transcendentals=0,
            bytes_accessed=int(bytes_accessed)),
    )(x,
      params["w1"], params["g1"], params["be1"],
      params["w2"], params["g2"], params["be2"],
      params["w3"], params["g3"], params["be3"],
      params["w4q"], params["s4"], params["g4"], params["be4"],
      params["w5t"])

    # Cross-tile (cross-core on v7x) reduction + final bias: two (B, n_out)
    # arrays, negligible XLA work.
    return jnp.sum(partials, axis=0) + params["b5"]


# --------------------------- parameter setup --------------------------------- #

def init_generator_params(key, n_input, hidden_size):
    """Init matching the module's layer shapes.

    Linear weights/bias ~ U(-1/sqrt(fan_in), 1/sqrt(fan_in)) (PyTorch-style),
    BatchNorm gamma = 1, beta = 0.  Pre-BN Linear biases are omitted (they
    cancel exactly in training-mode BatchNorm).  Layers 1-3 and 5 are bf16;
    layer 4 (the dominant HBM stream) is int8 with a per-output-column scale.
    Layers 4/5 are zero-padded from 5096 to 5120 features (transparent:
    padded W4 columns and W5^T columns are zero, padded beta is zero).
    """
    def uniform(k, shape, fan_in):
        bound = float(fan_in) ** -0.5
        return jax.random.uniform(k, shape, jnp.float32, -bound, bound)

    ks = jax.random.split(key, 6)
    p = {}
    # Layers 1-3: Linear (bias dropped, cancels in BN) + BN(gamma, beta).
    p["w1"] = uniform(ks[0], (n_input, 256), n_input).astype(jnp.bfloat16)
    p["g1"] = jnp.ones((1, 256), jnp.float32)
    p["be1"] = jnp.zeros((1, 256), jnp.float32)
    p["w2"] = uniform(ks[1], (256, 512), 256).astype(jnp.bfloat16)
    p["g2"] = jnp.ones((1, 512), jnp.float32)
    p["be2"] = jnp.zeros((1, 512), jnp.float32)
    p["w3"] = uniform(ks[2], (512, 1024), 512).astype(jnp.bfloat16)
    p["g3"] = jnp.ones((1, 1024), jnp.float32)
    p["be3"] = jnp.zeros((1, 1024), jnp.float32)

    # Layer 4: 1024 -> 5096 (padded to 5120), int8 per-output-column quant.
    w4 = uniform(ks[3], (1024, N_REAL), 1024)
    w4 = jnp.pad(w4, ((0, 0), (0, N_PAD - N_REAL)))
    amax = jnp.max(jnp.abs(w4), axis=0, keepdims=True)
    s4 = jnp.where(amax > 0.0, amax, 1.0) / 127.0
    p["w4q"] = jnp.clip(jnp.round(w4 / s4), -127.0, 127.0).astype(jnp.int8)
    p["s4"] = s4.astype(jnp.float32)               # (1, N_PAD)
    p["g4"] = jnp.ones((1, N_PAD), jnp.float32)
    p["be4"] = jnp.zeros((1, N_PAD), jnp.float32)

    # Layer 5: 5096 -> hidden, stored TRANSPOSED (hidden, 5120) bf16; padded
    # input features are zero columns.  Bias kept (added after the kernel).
    w5 = uniform(ks[4], (N_REAL, hidden_size), N_REAL)
    p["w5t"] = jnp.pad(w5, ((0, N_PAD - N_REAL), (0, 0))).T.astype(jnp.bfloat16)
    p["b5"] = uniform(ks[5], (1, hidden_size), N_REAL)
    return p


# --------------------------- pure-JAX reference ------------------------------ #

def generator_reference(params, x):
    """Mirrors the module math (training-mode BN) with the same weight
    representation (bf16 / int8-dequant) as the kernel."""
    h = _bn_relu(_dot_bf16(x, params["w1"]), params["g1"], params["be1"])
    h = _bn_relu(_dot_bf16(h, params["w2"]), params["g2"], params["be2"])
    h = _bn_relu(_dot_bf16(h, params["w3"]), params["g3"], params["be3"])
    y4 = _dot_bf16(h, params["w4q"]) * params["s4"]
    h4 = _bn_relu(y4, params["g4"], params["be4"])
    out = jax.lax.dot_general(
        h4.astype(jnp.bfloat16), params["w5t"],
        (((1,), (1,)), ((), ())),
        preferred_element_type=jnp.float32)
    return out + params["b5"]


# --------------------------------- main -------------------------------------- #

if __name__ == "__main__":
    n_input = 32
    hidden_size = 32
    batch = 8

    key = jax.random.PRNGKey(0)
    key, kx = jax.random.split(key)
    x = jax.random.normal(kx, (batch, n_input), dtype=jnp.float32)

    params = init_generator_params(key, n_input, hidden_size)

    out = jax.block_until_ready(generator_forward(params, x))
    ref = jax.block_until_ready(generator_reference(params, x))

    assert out.shape == (batch, hidden_size)
    if not bool(jnp.allclose(out, ref, atol=2e-2, rtol=2e-2)):
        max_err = float(jnp.max(jnp.abs(out - ref)))
        raise AssertionError(
            f"Pallas output does not match reference (max abs err {max_err})")

    print("KERNEL_OK")
</pallas_src>

<mosaic_0001>
module attributes {stable_mosaic.version = 11 : i64} {
  func.func @_generator_kernel(%arg0: i32, %arg1: memref<8x32xf32, #tpu.memory_space<vmem>>, %arg2: memref<32x256xbf16, #tpu.memory_space<vmem>>, %arg3: memref<1x256xf32, #tpu.memory_space<vmem>>, %arg4: memref<1x256xf32, #tpu.memory_space<vmem>>, %arg5: memref<256x512xbf16, #tpu.memory_space<vmem>>, %arg6: memref<1x512xf32, #tpu.memory_space<vmem>>, %arg7: memref<1x512xf32, #tpu.memory_space<vmem>>, %arg8: memref<512x1024xbf16, #tpu.memory_space<vmem>>, %arg9: memref<1x1024xf32, #tpu.memory_space<vmem>>, %arg10: memref<1x1024xf32, #tpu.memory_space<vmem>>, %arg11: memref<1024x2560xi8, #tpu.memory_space<vmem>>, %arg12: memref<1x2560xf32, #tpu.memory_space<vmem>>, %arg13: memref<1x2560xf32, #tpu.memory_space<vmem>>, %arg14: memref<1x2560xf32, #tpu.memory_space<vmem>>, %arg15: memref<32x2560xbf16, #tpu.memory_space<vmem>>, %arg16: memref<1x8x32xf32, #tpu.memory_space<vmem>>) attributes {dimension_semantics = [#tpu.dimension_semantics<parallel>], iteration_bounds = array<i64: 2>, scalar_prefetch = 0 : i64, scratch_operands = 0 : i64, tpu.core_type = #tpu.core_type<tc>, window_params = [{pipeline_mode = #tpu.pipeline_mode<synchronous>, transform_indices = @transform_0, window_bounds = array<i64: 8, 32>}, {pipeline_mode = #tpu.pipeline_mode<synchronous>, transform_indices = @transform_1, window_bounds = array<i64: 32, 256>}, {pipeline_mode = #tpu.pipeline_mode<synchronous>, transform_indices = @transform_2, window_bounds = array<i64: 1, 256>}, {pipeline_mode = #tpu.pipeline_mode<synchronous>, transform_indices = @transform_3, window_bounds = array<i64: 1, 256>}, {pipeline_mode = #tpu.pipeline_mode<synchronous>, transform_indices = @transform_4, window_bounds = array<i64: 256, 512>}, {pipeline_mode = #tpu.pipeline_mode<synchronous>, transform_indices = @transform_5, window_bounds = array<i64: 1, 512>}, {pipeline_mode = #tpu.pipeline_mode<synchronous>, transform_indices = @transform_6, window_bounds = array<i64: 1, 512>}, {pipeline_mode = #tpu.pipeline_mode<synchronous>, transform_indices = @transform_7, window_bounds = array<i64: 512, 1024>}, {pipeline_mode = #tpu.pipeline_mode<synchronous>, transform_indices = @transform_8, window_bounds = array<i64: 1, 1024>}, {pipeline_mode = #tpu.pipeline_mode<synchronous>, transform_indices = @transform_9, window_bounds = array<i64: 1, 1024>}, {transform_indices = @transform_10, window_bounds = array<i64: 1024, 2560>}, {transform_indices = @transform_11, window_bounds = array<i64: 1, 2560>}, {transform_indices = @transform_12, window_bounds = array<i64: 1, 2560>}, {transform_indices = @transform_13, window_bounds = array<i64: 1, 2560>}, {transform_indices = @transform_14, window_bounds = array<i64: 32, 2560>}, {transform_indices = @transform_15, window_bounds = array<i64: 1, 8, 32>}]} {
    %c0 = arith.constant 0 : index
    %c0_0 = arith.constant 0 : index
    %0 = vector.load %arg1[%c0, %c0_0] : memref<8x32xf32, #tpu.memory_space<vmem>>, vector<8x32xf32>
    %c0_1 = arith.constant 0 : index
    %c0_2 = arith.constant 0 : index
    %1 = vector.load %arg2[%c0_1, %c0_2] : memref<32x256xbf16, #tpu.memory_space<vmem>>, vector<32x256xbf16>
    %2 = arith.truncf %0 : vector<8x32xf32> to vector<8x32xbf16>
    %cst = arith.constant dense<0.000000e+00> : vector<8x256xf32>
    %3 = tpu.matmul %2, %1, %cst {dimension_numbers = #tpu.dot_dimension_numbers<[1], [0], [0], [1], [0, 0, 1, 1], [], []>} : vector<8x32xbf16>, vector<32x256xbf16>, vector<8x256xf32> -> vector<8x256xf32>
    %c0_3 = arith.constant 0 : index
    %c0_4 = arith.constant 0 : index
    %4 = vector.load %arg3[%c0_3, %c0_4] : memref<1x256xf32, #tpu.memory_space<vmem>>, vector<1x256xf32>
    %c0_5 = arith.constant 0 : index
    %c0_6 = arith.constant 0 : index
    %5 = vector.load %arg4[%c0_5, %c0_6] : memref<1x256xf32, #tpu.memory_space<vmem>>, vector<1x256xf32>
    %cst_7 = arith.constant dense<0.000000e+00> : vector<256xf32>
    %6 = vector.multi_reduction <add>, %3, %cst_7 [0] : vector<8x256xf32> to vector<256xf32>
    %7 = vector.shape_cast %6 : vector<256xf32> to vector<1x256xf32>
    %cst_8 = arith.constant 8.000000e+00 : f32
    %8 = vector.broadcast %cst_8 : f32 to vector<1x256xf32>
    %9 = arith.divf %7, %8 : vector<1x256xf32>
    %10 = vector.broadcast %9 : vector<1x256xf32> to vector<8x256xf32>
    %11 = arith.subf %3, %10 : vector<8x256xf32>
    %12 = arith.mulf %11, %11 : vector<8x256xf32>
    %cst_9 = arith.constant dense<0.000000e+00> : vector<256xf32>
    %13 = vector.multi_reduction <add>, %12, %cst_9 [0] : vector<8x256xf32> to vector<256xf32>
    %14 = vector.shape_cast %13 : vector<256xf32> to vector<1x256xf32>
    %cst_10 = arith.constant 8.000000e+00 : f32
    %15 = vector.broadcast %cst_10 : f32 to vector<1x256xf32>
    %16 = arith.divf %14, %15 : vector<1x256xf32>
    %17 = vector.broadcast %9 : vector<1x256xf32> to vector<8x256xf32>
    %18 = arith.subf %3, %17 : vector<8x256xf32>
    %cst_11 = arith.constant 9.99999974E-6 : f32
    %19 = vector.broadcast %cst_11 : f32 to vector<1x256xf32>
    %20 = arith.addf %16, %19 : vector<1x256xf32>
    %21 = math.rsqrt %20 : vector<1x256xf32>
    %22 = vector.broadcast %21 : vector<1x256xf32> to vector<8x256xf32>
    %23 = arith.mulf %18, %22 : vector<8x256xf32>
    %24 = vector.broadcast %4 : vector<1x256xf32> to vector<8x256xf32>
    %25 = arith.mulf %23, %24 : vector<8x256xf32>
    %26 = vector.broadcast %5 : vector<1x256xf32> to vector<8x256xf32>
    %27 = arith.addf %25, %26 : vector<8x256xf32>
    %cst_12 = arith.constant 0.000000e+00 : f32
    %28 = vector.broadcast %cst_12 : f32 to vector<8x256xf32>
    %29 = arith.maximumf %27, %28 : vector<8x256xf32>
    %c0_13 = arith.constant 0 : index
    %c0_14 = arith.constant 0 : index
    %30 = vector.load %arg5[%c0_13, %c0_14] : memref<256x512xbf16, #tpu.memory_space<vmem>>, vector<256x512xbf16>
    %31 = arith.truncf %29 : vector<8x256xf32> to vector<8x256xbf16>
    %cst_15 = arith.constant dense<0.000000e+00> : vector<8x512xf32>
    %32 = tpu.matmul %31, %30, %cst_15 {dimension_numbers = #tpu.dot_dimension_numbers<[1], [0], [0], [1], [0, 0, 1, 1], [], []>} : vector<8x256xbf16>, vector<256x512xbf16>, vector<8x512xf32> -> vector<8x512xf32>
    %c0_16 = arith.constant 0 : index
    %c0_17 = arith.constant 0 : index
    %33 = vector.load %arg6[%c0_16, %c0_17] : memref<1x512xf32, #tpu.memory_space<vmem>>, vector<1x512xf32>
    %c0_18 = arith.constant 0 : index
    %c0_19 = arith.constant 0 : index
    %34 = vector.load %arg7[%c0_18, %c0_19] : memref<1x512xf32, #tpu.memory_space<vmem>>, vector<1x512xf32>
    %cst_20 = arith.constant dense<0.000000e+00> : vector<512xf32>
    %35 = vector.multi_reduction <add>, %32, %cst_20 [0] : vector<8x512xf32> to vector<512xf32>
    %36 = vector.shape_cast %35 : vector<512xf32> to vector<1x512xf32>
    %cst_21 = arith.constant 8.000000e+00 : f32
    %37 = vector.broadcast %cst_21 : f32 to vector<1x512xf32>
    %38 = arith.divf %36, %37 : vector<1x512xf32>
    %39 = vector.broadcast %38 : vector<1x512xf32> to vector<8x512xf32>
    %40 = arith.subf %32, %39 : vector<8x512xf32>
    %41 = arith.mulf %40, %40 : vector<8x512xf32>
    %cst_22 = arith.constant dense<0.000000e+00> : vector<512xf32>
    %42 = vector.multi_reduction <add>, %41, %cst_22 [0] : vector<8x512xf32> to vector<512xf32>
    %43 = vector.shape_cast %42 : vector<512xf32> to vector<1x512xf32>
    %cst_23 = arith.constant 8.000000e+00 : f32
    %44 = vector.broadcast %cst_23 : f32 to vector<1x512xf32>
    %45 = arith.divf %43, %44 : vector<1x512xf32>
    %46 = vector.broadcast %38 : vector<1x512xf32> to vector<8x512xf32>
    %47 = arith.subf %32, %46 : vector<8x512xf32>
    %cst_24 = arith.constant 9.99999974E-6 : f32
    %48 = vector.broadcast %cst_24 : f32 to vector<1x512xf32>
    %49 = arith.addf %45, %48 : vector<1x512xf32>
    %50 = math.rsqrt %49 : vector<1x512xf32>
    %51 = vector.broadcast %50 : vector<1x512xf32> to vector<8x512xf32>
    %52 = arith.mulf %47, %51 : vector<8x512xf32>
    %53 = vector.broadcast %33 : vector<1x512xf32> to vector<8x512xf32>
    %54 = arith.mulf %52, %53 : vector<8x512xf32>
    %55 = vector.broadcast %34 : vector<1x512xf32> to vector<8x512xf32>
    %56 = arith.addf %54, %55 : vector<8x512xf32>
    %cst_25 = arith.constant 0.000000e+00 : f32
    %57 = vector.broadcast %cst_25 : f32 to vector<8x512xf32>
    %58 = arith.maximumf %56, %57 : vector<8x512xf32>
    %c0_26 = arith.constant 0 : index
    %c0_27 = arith.constant 0 : index
    %59 = vector.load %arg8[%c0_26, %c0_27] : memref<512x1024xbf16, #tpu.memory_space<vmem>>, vector<512x1024xbf16>
    %60 = arith.truncf %58 : vector<8x512xf32> to vector<8x512xbf16>
    %cst_28 = arith.constant dense<0.000000e+00> : vector<8x1024xf32>
    %61 = tpu.matmul %60, %59, %cst_28 {dimension_numbers = #tpu.dot_dimension_numbers<[1], [0], [0], [1], [0, 0, 1, 1], [], []>} : vector<8x512xbf16>, vector<512x1024xbf16>, vector<8x1024xf32> -> vector<8x1024xf32>
    %c0_29 = arith.constant 0 : index
    %c0_30 = arith.constant 0 : index
    %62 = vector.load %arg9[%c0_29, %c0_30] : memref<1x1024xf32, #tpu.memory_space<vmem>>, vector<1x1024xf32>
    %c0_31 = arith.constant 0 : index
    %c0_32 = arith.constant 0 : index
    %63 = vector.load %arg10[%c0_31, %c0_32] : memref<1x1024xf32, #tpu.memory_space<vmem>>, vector<1x1024xf32>
    %cst_33 = arith.constant dense<0.000000e+00> : vector<1024xf32>
    %64 = vector.multi_reduction <add>, %61, %cst_33 [0] : vector<8x1024xf32> to vector<1024xf32>
    %65 = vector.shape_cast %64 : vector<1024xf32> to vector<1x1024xf32>
    %cst_34 = arith.constant 8.000000e+00 : f32
    %66 = vector.broadcast %cst_34 : f32 to vector<1x1024xf32>
    %67 = arith.divf %65, %66 : vector<1x1024xf32>
    %68 = vector.broadcast %67 : vector<1x1024xf32> to vector<8x1024xf32>
    %69 = arith.subf %61, %68 : vector<8x1024xf32>
    %70 = arith.mulf %69, %69 : vector<8x1024xf32>
    %cst_35 = arith.constant dense<0.000000e+00> : vector<1024xf32>
    %71 = vector.multi_reduction <add>, %70, %cst_35 [0] : vector<8x1024xf32> to vector<1024xf32>
    %72 = vector.shape_cast %71 : vector<1024xf32> to vector<1x1024xf32>
    %cst_36 = arith.constant 8.000000e+00 : f32
    %73 = vector.broadcast %cst_36 : f32 to vector<1x1024xf32>
    %74 = arith.divf %72, %73 : vector<1x1024xf32>
    %75 = vector.broadcast %67 : vector<1x1024xf32> to vector<8x1024xf32>
    %76 = arith.subf %61, %75 : vector<8x1024xf32>
    %cst_37 = arith.constant 9.99999974E-6 : f32
    %77 = vector.broadcast %cst_37 : f32 to vector<1x1024xf32>
    %78 = arith.addf %74, %77 : vector<1x1024xf32>
    %79 = math.rsqrt %78 : vector<1x1024xf32>
    %80 = vector.broadcast %79 : vector<1x1024xf32> to vector<8x1024xf32>
    %81 = arith.mulf %76, %80 : vector<8x1024xf32>
    %82 = vector.broadcast %62 : vector<1x1024xf32> to vector<8x1024xf32>
    %83 = arith.mulf %81, %82 : vector<8x1024xf32>
    %84 = vector.broadcast %63 : vector<1x1024xf32> to vector<8x1024xf32>
    %85 = arith.addf %83, %84 : vector<8x1024xf32>
    %cst_38 = arith.constant 0.000000e+00 : f32
    %86 = vector.broadcast %cst_38 : f32 to vector<8x1024xf32>
    %87 = arith.maximumf %85, %86 : vector<8x1024xf32>
    %c0_39 = arith.constant 0 : index
    %c0_40 = arith.constant 0 : index
    %88 = vector.load %arg11[%c0_39, %c0_40] : memref<1024x2560xi8, #tpu.memory_space<vmem>>, vector<1024x2560xi8>
    %89 = arith.truncf %87 : vector<8x1024xf32> to vector<8x1024xbf16>
    %90 = arith.sitofp %88 : vector<1024x2560xi8> to vector<1024x2560xbf16>
    %cst_41 = arith.constant dense<0.000000e+00> : vector<8x2560xf32>
    %91 = tpu.matmul %89, %90, %cst_41 {dimension_numbers = #tpu.dot_dimension_numbers<[1], [0], [0], [1], [0, 0, 1, 1], [], []>} : vector<8x1024xbf16>, vector<1024x2560xbf16>, vector<8x2560xf32> -> vector<8x2560xf32>
    %c0_42 = arith.constant 0 : index
    %c0_43 = arith.constant 0 : index
    %92 = vector.load %arg12[%c0_42, %c0_43] : memref<1x2560xf32, #tpu.memory_space<vmem>>, vector<1x2560xf32>
    %93 = vector.broadcast %92 : vector<1x2560xf32> to vector<8x2560xf32>
    %94 = arith.mulf %91, %93 : vector<8x2560xf32>
    %c0_44 = arith.constant 0 : index
    %c0_45 = arith.constant 0 : index
    %95 = vector.load %arg13[%c0_44, %c0_45] : memref<1x2560xf32, #tpu.memory_space<vmem>>, vector<1x2560xf32>
    %c0_46 = arith.constant 0 : index
    %c0_47 = arith.constant 0 : index
    %96 = vector.load %arg14[%c0_46, %c0_47] : memref<1x2560xf32, #tpu.memory_space<vmem>>, vector<1x2560xf32>
    %cst_48 = arith.constant dense<0.000000e+00> : vector<2560xf32>
    %97 = vector.multi_reduction <add>, %94, %cst_48 [0] : vector<8x2560xf32> to vector<2560xf32>
    %98 = vector.shape_cast %97 : vector<2560xf32> to vector<1x2560xf32>
    %cst_49 = arith.constant 8.000000e+00 : f32
    %99 = vector.broadcast %cst_49 : f32 to vector<1x2560xf32>
    %100 = arith.divf %98, %99 : vector<1x2560xf32>
    %101 = vector.broadcast %100 : vector<1x2560xf32> to vector<8x2560xf32>
    %102 = arith.subf %94, %101 : vector<8x2560xf32>
    %103 = arith.mulf %102, %102 : vector<8x2560xf32>
    %cst_50 = arith.constant dense<0.000000e+00> : vector<2560xf32>
    %104 = vector.multi_reduction <add>, %103, %cst_50 [0] : vector<8x2560xf32> to vector<2560xf32>
    %105 = vector.shape_cast %104 : vector<2560xf32> to vector<1x2560xf32>
    %cst_51 = arith.constant 8.000000e+00 : f32
    %106 = vector.broadcast %cst_51 : f32 to vector<1x2560xf32>
    %107 = arith.divf %105, %106 : vector<1x2560xf32>
    %108 = vector.broadcast %100 : vector<1x2560xf32> to vector<8x2560xf32>
    %109 = arith.subf %94, %108 : vector<8x2560xf32>
    %cst_52 = arith.constant 9.99999974E-6 : f32
    %110 = vector.broadcast %cst_52 : f32 to vector<1x2560xf32>
    %111 = arith.addf %107, %110 : vector<1x2560xf32>
    %112 = math.rsqrt %111 : vector<1x2560xf32>
    %113 = vector.broadcast %112 : vector<1x2560xf32> to vector<8x2560xf32>
    %114 = arith.mulf %109, %113 : vector<8x2560xf32>
    %115 = vector.broadcast %95 : vector<1x2560xf32> to vector<8x2560xf32>
    %116 = arith.mulf %114, %115 : vector<8x2560xf32>
    %117 = vector.broadcast %96 : vector<1x2560xf32> to vector<8x2560xf32>
    %118 = arith.addf %116, %117 : vector<8x2560xf32>
    %cst_53 = arith.constant 0.000000e+00 : f32
    %119 = vector.broadcast %cst_53 : f32 to vector<8x2560xf32>
    %120 = arith.maximumf %118, %119 : vector<8x2560xf32>
    %121 = arith.truncf %120 : vector<8x2560xf32> to vector<8x2560xbf16>
    %c0_54 = arith.constant 0 : index
    %c0_55 = arith.constant 0 : index
    %122 = vector.load %arg15[%c0_54, %c0_55] : memref<32x2560xbf16, #tpu.memory_space<vmem>>, vector<32x2560xbf16>
    %cst_56 = arith.constant dense<0.000000e+00> : vector<8x32xf32>
    %123 = tpu.matmul %121, %122, %cst_56 {dimension_numbers = #tpu.dot_dimension_numbers<[1], [1], [0], [0], [0, 0, 1, 0], [], []>} : vector<8x2560xbf16>, vector<32x2560xbf16>, vector<8x32xf32> -> vector<8x32xf32>
    %c0_57 = arith.constant 0 : index
    %c0_58 = arith.constant 0 : index
    %c0_59 = arith.constant 0 : index
    %124 = vector.load %arg16[%c0_57, %c0_58, %c0_59] : memref<1x8x32xf32, #tpu.memory_space<vmem>>, vector<1x8x32xf32>
    %125 = vector.shape_cast %124 : vector<1x8x32xf32> to vector<8x32xf32>
    %126 = vector.shape_cast %123 : vector<8x32xf32> to vector<1x8x32xf32>
    tpu.vector_store %arg16[%c0_57, %c0_58, %c0_59], %126 {strides = array<i32>} : memref<1x8x32xf32, #tpu.memory_space<vmem>>, vector<1x8x32xf32>,
    return
  }
  func.func @transform_0(%arg0: i32) -> (i32, i32) {
    %c0_i32 = arith.constant 0 : i32
    %c0_i32_0 = arith.constant 0 : i32
    %c0_i32_1 = arith.constant 0 : i32
    return %c0_i32, %c0_i32_0 : i32, i32
  }
  func.func @transform_1(%arg0: i32) -> (i32, i32) {
    %c0_i32 = arith.constant 0 : i32
    %c0_i32_0 = arith.constant 0 : i32
    %c0_i32_1 = arith.constant 0 : i32
    return %c0_i32, %c0_i32_0 : i32, i32
  }
  func.func @transform_2(%arg0: i32) -> (i32, i32) {
    %c0_i32 = arith.constant 0 : i32
    %c0_i32_0 = arith.constant 0 : i32
    %c0_i32_1 = arith.constant 0 : i32
    return %c0_i32, %c0_i32_0 : i32, i32
  }
  func.func @transform_3(%arg0: i32) -> (i32, i32) {
    %c0_i32 = arith.constant 0 : i32
    %c0_i32_0 = arith.constant 0 : i32
    %c0_i32_1 = arith.constant 0 : i32
    return %c0_i32, %c0_i32_0 : i32, i32
  }
  func.func @transform_4(%arg0: i32) -> (i32, i32) {
    %c0_i32 = arith.constant 0 : i32
    %c0_i32_0 = arith.constant 0 : i32
    %c0_i32_1 = arith.constant 0 : i32
    return %c0_i32, %c0_i32_0 : i32, i32
  }
  func.func @transform_5(%arg0: i32) -> (i32, i32) {
    %c0_i32 = arith.constant 0 : i32
    %c0_i32_0 = arith.constant 0 : i32
    %c0_i32_1 = arith.constant 0 : i32
    return %c0_i32, %c0_i32_0 : i32, i32
  }
  func.func @transform_6(%arg0: i32) -> (i32, i32) {
    %c0_i32 = arith.constant 0 : i32
    %c0_i32_0 = arith.constant 0 : i32
    %c0_i32_1 = arith.constant 0 : i32
    return %c0_i32, %c0_i32_0 : i32, i32
  }
  func.func @transform_7(%arg0: i32) -> (i32, i32) {
    %c0_i32 = arith.constant 0 : i32
    %c0_i32_0 = arith.constant 0 : i32
    %c0_i32_1 = arith.constant 0 : i32
    return %c0_i32, %c0_i32_0 : i32, i32
  }
  func.func @transform_8(%arg0: i32) -> (i32, i32) {
    %c0_i32 = arith.constant 0 : i32
    %c0_i32_0 = arith.constant 0 : i32
    %c0_i32_1 = arith.constant 0 : i32
    return %c0_i32, %c0_i32_0 : i32, i32
  }
  func.func @transform_9(%arg0: i32) -> (i32, i32) {
    %c0_i32 = arith.constant 0 : i32
    %c0_i32_0 = arith.constant 0 : i32
    %c0_i32_1 = arith.constant 0 : i32
    return %c0_i32, %c0_i32_0 : i32, i32
  }
  func.func @transform_10(%arg0: i32) -> (i32, i32) {
    %c0_i32 = arith.constant 0 : i32
    %c0_i32_0 = arith.constant 0 : i32
    return %c0_i32, %arg0 : i32, i32
  }
  func.func @transform_11(%arg0: i32) -> (i32, i32) {
    %c0_i32 = arith.constant 0 : i32
    %c0_i32_0 = arith.constant 0 : i32
    return %c0_i32, %arg0 : i32, i32
  }
  func.func @transform_12(%arg0: i32) -> (i32, i32) {
    %c0_i32 = arith.constant 0 : i32
    %c0_i32_0 = arith.constant 0 : i32
    return %c0_i32, %arg0 : i32, i32
  }
  func.func @transform_13(%arg0: i32) -> (i32, i32) {
    %c0_i32 = arith.constant 0 : i32
    %c0_i32_0 = arith.constant 0 : i32
    return %c0_i32, %arg0 : i32, i32
  }
  func.func @transform_14(%arg0: i32) -> (i32, i32) {
    %c0_i32 = arith.constant 0 : i32
    %c0_i32_0 = arith.constant 0 : i32
    return %c0_i32, %arg0 : i32, i32
  }
  func.func @transform_15(%arg0: i32) -> (i32, i32, i32) {
    %c0_i32 = arith.constant 0 : i32
    %c0_i32_0 = arith.constant 0 : i32
    %c0_i32_1 = arith.constant 0 : i32
    return %arg0, %c0_i32, %c0_i32_0 : i32, i32, i32
  }
}

</mosaic_0001>

<bundles_post_ra>
// kernel: tpu_custom_call.1
= control target key start
LH: loop header
LB: loop body
LE: loop exit
PB: predicated region body
PF: predicated region fallthrough
CT: control target
= control target key end

     0   :  { %s12425_s0 = inlined_call_operand.hbm [shape: f32[8,32], index: 0, kind: input, shape index: {}]   ;;  %s12426_s1 = inlined_call_operand.hbm [shape: bf16[32,256], index: 1, kind: input, shape index: {}]   ;;  %s12427_s2 = inlined_call_operand.hbm [shape: f32[1,256], index: 2, kind: input, shape index: {}]   ;;  %s12428_s3 = inlined_call_operand.hbm [shape: f32[1,256], index: 3, kind: input, shape index: {}]   ;;  %s12429_s4 = inlined_call_operand.hbm [shape: bf16[256,512], index: 4, kind: input, shape index: {}]   ;;  %s12430_s5 = inlined_call_operand.hbm [shape: f32[1,512], index: 5, kind: input, shape index: {}]   ;;  %s12431_s6 = inlined_call_operand.hbm [shape: f32[1,512], index: 6, kind: input, shape index: {}]   ;;  %s12432_s7 = inlined_call_operand.hbm [shape: bf16[512,1024], index: 7, kind: input, shape index: {}]   ;;  %s12433_s8 = inlined_call_operand.hbm [shape: f32[1,1024], index: 8, kind: input, shape index: {}]   ;;  %s12434_s9 = inlined_call_operand.hbm [shape: f32[1,1024], index: 9, kind: input, shape index: {}]   ;;  %s12435_s10 = inlined_call_operand.hbm [shape: s8[1024,5120], index: 10, kind: input, shape index: {}]   ;;  %s12436_s11 = inlined_call_operand.hbm [shape: f32[1,5120], index: 11, kind: input, shape index: {}]   ;;  %s12437_s12 = inlined_call_operand.hbm [shape: f32[1,5120], index: 12, kind: input, shape index: {}]   ;;  %s12438_s13 = inlined_call_operand.hbm [shape: f32[1,5120], index: 13, kind: input, shape index: {}]   ;;  %s12439_s14 = inlined_call_operand.hbm [shape: bf16[32,5120], index: 14, kind: input, shape index: {}]   ;;  %s12440_s15 = inlined_call_operand.hbm [shape: f32[2,8,32], index: 15, kind: output, shape index: {}]  }
   0x1   :  { %12475 = sst [smem:[#allocation45_spill]] %s12425_s0 }
   0x2   :  { %12476 = sst [smem:[#allocation46_spill]] %s12433_s8 }
   0x3   :  { %12477 = sst [smem:[#allocation47_spill]] %s12434_s9 }
   0x4   :  { %12478 = sst [smem:[#allocation48_spill]] %s12435_s10 }
   0x5   :  { %12479 = sst [smem:[#allocation49_spill]] %s12436_s11 }
   0x6   :  { %12480 = sst [smem:[#allocation50_spill]] %s12437_s12 }
   0x7   :  { %12481 = sst [smem:[#allocation51_spill]] %s12439_s14 }
   0x8   :  { %12482 = sst [smem:[#allocation52_spill]] %s12440_s15 }
   0x9   :  { %20 = vsyncpa [#allocation3], 0 }
   0xa   :  { %21 = vsyncpa [#allocation6], 0 }
   0xb   :  { %22 = vsyncpa [#allocation9], 0 }
   0xc   :  { %23 = vsyncpa [#allocation12], 0 }
   0xd   :  { %24 = vsyncpa [#allocation15], 0 }
   0xe   :  { %25 = vsyncpa [#allocation18], 0 }
   0xf   :  { %26 = vsyncpa [#allocation4], 0 }
  0x10   :  { %28 = vsyncpa [#allocation4 + $0x1], 0  ;;  %s10546_s18 = smov 0   ;;  %s10548_s19 = smov 0  }
  0x11   :  { %s10550_s20 = smov 0   ;;  %s10552_s21 = smov 0  }
  0x12 LB: > { %12483 = sst [smem:[#allocation33_spill]] %s10424_s18  ;;  %s10438_s22 = smov [#allocation2]   ;;  %s10436_s21 = sphi %s10552_s21, %s12553_s21   ;;  %s10432_s20 = sphi %s10550_s20, %s12556_s20   ;;  %s10428_s19 = sphi %s10548_s19, %s12555_s19   ;;  %s10424_s18 = sphi %s10546_s18, %s12554_s18  }
  0x13   : > { %12484 = sst [smem:[#allocation34_spill]] %s10428_s19  ;;  %s418_s23 = sshll.u32 %s10438_s22, 4  ;;  %s419_s23 = int_to_ptr.vmem [resolvable:$true] %s418_s23 }
  0x14   : > { %12485 = sst [smem:[#allocation35_spill]] %s10432_s20  ;;  %s10567_s24 = sadd.s32 4294967295, %s10436_s21  }
  0x15   : > { %12486 = sst [smem:[#allocation36_spill]] %s10436_s21  ;;  %p8925_p0 = scmp.ge.s32.totalorder %s10436_s21, 1 }
  0x16   : > { %12487 = sst [smem:[#allocation37_spill]] %s10567_s24  ;;  %p12445_p1 = scmp.eq.s32.totalorder %s10567_s24, 0 }
  0x17   : > { %p405_p2 = scmp.lt.s32.totalorder %s10436_s21, 3  ;;  %s8924_s27 = sadd.s32 4294967294, %s10436_s21  }
  0x18   : > { %s10587_s28 = sadd.s32 1, %s10436_s21   ;;  %s12492_s0 = sld [smem:[#allocation45_spill]] }
  0x19   : > { %p10572_p3 = pnand %p8925_p0, %p405_p2  ;;  %12491 = sst [smem:[#allocation39_spill]] %s10587_s28 }
  0x1a   : > { %s248_s29 = ssub.s32 %s10436_s21, %s10587_s28 }
  0x1b   : > { %s12488_s25 = scalar_select %p10572_p3, 1, 0 }
  0x1c   : > { %p9557_p5 = pneg %p10572_p3 }
  0x1d   : > { %12489 = sst [smem:[#allocation38_spill]] %s12488_s25 }
  0x1e   : > { %p10581_p6 = pnand %p9557_p5, %p12445_p1  ;;  %s9916_s17 = scalar_lea.hbm %s12492_s0, 128 }
  0x1f   : > { %p9917_p7 = scmp.ne.s32.totalorder %s12492_s0, %s9916_s17  ;;  %p9923_p11 = scmp.lt.u32.totalorder %s9916_s17, %s12492_s0 }
  0x20   : > { %s12490_s26 = scalar_select %p10581_p6, 1, 0 }
  0x21   : > { %p10599_p8 = pneg %p10581_p6 }
  0x23   : > { %s12493_s25 = scalar_select %p10599_p8, 1, 0 }
  0x24   : > { %p9919_p9 = pnand %p10599_p8, %p9917_p7 }
  0x26   : > { %p9920_p10 = pneg %p9919_p9 }
  0x28   : > { %p9925_p12 = pnand %p9923_p11, %p9920_p10 }
  0x2a   : > { %9928 = shalt.err (!%p9925_p12)
}
  0x2b   : > { %s9929_s30 = scalar_lea.vmem %s419_s23, 128  ;;  %p9937_p5 = scmp.lt.s32.totalorder %s419_s23, %s419_s23 }
  0x2c   : > { %p9930_p13 = scmp.ne.s32.totalorder %s419_s23, %s9929_s30  ;;  %p9938_p4 = scmp.lt.s32.totalorder %s9929_s30, %s9929_s30 }
  0x2e   : > { %p9932_p0 = pnand %p9930_p13, %p10599_p8  ;;  %p9939_p1 = por %p9938_p4, %p9937_p5 }
  0x30   : > { %p9933_p2 = pneg %p9932_p0 }
  0x32   : > { %p9940_p3 = pnand %p9939_p1, %p9933_p2 }
  0x34   : > { %9943 = shalt.err (!%p9940_p3)
}
  0x35   : > { %9560 = dma.hbm_to_vmem [thread:$0]  (!%p10581_p6), %s12492_s0, 128, %s419_s23, [#allocation3]  }
  0x36   : > { %p249_p1 = scmp.eq.s32.totalorder %s248_s29, 0  ;;  %s251_s9 = sadd.s32 1, %s10432_s20 }
  0x37   : > { %p258_p3 = scmp.ne.s32.totalorder %s10432_s20, %s10428_s19  ;;  %p259_p4 = scmp.eq.s32.totalorder %s10436_s21, 0 }
  0x38   : > { %s10620_s14 = scalar_select %p249_p1, %s10432_s20, %s251_s9  }
  0x39   : > { %p260_p7 = por %p259_p4, %p258_p3  ;;  %p264_p9 = scmp.ne.s32.totalorder %s10428_s19, %s10424_s18 }
  0x3a   : > { %12494 = sst [smem:[#allocation40_spill]] %s10620_s14  ;;  %p392_p10 = scmp.eq.s32.totalorder %s10567_s24, 1 }
  0x3b   : > { %p398_p11 = scmp.eq.s32.totalorder %s8924_s27, 1  ;;  %p12495_p12 = scmp.eq.s32.totalorder %s10567_s24, 0 }
  0x3c   : > { %p9618_p0 = scmp.lt.s32.totalorder %s10436_s21, 2  ;;  %p10632_p2 = por %p392_p10, %p258_p3 }
  0x3d   : > { %p10627_p13 = por %p12495_p12, %p264_p9  ;;  %p10636_p5 = por %p398_p11, %p264_p9 }
  0x3e   : > { %s12498_s22 = scalar_select %p10632_p2, 1, 0 }
  0x3f   : > { %s12496_s17 = scalar_select %p10627_p13, 1, 0 }
  0x40   : > { %12499 = sst [smem:[#allocation42_spill]] %s12498_s22  ;;  %s534_s29 = sand.u32 1, %s10436_s21  }
  0x41   : > { %12497 = sst [smem:[#allocation41_spill]] %s12496_s17  ;;  %s10642_s30 = sand.u32 1, %s10432_s20  }
  0x42   : > { %s12500_s23 = scalar_select %p10636_p5, 1, 0 }
  0x43   : > { %12502 = sst [smem:[#allocation44_spill]] %s10642_s30  ;;  %s9497_s15 = smul.u32 5120, %s10642_s30 }
  0x44   : > { %12501 = sst [smem:[#allocation43_spill]] %s12500_s23  ;;  %s9323_s27 = smul.u32 2560, %s10436_s21 }
  0x45   : > { %p10646_p1 = pnand %p9618_p0, %p260_p7  ;;  %s12504_s10 = sld [smem:[#allocation48_spill]] }
  0x46   : > { %s538_s28 = scalar_lea.vmem [#allocation19], %s9497_s15  ;;  %s10657_s23 = scalar_lea.sflag [#allocation3], %s534_s29 }
  0x47   : > { %s12503_s16 = scalar_select %p10646_p1, 1, 0 }
  0x48   : > { %s545_s20 = sshll.u32 %s538_s28, 4  ;;  %p10663_p4 = pneg %p10646_p1  ;;  %s10655_s20 = int_to_ptr.vmem [resolvable:$true] %s545_s20 }
  0x4a   : > { %s12505_s22 = scalar_select %p10663_p4, 1, 0 }
  0x4b   : > { %s10653_s14 = scalar_lea.hbm %s12504_s10, %s9323_s27  ;;  %s9949_s15 = scalar_lea.hbm %s12504_s10, 163840 }
  0x4c   : > { %s9944_s18 = scalar_lea.hbm %s10653_s14, 81920  ;;  %p9950_p10 = scmp.lt.u32.totalorder %s10653_s14, %s12504_s10 }
  0x4d   : > { %p9945_p3 = scmp.ne.s32.totalorder %s10653_s14, %s9944_s18  ;;  %p9951_p11 = scmp.lt.u32.totalorder %s9949_s15, %s9944_s18 }
  0x4e   : > { %p9953_p0 = scmp.lt.u32.totalorder %s9944_s18, %s10653_s14 }
  0x4f   : > { %p9947_p7 = pnand %p10663_p4, %p9945_p3  ;;  %p9952_p12 = por %p9951_p11, %p9950_p10 }
  0x51   : > { %p9948_p9 = pneg %p9947_p7  ;;  %p9954_p5 = por %p9953_p0, %p9952_p12 }
  0x53   : > { %p9955_p2 = pnand %p9954_p5, %p9948_p9 }
  0x55   : > { %9958 = shalt.err (!%p9955_p2)
}
  0x56   : > { %s9959_s29 = scalar_lea.vmem %s10655_s20, 81920  ;;  %s10439_s0 = smov [#allocation19]  }
  0x57   : > { %p9960_p3 = scmp.ne.s32.totalorder %s10655_s20, %s9959_s29  ;;  %s9964_s27 = sshll.u32 %s10439_s0, 4  ;;  %s9965_s27 = int_to_ptr.vmem [resolvable:$false] %s9964_s27 }
  0x58   : > { %s9966_s28 = scalar_lea.vmem %s9965_s27, 163840  ;;  %p9967_p6 = scmp.lt.s32.totalorder %s10655_s20, %s9965_s27 }
  0x59   : > { %p9962_p7 = pnand %p9960_p3, %p10663_p4  ;;  %p9968_p8 = scmp.lt.s32.totalorder %s9966_s28, %s9959_s29 }
  0x5b   : > { %p9963_p13 = pneg %p9962_p7  ;;  %p9969_p10 = por %p9968_p8, %p9967_p6 }
  0x5d   : > { %p9970_p11 = pnand %p9969_p10, %p9963_p13 }
  0x5f   : > { %9973 = shalt.err (!%p9970_p11)
}
  0x60   : > { %s10440_s18 = smov 5120   ;;  %s12463_s15 = smov 2560  }
  0x61   : > { %s10442_s9 = smov 160   ;;  %s10689_s0 = smul.u32 20, %s10642_s30 }
  0x62   : > { %9591 = dma.hbm_to_vmem [thread:$0]  (!%p10646_p1), %s10653_s14, 81920, %s10655_s20, %s10657_s23, %s10440_s18, %s12463_s15, %s10442_s9  }
  0x63   : > { %s10692_s29 = smul.u32 320, %s10436_s21  ;;  %s10443_s27 = smov [#allocation5]  }
  0x64   : > { %s10694_s28 = sshll.u32 %s10443_s27, 4  ;;  %s12506_s11 = sld [smem:[#allocation49_spill]]  ;;  %s10729_s28 = int_to_ptr.vmem [resolvable:$true] %s10694_s28 }
  0x65   : > { %s559_s20 = scalar_lea.vmem [#allocation20], %s10689_s0  ;;  %s12507_s12 = sld [smem:[#allocation50_spill]] }
  0x66   : > { %s567_s14 = sshll.u32 %s559_s20, 4  ;;  %s568_s14 = int_to_ptr.vmem [resolvable:$true] %s567_s14 }
  0x6a   : > { %s10700_s19 = scalar_lea.hbm %s12506_s11, %s10692_s29  ;;  %s9979_s27 = scalar_lea.hbm %s12506_s11, 640 }
  0x6b   : > { %s10707_s15 = scalar_lea.hbm %s12507_s12, %s10692_s29  ;;  %s9974_s24 = scalar_lea.hbm %s10700_s19, 320 }
  0x6c   : > { %p9975_p6 = scmp.ne.s32.totalorder %s10700_s19, %s9974_s24  ;;  %p9980_p2 = scmp.lt.u32.totalorder %s10700_s19, %s12506_s11 }
  0x6d   : > { %p9981_p5 = scmp.lt.u32.totalorder %s9979_s27, %s9974_s24  ;;  %p9983_p12 = scmp.lt.u32.totalorder %s9974_s24, %s10700_s19 }
  0x6e   : > { %p9977_p8 = pnand %p9975_p6, %p10663_p4 }
  0x6f   : > { %p9982_p9 = por %p9981_p5, %p9980_p2 }
  0x70   : > { %p9978_p13 = pneg %p9977_p8 }
  0x71   : > { %p9984_p0 = por %p9983_p12, %p9982_p9 }
  0x73   : > { %p9985_p3 = pnand %p9984_p0, %p9978_p13 }
  0x75   : > { %9988 = shalt.err (!%p9985_p3)
}
  0x76   : > { %s9989_s20 = scalar_lea.vmem %s568_s14, 320  ;;  %s10444_s18 = smov [#allocation20]  }
  0x77   : > { %p9990_p7 = scmp.ne.s32.totalorder %s568_s14, %s9989_s20  ;;  %s9994_s9 = sshll.u32 %s10444_s18, 4  ;;  %s9995_s9 = int_to_ptr.vmem [resolvable:$false] %s9994_s9 }
  0x78   : > { %s9996_s10 = scalar_lea.vmem %s9995_s9, 640  ;;  %p9997_p6 = scmp.lt.s32.totalorder %s568_s14, %s9995_s9 }
  0x79   : > { %p9992_p10 = pnand %p9990_p7, %p10663_p4  ;;  %p9998_p8 = scmp.lt.s32.totalorder %s9996_s10, %s9989_s20 }
  0x7b   : > { %p9993_p11 = pneg %p9992_p10  ;;  %p9999_p1 = por %p9998_p8, %p9997_p6 }
  0x7d   : > { %p10000_p2 = pnand %p9999_p1, %p9993_p11 }
  0x7f   : > { %10003 = shalt.err (!%p10000_p2)
}
  0x80   : > { %p12508_p5 = scmp.ne.s32.totalorder %s12503_s16, 0  ;;  %s578_s21 = scalar_lea.vmem [#allocation21], %s10689_s0 }
  0x81   : > { %s586_s24 = sshll.u32 %s578_s21, 4  ;;  %s10004_s30 = scalar_lea.hbm %s10707_s15, 320  ;;  %s587_s24 = int_to_ptr.vmem [resolvable:$true] %s586_s24 }
  0x82   : > { %9594 = dma.hbm_to_vmem [thread:$0]  (!%p12508_p5), %s10700_s19, 320, %s568_s14, %s10657_s23  }
  0x83   : > { %p10005_p1 = scmp.ne.s32.totalorder %s10707_s15, %s10004_s30  ;;  %s10009_s20 = scalar_lea.hbm %s12507_s12, 640 }
  0x84   : > { %p10010_p12 = scmp.lt.u32.totalorder %s10707_s15, %s12507_s12  ;;  %p10011_p0 = scmp.lt.u32.totalorder %s10009_s20, %s10004_s30 }
  0x85   : > { %p10007_p13 = pnand %p10005_p1, %p10663_p4  ;;  %p10013_p7 = scmp.lt.u32.totalorder %s10004_s30, %s10707_s15 }
  0x86   : > { %p10012_p3 = por %p10011_p0, %p10010_p12 }
  0x87   : > { %p10008_p9 = pneg %p10007_p13 }
  0x88   : > { %p10014_p10 = por %p10013_p7, %p10012_p3 }
  0x8a   : > { %p10015_p11 = pnand %p10014_p10, %p10008_p9 }
  0x8c   : > { %10018 = shalt.err (!%p10015_p11)
}
  0x8d   : > { %s10019_s19 = scalar_lea.vmem %s587_s24, 320  ;;  %s10445_s14 = smov [#allocation21]  }
  0x8e   : > { %p10020_p6 = scmp.ne.s32.totalorder %s587_s24, %s10019_s19  ;;  %s10024_s10 = sshll.u32 %s10445_s14, 4  ;;  %s10025_s10 = int_to_ptr.vmem [resolvable:$false] %s10024_s10 }
  0x8f   : > { %s10026_s21 = scalar_lea.vmem %s10025_s10, 640  ;;  %p10027_p1 = scmp.lt.s32.totalorder %s587_s24, %s10025_s10 }
  0x90   : > { %p10022_p8 = pnand %p10020_p6, %p10663_p4  ;;  %p10028_p13 = scmp.lt.s32.totalorder %s10026_s21, %s10019_s19 }
  0x92   : > { %p10023_p2 = pneg %p10022_p8  ;;  %p10029_p5 = por %p10028_p13, %p10027_p1 }
  0x94   : > { %p10030_p0 = pnand %p10029_p5, %p10023_p2 }
  0x96   : > { %10033 = shalt.err (!%p10030_p0)
}
  0x97   : > { %p12509_p12 = scmp.ne.s32.totalorder %s12503_s16, 0  ;;  %s10034_s27 = scalar_lea.hbm %s12426_s1, 512 }
  0x98   : > { %p10035_p9 = scmp.ne.s32.totalorder %s12426_s1, %s10034_s27  ;;  %p12510_p3 = scmp.ne.s32.totalorder %s12493_s25, 0 }
  0x99   : > { %9597 = dma.hbm_to_vmem [thread:$0]  (!%p12509_p12), %s10707_s15, 320, %s587_s24, %s10657_s23  }
  0x9a   : > { %p10037_p7 = pnand %p10035_p9, %p12510_p3  ;;  %p10041_p5 = scmp.lt.u32.totalorder %s10034_s27, %s12426_s1 }
  0x9c   : > { %p10038_p10 = pneg %p10037_p7 }
  0x9e   : > { %p10043_p11 = pnand %p10041_p5, %p10038_p10 }
  0xa0   : > { %10046 = shalt.err (!%p10043_p11)
}
  0xa1   : > { %s10047_s15 = scalar_lea.vmem %s10729_s28, 512  ;;  %p10055_p1 = scmp.lt.s32.totalorder %s10729_s28, %s10729_s28 }
  0xa2   : > { %p10048_p6 = scmp.ne.s32.totalorder %s10729_s28, %s10047_s15  ;;  %p10056_p13 = scmp.lt.s32.totalorder %s10047_s15, %s10047_s15 }
  0xa4   : > { %p10050_p8 = pnand %p10048_p6, %p12510_p3  ;;  %p10057_p0 = por %p10056_p13, %p10055_p1 }
  0xa6   : > { %p10051_p2 = pneg %p10050_p8 }
  0xa8   : > { %p10058_p9 = pnand %p10057_p0, %p10051_p2 }
  0xaa   : > { %10061 = shalt.err (!%p10058_p9)
}
  0xab   : > { %s10446_s24 = smov 128   ;;  %s10447_s14 = smov 8  }
  0xac   : > { %p12511_p7 = scmp.ne.s32.totalorder %s12490_s26, 0  ;;  %s10448_s30 = smov [#allocation8]  }
  0xad   : > { %s453_s17 = sshll.u32 %s10448_s30, 4  ;;  %s10449_s27 = smov [#allocation11]   ;;  %s454_s17 = int_to_ptr.vmem [resolvable:$true] %s453_s17 }
  0xae   : > { %9563 = dma.hbm_to_vmem [thread:$0]  (!%p12511_p7), %s12426_s1, 512, %s10729_s28, [#allocation6], %s10446_s24, %s10446_s24, %s10447_s14  }
  0xaf   : > { %s477_s20 = sshll.u32 %s10449_s27, 4  ;;  %s10062_s19 = scalar_lea.hbm %s12428_s3, 32  ;;  %s478_s20 = int_to_ptr.vmem [resolvable:$true] %s477_s20 }
  0xb0   : > { %p10063_p10 = scmp.ne.s32.totalorder %s12428_s3, %s10062_s19  ;;  %p10069_p6 = scmp.lt.u32.totalorder %s10062_s19, %s12428_s3 }
  0xb2   : > { %p10065_p5 = pnand %p10063_p10, %p12510_p3 }
  0xb4   : > { %p10066_p11 = pneg %p10065_p5 }
  0xb6   : > { %p10071_p8 = pnand %p10069_p6, %p10066_p11 }
  0xb8   : > { %10074 = shalt.err (!%p10071_p8)
}
  0xb9   : > { %s10075_s28 = scalar_lea.vmem %s454_s17, 32  ;;  %p10083_p0 = scmp.lt.s32.totalorder %s454_s17, %s454_s17 }
  0xba   : > { %p10076_p2 = scmp.ne.s32.totalorder %s454_s17, %s10075_s28  ;;  %p10084_p9 = scmp.lt.s32.totalorder %s10075_s28, %s10075_s28 }
  0xbc   : > { %p10078_p1 = pnand %p10076_p2, %p12510_p3  ;;  %p10085_p12 = por %p10084_p9, %p10083_p0 }
  0xbe   : > { %p10079_p13 = pneg %p10078_p1 }
  0xc0   : > { %p10086_p4 = pnand %p10085_p12, %p10079_p13 }
  0xc2   : > { %10089 = shalt.err (!%p10086_p4)
}
  0xc3   : > { %9569 = dma.hbm_to_vmem [thread:$0]  (!%p12511_p7), %s12428_s3, 32, %s454_s17, [#allocation9]  }
  0xc4   : > { %s10090_s14 = scalar_lea.hbm %s12430_s5, 64 }
  0xc5   : > { %p10091_p10 = scmp.ne.s32.totalorder %s12430_s5, %s10090_s14  ;;  %p10097_p4 = scmp.lt.u32.totalorder %s10090_s14, %s12430_s5 }
  0xc7   : > { %p10093_p5 = pnand %p10091_p10, %p12510_p3 }
  0xc9   : > { %p10094_p12 = pneg %p10093_p5 }
  0xcb   : > { %p10099_p11 = pnand %p10097_p4, %p10094_p12 }
  0xcd   : > { %10102 = shalt.err (!%p10099_p11)
}
  0xce   : > { %s10103_s18 = scalar_lea.vmem %s478_s20, 64  ;;  %p10111_p1 = scmp.lt.s32.totalorder %s478_s20, %s478_s20 }
  0xcf   : > { %p10104_p6 = scmp.ne.s32.totalorder %s478_s20, %s10103_s18  ;;  %p10112_p13 = scmp.lt.s32.totalorder %s10103_s18, %s10103_s18 }
  0xd1   : > { %p10106_p8 = pnand %p10104_p6, %p12510_p3  ;;  %p10113_p0 = por %p10112_p13, %p10111_p1 }
  0xd3   : > { %p10107_p2 = pneg %p10106_p8 }
  0xd5   : > { %p10114_p9 = pnand %p10113_p0, %p10107_p2 }
  0xd7   : > { %10117 = shalt.err (!%p10114_p9)
}
  0xd8   : > { %9575 = dma.hbm_to_vmem [thread:$0]  (!%p12511_p7), %s12430_s5, 64, %s478_s20, [#allocation12]  }
  0xd9   : > { %s10450_s19 = smov [#allocation14]   ;;  %s10118_s24 = scalar_lea.hbm %s12432_s7, 32768 }
  0xda   : > { %s498_s15 = sshll.u32 %s10450_s19, 4  ;;  %p10119_p10 = scmp.ne.s32.totalorder %s12432_s7, %s10118_s24  ;;  %s499_s15 = int_to_ptr.vmem [resolvable:$true] %s498_s15 }
  0xdb   : > { %p10125_p4 = scmp.lt.u32.totalorder %s10118_s24, %s12432_s7 }
  0xdc   : > { %p10121_p5 = pnand %p10119_p10, %p12510_p3 }
  0xde   : > { %p10122_p12 = pneg %p10121_p5 }
  0xe0   : > { %p10127_p11 = pnand %p10125_p4, %p10122_p12 }
  0xe2   : > { %10130 = shalt.err (!%p10127_p11)
}
  0xe3   : > { %s10131_s20 = scalar_lea.vmem %s499_s15, 32768  ;;  %p10139_p1 = scmp.lt.s32.totalorder %s499_s15, %s499_s15 }
  0xe4   : > { %p10132_p6 = scmp.ne.s32.totalorder %s499_s15, %s10131_s20  ;;  %p10140_p13 = scmp.lt.s32.totalorder %s10131_s20, %s10131_s20 }
  0xe6   : > { %p10134_p8 = pnand %p10132_p6, %p12510_p3  ;;  %p10141_p0 = por %p10140_p13, %p10139_p1 }
  0xe8   : > { %p10135_p2 = pneg %p10134_p8 }
  0xea   : > { %p10142_p9 = pnand %p10141_p0, %p10135_p2 }
  0xec   : > { %10145 = shalt.err (!%p10142_p9)
}
  0xed   : > { %s10451_s21 = smov 512   ;;  %s10452_s30 = smov 32  }
  0xee   : > { %9581 = dma.hbm_to_vmem [thread:$0]  (!%p12511_p7), %s12432_s7, 32768, %s499_s15, [#allocation15], %s10451_s21, %s10451_s21, %s10452_s30  }
  0xef   : > { %s10830_s19 = scalar_lea.hbm %s12438_s13, %s10692_s29  ;;  %s597_s28 = scalar_lea.vmem [#allocation22], %s10689_s0 }
  0xf0   : > { %s605_s11 = sshll.u32 %s597_s28, 4  ;;  %s10453_s24 = smov [#allocation7]   ;;  %s10833_s11 = int_to_ptr.vmem [resolvable:$true] %s605_s11 }
  0xf1   : > { %s442_s8 = sshll.u32 %s10453_s24, 4  ;;  %s10146_s12 = scalar_lea.hbm %s10830_s19, 320  ;;  %s443_s8 = int_to_ptr.vmem [resolvable:$true] %s442_s8 }
  0xf2   : > { %p10147_p10 = scmp.ne.s32.totalorder %s10830_s19, %s10146_s12  ;;  %p12512_p5 = scmp.ne.s32.totalorder %s12505_s22, 0 }
  0xf3   : > { %s10151_s29 = scalar_lea.hbm %s12438_s13, 640  ;;  %p10152_p11 = scmp.lt.u32.totalorder %s10830_s19, %s12438_s13 }
  0xf4   : > { %p10149_p12 = pnand %p10147_p10, %p12512_p5  ;;  %p10153_p6 = scmp.lt.u32.totalorder %s10151_s29, %s10146_s12 }
  0xf5   : > { %p10155_p2 = scmp.lt.u32.totalorder %s10146_s12, %s10830_s19 }
  0xf6   : > { %p10150_p4 = pneg %p10149_p12  ;;  %p10154_p8 = por %p10153_p6, %p10152_p11 }
  0xf8   : > { %p10156_p1 = por %p10155_p2, %p10154_p8 }
  0xfa   : > { %p10157_p13 = pnand %p10156_p1, %p10150_p4 }
  0xfc   : > { %10160 = shalt.err (!%p10157_p13)
}
  0xfd   : > { %s10161_s0 = scalar_lea.vmem %s10833_s11, 320  ;;  %s10454_s21 = smov [#allocation22]  }
  0xfe   : > { %p10162_p0 = scmp.ne.s32.totalorder %s10833_s11, %s10161_s0  ;;  %s10166_s30 = sshll.u32 %s10454_s21, 4  ;;  %s10167_s30 = int_to_ptr.vmem [resolvable:$false] %s10166_s30 }
  0xff   : > { %s10168_s27 = scalar_lea.vmem %s10167_s30, 640  ;;  %p10169_p12 = scmp.lt.s32.totalorder %s10833_s11, %s10167_s30 }
 0x100   : > { %p10164_p9 = pnand %p10162_p0, %p12512_p5  ;;  %p10170_p7 = scmp.lt.s32.totalorder %s10168_s27, %s10161_s0 }
 0x102   : > { %p10165_p10 = pneg %p10164_p9  ;;  %p10171_p11 = por %p10170_p7, %p10169_p12 }
 0x104   : > { %p10172_p6 = pnand %p10171_p11, %p10165_p10 }
 0x106   : > { %10175 = shalt.err (!%p10172_p6)
}
 0x107   : > { %p12513_p4 = scmp.ne.s32.totalorder %s12503_s16, 0  ;;  %s10176_s9 = scalar_lea.hbm %s12427_s2, 32 }
 0x108   : > { %p10177_p8 = scmp.ne.s32.totalorder %s12427_s2, %s10176_s9  ;;  %p10183_p1 = scmp.lt.u32.totalorder %s10176_s9, %s12427_s2 }
 0x109   : > { %9600 = dma.hbm_to_vmem [thread:$0]  (!%p12513_p4), %s10830_s19, 320, %s10833_s11, %s10657_s23  }
 0x10a   : > { %p10179_p7 = pnand %p10177_p8, %p12510_p3 }
 0x10c   : > { %p10180_p2 = pneg %p10179_p7 }
 0x10e   : > { %p10185_p13 = pnand %p10183_p1, %p10180_p2 }
 0x110   : > { %10188 = shalt.err (!%p10185_p13)
}
 0x111   : > { %s10189_s14 = scalar_lea.vmem %s443_s8, 32  ;;  %p10197_p12 = scmp.lt.s32.totalorder %s443_s8, %s443_s8 }
 0x112   : > { %p10190_p0 = scmp.ne.s32.totalorder %s443_s8, %s10189_s14  ;;  %p10198_p11 = scmp.lt.s32.totalorder %s10189_s14, %s10189_s14 }
 0x114   : > { %p10192_p9 = pnand %p10190_p0, %p12510_p3  ;;  %p10199_p6 = por %p10198_p11, %p10197_p12 }
 0x116   : > { %p10193_p10 = pneg %p10192_p9 }
 0x118   : > { %p10200_p4 = pnand %p10199_p6, %p10193_p10 }
 0x11a   : > { %10203 = shalt.err (!%p10200_p4)
}
 0x11b   : > { %p12514_p8 = scmp.ne.s32.totalorder %s12490_s26, 0  ;;  %s10455_s29 = smov [#allocation10]  }
 0x11c   : > { %s463_s10 = sshll.u32 %s10455_s29, 4  ;;  %s10204_s21 = scalar_lea.hbm %s12429_s4, 8192  ;;  %s464_s10 = int_to_ptr.vmem [resolvable:$true] %s463_s10 }
 0x11d   : > { %9566 = dma.hbm_to_vmem [thread:$0]  (!%p12514_p8), %s12427_s2, 32, %s443_s8, [#allocation6]  }
 0x11e   : > { %p10205_p7 = scmp.ne.s32.totalorder %s12429_s4, %s10204_s21  ;;  %p10211_p1 = scmp.lt.u32.totalorder %s10204_s21, %s12429_s4 }
 0x120   : > { %p10207_p4 = pnand %p10205_p7, %p12510_p3 }
 0x122   : > { %p10208_p2 = pneg %p10207_p4 }
 0x124   : > { %p10213_p13 = pnand %p10211_p1, %p10208_p2 }
 0x126   : > { %10216 = shalt.err (!%p10213_p13)
}
 0x127   : > { %s10217_s8 = scalar_lea.vmem %s464_s10, 8192  ;;  %p10225_p12 = scmp.lt.s32.totalorder %s464_s10, %s464_s10 }
 0x128   : > { %p10218_p0 = scmp.ne.s32.totalorder %s464_s10, %s10217_s8  ;;  %p10226_p11 = scmp.lt.s32.totalorder %s10217_s8, %s10217_s8 }
 0x12a   : > { %p10220_p9 = pnand %p10218_p0, %p12510_p3  ;;  %p10227_p6 = por %p10226_p11, %p10225_p12 }
 0x12c   : > { %p10221_p10 = pneg %p10220_p9 }
 0x12e   : > { %p10228_p5 = pnand %p10227_p6, %p10221_p10 }
 0x130   : > { %10231 = shalt.err (!%p10228_p5)
}
 0x131   : > { %s10456_s9 = smov 256   ;;  %s10457_s28 = smov 16  }
 0x132   : > { %9572 = dma.hbm_to_vmem [thread:$0]  (!%p12514_p8), %s12429_s4, 8192, %s464_s10, [#allocation9], %s10456_s9, %s10456_s9, %s10457_s28  }
 0x133   : > { %s10458_s15 = smov [#allocation13]   ;;  %s10459_s19 = smov [#allocation16]  }
 0x134   : > { %s488_s14 = sshll.u32 %s10458_s15, 4  ;;  %s512_s11 = sshll.u32 %s10459_s19, 4  ;;  %s489_s14 = int_to_ptr.vmem [resolvable:$true] %s488_s14  ;;  %s10893_s11 = int_to_ptr.vmem [resolvable:$true] %s512_s11 }
 0x135   : > { %s10232_s0 = scalar_lea.hbm %s12431_s6, 64 }
 0x136   : > { %p10233_p5 = scmp.ne.s32.totalorder %s12431_s6, %s10232_s0  ;;  %p10239_p2 = scmp.lt.u32.totalorder %s10232_s0, %s12431_s6 }
 0x138   : > { %p10235_p7 = pnand %p10233_p5, %p12510_p3 }
 0x13a   : > { %p10236_p4 = pneg %p10235_p7 }
 0x13c   : > { %p10241_p1 = pnand %p10239_p2, %p10236_p4 }
 0x13e   : > { %10244 = shalt.err (!%p10241_p1)
}
 0x13f   : > { %s10245_s18 = scalar_lea.vmem %s489_s14, 64  ;;  %p10253_p10 = scmp.lt.s32.totalorder %s489_s14, %s489_s14 }
 0x140   : > { %p10246_p13 = scmp.ne.s32.totalorder %s489_s14, %s10245_s18  ;;  %p10254_p12 = scmp.lt.s32.totalorder %s10245_s18, %s10245_s18 }
 0x142   : > { %p10248_p0 = pnand %p10246_p13, %p12510_p3  ;;  %p10255_p11 = por %p10254_p12, %p10253_p10 }
 0x144   : > { %p10249_p9 = pneg %p10248_p0 }
 0x146   : > { %p10256_p6 = pnand %p10255_p11, %p10249_p9 }
 0x148   : > { %10259 = shalt.err (!%p10256_p6)
}
 0x149   : > { %9578 = dma.hbm_to_vmem [thread:$0]  (!%p12514_p8), %s12431_s6, 64, %s489_s14, [#allocation12]  }
 0x14a   : > { %s12515_s24 = sld [smem:[#allocation46_spill]] }
 0x150   : > { %s10260_s12 = scalar_lea.hbm %s12515_s24, 128 }
 0x151   : > { %p10261_p5 = scmp.ne.s32.totalorder %s12515_s24, %s10260_s12  ;;  %p10267_p2 = scmp.lt.u32.totalorder %s10260_s12, %s12515_s24 }
 0x153   : > { %p10263_p7 = pnand %p10261_p5, %p12510_p3 }
 0x155   : > { %p10264_p4 = pneg %p10263_p7 }
 0x157   : > { %p10269_p1 = pnand %p10267_p2, %p10264_p4 }
 0x159   : > { %10272 = shalt.err (!%p10269_p1)
}
 0x15a   : > { %s10273_s14 = scalar_lea.vmem %s10893_s11, 128  ;;  %p10281_p10 = scmp.lt.s32.totalorder %s10893_s11, %s10893_s11 }
 0x15b   : > { %p10274_p13 = scmp.ne.s32.totalorder %s10893_s11, %s10273_s14  ;;  %p10282_p12 = scmp.lt.s32.totalorder %s10273_s14, %s10273_s14 }
 0x15d   : > { %p10276_p0 = pnand %p10274_p13, %p12510_p3  ;;  %p10283_p11 = por %p10282_p12, %p10281_p10 }
 0x15f   : > { %p10277_p9 = pneg %p10276_p0 }
 0x161   : > { %p10284_p6 = pnand %p10283_p11, %p10277_p9 }
 0x163   : > { %10287 = shalt.err (!%p10284_p6)
}
 0x164   : > { %s12516_s30 = sld [smem:[#allocation44_spill]]  ;;  %s12517_s27 = sld [smem:[#allocation36_spill]] }
 0x165   : > { %9584 = dma.hbm_to_vmem [thread:$0]  (!%p12514_p8), %s12515_s24, 128, %s10893_s11, [#allocation15]  }
 0x166   : > { %s10460_s18 = smov [#allocation17]   ;;  %s12518_s12 = sld [smem:[#allocation47_spill]] }
 0x167   : > { %s523_s17 = sshll.u32 %s10460_s18, 4  ;;  %s524_s17 = int_to_ptr.vmem [resolvable:$true] %s523_s17 }
 0x16a   : > { %s9501_s10 = smul.u32 320, %s12516_s30 }
 0x16b   : > { %s9327_s8 = smul.u32 1280, %s12517_s27 }
 0x16c   : > { %s10288_s15 = scalar_lea.hbm %s12518_s12, 128 }
 0x16d   : > { %p10289_p5 = scmp.ne.s32.totalorder %s12518_s12, %s10288_s15  ;;  %p10295_p2 = scmp.lt.u32.totalorder %s10288_s15, %s12518_s12 }
 0x16f   : > { %p10291_p7 = pnand %p10289_p5, %p12510_p3 }
 0x171   : > { %p10292_p4 = pneg %p10291_p7 }
 0x173   : > { %p10297_p1 = pnand %p10295_p2, %p10292_p4 }
 0x175   : > { %10300 = shalt.err (!%p10297_p1)
}
 0x176   : > { %s10301_s11 = scalar_lea.vmem %s524_s17, 128  ;;  %p10309_p10 = scmp.lt.s32.totalorder %s524_s17, %s524_s17 }
 0x177   : > { %p10302_p13 = scmp.ne.s32.totalorder %s524_s17, %s10301_s11  ;;  %p10310_p12 = scmp.lt.s32.totalorder %s10301_s11, %s10301_s11 }
 0x179   : > { %p10304_p0 = pnand %p10302_p13, %p12510_p3  ;;  %p10311_p11 = por %p10310_p12, %p10309_p10 }
 0x17b   : > { %p10305_p9 = pneg %p10304_p0 }
 0x17d   : > { %p10312_p6 = pnand %p10311_p11, %p10305_p9 }
 0x17f   : > { %10315 = shalt.err (!%p10312_p6)
}
 0x180   : > { %9587 = dma.hbm_to_vmem [thread:$0]  (!%p12514_p8), %s12518_s12, 128, %s524_s17, [#allocation18]  }
 0x181   : > { %s12519_s18 = sld [smem:[#allocation51_spill]]  ;;  %s616_s25 = scalar_lea.vmem [#allocation23], %s9501_s10 }
 0x182   : > { %s623_s15 = sshll.u32 %s616_s25, 4  ;;  %p12521_p5 = scmp.ne.s32.totalorder %s12505_s22, 0  ;;  %s10961_s15 = int_to_ptr.vmem [resolvable:$true] %s623_s15 }
 0x187   : > { %s12520_s9 = smov %s12519_s18  ;;  %s10959_s28 = scalar_lea.hbm %s12519_s18, %s9327_s8 }
 0x188   : > { %s10316_s19 = scalar_lea.hbm %s10959_s28, 5120  ;;  %s10321_s29 = scalar_lea.hbm %s12520_s9, 10240 }
 0x189   : > { %p10317_p3 = scmp.ne.s32.totalorder %s10959_s28, %s10316_s19  ;;  %p10322_p8 = scmp.lt.u32.totalorder %s10959_s28, %s12520_s9 }
 0x18a   : > { %p10323_p2 = scmp.lt.u32.totalorder %s10321_s29, %s10316_s19  ;;  %p10325_p13 = scmp.lt.u32.totalorder %s10316_s19, %s10959_s28 }
 0x18b   : > { %p10319_p7 = pnand %p10317_p3, %p12521_p5 }
 0x18c   : > { %p10324_p1 = por %p10323_p2, %p10322_p8 }
 0x18d   : > { %p10320_p4 = pneg %p10319_p7 }
 0x18e   : > { %p10326_p0 = por %p10325_p13, %p10324_p1 }
 0x190   : > { %p10327_p9 = pnand %p10326_p0, %p10320_p4 }
 0x192   : > { %10330 = shalt.err (!%p10327_p9)
}
 0x193   : > { %s10331_s10 = scalar_lea.vmem %s10961_s15, 5120  ;;  %s10461_s14 = smov [#allocation23]  }
 0x194   : > { %p10332_p10 = scmp.ne.s32.totalorder %s10961_s15, %s10331_s10  ;;  %s10336_s11 = sshll.u32 %s10461_s14, 4  ;;  %s10337_s11 = int_to_ptr.vmem [resolvable:$false] %s10336_s11 }
 0x195   : > { %s10338_s0 = scalar_lea.vmem %s10337_s11, 10240  ;;  %p10339_p6 = scmp.lt.s32.totalorder %s10961_s15, %s10337_s11 }
 0x196   : > { %p10334_p12 = pnand %p10332_p10, %p12521_p5  ;;  %p10340_p3 = scmp.lt.s32.totalorder %s10338_s0, %s10331_s10 }
 0x198   : > { %p10335_p11 = pneg %p10334_p12  ;;  %p10341_p7 = por %p10340_p3, %p10339_p6 }
 0x19a   : > { %p10342_p8 = pnand %p10341_p7, %p10335_p11 }
 0x19c   : > { %10345 = shalt.err (!%p10342_p8)
}
 0x19d   : > { %s10462_s21 = smov 1280   ;;  %s10463_s30 = smov 80  }
 0x19e   : > { %p12522_p4 = scmp.ne.s32.totalorder %s12503_s16, 0  ;;  %s12523_s27 = smov 2560  }
 0x19f   : > { %s12524_s22 = sld [smem:[#allocation38_spill]] }
 0x1a0   : > { %9603 = dma.hbm_to_vmem [thread:$0]  (!%p12522_p4), %s10959_s28, 5120, %s10961_s15, %s10657_s23, %s12523_s27, %s10462_s21, %s10463_s30  }
 0x1a5   : > { %p12525_p5 = scmp.ne.s32.totalorder %s12524_s22, 0 }
 0x1a6   : > { %s12526_s18 = sld [smem:[#allocation37_spill]] (!%p12525_p5) }
 0x1a7   : > { %635 = sbr.rel (%p12525_p5) target bundleno = 3069 (0xbfd), region = 80 }
 0x1ac   : > { %p12527_p2 = scmp.eq.s32.totalorder (!%p12525_p5), %s12526_s18, 0 }
 0x1ae   : > { %10391 = dma.done.wait (%p12527_p2), [#allocation3], 128   ;;  %p12528_p1 = pmov %p12527_p2 }
 0x1b0   : > { %10393 = vsyncadd (%p12528_p1), [#allocation3], 4294967168  ;;  %p12529_p13 = pmov %p12528_p1 }
 0x1b1   : > { %p12530_p0 = pmov %p12528_p1 }
 0x1b2   : > { %10395 = dma.done.wait (%p12529_p13), [#allocation6], 544  }
 0x1b3   : > { %10397 = vsyncadd (%p12530_p0), [#allocation6], 4294966752  ;;  %p12531_p9 = pmov %p12530_p0 }
 0x1b4   : > { %p12532_p10 = pmov %p12530_p0 }
 0x1b5   : > { %10399 = dma.done.wait (%p12531_p9), [#allocation9], 8224  }
 0x1b6   : > { %10401 = vsyncadd (%p12532_p10), [#allocation9], 4294959072  ;;  %p12533_p12 = pmov %p12530_p0 }
 0x1b7   : > { %p12534_p11 = pmov %p12530_p0 }
 0x1b8   : > { %10403 = dma.done.wait (%p12533_p12), [#allocation12], 128  }
 0x1b9   : > { %10405 = vsyncadd (%p12534_p11), [#allocation12], 4294967168  ;;  %p12535_p6 = pmov %p12530_p0 }
 0x1ba   : > { %p12536_p3 = pmov %p12530_p0 }
 0x1bb   : > { %10407 = dma.done.wait (%p12535_p6), [#allocation15], 32896  }
 0x1bc   : > { %10409 = vsyncadd (%p12536_p3), [#allocation15], 4294934400  ;;  %p12537_p7 = pmov %p12530_p0 }
 0x1bd   : > { %p12538_p8 = pmov %p12530_p0 }
 0x1be   : > { %10411 = dma.done.wait (%p12537_p7), [#allocation18], 128  }
 0x1bf   : > { %10413 = vsyncadd (%p12538_p8), [#allocation18], 4294967168  ;;  %s12539_s23 = sld [smem:[#allocation34_spill]]  ;;  %s677_s28 = sand.u32 1, %s12526_s18  }
 0x1c0   : > { %s12540_s16 = sld [smem:[#allocation41_spill]]  ;;  %s678_s19 = scalar_lea.sflag [#allocation3], %s677_s28 }
 0x1c5   : > { %s11014_s25 = sand.u32 1, %s12539_s23  }
 0x1c6   : > { %s9502_s15 = smul.u32 5120, %s11014_s25  ;;  %p12541_p4 = scmp.ne.s32.totalorder %s12540_s16, 0 }
 0x1c8   : > { %s11017_s26 = scalar_lea.vmem [#allocation19], %s9502_s15 }
 0x1c9   : > { %10415 = dma.done.wait (%p12541_p4), %s678_s19, 88000  }
 0x1ca   : > { %10417 = vsyncadd (%p12541_p4), %s678_s19, 4294879296  ;;  %v10464_v0 = vmov 0   ;;  %v9684_v1 = vld [vmem:[#allocation5 + $0x4] ss:$8 sps:$4 sm:$0xff]   ;;  %v9686_v2 = vld [vmem:[#allocation5] ss:$8 sps:$4 sm:$0xff]  }
 0x1cb   : > { %852 = vmatprep.mubr.bf16.mxu0 %v10464_v0  ;;  %820 = vmatprep.subr.bf16.mxu0 %v9684_v1  ;;  %v9687_v3 = vld [vmem:[#allocation5 + $0x14] ss:$8 sps:$4 sm:$0xff]   ;;  %v9689_v4 = vld [vmem:[#allocation5 + $0x10] ss:$8 sps:$4 sm:$0xff]   ;;  %vm816_vm0 = vcmask 261120   ;;  %s9504_s17 = smul.u32 320, %s11014_s25 }
 0x1cc   : > { %821 = vmatpush1.bf16.msra.mxu0 %v9686_v2  ;;  %v790_v5 = vld [vmem:[#allocation2] sm:$0xff]  ;;  %v9690_v7 = vld [vmem:[#allocation10] ss:$16 sps:$4 sm:$0xff]   ;;  %v9740_v39 = vld [vmem:[#allocation10 + $0xc] ss:$16 sps:$4 sm:$0xff]   ;;  %s11929_s20 = smul.u32 20, %s11014_s25 }
 0x1cd   : > { %822 = vmatprep.subr.bf16.mxu0 %v9687_v3  ;;  %v9692_v6 = vld [vmem:[#allocation10 + $0x4] ss:$16 sps:$4 sm:$0xff]   ;;  %v795_v8 = vpack.c.bf16 %v790_v5, %v790_v5  ;;  %v9693_v10 = vld [vmem:[#allocation10 + $0x20] ss:$16 sps:$4 sm:$0xff]   ;;  %v1530_v40 = vld [vmem:[#allocation14] sm:$0xff]  ;;  %s11925_s29 = scalar_lea.vmem [#allocation23], %s9504_s17 }
 0x1ce   : > { %v9695_v9 = vld [vmem:[#allocation10 + $0x24] ss:$16 sps:$4 sm:$0xff]   ;;  %v9696_v12 = vld [vmem:[#allocation10 + $0x40] ss:$16 sps:$4 sm:$0xff]   ;;  %v1534_v41 = vld [vmem:[#allocation14 + $0x20] sm:$0xff]  ;;  %s11937_s8 = scalar_lea.vmem [#allocation20], %s11929_s20 }
 0x1cf   : > { %v9698_v11 = vld [vmem:[#allocation10 + $0x44] ss:$16 sps:$4 sm:$0xff]   ;;  %v9699_v14 = vld [vmem:[#allocation10 + $0x60] ss:$16 sps:$4 sm:$0xff]   ;;  %v9024_v42 = vcombine.high %v1530_v40, %v1534_v41  ;;  %v9023_v43 = vcombine.low %v1530_v40, %v1534_v41  ;;  %v1538_v44 = vld [vmem:[#allocation14 + $0x40] sm:$0xff]  ;;  %s12108_s10 = scalar_lea.vmem [#allocation21], %s11929_s20 }
 0x1d0   : > { %823 = vmatpush1.bf16.msra.mxu0 %v9689_v4  ;;  %v9701_v13 = vld [vmem:[#allocation10 + $0x64] ss:$16 sps:$4 sm:$0xff]   ;;  %v9702_v16 = vld [vmem:[#allocation10 + $0x80] ss:$16 sps:$4 sm:$0xff]   ;;  %v1542_v45 = vld [vmem:[#allocation14 + $0x60] sm:$0xff]  ;;  %s12119_s14 = scalar_lea.vmem [#allocation22], %s11929_s20 }
 0x1d1   : > { %1316 = vmatprep.subr.bf16.mxu0 %v9692_v6  ;;  %v9704_v15 = vld [vmem:[#allocation10 + $0x84] ss:$16 sps:$4 sm:$0xff]   ;;  %v9705_v18 = vld [vmem:[#allocation10 + $0xa0] ss:$16 sps:$4 sm:$0xff]   ;;  %v9032_v46 = vcombine.high %v1538_v44, %v1542_v45  ;;  %3070 = vmatprep.subr.bf16.mxu1 %v9024_v42  ;;  %v9031_v47 = vcombine.low %v1538_v44, %v1542_v45  ;;  %v9743_v45 = vld [vmem:[#allocation10 + $0x2c] ss:$16 sps:$4 sm:$0xff]  }
 0x1d2   : > { %v9707_v17 = vld [vmem:[#allocation10 + $0xa4] ss:$16 sps:$4 sm:$0xff]   ;;  %v9708_v20 = vld [vmem:[#allocation10 + $0xc0] ss:$16 sps:$4 sm:$0xff]   ;;  %3071 = vmatpush1.bf16.msra.mxu1 %v9023_v43  ;;  %v9738_v43 = vld [vmem:[#allocation10 + $0x8] ss:$16 sps:$4 sm:$0xff]  }
 0x1d3   : > { %8958 = vmatmul.mubr.msk.bf16.vlgmr.msra.gmra.mrb[0].mxu0 %vm816_vm0, %v795_v8  ;;  %v9710_v19 = vld [vmem:[#allocation10 + $0xc4] ss:$16 sps:$4 sm:$0xff]   ;;  %v9711_v22 = vld [vmem:[#allocation10 + $0xe0] ss:$16 sps:$4 sm:$0xff]   ;;  %3072 = vmatprep.subr.bf16.mxu1 %v9032_v46  ;;  %v9741_v46 = vld [vmem:[#allocation10 + $0x28] ss:$16 sps:$4 sm:$0xff]  }
 0x1d4   : > { %1317 = vmatpush1.bf16.msra.mxu0 %v9690_v7  ;;  %v9713_v21 = vld [vmem:[#allocation10 + $0xe4] ss:$16 sps:$4 sm:$0xff]   ;;  %v9714_v24 = vld [vmem:[#allocation10 + $0x100] ss:$16 sps:$4 sm:$0xff]   ;;  %s12545_s11 = sld [smem:[#allocation42_spill]]  ;;  %s8953_s0 = sshll.u32 %s11014_s25, 3 }
 0x1d5   : > { %1318 = vmatprep.subr.bf16.mxu0 %v9695_v9  ;;  %v9716_v23 = vld [vmem:[#allocation10 + $0x104] ss:$16 sps:$4 sm:$0xff]   ;;  %v9717_v26 = vld [vmem:[#allocation10 + $0x120] ss:$16 sps:$4 sm:$0xff]   ;;  %s9320_s21 = sshll.u32 %s12526_s18, 7  ;;  %s783_s30 = scalar_lea.vmem [#allocation24], %s8953_s0 }
 0x1d6   : > { %v9719_v25 = vld [vmem:[#allocation10 + $0x124] ss:$16 sps:$4 sm:$0xff]   ;;  %v9720_v28 = vld [vmem:[#allocation10 + $0x140] ss:$16 sps:$4 sm:$0xff]   ;;  %3073 = vmatpush1.bf16.msra.mxu1 %v9031_v47  ;;  %v9746_v47 = vld [vmem:[#allocation10 + $0x4c] ss:$16 sps:$4 sm:$0xff]  }
 0x1d7   : > { %v9722_v27 = vld [vmem:[#allocation10 + $0x144] ss:$16 sps:$4 sm:$0xff]   ;;  %v9723_v30 = vld [vmem:[#allocation10 + $0x160] ss:$16 sps:$4 sm:$0xff]   ;;  %s8679_s27 = sshll.u32 %s783_s30, 4  ;;  %s12546_s16 = sld [smem:[#allocation52_spill]]  ;;  %s12382_s27 = int_to_ptr.vmem [resolvable:$true] %s8679_s27 }
 0x1d8   : > { %1319 = vmatpush1.bf16.msra.mxu0 %v9693_v10  ;;  %v9725_v29 = vld [vmem:[#allocation10 + $0x164] ss:$16 sps:$4 sm:$0xff]   ;;  %v9726_v32 = vld [vmem:[#allocation10 + $0x180] ss:$16 sps:$4 sm:$0xff]   ;;  %s8666_s18 = scalar_lea.sflag [#allocation4], %s11014_s25  ;;  %s10346_s15 = scalar_lea.vmem %s12382_s27, 128 }
 0x1d9   : > { %1320 = vmatprep.subr.bf16.mxu0 %v9698_v11  ;;  %v9728_v31 = vld [vmem:[#allocation10 + $0x184] ss:$16 sps:$4 sm:$0xff]   ;;  %v9729_v34 = vld [vmem:[#allocation10 + $0x1a0] ss:$16 sps:$4 sm:$0xff]   ;;  %p10347_p5 = scmp.ne.s32.totalorder %s12382_s27, %s10346_s15  ;;  %s10465_s19 = smov [#allocation24]  }
 0x1da   : > { %v9731_v33 = vld [vmem:[#allocation10 + $0x1a4] ss:$16 sps:$4 sm:$0xff]   ;;  %v9732_v36 = vld [vmem:[#allocation10 + $0x1c0] ss:$16 sps:$4 sm:$0xff]   ;;  %p12547_p2 = scmp.ne.s32.totalorder %s12545_s11, 0 }
 0x1db   : > { %v9734_v35 = vld [vmem:[#allocation10 + $0x1c4] ss:$16 sps:$4 sm:$0xff]   ;;  %v9735_v38 = vld [vmem:[#allocation10 + $0x1e0] ss:$16 sps:$4 sm:$0xff]  }
 0x1dc   : > { %1321 = vmatpush1.bf16.msra.mxu0 %v9696_v12  ;;  %v9737_v37 = vld [vmem:[#allocation10 + $0x1e4] ss:$16 sps:$4 sm:$0xff]   ;;  %p10348_p1 = pnand %p10347_p5, %p12547_p2 }
 0x1dd   : > { %1322 = vmatprep.subr.bf16.mxu0 %v9701_v13  ;;  %s12380_s28 = scalar_lea.hbm %s12546_s16, %s9320_s21 }
 0x1de   : > { %p10349_p13 = pneg %p10348_p1 }
 0x1e0   : > { %1323 = vmatpush1.bf16.msra.mxu0 %v9699_v14 }
 0x1e1   : > { %1324 = vmatprep.subr.bf16.mxu0 %v9704_v15 }
 0x1e4   : > { %1325 = vmatpush1.bf16.msra.mxu0 %v9702_v16 }
 0x1e5   : > { %1326 = vmatprep.subr.bf16.mxu0 %v9707_v17 }
 0x1e8   : > { %1327 = vmatpush1.bf16.msra.mxu0 %v9705_v18 }
 0x1e9   : > { %1328 = vmatprep.subr.bf16.mxu0 %v9710_v19  ;;  %v903_v19 = vlaneseq }
 0x1ec   : > { %1329 = vmatpush1.bf16.msra.mxu0 %v9708_v20 }
 0x1ed   : > { %1330 = vmatprep.subr.bf16.mxu0 %v9713_v21 }
 0x1f0   : > { %1331 = vmatpush1.bf16.msra.mxu0 %v9711_v22 }
 0x1f1   : > { %1332 = vmatprep.subr.bf16.mxu0 %v9716_v23  ;;  %v11024_v23 = vshrl.u32 %v903_v19, 7  ;;  %v1546_v19 = vld [vmem:[#allocation14 + $0x80] sm:$0xff] }
 0x1f4   : > { %1333 = vmatpush1.bf16.msra.mxu0 %v9714_v24  ;;  %v11027_v24 = vsub.s32 0, %v11024_v23 }
 0x1f5   : > { %1334 = vmatprep.subr.bf16.mxu0 %v9719_v25  ;;  %v861_v25 = vld [vmem:[#allocation7] sm:$0x3] }
 0x1f8   : > { %1335 = vmatpush1.bf16.msra.mxu0 %v9717_v26  ;;  %v11030_v26 = vsub.s32 1, %v11024_v23 }
 0x1f9   : > { %1336 = vmatprep.subr.bf16.mxu0 %v9722_v27  ;;  %v862_v27 = vld [vmem:[#allocation8] sm:$0x3] }
 0x1fc   : > { %1337 = vmatpush1.bf16.msra.mxu0 %v9720_v28  ;;  %v906_v28 = vrot.slane %v861_v25, %v11027_v24 }
 0x1fd   : > { %1338 = vmatprep.subr.bf16.mxu0 %v9725_v29 }
 0x200   : > { %1339 = vmatpush1.bf16.msra.mxu0 %v9723_v30  ;;  %v910_v30 = vrot.slane %v861_v25, %v11030_v26  ;;  %v1551_v25 = vld [vmem:[#allocation14 + $0xa8] sm:$0xff] }
 0x201   : > { %1340 = vmatprep.subr.bf16.mxu0 %v9728_v31 }
 0x204   : > { %1341 = vmatpush1.bf16.msra.mxu0 %v9726_v32 }
 0x205   : > { %1342 = vmatprep.subr.bf16.mxu0 %v9731_v33  ;;  %v919_v33 = vrot.slane %v862_v27, %v11027_v24 }
 0x208   : > { %1343 = vmatpush1.bf16.msra.mxu0 %v9729_v34 }
 0x209   : > { %1344 = vmatprep.subr.bf16.mxu0 %v9734_v35  ;;  %v923_v35 = vrot.slane %v862_v27, %v11030_v26 }
 0x20c   : > { %1345 = vmatpush1.bf16.msra.mxu0 %v9732_v36 }
 0x20d   : > { %1346 = vmatprep.subr.bf16.mxu0 %v9737_v37 }
 0x210   : > { %1347 = vmatpush1.bf16.msra.mxu0 %v9735_v38 }
 0x211   : > { %1357 = vmatprep.subr.bf16.mxu0 %v9740_v39 }
 0x2a6   : > { %v854_v48 = vpop.f32.mrb[0].mxu0 }
 0x2a7   : > { %v863_v49 = vrot.slane %v854_v48, 4  ;;  %v856_v50 = vpop.f32.mrb[1].mxu0 }
 0x2a8   : > { %v869_v51 = vrot.slane %v856_v50, 4  ;;  %v858_v52 = vpop.f32.mrb[2].mxu0 }
 0x2a9   : > { %v864_v53 = vadd.f32 %v863_v49, %v854_v48  ;;  %v859_v54 = vpop.f32.mrb[3].mxu0  ;;  %v9749_v49 = vld [vmem:[#allocation10 + $0x6c] ss:$16 sps:$4 sm:$0xff]   ;;  %v9750_v52 = vld [vmem:[#allocation10 + $0x88] ss:$16 sps:$4 sm:$0xff]  }
 0x2aa   : > { %v870_v55 = vadd.f32 %v869_v51, %v856_v50  ;;  %v9752_v51 = vld [vmem:[#allocation10 + $0x8c] ss:$16 sps:$4 sm:$0xff]   ;;  %v9753_v54 = vld [vmem:[#allocation10 + $0xa8] ss:$16 sps:$4 sm:$0xff]  }
 0x2ab   : > { %v865_v56 = vrot.slane %v864_v53, 2 }
 0x2ac   : > { %v871_v57 = vrot.slane %v870_v55, 2 }
 0x2ad   : > { %v866_v58 = vadd.f32 %v865_v56, %v864_v53  ;;  %v9755_v53 = vld [vmem:[#allocation10 + $0xac] ss:$16 sps:$4 sm:$0xff]   ;;  %v9756_v56 = vld [vmem:[#allocation10 + $0xc8] ss:$16 sps:$4 sm:$0xff]  }
 0x2ae   : > { %v872_v59 = vadd.f32 %v871_v57, %v870_v55  ;;  %v9758_v55 = vld [vmem:[#allocation10 + $0xcc] ss:$16 sps:$4 sm:$0xff]  }
 0x2af   : > { %v867_v60 = vrot.slane %v866_v58, 1  ;;  %v9761_v57 = vld [vmem:[#allocation10 + $0xec] ss:$16 sps:$4 sm:$0xff]  }
 0x2b0   : > { %v873_v61 = vrot.slane %v872_v59, 1 }
 0x2b1   : > { %v868_v62 = vadd.f32 %v867_v60, %v866_v58  ;;  %v9759_v58 = vld [vmem:[#allocation10 + $0xe8] ss:$16 sps:$4 sm:$0xff]  }
 0x2b2   : > { %v874_v63 = vadd.f32 %v873_v61, %v872_v59  ;;  %v9764_v59 = vld [vmem:[#allocation10 + $0x10c] ss:$16 sps:$4 sm:$0xff]   ;;  %v9762_v60 = vld [vmem:[#allocation10 + $0x108] ss:$16 sps:$4 sm:$0xff]  }
 0x2b3   : > { %v876_v0 = vmul.f32 0.125, %v868_v62  ;;  %v9767_v61 = vld [vmem:[#allocation10 + $0x12c] ss:$16 sps:$4 sm:$0xff]   ;;  %v9765_v62 = vld [vmem:[#allocation10 + $0x128] ss:$16 sps:$4 sm:$0xff]  }
 0x2b4   : > { %v877_v1 = vmul.f32 0.125, %v874_v63  ;;  %v9770_v63 = vld [vmem:[#allocation10 + $0x14c] ss:$16 sps:$4 sm:$0xff]  }
 0x2b5   : > { %v878_v2 = vsub.f32 %v854_v48, %v876_v0  ;;  %v9744_v48 = vld [vmem:[#allocation10 + $0x48] ss:$16 sps:$4 sm:$0xff]  }
 0x2b6   : > { %v879_v3 = vsub.f32 %v856_v50, %v877_v1  ;;  %v9747_v50 = vld [vmem:[#allocation10 + $0x68] ss:$16 sps:$4 sm:$0xff]   ;;  %v9773_v1 = vld [vmem:[#allocation10 + $0x16c] ss:$16 sps:$4 sm:$0xff]  }
 0x2b7   : > { %v880_v4 = vmul.f32 %v878_v2, %v878_v2  ;;  %v9768_v0 = vld [vmem:[#allocation10 + $0x148] ss:$16 sps:$4 sm:$0xff]  }
 0x2b8   : > { %v881_v5 = vmul.f32 %v879_v3, %v879_v3 }
 0x2b9   : > { %v882_v6 = vrot.slane %v880_v4, 4 }
 0x2ba   : > { %v888_v7 = vrot.slane %v881_v5, 4 }
 0x2bb   : > { %v883_v8 = vadd.f32 %v882_v6, %v880_v4  ;;  %v9774_v4 = vld [vmem:[#allocation10 + $0x188] ss:$16 sps:$4 sm:$0xff]  }
 0x2bc   : > { %v889_v9 = vadd.f32 %v888_v7, %v881_v5  ;;  %v9779_v5 = vld [vmem:[#allocation10 + $0x1ac] ss:$16 sps:$4 sm:$0xff]   ;;  %v9777_v6 = vld [vmem:[#allocation10 + $0x1a8] ss:$16 sps:$4 sm:$0xff]  }
 0x2bd   : > { %v884_v10 = vrot.slane %v883_v8, 2  ;;  %v9782_v7 = vld [vmem:[#allocation10 + $0x1cc] ss:$16 sps:$4 sm:$0xff]  }
 0x2be   : > { %v890_v11 = vrot.slane %v889_v9, 2 }
 0x2bf   : > { %v885_v12 = vadd.f32 %v884_v10, %v883_v8  ;;  %v9780_v8 = vld [vmem:[#allocation10 + $0x1c8] ss:$16 sps:$4 sm:$0xff]   ;;  %v1531_v10 = vld [vmem:[#allocation14 + $0x8] sm:$0xff] }
 0x2c0   : > { %v891_v13 = vadd.f32 %v890_v11, %v889_v9  ;;  %v9785_v9 = vld [vmem:[#allocation10 + $0x1ec] ss:$16 sps:$4 sm:$0xff]   ;;  %v1535_v11 = vld [vmem:[#allocation14 + $0x28] sm:$0xff] }
 0x2c1   : > { %v886_v14 = vrot.slane %v885_v12, 1 }
 0x2c2   : > { %v892_v15 = vrot.slane %v891_v13, 1 }
 0x2c3   : > { %v887_v16 = vadd.f32 %v886_v14, %v885_v12  ;;  %v9783_v12 = vld [vmem:[#allocation10 + $0x1e8] ss:$16 sps:$4 sm:$0xff]   ;;  %v1539_v14 = vld [vmem:[#allocation14 + $0x48] sm:$0xff] }
 0x2c4   : > { %v893_v17 = vadd.f32 %v892_v15, %v891_v13  ;;  %v9026_v13 = vcombine.high %v1531_v10, %v1535_v11  ;;  %v1543_v15 = vld [vmem:[#allocation14 + $0x68] sm:$0xff] }
 0x2c5   : > { %v894_v18 = vmul.f32 0.125, %v887_v16  ;;  %v9025_v16 = vcombine.low %v1531_v10, %v1535_v11  ;;  %v1599_v10 = vld [vmem:[#allocation14 + $0x228] sm:$0xff] }
 0x2c6   : > { %v895_v20 = vmul.f32 0.125, %v893_v17  ;;  %v9034_v17 = vcombine.high %v1539_v14, %v1543_v15 }
 0x2c7   : > { %v896_v21 = vadd.f32 1e-05, %v894_v18  ;;  %v9033_v18 = vcombine.low %v1539_v14, %v1543_v15  ;;  %v1602_v14 = vld [vmem:[#allocation14 + $0x240] sm:$0xff] }
 0x2c8   : > { %v897_v22 = vadd.f32 1e-05, %v895_v20  ;;  %v1550_v20 = vld [vmem:[#allocation14 + $0xa0] sm:$0xff] }
 0x2c9   : > { %9846 = vrsqrt.f32 %v896_v21  ;;  %v1547_v21 = vld [vmem:[#allocation14 + $0x88] sm:$0xff]  ;;  %v1606_v15 = vld [vmem:[#allocation14 + $0x260] sm:$0xff] }
 0x2ca   : > { %9848 = vrsqrt.f32 %v897_v22  ;;  %v9040_v22 = vcombine.high %v1546_v19, %v1550_v20  ;;  %v9041_v27 = vcombine.low %v1547_v21, %v1551_v25 }
 0x2cc   : > { %3074 = vmatprep.subr.bf16.mxu1 %v9040_v22  ;;  %v1610_v22 = vld [vmem:[#allocation14 + $0x280] sm:$0xff] }
 0x2d3   : > { %v9847_v29 = vpop.eup %9846 }
 0x2d4   : > { %v9849_v31 = vpop.eup %9848  ;;  %v900_v32 = vmul.f32 %v9847_v29, %v878_v2  ;;  %v9771_v2 = vld [vmem:[#allocation10 + $0x168] ss:$16 sps:$4 sm:$0xff]   ;;  %v9039_v29 = vcombine.low %v1546_v19, %v1550_v20 }
 0x2d5   : > { %v901_v34 = vmul.f32 %v9849_v31, %v879_v3  ;;  %v9776_v3 = vld [vmem:[#allocation10 + $0x18c] ss:$16 sps:$4 sm:$0xff]  }
 0x2d6   : > { %v913_v36 = vmul.f32 %v906_v28, %v900_v32  ;;  %v9042_v28 = vcombine.high %v1547_v21, %v1551_v25  ;;  %3075 = vmatpush1.bf16.msra.mxu1 %v9039_v29  ;;  %v1558_v31 = vld [vmem:[#allocation14 + $0xe0] sm:$0xff]  ;;  %v1555_v32 = vld [vmem:[#allocation14 + $0xc8] sm:$0xff]  ;;  %v9095_v21 = vcombine.low %v1602_v14, %v1606_v15 }
 0x2d7   : > { %v914_v37 = vmul.f32 %v910_v30, %v901_v34  ;;  %v1554_v30 = vld [vmem:[#allocation14 + $0xc0] sm:$0xff]  ;;  %v1559_v34 = vld [vmem:[#allocation14 + $0xe8] sm:$0xff] }
 0x2d8   : > { %v926_v38 = vadd.f32 %v919_v33, %v913_v36  ;;  %v9048_v33 = vcombine.high %v1554_v30, %v1558_v31  ;;  %v9050_v36 = vcombine.high %v1555_v32, %v1559_v34  ;;  %v1614_v25 = vld [vmem:[#allocation14 + $0x2a0] sm:$0xff]  ;;  %v1615_v29 = vld [vmem:[#allocation14 + $0x2a8] sm:$0xff] }
 0x2d9   : > { %v927_v39 = vadd.f32 %v923_v35, %v914_v37  ;;  %v9049_v35 = vcombine.low %v1555_v32, %v1559_v34  ;;  %v9047_v37 = vcombine.low %v1554_v30, %v1558_v31  ;;  %v9103_v32 = vcombine.low %v1610_v22, %v1614_v25  ;;  %v1622_v34 = vld [vmem:[#allocation14 + $0x2e0] sm:$0xff] }
 0x2da   : > { %v928_v40 = vmax.f32 %v926_v38, 0.0  ;;  %3076 = vmatprep.subr.bf16.mxu1 %v9048_v33  ;;  %v1562_v38 = vld [vmem:[#allocation14 + $0x100] sm:$0xff] }
 0x2db   : > { %v929_v41 = vmax.f32 %v927_v39, 0.0  ;;  %3077 = vmatpush1.bf16.msra.mxu1 %v9047_v37  ;;  %v1566_v39 = vld [vmem:[#allocation14 + $0x120] sm:$0xff]  ;;  %v1623_v37 = vld [vmem:[#allocation14 + $0x2e8] sm:$0xff] }
 0x2dc   : > { %v11036_v44 = vpack.c.bf16 %v928_v40, %v928_v40  ;;  %v1563_v40 = vld [vmem:[#allocation14 + $0x108] sm:$0xff]  ;;  %v1618_v33 = vld [vmem:[#allocation14 + $0x2c0] sm:$0xff] }
 0x2dd   : > { %v995_v42 = vpack.c.bf16 %v929_v41, %v929_v41  ;;  %v9056_v41 = vcombine.high %v1562_v38, %v1566_v39 }
 0x2df   : > { %1348 = vmatprep.mubr.bf16.mxu0 %v995_v42  ;;  %3078 = vmatprep.subr.bf16.mxu1 %v9056_v41  ;;  %v1626_v41 = vld [vmem:[#allocation14 + $0x300] sm:$0xff] }
 0x2e0   : > { %1349 = vmatmul.mubr.bf16.vlgmr.msra.gmra.mrb[4].mxu0 %v11036_v44 }
 0x2e1   : > { %1358 = vmatpush1.bf16.msra.mxu0 %v9738_v43  ;;  %1389 = vmatprep.mubr.bf16.mxu0 %v995_v42  ;;  %v1567_v42 = vld [vmem:[#allocation14 + $0x128] sm:$0xff] }
 0x2e2   : > { %1359 = vmatprep.subr.bf16.mxu0 %v9743_v45  ;;  %v9057_v43 = vcombine.low %v1563_v40, %v1567_v42  ;;  %v9055_v45 = vcombine.low %v1562_v38, %v1566_v39 }
 0x2e4   : > { %3079 = vmatpush1.bf16.msra.mxu1 %v9055_v45  ;;  %v1631_v45 = vld [vmem:[#allocation14 + $0x328] sm:$0xff] }
 0x2e5   : > { %1360 = vmatpush1.bf16.msra.mxu0 %v9741_v46  ;;  %v1570_v46 = vld [vmem:[#allocation14 + $0x140] sm:$0xff] }
 0x2e6   : > { %1361 = vmatprep.subr.bf16.mxu0 %v9746_v47  ;;  %v1574_v47 = vld [vmem:[#allocation14 + $0x160] sm:$0xff] }
 0x2e9   : > { %1362 = vmatpush1.bf16.msra.mxu0 %v9744_v48  ;;  %v1571_v48 = vld [vmem:[#allocation14 + $0x148] sm:$0xff] }
 0x2ea   : > { %1363 = vmatprep.subr.bf16.mxu0 %v9749_v49  ;;  %v9064_v49 = vcombine.high %v1570_v46, %v1574_v47 }
 0x2ec   : > { %3080 = vmatprep.subr.bf16.mxu1 %v9064_v49  ;;  %v1634_v49 = vld [vmem:[#allocation14 + $0x340] sm:$0xff] }
 0x2ed   : > { %1364 = vmatpush1.bf16.msra.mxu0 %v9747_v50  ;;  %v1575_v50 = vld [vmem:[#allocation14 + $0x168] sm:$0xff] }
 0x2ee   : > { %1365 = vmatprep.subr.bf16.mxu0 %v9752_v51  ;;  %v9065_v51 = vcombine.low %v1571_v48, %v1575_v50 }
 0x2f1   : > { %1366 = vmatpush1.bf16.msra.mxu0 %v9750_v52  ;;  %v9066_v52 = vcombine.high %v1571_v48, %v1575_v50  ;;  %v1638_v50 = vld [vmem:[#allocation14 + $0x360] sm:$0xff] }
 0x2f2   : > { %1367 = vmatprep.subr.bf16.mxu0 %v9755_v53  ;;  %v9063_v53 = vcombine.low %v1570_v46, %v1574_v47 }
 0x2f4   : > { %3081 = vmatpush1.bf16.msra.mxu1 %v9063_v53  ;;  %v1639_v53 = vld [vmem:[#allocation14 + $0x368] sm:$0xff] }
 0x2f5   : > { %1368 = vmatpush1.bf16.msra.mxu0 %v9753_v54  ;;  %v1578_v54 = vld [vmem:[#allocation14 + $0x180] sm:$0xff] }
 0x2f6   : > { %1369 = vmatprep.subr.bf16.mxu0 %v9758_v55  ;;  %v1582_v55 = vld [vmem:[#allocation14 + $0x1a0] sm:$0xff] }
 0x2f9   : > { %1370 = vmatpush1.bf16.msra.mxu0 %v9756_v56  ;;  %v1579_v56 = vld [vmem:[#allocation14 + $0x188] sm:$0xff] }
 0x2fa   : > { %1371 = vmatprep.subr.bf16.mxu0 %v9761_v57  ;;  %v9072_v57 = vcombine.high %v1578_v54, %v1582_v55 }
 0x2fc   : > { %3082 = vmatprep.subr.bf16.mxu1 %v9072_v57  ;;  %v1642_v57 = vld [vmem:[#allocation14 + $0x380] sm:$0xff] }
 0x2fd   : > { %1372 = vmatpush1.bf16.msra.mxu0 %v9759_v58  ;;  %v1583_v58 = vld [vmem:[#allocation14 + $0x1a8] sm:$0xff] }
 0x2fe   : > { %1373 = vmatprep.subr.bf16.mxu0 %v9764_v59  ;;  %v9073_v59 = vcombine.low %v1579_v56, %v1583_v58 }
 0x301   : > { %1374 = vmatpush1.bf16.msra.mxu0 %v9762_v60  ;;  %v9074_v60 = vcombine.high %v1579_v56, %v1583_v58  ;;  %v9127_v56 = vcombine.low %v1634_v49, %v1638_v50  ;;  %v1646_v58 = vld [vmem:[#allocation14 + $0x3a0] sm:$0xff] }
 0x302   : > { %1375 = vmatprep.subr.bf16.mxu0 %v9767_v61  ;;  %v9071_v61 = vcombine.low %v1578_v54, %v1582_v55 }
 0x304   : > { %3083 = vmatpush1.bf16.msra.mxu1 %v9071_v61  ;;  %v1647_v61 = vld [vmem:[#allocation14 + $0x3a8] sm:$0xff] }
 0x305   : > { %1376 = vmatpush1.bf16.msra.mxu0 %v9765_v62  ;;  %v1586_v62 = vld [vmem:[#allocation14 + $0x1c0] sm:$0xff] }
 0x306   : > { %1377 = vmatprep.subr.bf16.mxu0 %v9770_v63  ;;  %v1590_v63 = vld [vmem:[#allocation14 + $0x1e0] sm:$0xff] }
 0x309   : > { %1378 = vmatpush1.bf16.msra.mxu0 %v9768_v0  ;;  %v1587_v0 = vld [vmem:[#allocation14 + $0x1c8] sm:$0xff] }
 0x30a   : > { %1379 = vmatprep.subr.bf16.mxu0 %v9773_v1  ;;  %v9080_v1 = vcombine.high %v1586_v62, %v1590_v63 }
 0x30c   : > { %3084 = vmatprep.subr.bf16.mxu1 %v9080_v1  ;;  %v1650_v1 = vld [vmem:[#allocation14 + $0x3c0] sm:$0xff] }
 0x30d   : > { %1380 = vmatpush1.bf16.msra.mxu0 %v9771_v2  ;;  %v1591_v2 = vld [vmem:[#allocation14 + $0x1e8] sm:$0xff] }
 0x30e   : > { %1381 = vmatprep.subr.bf16.mxu0 %v9776_v3  ;;  %v9081_v3 = vcombine.low %v1587_v0, %v1591_v2 }
 0x311   : > { %1382 = vmatpush1.bf16.msra.mxu0 %v9774_v4  ;;  %v9082_v4 = vcombine.high %v1587_v0, %v1591_v2  ;;  %v9135_v0 = vcombine.low %v1642_v57, %v1646_v58  ;;  %v1654_v2 = vld [vmem:[#allocation14 + $0x3e0] sm:$0xff] }
 0x312   : > { %1383 = vmatprep.subr.bf16.mxu0 %v9779_v5  ;;  %v9079_v5 = vcombine.low %v1586_v62, %v1590_v63 }
 0x314   : > { %3085 = vmatpush1.bf16.msra.mxu1 %v9079_v5  ;;  %v1655_v5 = vld [vmem:[#allocation14 + $0x3e8] sm:$0xff] }
 0x315   : > { %1384 = vmatpush1.bf16.msra.mxu0 %v9777_v6  ;;  %v1594_v6 = vld [vmem:[#allocation14 + $0x200] sm:$0xff] }
 0x316   : > { %1385 = vmatprep.subr.bf16.mxu0 %v9782_v7  ;;  %v1598_v7 = vld [vmem:[#allocation14 + $0x220] sm:$0xff] }
 0x319   : > { %1386 = vmatpush1.bf16.msra.mxu0 %v9780_v8  ;;  %v1595_v8 = vld [vmem:[#allocation14 + $0x208] sm:$0xff] }
 0x31a   : > { %1387 = vmatprep.subr.bf16.mxu0 %v9785_v9  ;;  %v9088_v9 = vcombine.high %v1594_v6, %v1598_v7  ;;  %v9089_v11 = vcombine.low %v1595_v8, %v1599_v10 }
 0x31c   : > { %3086 = vmatprep.subr.bf16.mxu1 %v9088_v9  ;;  %v11040_v9 = vld [vmem:[#allocation14 + $0x400] sm:$0xff] }
 0x31d   : > { %1388 = vmatpush1.bf16.msra.mxu0 %v9783_v12  ;;  %v9090_v12 = vcombine.high %v1595_v8, %v1599_v10  ;;  %v11042_v10 = vld [vmem:[#allocation14 + $0x420] sm:$0xff] }
 0x31e   : > { %3152 = vmatprep.subr.bf16.mxu0 %v9026_v13  ;;  %v9087_v13 = vcombine.low %v1594_v6, %v1598_v7  ;;  %v9143_v7 = vcombine.low %v1650_v1, %v1654_v2 }
 0x320   : > { %1390 = vmatmul.mubr.bf16.vlgmr.msra.gmra.mrb[8].mxu0 %v11036_v44  ;;  %v9058_v44 = vcombine.high %v1563_v40, %v1567_v42  ;;  %3087 = vmatpush1.bf16.msra.mxu1 %v9087_v13  ;;  %v9111_v40 = vcombine.low %v1618_v33, %v1622_v34  ;;  %v1630_v42 = vld [vmem:[#allocation14 + $0x320] sm:$0xff]  ;;  %v11048_v13 = vld [vmem:[#allocation14 + $0x428] sm:$0xff] }
 0x321   : > { %3153 = vmatpush1.bf16.msra.mxu0 %v9025_v16  ;;  %v1603_v16 = vld [vmem:[#allocation14 + $0x248] sm:$0xff]  ;;  %v9119_v48 = vcombine.low %v1626_v41, %v1630_v42 }
 0x322   : > { %3154 = vmatprep.subr.bf16.mxu0 %v9034_v17  ;;  %v9096_v17 = vcombine.high %v1602_v14, %v1606_v15  ;;  %v9151_v14 = vcombine.low %v11040_v9, %v11042_v10 }
 0x324   : > { %3088 = vmatprep.subr.bf16.mxu1 %v9096_v17 }
 0x325   : > { %3155 = vmatpush1.bf16.msra.mxu0 %v9033_v18  ;;  %v1607_v18 = vld [vmem:[#allocation14 + $0x268] sm:$0xff]  ;;  %3089 = vmatpush1.bf16.msra.mxu1 %v9095_v21 }
 0x326   : > { %3156 = vmatprep.subr.bf16.mxu0 %v9042_v28  ;;  %v9097_v19 = vcombine.low %v1603_v16, %v1607_v18  ;;  %v9098_v20 = vcombine.high %v1603_v16, %v1607_v18  ;;  %v9104_v28 = vcombine.high %v1610_v22, %v1614_v25 }
 0x328   : > { %3090 = vmatprep.subr.bf16.mxu1 %v9104_v28 }
 0x329   : > { %3157 = vmatpush1.bf16.msra.mxu0 %v9041_v27  ;;  %v1611_v27 = vld [vmem:[#allocation14 + $0x288] sm:$0xff]  ;;  %3091 = vmatpush1.bf16.msra.mxu1 %v9103_v32 }
 0x32a   : > { %3158 = vmatprep.subr.bf16.mxu0 %v9050_v36  ;;  %v9105_v30 = vcombine.low %v1611_v27, %v1615_v29  ;;  %v9106_v31 = vcombine.high %v1611_v27, %v1615_v29  ;;  %v9112_v36 = vcombine.high %v1618_v33, %v1622_v34 }
 0x32c   : > { %3092 = vmatprep.subr.bf16.mxu1 %v9112_v36 }
 0x32d   : > { %3159 = vmatpush1.bf16.msra.mxu0 %v9049_v35  ;;  %v1619_v35 = vld [vmem:[#allocation14 + $0x2c8] sm:$0xff]  ;;  %3093 = vmatpush1.bf16.msra.mxu1 %v9111_v40 }
 0x32e   : > { %3160 = vmatprep.subr.bf16.mxu0 %v9058_v44  ;;  %v9113_v38 = vcombine.low %v1619_v35, %v1623_v37  ;;  %v9114_v39 = vcombine.high %v1619_v35, %v1623_v37  ;;  %v9120_v44 = vcombine.high %v1626_v41, %v1630_v42 }
 0x330   : > { %3094 = vmatprep.subr.bf16.mxu1 %v9120_v44 }
 0x331   : > { %3161 = vmatpush1.bf16.msra.mxu0 %v9057_v43  ;;  %v1627_v43 = vld [vmem:[#allocation14 + $0x308] sm:$0xff]  ;;  %3095 = vmatpush1.bf16.msra.mxu1 %v9119_v48 }
 0x332   : > { %3162 = vmatprep.subr.bf16.mxu0 %v9066_v52  ;;  %v9121_v46 = vcombine.low %v1627_v43, %v1631_v45  ;;  %v9122_v47 = vcombine.high %v1627_v43, %v1631_v45  ;;  %v9128_v52 = vcombine.high %v1634_v49, %v1638_v50 }
 0x334   : > { %3096 = vmatprep.subr.bf16.mxu1 %v9128_v52 }
 0x335   : > { %3163 = vmatpush1.bf16.msra.mxu0 %v9065_v51  ;;  %v1635_v51 = vld [vmem:[#allocation14 + $0x348] sm:$0xff]  ;;  %3097 = vmatpush1.bf16.msra.mxu1 %v9127_v56 }
 0x336   : > { %3164 = vmatprep.subr.bf16.mxu0 %v9074_v60  ;;  %v9129_v54 = vcombine.low %v1635_v51, %v1639_v53  ;;  %v9130_v55 = vcombine.high %v1635_v51, %v1639_v53  ;;  %v9136_v60 = vcombine.high %v1642_v57, %v1646_v58  ;;  %v11056_v58 = vld [vmem:[#allocation11] sm:$0xf] }
 0x338   : > { %3098 = vmatprep.subr.bf16.mxu1 %v9136_v60  ;;  %v1480_v60 = vrot.slane %v11056_v58, %v11027_v24 }
 0x339   : > { %3165 = vmatpush1.bf16.msra.mxu0 %v9073_v59  ;;  %v1643_v59 = vld [vmem:[#allocation14 + $0x388] sm:$0xff]  ;;  %3099 = vmatpush1.bf16.msra.mxu1 %v9135_v0 }
 0x33a   : > { %3166 = vmatprep.subr.bf16.mxu0 %v9082_v4  ;;  %v9137_v62 = vcombine.low %v1643_v59, %v1647_v61  ;;  %v9138_v63 = vcombine.high %v1643_v59, %v1647_v61  ;;  %v9144_v4 = vcombine.high %v1650_v1, %v1654_v2  ;;  %v11058_v59 = vld [vmem:[#allocation13] sm:$0xf] }
 0x33b   : > { %v1505_v1 = vrot.slane %v11058_v59, %v11027_v24 }
 0x33c   : > { %3100 = vmatprep.subr.bf16.mxu1 %v9144_v4 }
 0x33d   : > { %3167 = vmatpush1.bf16.msra.mxu0 %v9081_v3  ;;  %v1651_v3 = vld [vmem:[#allocation14 + $0x3c8] sm:$0xff]  ;;  %3101 = vmatpush1.bf16.msra.mxu1 %v9143_v7 }
 0x33e   : > { %3168 = vmatprep.subr.bf16.mxu0 %v9090_v12  ;;  %v9146_v6 = vcombine.high %v1651_v3, %v1655_v5  ;;  %v9145_v8 = vcombine.low %v1651_v3, %v1655_v5  ;;  %v9152_v12 = vcombine.high %v11040_v9, %v11042_v10  ;;  %v1509_v3 = vrot.slane %v11058_v59, %v11030_v26 }
 0x340   : > { %3111 = vmatprep.subr.bf16.mxu1 %v9152_v12  ;;  %v1666_v12 = vld [vmem:[#allocation14 + $0x440] sm:$0xff] }
 0x341   : > { %3169 = vmatpush1.bf16.msra.mxu0 %v9089_v11  ;;  %v11044_v11 = vld [vmem:[#allocation14 + $0x408] sm:$0xff] }
 0x342   : > { %3170 = vmatprep.subr.bf16.mxu0 %v9098_v20  ;;  %v9153_v15 = vcombine.low %v11044_v11, %v11048_v13  ;;  %v9154_v16 = vcombine.high %v11044_v11, %v11048_v13  ;;  %v1690_v13 = vld [vmem:[#allocation14 + $0x500] sm:$0xff] }
 0x345   : > { %3171 = vmatpush1.bf16.msra.mxu0 %v9097_v19 }
 0x346   : > { %3172 = vmatprep.subr.bf16.mxu0 %v9106_v31 }
 0x349   : > { %3173 = vmatpush1.bf16.msra.mxu0 %v9105_v30 }
 0x34a   : > { %3174 = vmatprep.subr.bf16.mxu0 %v9114_v39 }
 0x34d   : > { %3175 = vmatpush1.bf16.msra.mxu0 %v9113_v38 }
 0x34e   : > { %3176 = vmatprep.subr.bf16.mxu0 %v9122_v47 }
 0x351   : > { %3177 = vmatpush1.bf16.msra.mxu0 %v9121_v46 }
 0x352   : > { %3178 = vmatprep.subr.bf16.mxu0 %v9130_v55 }
 0x355   : > { %3179 = vmatpush1.bf16.msra.mxu0 %v9129_v54 }
 0x356   : > { %3180 = vmatprep.subr.bf16.mxu0 %v9138_v63 }
 0x359   : > { %3181 = vmatpush1.bf16.msra.mxu0 %v9137_v62  ;;  %v1484_v62 = vrot.slane %v11056_v58, %v11030_v26 }
 0x35a   : > { %3182 = vmatprep.subr.bf16.mxu0 %v9146_v6 }
 0x35d   : > { %3183 = vmatpush1.bf16.msra.mxu0 %v9145_v8 }
 0x35e   : > { %3193 = vmatprep.subr.bf16.mxu0 %v9154_v16 }
 0x3b3   : > { %v1350_v17 = vpop.f32.mrb[4].mxu0 }
 0x3b4   : > { %v1400_v18 = vrot.slane %v1350_v17, 4  ;;  %v1352_v19 = vpop.f32.mrb[5].mxu0 }
 0x3b5   : > { %v1406_v20 = vrot.slane %v1352_v19, 4  ;;  %v1354_v21 = vpop.f32.mrb[6].mxu0 }
 0x3b6   : > { %v1401_v22 = vadd.f32 %v1400_v18, %v1350_v17  ;;  %v1355_v25 = vpop.f32.mrb[7].mxu0  ;;  %v1667_v18 = vld [vmem:[#allocation14 + $0x448] sm:$0xff] }
 0x3b7   : > { %v1407_v27 = vadd.f32 %v1406_v20, %v1352_v19 }
 0x3b8   : > { %v1402_v28 = vrot.slane %v1401_v22, 2 }
 0x3b9   : > { %v1408_v29 = vrot.slane %v1407_v27, 2 }
 0x3ba   : > { %v1403_v30 = vadd.f32 %v1402_v28, %v1401_v22  ;;  %v1678_v28 = vld [vmem:[#allocation14 + $0x4a0] sm:$0xff] }
 0x3bb   : > { %v1409_v31 = vadd.f32 %v1408_v29, %v1407_v27  ;;  %v1674_v27 = vld [vmem:[#allocation14 + $0x480] sm:$0xff]  ;;  %v1675_v29 = vld [vmem:[#allocation14 + $0x488] sm:$0xff] }
 0x3bc   : > { %v1404_v32 = vrot.slane %v1403_v30, 1 }
 0x3bd   : > { %v1410_v33 = vrot.slane %v1409_v31, 1 }
 0x3be   : > { %v1405_v34 = vadd.f32 %v1404_v32, %v1403_v30  ;;  %v1679_v30 = vld [vmem:[#allocation14 + $0x4a8] sm:$0xff] }
 0x3bf   : > { %v1411_v35 = vadd.f32 %v1410_v33, %v1409_v31  ;;  %v9168_v33 = vcombine.high %v1674_v27, %v1678_v28 }
 0x3c0   : > { %v1424_v36 = vmul.f32 0.125, %v1405_v34  ;;  %v9170_v34 = vcombine.high %v1675_v29, %v1679_v30 }
 0x3c1   : > { %v1425_v37 = vmul.f32 0.125, %v1411_v35  ;;  %v1682_v35 = vld [vmem:[#allocation14 + $0x4c0] sm:$0xff] }
 0x3c2   : > { %v1428_v38 = vsub.f32 %v1350_v17, %v1424_v36  ;;  %v1670_v17 = vld [vmem:[#allocation14 + $0x460] sm:$0xff] }
 0x3c3   : > { %v1429_v39 = vsub.f32 %v1352_v19, %v1425_v37  ;;  %v1671_v19 = vld [vmem:[#allocation14 + $0x468] sm:$0xff]  ;;  %v9160_v22 = vcombine.high %v1666_v12, %v1670_v17  ;;  %v9159_v31 = vcombine.low %v1666_v12, %v1670_v17  ;;  %v1686_v36 = vld [vmem:[#allocation14 + $0x4e0] sm:$0xff] }
 0x3c4   : > { %v1432_v40 = vmul.f32 %v1428_v38, %v1428_v38  ;;  %v9162_v25 = vcombine.high %v1667_v18, %v1671_v19  ;;  %v9161_v32 = vcombine.low %v1667_v18, %v1671_v19  ;;  %v1683_v37 = vld [vmem:[#allocation14 + $0x4c8] sm:$0xff]  ;;  %v9176_v10 = vcombine.high %v1682_v35, %v1686_v36 }
 0x3c5   : > { %v1433_v41 = vmul.f32 %v1429_v39, %v1429_v39 }
 0x3c6   : > { %v1436_v42 = vrot.slane %v1432_v40, 4 }
 0x3c7   : > { %v1442_v43 = vrot.slane %v1433_v41, 4 }
 0x3c8   : > { %v1437_v44 = vadd.f32 %v1436_v42, %v1432_v40  ;;  %v9169_v40 = vcombine.low %v1675_v29, %v1679_v30  ;;  %v1691_v42 = vld [vmem:[#allocation14 + $0x508] sm:$0xff] }
 0x3c9   : > { %v1443_v45 = vadd.f32 %v1442_v43, %v1433_v41  ;;  %v1694_v41 = vld [vmem:[#allocation14 + $0x520] sm:$0xff]  ;;  %v1695_v43 = vld [vmem:[#allocation14 + $0x528] sm:$0xff] }
 0x3ca   : > { %v1438_v46 = vrot.slane %v1437_v44, 2  ;;  %v1715_v29 = vld [vmem:[#allocation14 + $0x5c8] sm:$0xff] }
 0x3cb   : > { %v1444_v47 = vrot.slane %v1443_v45, 2  ;;  %v1719_v30 = vld [vmem:[#allocation14 + $0x5e8] sm:$0xff] }
 0x3cc   : > { %v1439_v48 = vadd.f32 %v1438_v46, %v1437_v44 }
 0x3cd   : > { %v1445_v49 = vadd.f32 %v1444_v47, %v1443_v45 }
 0x3ce   : > { %v1440_v50 = vrot.slane %v1439_v48, 1 }
 0x3cf   : > { %v1446_v51 = vrot.slane %v1445_v49, 1 }
 0x3d0   : > { %v1441_v52 = vadd.f32 %v1440_v50, %v1439_v48  ;;  %v9175_v48 = vcombine.low %v1682_v35, %v1686_v36 }
 0x3d1   : > { %v1447_v53 = vadd.f32 %v1446_v51, %v1445_v49  ;;  %v9184_v51 = vcombine.high %v1690_v13, %v1694_v41 }
 0x3d2   : > { %v1460_v54 = vmul.f32 0.125, %v1441_v52  ;;  %v9186_v52 = vcombine.high %v1691_v42, %v1695_v43 }
 0x3d3   : > { %v1461_v55 = vmul.f32 0.125, %v1447_v53  ;;  %v1698_v53 = vld [vmem:[#allocation14 + $0x540] sm:$0xff] }
 0x3d4   : > { %v1464_v56 = vadd.f32 1e-05, %v1460_v54 }
 0x3d5   : > { %v1465_v57 = vadd.f32 1e-05, %v1461_v55  ;;  %v1702_v55 = vld [vmem:[#allocation14 + $0x560] sm:$0xff] }
 0x3d6   : > { %9850 = vrsqrt.f32 %v1464_v56  ;;  %v1699_v56 = vld [vmem:[#allocation14 + $0x548] sm:$0xff] }
 0x3d7   : > { %9852 = vrsqrt.f32 %v1465_v57  ;;  %v1703_v57 = vld [vmem:[#allocation14 + $0x568] sm:$0xff] }
 0x3d8   : > { %v9193_v17 = vcombine.low %v1699_v56, %v1703_v57 }
 0x3e0   : > { %v9851_v61 = vpop.eup %9850 }
 0x3e1   : > { %v9853_v63 = vpop.eup %9852  ;;  %v1472_v0 = vmul.f32 %v9851_v61, %v1428_v38  ;;  %v1687_v38 = vld [vmem:[#allocation14 + $0x4e8] sm:$0xff] }
 0x3e2   : > { %v1473_v2 = vmul.f32 %v9853_v63, %v1429_v39  ;;  %v9167_v39 = vcombine.low %v1674_v27, %v1678_v28  ;;  %v9178_v11 = vcombine.high %v1683_v37, %v1687_v38  ;;  %v9177_v49 = vcombine.low %v1683_v37, %v1687_v38  ;;  %v1718_v28 = vld [vmem:[#allocation14 + $0x5e0] sm:$0xff] }
 0x3e3   : > { %v1497_v4 = vmul.f32 %v1480_v60, %v1472_v0  ;;  %v9185_v63 = vcombine.low %v1691_v42, %v1695_v43  ;;  %v9210_v37 = vcombine.high %v1715_v29, %v1719_v30  ;;  %v1722_v38 = vld [vmem:[#allocation14 + $0x600] sm:$0xff] }
 0x3e4   : > { %v1498_v5 = vmul.f32 %v1484_v62, %v1473_v2  ;;  %v9183_v62 = vcombine.low %v1690_v13, %v1694_v41  ;;  %v9194_v2 = vcombine.high %v1699_v56, %v1703_v57  ;;  %v1738_v56 = vld [vmem:[#allocation14 + $0x680] sm:$0xff] }
 0x3e5   : > { %v1522_v6 = vadd.f32 %v1505_v1, %v1497_v4  ;;  %v9192_v1 = vcombine.high %v1698_v53, %v1702_v55 }
 0x3e6   : > { %v1523_v7 = vadd.f32 %v1509_v3, %v1498_v5  ;;  %v1706_v3 = vld [vmem:[#allocation14 + $0x580] sm:$0xff] }
 0x3e7   : > { %v1526_v8 = vmax.f32 %v1522_v6, 0.0  ;;  %v1710_v5 = vld [vmem:[#allocation14 + $0x5a0] sm:$0xff]  ;;  %v1707_v6 = vld [vmem:[#allocation14 + $0x588] sm:$0xff] }
 0x3e8   : > { %v1527_v16 = vmax.f32 %v1523_v7, 0.0  ;;  %v1711_v7 = vld [vmem:[#allocation14 + $0x5a8] sm:$0xff]  ;;  %v9200_v19 = vcombine.high %v1706_v3, %v1710_v5 }
 0x3e9   : > { %v11070_v21 = vpack.c.bf16 %v1526_v8, %v1526_v8 }
 0x3ea   : > { %v11068_v20 = vpack.c.bf16 %v1527_v16, %v1527_v16  ;;  %v9191_v16 = vcombine.low %v1698_v53, %v1702_v55 }
 0x3ec   : > { %3102 = vmatprep.mubr.bf16.mxu1 %v11068_v20  ;;  %3184 = vmatprep.mubr.bf16.mxu0 %v11068_v20 }
 0x3ed   : > { %3103 = vmatmul.mubr.bf16.vlgmr.msra.gmra.mrb[0].mxu1 %v11070_v21  ;;  %3185 = vmatmul.mubr.bf16.vlgmr.msra.gmra.mrb[12].mxu0 %v11070_v21 }
 0x3ee   : > { %3112 = vmatpush1.bf16.msra.mxu1 %v9151_v14  ;;  %3194 = vmatpush1.bf16.msra.mxu0 %v9153_v15 }
 0x3ef   : > { %3113 = vmatprep.subr.bf16.mxu1 %v9160_v22  ;;  %3195 = vmatprep.subr.bf16.mxu0 %v9162_v25  ;;  %v9202_v22 = vcombine.high %v1707_v6, %v1711_v7  ;;  %v1714_v25 = vld [vmem:[#allocation14 + $0x5c0] sm:$0xff] }
 0x3f0   : > { %v9208_v36 = vcombine.high %v1714_v25, %v1718_v28 }
 0x3f2   : > { %3114 = vmatpush1.bf16.msra.mxu1 %v9159_v31  ;;  %3196 = vmatpush1.bf16.msra.mxu0 %v9161_v32 }
 0x3f3   : > { %v1391_v9 = vpop.f32.mrb[8].mxu0  ;;  %3115 = vmatprep.subr.bf16.mxu1 %v9168_v33  ;;  %3197 = vmatprep.subr.bf16.mxu0 %v9170_v34  ;;  %v9199_v33 = vcombine.low %v1706_v3, %v1710_v5  ;;  %v9201_v34 = vcombine.low %v1707_v6, %v1711_v7  ;;  %v1746_v6 = vld [vmem:[#allocation14 + $0x6c0] sm:$0xff] }
 0x3f4   : > { %v1412_v14 = vrot.slane %v1391_v9, 4  ;;  %v1393_v15 = vpop.f32.mrb[9].mxu0 }
 0x3f5   : > { %v1418_v44 = vrot.slane %v1393_v15, 4  ;;  %v1395_v45 = vpop.f32.mrb[10].mxu0 }
 0x3f6   : > { %v1413_v46 = vadd.f32 %v1412_v14, %v1391_v9  ;;  %v1396_v47 = vpop.f32.mrb[11].mxu0  ;;  %3116 = vmatpush1.bf16.msra.mxu1 %v9167_v39  ;;  %3198 = vmatpush1.bf16.msra.mxu0 %v9169_v40  ;;  %v1726_v40 = vld [vmem:[#allocation14 + $0x620] sm:$0xff]  ;;  %v9207_v14 = vcombine.low %v1714_v25, %v1718_v28 }
 0x3f7   : > { %v1419_v50 = vadd.f32 %v1418_v44, %v1393_v15  ;;  %3117 = vmatprep.subr.bf16.mxu1 %v9176_v10  ;;  %3199 = vmatprep.subr.bf16.mxu0 %v9178_v11  ;;  %v1723_v10 = vld [vmem:[#allocation14 + $0x608] sm:$0xff]  ;;  %v9216_v42 = vcombine.high %v1722_v38, %v1726_v40  ;;  %v1730_v44 = vld [vmem:[#allocation14 + $0x640] sm:$0xff] }
 0x3f8   : > { %v1414_v54 = vrot.slane %v1413_v46, 2  ;;  %v1727_v11 = vld [vmem:[#allocation14 + $0x628] sm:$0xff] }
 0x3f9   : > { %v1420_v60 = vrot.slane %v1419_v50, 2  ;;  %v9218_v43 = vcombine.high %v1723_v10, %v1727_v11  ;;  %v1731_v47 = vld [vmem:[#allocation14 + $0x648] sm:$0xff] }
 0x3fa   : > { %v1415_v61 = vadd.f32 %v1414_v54, %v1413_v46  ;;  %3118 = vmatpush1.bf16.msra.mxu1 %v9175_v48  ;;  %3200 = vmatpush1.bf16.msra.mxu0 %v9177_v49  ;;  %v1734_v46 = vld [vmem:[#allocation14 + $0x660] sm:$0xff]  ;;  %v1735_v48 = vld [vmem:[#allocation14 + $0x668] sm:$0xff] }
 0x3fb   : > { %v1421_v0 = vadd.f32 %v1420_v60, %v1419_v50  ;;  %3119 = vmatprep.subr.bf16.mxu1 %v9184_v51  ;;  %3201 = vmatprep.subr.bf16.mxu0 %v9186_v52  ;;  %v9215_v51 = vcombine.low %v1722_v38, %v1726_v40  ;;  %v9217_v52 = vcombine.low %v1723_v10, %v1727_v11  ;;  %v1742_v60 = vld [vmem:[#allocation14 + $0x6a0] sm:$0xff] }
 0x3fc   : > { %v1416_v4 = vrot.slane %v1415_v61, 1  ;;  %v9224_v54 = vcombine.high %v1730_v44, %v1734_v46  ;;  %v9226_v55 = vcombine.high %v1731_v47, %v1735_v48  ;;  %v1762_v10 = vld [vmem:[#allocation14 + $0x740] sm:$0xff] }
 0x3fd   : > { %v1422_v8 = vrot.slane %v1421_v0, 1  ;;  %v1766_v11 = vld [vmem:[#allocation14 + $0x760] sm:$0xff] }
 0x3fe   : > { %v1417_v12 = vadd.f32 %v1416_v4, %v1415_v61  ;;  %3120 = vmatpush1.bf16.msra.mxu1 %v9183_v62  ;;  %3202 = vmatpush1.bf16.msra.mxu0 %v9185_v63  ;;  %v1739_v61 = vld [vmem:[#allocation14 + $0x688] sm:$0xff]  ;;  %v9232_v4 = vcombine.high %v1738_v56, %v1742_v60 }
 0x3ff   : > { %v1423_v18 = vadd.f32 %v1422_v8, %v1421_v0  ;;  %3121 = vmatprep.subr.bf16.mxu1 %v9192_v1  ;;  %3203 = vmatprep.subr.bf16.mxu0 %v9194_v2  ;;  %v1743_v62 = vld [vmem:[#allocation14 + $0x6a8] sm:$0xff]  ;;  %v9223_v1 = vcombine.low %v1730_v44, %v1734_v46  ;;  %v9225_v2 = vcombine.low %v1731_v47, %v1735_v48  ;;  %v1750_v8 = vld [vmem:[#allocation14 + $0x6e0] sm:$0xff] }
 0x400   : > { %v1426_v27 = vmul.f32 0.125, %v1417_v12  ;;  %v9234_v5 = vcombine.high %v1739_v61, %v1743_v62  ;;  %v1747_v12 = vld [vmem:[#allocation14 + $0x6c8] sm:$0xff]  ;;  %v1770_v44 = vld [vmem:[#allocation14 + $0x780] sm:$0xff] }
 0x401   : > { %v1427_v31 = vmul.f32 0.125, %v1423_v18  ;;  %v1774_v46 = vld [vmem:[#allocation14 + $0x7a0] sm:$0xff]  ;;  %v1771_v47 = vld [vmem:[#allocation14 + $0x788] sm:$0xff] }
 0x402   : > { %v11082_v32 = vsub.f32 %v1391_v9, %v1426_v27  ;;  %3122 = vmatpush1.bf16.msra.mxu1 %v9191_v16  ;;  %3204 = vmatpush1.bf16.msra.mxu0 %v9193_v17  ;;  %v1751_v16 = vld [vmem:[#allocation14 + $0x6e8] sm:$0xff]  ;;  %v9240_v27 = vcombine.high %v1746_v6, %v1750_v8 }
 0x403   : > { %v11084_v35 = vsub.f32 %v1393_v15, %v1427_v31  ;;  %3123 = vmatprep.subr.bf16.mxu1 %v9200_v19  ;;  %3205 = vmatprep.subr.bf16.mxu0 %v9202_v22  ;;  %v9209_v15 = vcombine.low %v1715_v29, %v1719_v30  ;;  %v9231_v19 = vcombine.low %v1738_v56, %v1742_v60  ;;  %v1754_v29 = vld [vmem:[#allocation14 + $0x700] sm:$0xff]  ;;  %v1775_v48 = vld [vmem:[#allocation14 + $0x7a8] sm:$0xff] }
 0x404   : > { %v1434_v39 = vmul.f32 %v11082_v32, %v11082_v32  ;;  %v9233_v22 = vcombine.low %v1739_v61, %v1743_v62  ;;  %v9242_v28 = vcombine.high %v1747_v12, %v1751_v16  ;;  %v1758_v31 = vld [vmem:[#allocation14 + $0x720] sm:$0xff]  ;;  %v9241_v38 = vcombine.low %v1747_v12, %v1751_v16  ;;  %v1779_v60 = vld [vmem:[#allocation14 + $0x7c8] sm:$0xff]  ;;  %v1533_v12 = vld [vmem:[#allocation14 + $0x18] sm:$0xff] }
 0x405   : > { %v1435_v9 = vmul.f32 %v11084_v35, %v11084_v35  ;;  %v1783_v61 = vld [vmem:[#allocation14 + $0x7e8] sm:$0xff]  ;;  %v1537_v16 = vld [vmem:[#allocation14 + $0x38] sm:$0xff] }
 0x406   : > { %v1448_v13 = vrot.slane %v1434_v39, 4  ;;  %3124 = vmatpush1.bf16.msra.mxu1 %v9199_v33  ;;  %3206 = vmatpush1.bf16.msra.mxu0 %v9201_v34  ;;  %v1755_v33 = vld [vmem:[#allocation14 + $0x708] sm:$0xff] }
 0x407   : > { %v1454_v41 = vrot.slane %v1435_v9, 4  ;;  %3125 = vmatprep.subr.bf16.mxu1 %v9208_v36  ;;  %3207 = vmatprep.subr.bf16.mxu0 %v9210_v37  ;;  %v1759_v34 = vld [vmem:[#allocation14 + $0x728] sm:$0xff]  ;;  %v9239_v37 = vcombine.low %v1746_v6, %v1750_v8  ;;  %v9274_v6 = vcombine.high %v1779_v60, %v1783_v61 }
 0x408   : > { %v1449_v45 = vadd.f32 %v1448_v13, %v1434_v39  ;;  %v9248_v39 = vcombine.high %v1754_v29, %v1758_v31  ;;  %v9250_v40 = vcombine.high %v1755_v33, %v1759_v34  ;;  %v1767_v13 = vld [vmem:[#allocation14 + $0x768] sm:$0xff] }
 0x409   : > { %v1455_v49 = vadd.f32 %v1454_v41, %v1435_v9  ;;  %v1763_v9 = vld [vmem:[#allocation14 + $0x748] sm:$0xff]  ;;  %v11091_v41 = vsub.s32 2, %v11024_v23 }
 0x40a   : > { %v1450_v50 = vrot.slane %v1449_v45, 2  ;;  %3126 = vmatpush1.bf16.msra.mxu1 %v9207_v14  ;;  %3208 = vmatpush1.bf16.msra.mxu0 %v9209_v15  ;;  %v9247_v14 = vcombine.low %v1754_v29, %v1758_v31  ;;  %v9249_v15 = vcombine.low %v1755_v33, %v1759_v34  ;;  %v1544_v29 = vld [vmem:[#allocation14 + $0x70] sm:$0xff]  ;;  %v1545_v31 = vld [vmem:[#allocation14 + $0x78] sm:$0xff] }
 0x40b   : > { %v1456_v53 = vrot.slane %v1455_v49, 2  ;;  %3127 = vmatprep.subr.bf16.mxu1 %v9216_v42  ;;  %3209 = vmatprep.subr.bf16.mxu0 %v9218_v43  ;;  %v9256_v42 = vcombine.high %v1762_v10, %v1766_v11  ;;  %v9258_v43 = vcombine.high %v1763_v9, %v1767_v13 }
 0x40c   : > { %v1451_v57 = vadd.f32 %v1450_v50, %v1449_v45  ;;  %v11094_v45 = vsub.s32 3, %v11024_v23  ;;  %v9257_v50 = vcombine.low %v1763_v9, %v1767_v13  ;;  %v1553_v9 = vld [vmem:[#allocation14 + $0xb8] sm:$0xff] }
 0x40d   : > { %v1457_v63 = vadd.f32 %v1456_v53, %v1455_v49  ;;  %v9255_v49 = vcombine.low %v1762_v10, %v1766_v11  ;;  %v9266_v53 = vcombine.high %v1771_v47, %v1775_v48  ;;  %v1552_v10 = vld [vmem:[#allocation14 + $0xb0] sm:$0xff]  ;;  %v1549_v11 = vld [vmem:[#allocation14 + $0x98] sm:$0xff] }
 0x40e   : > { %v1452_v0 = vrot.slane %v1451_v57, 1  ;;  %3128 = vmatpush1.bf16.msra.mxu1 %v9215_v51  ;;  %3210 = vmatpush1.bf16.msra.mxu0 %v9217_v52  ;;  %v1488_v51 = vrot.slane %v11056_v58, %v11091_v41  ;;  %v9264_v52 = vcombine.high %v1770_v44, %v1774_v46  ;;  %v1492_v56 = vrot.slane %v11056_v58, %v11094_v45 }
 0x40f   : > { %v1458_v3 = vrot.slane %v1457_v63, 1  ;;  %3129 = vmatprep.subr.bf16.mxu1 %v9224_v54  ;;  %3211 = vmatprep.subr.bf16.mxu0 %v9226_v55  ;;  %v1778_v54 = vld [vmem:[#allocation14 + $0x7c0] sm:$0xff] }
 0x410   : > { %v1453_v7 = vadd.f32 %v1452_v0, %v1451_v57  ;;  %v1782_v57 = vld [vmem:[#allocation14 + $0x7e0] sm:$0xff]  ;;  %v9263_v0 = vcombine.low %v1770_v44, %v1774_v46  ;;  %v1560_v44 = vld [vmem:[#allocation14 + $0xf0] sm:$0xff]  ;;  %v1557_v46 = vld [vmem:[#allocation14 + $0xd8] sm:$0xff] }
 0x411   : > { %v1459_v17 = vadd.f32 %v1458_v3, %v1457_v63  ;;  %v9265_v3 = vcombine.low %v1771_v47, %v1775_v48  ;;  %v9272_v58 = vcombine.high %v1778_v54, %v1782_v57  ;;  %v1561_v47 = vld [vmem:[#allocation14 + $0xf8] sm:$0xff] }
 0x412   : > { %v1462_v18 = vmul.f32 0.125, %v1453_v7  ;;  %3130 = vmatpush1.bf16.msra.mxu1 %v9223_v1  ;;  %3212 = vmatpush1.bf16.msra.mxu0 %v9225_v2  ;;  %v1513_v1 = vrot.slane %v11058_v59, %v11091_v41  ;;  %v1532_v7 = vld [vmem:[#allocation14 + $0x10] sm:$0xff] }
 0x413   : > { %v1463_v25 = vmul.f32 0.125, %v1459_v17  ;;  %3131 = vmatprep.subr.bf16.mxu1 %v9232_v4  ;;  %3213 = vmatprep.subr.bf16.mxu0 %v9234_v5  ;;  %v1517_v4 = vrot.slane %v11058_v59, %v11094_v45 }
 0x414   : > { %v1466_v30 = vadd.f32 1e-05, %v1462_v18  ;;  %v9273_v18 = vcombine.low %v1779_v60, %v1783_v61  ;;  %v1572_v61 = vld [vmem:[#allocation14 + $0x150] sm:$0xff] }
 0x415   : > { %v1467_v36 = vadd.f32 1e-05, %v1463_v25  ;;  %v9030_v25 = vcombine.high %v1533_v12, %v1537_v16 }
 0x416   : > { %9854 = vrsqrt.f32 %v1466_v30  ;;  %3132 = vmatpush1.bf16.msra.mxu1 %v9231_v19  ;;  %3214 = vmatpush1.bf16.msra.mxu0 %v9233_v22  ;;  %v1541_v30 = vld [vmem:[#allocation14 + $0x58] sm:$0xff] }
 0x417   : > { %9856 = vrsqrt.f32 %v1467_v36  ;;  %3133 = vmatprep.subr.bf16.mxu1 %v9240_v27  ;;  %3215 = vmatprep.subr.bf16.mxu0 %v9242_v28  ;;  %v1540_v28 = vld [vmem:[#allocation14 + $0x50] sm:$0xff] }
 0x418   : > { %v9035_v13 = vcombine.low %v1540_v28, %v1544_v29 }
 0x41a   : > { %3134 = vmatpush1.bf16.msra.mxu1 %v9239_v37  ;;  %3216 = vmatpush1.bf16.msra.mxu0 %v9241_v38  ;;  %v9029_v37 = vcombine.low %v1533_v12, %v1537_v16  ;;  %v9036_v38 = vcombine.high %v1540_v28, %v1544_v29  ;;  %v1596_v28 = vld [vmem:[#allocation14 + $0x210] sm:$0xff] }
 0x41b   : > { %3135 = vmatprep.subr.bf16.mxu1 %v9248_v39  ;;  %3217 = vmatprep.subr.bf16.mxu0 %v9250_v40  ;;  %v9038_v39 = vcombine.high %v1541_v30, %v1545_v31  ;;  %v1548_v40 = vld [vmem:[#allocation14 + $0x90] sm:$0xff] }
 0x41c   : > { %v9043_v48 = vcombine.low %v1548_v40, %v1552_v10  ;;  %v1600_v29 = vld [vmem:[#allocation14 + $0x230] sm:$0xff] }
 0x41e   : > { %3136 = vmatpush1.bf16.msra.mxu1 %v9247_v14  ;;  %3218 = vmatpush1.bf16.msra.mxu0 %v9249_v15  ;;  %v9037_v14 = vcombine.low %v1541_v30, %v1545_v31  ;;  %v9044_v15 = vcombine.high %v1548_v40, %v1552_v10  ;;  %v1597_v30 = vld [vmem:[#allocation14 + $0x218] sm:$0xff]  ;;  %v1604_v40 = vld [vmem:[#allocation14 + $0x250] sm:$0xff] }
 0x41f   : > { %3137 = vmatprep.subr.bf16.mxu1 %v9256_v42  ;;  %3219 = vmatprep.subr.bf16.mxu0 %v9258_v43  ;;  %v9046_v42 = vcombine.high %v1549_v11, %v1553_v9  ;;  %v1556_v43 = vld [vmem:[#allocation14 + $0xd0] sm:$0xff]  ;;  %v1601_v31 = vld [vmem:[#allocation14 + $0x238] sm:$0xff] }
 0x420   : > { %v9855_v55 = vpop.eup %9854  ;;  %v1608_v10 = vld [vmem:[#allocation14 + $0x270] sm:$0xff] }
 0x421   : > { %v9857_v62 = vpop.eup %9856  ;;  %v1474_v63 = vmul.f32 %v9855_v55, %v11082_v32  ;;  %v1536_v32 = vld [vmem:[#allocation14 + $0x30] sm:$0xff]  ;;  %v9051_v55 = vcombine.low %v1556_v43, %v1560_v44 }
 0x422   : > { %v1475_v2 = vmul.f32 %v9857_v62, %v11084_v35  ;;  %3138 = vmatpush1.bf16.msra.mxu1 %v9255_v49  ;;  %3220 = vmatpush1.bf16.msra.mxu0 %v9257_v50  ;;  %v9271_v35 = vcombine.low %v1778_v54, %v1782_v57  ;;  %v9028_v59 = vcombine.high %v1532_v7, %v1536_v32  ;;  %v1569_v54 = vld [vmem:[#allocation14 + $0x138] sm:$0xff]  ;;  %v1576_v62 = vld [vmem:[#allocation14 + $0x170] sm:$0xff] }
 0x423   : > { %v1499_v5 = vmul.f32 %v1488_v51, %v1474_v63  ;;  %3139 = vmatprep.subr.bf16.mxu1 %v9264_v52  ;;  %3221 = vmatprep.subr.bf16.mxu0 %v9266_v53  ;;  %v9027_v34 = vcombine.low %v1532_v7, %v1536_v32  ;;  %v9045_v49 = vcombine.low %v1549_v11, %v1553_v9  ;;  %v1564_v52 = vld [vmem:[#allocation14 + $0x110] sm:$0xff]  ;;  %v1573_v63 = vld [vmem:[#allocation14 + $0x158] sm:$0xff] }
 0x424   : > { %v1500_v8 = vmul.f32 %v1492_v56, %v1475_v2  ;;  %v9052_v50 = vcombine.high %v1556_v43, %v1560_v44  ;;  %v9054_v51 = vcombine.high %v1557_v46, %v1561_v47  ;;  %v1568_v53 = vld [vmem:[#allocation14 + $0x130] sm:$0xff]  ;;  %v9053_v56 = vcombine.low %v1557_v46, %v1561_v47  ;;  %v1585_v7 = vld [vmem:[#allocation14 + $0x1b8] sm:$0xff] }
 0x425   : > { %v1524_v17 = vadd.f32 %v1513_v1, %v1499_v5  ;;  %v9060_v57 = vcombine.high %v1564_v52, %v1568_v53  ;;  %v9059_v1 = vcombine.low %v1564_v52, %v1568_v53  ;;  %v1580_v5 = vld [vmem:[#allocation14 + $0x190] sm:$0xff]  ;;  %v1605_v11 = vld [vmem:[#allocation14 + $0x258] sm:$0xff] }
 0x426   : > { %3140 = vmatpush1.bf16.msra.mxu1 %v9263_v0  ;;  %3222 = vmatpush1.bf16.msra.mxu0 %v9265_v3  ;;  %v1525_v19 = vadd.f32 %v1517_v4, %v1500_v8  ;;  %v1577_v0 = vld [vmem:[#allocation14 + $0x178] sm:$0xff]  ;;  %v9068_v3 = vcombine.high %v1572_v61, %v1576_v62  ;;  %v9067_v8 = vcombine.low %v1572_v61, %v1576_v62  ;;  %v1612_v43 = vld [vmem:[#allocation14 + $0x290] sm:$0xff] }
 0x427   : > { %3141 = vmatprep.subr.bf16.mxu1 %v9272_v58  ;;  %3223 = vmatprep.subr.bf16.mxu0 %v9274_v6  ;;  %v1528_v22 = vmax.f32 %v1524_v17, 0.0  ;;  %v9070_v4 = vcombine.high %v1573_v63, %v1577_v0  ;;  %v1584_v58 = vld [vmem:[#allocation14 + $0x1b0] sm:$0xff]  ;;  %v1581_v6 = vld [vmem:[#allocation14 + $0x198] sm:$0xff]  ;;  %v9069_v32 = vcombine.low %v1573_v63, %v1577_v0 }
 0x428   : > { %v1529_v27 = vmax.f32 %v1525_v19, 0.0  ;;  %v9076_v12 = vcombine.high %v1580_v5, %v1584_v58  ;;  %v9078_v16 = vcombine.high %v1581_v6, %v1585_v7  ;;  %v1588_v17 = vld [vmem:[#allocation14 + $0x1d0] sm:$0xff]  ;;  %v1593_v19 = vld [vmem:[#allocation14 + $0x1f8] sm:$0xff] }
 0x429   : > { %v11108_v36 = vpack.c.bf16 %v1528_v22, %v1528_v22  ;;  %v9075_v22 = vcombine.low %v1580_v5, %v1584_v58  ;;  %v1609_v9 = vld [vmem:[#allocation14 + $0x278] sm:$0xff]  ;;  %v1616_v44 = vld [vmem:[#allocation14 + $0x2b0] sm:$0xff] }
 0x42a   : > { %3142 = vmatpush1.bf16.msra.mxu1 %v9271_v35  ;;  %3224 = vmatpush1.bf16.msra.mxu0 %v9273_v18  ;;  %v11106_v33 = vpack.c.bf16 %v1529_v27, %v1529_v27  ;;  %v1592_v35 = vld [vmem:[#allocation14 + $0x1f0] sm:$0xff]  ;;  %v1589_v18 = vld [vmem:[#allocation14 + $0x1d8] sm:$0xff] }
 0x42b   : > { %3234 = vmatprep.subr.bf16.mxu1 %v9028_v59  ;;  %3316 = vmatprep.subr.bf16.mxu0 %v9030_v25  ;;  %v9077_v59 = vcombine.low %v1581_v6, %v1585_v7  ;;  %v9084_v25 = vcombine.high %v1588_v17, %v1592_v35  ;;  %v9086_v27 = vcombine.high %v1589_v18, %v1593_v19  ;;  %v1613_v46 = vld [vmem:[#allocation14 + $0x298] sm:$0xff]  ;;  %v1620_v52 = vld [vmem:[#allocation14 + $0x2d0] sm:$0xff] }
 0x42c   : > { %3143 = vmatprep.mubr.bf16.mxu1 %v11106_v33  ;;  %3225 = vmatprep.mubr.bf16.mxu0 %v11106_v33  ;;  %v1617_v47 = vld [vmem:[#allocation14 + $0x2b8] sm:$0xff]  ;;  %v1624_v53 = vld [vmem:[#allocation14 + $0x2f0] sm:$0xff] }
 0x42d   : > { %3144 = vmatmul.mubr.bf16.vlgmr.msra.gmra.mrb[0].mxu1 %v11108_v36  ;;  %3226 = vmatmul.mubr.bf16.vlgmr.msra.gmra.mrb[12].mxu0 %v11108_v36  ;;  %v1628_v61 = vld [vmem:[#allocation14 + $0x310] sm:$0xff]  ;;  %v1629_v63 = vld [vmem:[#allocation14 + $0x318] sm:$0xff] }
 0x42e   : > { %3235 = vmatpush1.bf16.msra.mxu1 %v9027_v34  ;;  %3266 = vmatprep.mubr.bf16.mxu1 %v11068_v20  ;;  %v9083_v34 = vcombine.low %v1588_v17, %v1592_v35  ;;  %v1632_v62 = vld [vmem:[#allocation14 + $0x330] sm:$0xff]  ;;  %v1633_v0 = vld [vmem:[#allocation14 + $0x338] sm:$0xff] }
 0x42f   : > { %3317 = vmatpush1.bf16.msra.mxu0 %v9029_v37  ;;  %3348 = vmatprep.mubr.bf16.mxu0 %v11068_v20  ;;  %v1565_v20 = vld [vmem:[#allocation14 + $0x118] sm:$0xff]  ;;  %v9085_v37 = vcombine.low %v1589_v18, %v1593_v19  ;;  %v1636_v5 = vld [vmem:[#allocation14 + $0x350] sm:$0xff] }
 0x430   : > { %3236 = vmatprep.subr.bf16.mxu1 %v9036_v38  ;;  %3318 = vmatprep.subr.bf16.mxu0 %v9038_v39  ;;  %v9062_v60 = vcombine.high %v1565_v20, %v1569_v54  ;;  %v9061_v2 = vcombine.low %v1565_v20, %v1569_v54  ;;  %v9092_v38 = vcombine.high %v1596_v28, %v1600_v29  ;;  %v1621_v20 = vld [vmem:[#allocation14 + $0x2d8] sm:$0xff]  ;;  %v1640_v58 = vld [vmem:[#allocation14 + $0x370] sm:$0xff] }
 0x431   : > { %v9094_v39 = vcombine.high %v1597_v30, %v1601_v31  ;;  %v1625_v54 = vld [vmem:[#allocation14 + $0x2f8] sm:$0xff]  ;;  %v1644_v17 = vld [vmem:[#allocation14 + $0x390] sm:$0xff] }
 0x432   : > { %3237 = vmatpush1.bf16.msra.mxu1 %v9035_v13  ;;  %v9091_v13 = vcombine.low %v1596_v28, %v1600_v29  ;;  %v1637_v6 = vld [vmem:[#allocation14 + $0x358] sm:$0xff]  ;;  %v1648_v35 = vld [vmem:[#allocation14 + $0x3b0] sm:$0xff] }
 0x433   : > { %3319 = vmatpush1.bf16.msra.mxu0 %v9037_v14  ;;  %3238 = vmatprep.subr.bf16.mxu1 %v9044_v15  ;;  %v9093_v14 = vcombine.low %v1597_v30, %v1601_v31  ;;  %v9100_v15 = vcombine.high %v1604_v40, %v1608_v10  ;;  %v1641_v7 = vld [vmem:[#allocation14 + $0x378] sm:$0xff]  ;;  %v1652_v28 = vld [vmem:[#allocation14 + $0x3d0] sm:$0xff] }
 0x434   : > { %3320 = vmatprep.subr.bf16.mxu0 %v9046_v42  ;;  %v9102_v42 = vcombine.high %v1605_v11, %v1609_v9  ;;  %v1645_v18 = vld [vmem:[#allocation14 + $0x398] sm:$0xff]  ;;  %v1656_v29 = vld [vmem:[#allocation14 + $0x3f0] sm:$0xff] }
 0x435   : > { %v1649_v19 = vld [vmem:[#allocation14 + $0x3b8] sm:$0xff] }
 0x436   : > { %3239 = vmatpush1.bf16.msra.mxu1 %v9043_v48  ;;  %v9099_v48 = vcombine.low %v1604_v40, %v1608_v10  ;;  %v1653_v30 = vld [vmem:[#allocation14 + $0x3d8] sm:$0xff]  ;;  %v1660_v40 = vld [vmem:[#allocation14 + $0x410] sm:$0xff] }
 0x437   : > { %3321 = vmatpush1.bf16.msra.mxu0 %v9045_v49  ;;  %3240 = vmatprep.subr.bf16.mxu1 %v9052_v50  ;;  %v9101_v49 = vcombine.low %v1605_v11, %v1609_v9  ;;  %v9108_v50 = vcombine.high %v1612_v43, %v1616_v44  ;;  %v1657_v31 = vld [vmem:[#allocation14 + $0x3f8] sm:$0xff]  ;;  %v1664_v10 = vld [vmem:[#allocation14 + $0x430] sm:$0xff] }
 0x438   : > { %3322 = vmatprep.subr.bf16.mxu0 %v9054_v51  ;;  %v9110_v51 = vcombine.high %v1613_v46, %v1617_v47  ;;  %v1661_v11 = vld [vmem:[#allocation14 + $0x418] sm:$0xff] }
 0x439   : > { %v1665_v9 = vld [vmem:[#allocation14 + $0x438] sm:$0xff] }
 0x43a   : > { %3241 = vmatpush1.bf16.msra.mxu1 %v9051_v55  ;;  %v9107_v55 = vcombine.low %v1612_v43, %v1616_v44  ;;  %v1668_v43 = vld [vmem:[#allocation14 + $0x450] sm:$0xff] }
 0x43b   : > { %3323 = vmatpush1.bf16.msra.mxu0 %v9053_v56  ;;  %3242 = vmatprep.subr.bf16.mxu1 %v9060_v57  ;;  %v9109_v56 = vcombine.low %v1613_v46, %v1617_v47  ;;  %v9116_v57 = vcombine.high %v1620_v52, %v1624_v53  ;;  %v1672_v44 = vld [vmem:[#allocation14 + $0x470] sm:$0xff]  ;;  %v9155_v46 = vcombine.low %v1660_v40, %v1664_v10  ;;  %v1669_v47 = vld [vmem:[#allocation14 + $0x458] sm:$0xff] }
 0x43c   : > { %3324 = vmatprep.subr.bf16.mxu0 %v9062_v60  ;;  %v9118_v60 = vcombine.high %v1621_v20, %v1625_v54 }
 0x43e   : > { %3243 = vmatpush1.bf16.msra.mxu1 %v9059_v1  ;;  %v9115_v1 = vcombine.low %v1620_v52, %v1624_v53  ;;  %v1680_v52 = vld [vmem:[#allocation14 + $0x4b0] sm:$0xff] }
 0x43f   : > { %3325 = vmatpush1.bf16.msra.mxu0 %v9061_v2  ;;  %3244 = vmatprep.subr.bf16.mxu1 %v9068_v3  ;;  %v9117_v2 = vcombine.low %v1621_v20, %v1625_v54  ;;  %v9124_v3 = vcombine.high %v1628_v61, %v1632_v62  ;;  %v1677_v20 = vld [vmem:[#allocation14 + $0x498] sm:$0xff] }
 0x440   : > { %3326 = vmatprep.subr.bf16.mxu0 %v9070_v4  ;;  %v9126_v4 = vcombine.high %v1629_v63, %v1633_v0  ;;  %v1681_v54 = vld [vmem:[#allocation14 + $0x4b8] sm:$0xff] }
 0x442   : > { %3245 = vmatpush1.bf16.msra.mxu1 %v9067_v8  ;;  %v9123_v8 = vcombine.low %v1628_v61, %v1632_v62  ;;  %v1684_v61 = vld [vmem:[#allocation14 + $0x4d0] sm:$0xff] }
 0x443   : > { %3327 = vmatpush1.bf16.msra.mxu0 %v9069_v32  ;;  %3246 = vmatprep.subr.bf16.mxu1 %v9076_v12  ;;  %v9125_v32 = vcombine.low %v1629_v63, %v1633_v0  ;;  %v9132_v12 = vcombine.high %v1636_v5, %v1640_v58  ;;  %v1688_v62 = vld [vmem:[#allocation14 + $0x4f0] sm:$0xff]  ;;  %v1685_v63 = vld [vmem:[#allocation14 + $0x4d8] sm:$0xff] }
 0x444   : > { %3328 = vmatprep.subr.bf16.mxu0 %v9078_v16  ;;  %v9134_v16 = vcombine.high %v1637_v6, %v1641_v7  ;;  %v1689_v0 = vld [vmem:[#allocation14 + $0x4f8] sm:$0xff] }
 0x446   : > { %3247 = vmatpush1.bf16.msra.mxu1 %v9075_v22  ;;  %v9131_v22 = vcombine.low %v1636_v5, %v1640_v58  ;;  %v1696_v5 = vld [vmem:[#allocation14 + $0x530] sm:$0xff]  ;;  %v1693_v58 = vld [vmem:[#allocation14 + $0x518] sm:$0xff] }
 0x447   : > { %3329 = vmatpush1.bf16.msra.mxu0 %v9077_v59  ;;  %3248 = vmatprep.subr.bf16.mxu1 %v9084_v25  ;;  %v9133_v59 = vcombine.low %v1637_v6, %v1641_v7  ;;  %v9140_v25 = vcombine.high %v1644_v17, %v1648_v35  ;;  %v1697_v6 = vld [vmem:[#allocation14 + $0x538] sm:$0xff]  ;;  %v9181_v7 = vcombine.low %v1685_v63, %v1689_v0 }
 0x448   : > { %3330 = vmatprep.subr.bf16.mxu0 %v9086_v27  ;;  %v9142_v27 = vcombine.high %v1645_v18, %v1649_v19 }
 0x44a   : > { %3249 = vmatpush1.bf16.msra.mxu1 %v9083_v34  ;;  %v9139_v34 = vcombine.low %v1644_v17, %v1648_v35  ;;  %v1701_v17 = vld [vmem:[#allocation14 + $0x558] sm:$0xff] }
 0x44b   : > { %3331 = vmatpush1.bf16.msra.mxu0 %v9085_v37  ;;  %3250 = vmatprep.subr.bf16.mxu1 %v9092_v38  ;;  %v9141_v37 = vcombine.low %v1645_v18, %v1649_v19  ;;  %v9148_v38 = vcombine.high %v1652_v28, %v1656_v29  ;;  %v1705_v35 = vld [vmem:[#allocation14 + $0x578] sm:$0xff]  ;;  %v9189_v19 = vcombine.low %v1693_v58, %v1697_v6 }
 0x44c   : > { %3332 = vmatprep.subr.bf16.mxu0 %v9094_v39  ;;  %v9150_v39 = vcombine.high %v1653_v30, %v1657_v31 }
 0x44e   : > { %3251 = vmatpush1.bf16.msra.mxu1 %v9091_v13  ;;  %v9147_v13 = vcombine.low %v1652_v28, %v1656_v29  ;;  %v1709_v28 = vld [vmem:[#allocation14 + $0x598] sm:$0xff] }
 0x44f   : > { %3333 = vmatpush1.bf16.msra.mxu0 %v9093_v14  ;;  %3252 = vmatprep.subr.bf16.mxu1 %v9100_v15  ;;  %v9149_v14 = vcombine.low %v1653_v30, %v1657_v31  ;;  %v9156_v15 = vcombine.high %v1660_v40, %v1664_v10  ;;  %v1713_v29 = vld [vmem:[#allocation14 + $0x5b8] sm:$0xff]  ;;  %v9197_v31 = vcombine.low %v1701_v17, %v1705_v35 }
 0x450   : > { %3334 = vmatprep.subr.bf16.mxu0 %v9102_v42  ;;  %v9158_v42 = vcombine.high %v1661_v11, %v1665_v9  ;;  %v1717_v40 = vld [vmem:[#allocation14 + $0x5d8] sm:$0xff] }
 0x451   : > { %v1721_v10 = vld [vmem:[#allocation14 + $0x5f8] sm:$0xff] }
 0x452   : > { %3253 = vmatpush1.bf16.msra.mxu1 %v9099_v48  ;;  %v1673_v48 = vld [vmem:[#allocation14 + $0x478] sm:$0xff] }
 0x453   : > { %3335 = vmatpush1.bf16.msra.mxu0 %v9101_v49  ;;  %3254 = vmatprep.subr.bf16.mxu1 %v9108_v50  ;;  %v9157_v49 = vcombine.low %v1661_v11, %v1665_v9  ;;  %v9164_v50 = vcombine.high %v1668_v43, %v1672_v44  ;;  %v9166_v53 = vcombine.high %v1669_v47, %v1673_v48 }
 0x454   : > { %3336 = vmatprep.subr.bf16.mxu0 %v9110_v51  ;;  %v1676_v51 = vld [vmem:[#allocation14 + $0x490] sm:$0xff]  ;;  %v9205_v9 = vcombine.low %v1709_v28, %v1713_v29 }
 0x456   : > { %3255 = vmatpush1.bf16.msra.mxu1 %v9107_v55  ;;  %v9163_v55 = vcombine.low %v1668_v43, %v1672_v44  ;;  %v1725_v43 = vld [vmem:[#allocation14 + $0x618] sm:$0xff] }
 0x457   : > { %3337 = vmatpush1.bf16.msra.mxu0 %v9109_v56  ;;  %3256 = vmatprep.subr.bf16.mxu1 %v9116_v57  ;;  %v9165_v56 = vcombine.low %v1669_v47, %v1673_v48  ;;  %v9172_v57 = vcombine.high %v1676_v51, %v1680_v52  ;;  %v1729_v44 = vld [vmem:[#allocation14 + $0x638] sm:$0xff]  ;;  %v9213_v47 = vcombine.low %v1717_v40, %v1721_v10 }
 0x458   : > { %3338 = vmatprep.subr.bf16.mxu0 %v9118_v60  ;;  %v9174_v60 = vcombine.high %v1677_v20, %v1681_v54 }
 0x45a   : > { %3257 = vmatpush1.bf16.msra.mxu1 %v9115_v1  ;;  %v9171_v1 = vcombine.low %v1676_v51, %v1680_v52  ;;  %v1736_v51 = vld [vmem:[#allocation14 + $0x670] sm:$0xff]  ;;  %v1733_v52 = vld [vmem:[#allocation14 + $0x658] sm:$0xff] }
 0x45b   : > { %3339 = vmatpush1.bf16.msra.mxu0 %v9117_v2  ;;  %3258 = vmatprep.subr.bf16.mxu1 %v9124_v3  ;;  %v9180_v2 = vcombine.high %v1684_v61, %v1688_v62  ;;  %v9182_v3 = vcombine.high %v1685_v63, %v1689_v0 }
 0x45c   : > { %3340 = vmatprep.subr.bf16.mxu0 %v9126_v4  ;;  %v1692_v4 = vld [vmem:[#allocation14 + $0x510] sm:$0xff] }
 0x45d   : > { %v9187_v18 = vcombine.low %v1692_v4, %v1696_v5 }
 0x45e   : > { %3259 = vmatpush1.bf16.msra.mxu1 %v9123_v8  ;;  %v9188_v8 = vcombine.high %v1692_v4, %v1696_v5  ;;  %v1749_v4 = vld [vmem:[#allocation14 + $0x6d8] sm:$0xff] }
 0x45f   : > { %3341 = vmatpush1.bf16.msra.mxu0 %v9125_v32  ;;  %3260 = vmatprep.subr.bf16.mxu1 %v9132_v12  ;;  %v9190_v32 = vcombine.high %v1693_v58, %v1697_v6  ;;  %v1700_v12 = vld [vmem:[#allocation14 + $0x550] sm:$0xff]  ;;  %v1753_v5 = vld [vmem:[#allocation14 + $0x6f8] sm:$0xff] }
 0x460   : > { %3342 = vmatprep.subr.bf16.mxu0 %v9134_v16  ;;  %v1704_v16 = vld [vmem:[#allocation14 + $0x570] sm:$0xff] }
 0x461   : > { %v9195_v30 = vcombine.low %v1700_v12, %v1704_v16 }
 0x462   : > { %3261 = vmatpush1.bf16.msra.mxu1 %v9131_v22  ;;  %v9196_v22 = vcombine.high %v1700_v12, %v1704_v16  ;;  %v1757_v12 = vld [vmem:[#allocation14 + $0x718] sm:$0xff] }
 0x463   : > { %3343 = vmatpush1.bf16.msra.mxu0 %v9133_v59  ;;  %3262 = vmatprep.subr.bf16.mxu1 %v9140_v25  ;;  %v9198_v59 = vcombine.high %v1701_v17, %v1705_v35  ;;  %v1708_v25 = vld [vmem:[#allocation14 + $0x590] sm:$0xff]  ;;  %v1761_v16 = vld [vmem:[#allocation14 + $0x738] sm:$0xff]  ;;  %v9245_v35 = vcombine.low %v1749_v4, %v1753_v5 }
 0x464   : > { %3344 = vmatprep.subr.bf16.mxu0 %v9142_v27  ;;  %v1712_v27 = vld [vmem:[#allocation14 + $0x5b0] sm:$0xff] }
 0x465   : > { %v9203_v11 = vcombine.low %v1708_v25, %v1712_v27 }
 0x466   : > { %3263 = vmatpush1.bf16.msra.mxu1 %v9139_v34  ;;  %v9204_v34 = vcombine.high %v1708_v25, %v1712_v27  ;;  %v1765_v25 = vld [vmem:[#allocation14 + $0x758] sm:$0xff] }
 0x467   : > { %3345 = vmatpush1.bf16.msra.mxu0 %v9141_v37  ;;  %3264 = vmatprep.subr.bf16.mxu1 %v9148_v38  ;;  %v9206_v37 = vcombine.high %v1709_v28, %v1713_v29  ;;  %v1716_v38 = vld [vmem:[#allocation14 + $0x5d0] sm:$0xff]  ;;  %v1769_v27 = vld [vmem:[#allocation14 + $0x778] sm:$0xff]  ;;  %v9253_v29 = vcombine.low %v1757_v12, %v1761_v16 }
 0x468   : > { %3346 = vmatprep.subr.bf16.mxu0 %v9150_v39  ;;  %v1720_v39 = vld [vmem:[#allocation14 + $0x5f0] sm:$0xff] }
 0x46a   : > { %3265 = vmatpush1.bf16.msra.mxu1 %v9147_v13  ;;  %v9212_v13 = vcombine.high %v1716_v38, %v1720_v39 }
 0x46b   : > { %3347 = vmatpush1.bf16.msra.mxu0 %v9149_v14  ;;  %3275 = vmatprep.subr.bf16.mxu1 %v9156_v15  ;;  %v9214_v14 = vcombine.high %v1717_v40, %v1721_v10  ;;  %v1724_v15 = vld [vmem:[#allocation14 + $0x610] sm:$0xff]  ;;  %v9261_v10 = vcombine.low %v1765_v25, %v1769_v27 }
 0x46c   : > { %3357 = vmatprep.subr.bf16.mxu0 %v9158_v42  ;;  %v1728_v42 = vld [vmem:[#allocation14 + $0x630] sm:$0xff] }
 0x46d   : > { %3267 = vmatmul.mubr.bf16.vlgmr.msra.gmra.mrb[4].mxu1 %v11070_v21  ;;  %v9220_v48 = vcombine.high %v1724_v15, %v1728_v42 }
 0x46e   : > { %3349 = vmatmul.mubr.bf16.vlgmr.msra.gmra.mrb[16].mxu0 %v11070_v21  ;;  %3276 = vmatpush1.bf16.msra.mxu1 %v9155_v46  ;;  %v9173_v21 = vcombine.low %v1677_v20, %v1681_v54  ;;  %v9211_v46 = vcombine.low %v1716_v38, %v1720_v39  ;;  %v9219_v20 = vcombine.low %v1724_v15, %v1728_v42  ;;  %v1773_v38 = vld [vmem:[#allocation14 + $0x798] sm:$0xff] }
 0x46f   : > { %3307 = vmatprep.mubr.bf16.mxu1 %v11106_v33  ;;  %3358 = vmatpush1.bf16.msra.mxu0 %v9157_v49  ;;  %v9222_v49 = vcombine.high %v1725_v43, %v1729_v44  ;;  %v9221_v54 = vcombine.low %v1725_v43, %v1729_v44  ;;  %v1777_v39 = vld [vmem:[#allocation14 + $0x7b8] sm:$0xff] }
 0x470   : > { %3389 = vmatprep.mubr.bf16.mxu0 %v11106_v33  ;;  %3277 = vmatprep.subr.bf16.mxu1 %v9164_v50  ;;  %v9179_v33 = vcombine.low %v1684_v61, %v1688_v62  ;;  %v1732_v50 = vld [vmem:[#allocation14 + $0x650] sm:$0xff]  ;;  %v1741_v61 = vld [vmem:[#allocation14 + $0x698] sm:$0xff]  ;;  %v9269_v44 = vcombine.low %v1773_v38, %v1777_v39 }
 0x471   : > { %3359 = vmatprep.subr.bf16.mxu0 %v9166_v53  ;;  %v1737_v53 = vld [vmem:[#allocation14 + $0x678] sm:$0xff]  ;;  %v9227_v63 = vcombine.low %v1732_v50, %v1736_v51 }
 0x472   : > { %3278 = vmatpush1.bf16.msra.mxu1 %v9163_v55  ;;  %v9228_v55 = vcombine.high %v1732_v50, %v1736_v51  ;;  %v1745_v62 = vld [vmem:[#allocation14 + $0x6b8] sm:$0xff]  ;;  %v9229_v0 = vcombine.low %v1733_v52, %v1737_v53 }
 0x473   : > { %3360 = vmatpush1.bf16.msra.mxu0 %v9165_v56  ;;  %3279 = vmatprep.subr.bf16.mxu1 %v9172_v57  ;;  %v9230_v56 = vcombine.high %v1733_v52, %v1737_v53  ;;  %v1740_v57 = vld [vmem:[#allocation14 + $0x690] sm:$0xff]  ;;  %v9237_v6 = vcombine.low %v1741_v61, %v1745_v62  ;;  %v1781_v15 = vld [vmem:[#allocation14 + $0x7d8] sm:$0xff] }
 0x474   : > { %3361 = vmatprep.subr.bf16.mxu0 %v9174_v60  ;;  %v1744_v60 = vld [vmem:[#allocation14 + $0x6b0] sm:$0xff]  ;;  %v1785_v42 = vld [vmem:[#allocation14 + $0x7f8] sm:$0xff] }
 0x475   : > { %v9235_v58 = vcombine.low %v1740_v57, %v1744_v60  ;;  %v9277_v51 = vcombine.low %v1781_v15, %v1785_v42  ;;  %v3658_v53 = vld [vmem:[%s11017_s26] sm:$0xff] }
 0x476   : > { %3280 = vmatpush1.bf16.msra.mxu1 %v9171_v1  ;;  %v9236_v1 = vcombine.high %v1740_v57, %v1744_v60 }
 0x477   : > { %3362 = vmatpush1.bf16.msra.mxu0 %v9173_v21  ;;  %3281 = vmatprep.subr.bf16.mxu1 %v9180_v2  ;;  %v9238_v21 = vcombine.high %v1741_v61, %v1745_v62  ;;  %v1748_v2 = vld [vmem:[#allocation14 + $0x6d0] sm:$0xff]  ;;  %v3679_v61 = vld [vmem:[%s11017_s26 + $0xa8] sm:$0xff]  ;;  %v3681_v62 = vld [vmem:[%s11017_s26 + $0xb8] sm:$0xff] }
 0x478   : > { %3363 = vmatprep.subr.bf16.mxu0 %v9182_v3  ;;  %v1752_v3 = vld [vmem:[#allocation14 + $0x6f0] sm:$0xff] }
 0x479   : > { %v9243_v17 = vcombine.low %v1748_v2, %v1752_v3 }
 0x47a   : > { %3282 = vmatpush1.bf16.msra.mxu1 %v9179_v33  ;;  %v9244_v33 = vcombine.high %v1748_v2, %v1752_v3  ;;  %v4349_v2 = vunpack.c.l.s8.bf16 %v3681_v62  ;;  %v3680_v3 = vld [vmem:[%s11017_s26 + $0xb0] sm:$0xff] }
 0x47b   : > { %3364 = vmatpush1.bf16.msra.mxu0 %v9181_v7  ;;  %3283 = vmatprep.subr.bf16.mxu1 %v9188_v8  ;;  %v9246_v7 = vcombine.high %v1749_v4, %v1753_v5  ;;  %v1756_v8 = vld [vmem:[#allocation14 + $0x710] sm:$0xff]  ;;  %v4348_v5 = vunpack.c.l.s8.bf16 %v3680_v3 }
 0x47c   : > { %3365 = vmatprep.subr.bf16.mxu0 %v9190_v32  ;;  %v1760_v32 = vld [vmem:[#allocation14 + $0x730] sm:$0xff] }
 0x47d   : > { %v9251_v28 = vcombine.low %v1756_v8, %v1760_v32 }
 0x47e   : > { %3284 = vmatpush1.bf16.msra.mxu1 %v9187_v18  ;;  %v9252_v18 = vcombine.high %v1756_v8, %v1760_v32  ;;  %v4368_v8 = vunpack.c.h.s8.bf16 %v3680_v3 }
 0x47f   : > { %3366 = vmatpush1.bf16.msra.mxu0 %v9189_v19  ;;  %3285 = vmatprep.subr.bf16.mxu1 %v9196_v22  ;;  %v9254_v19 = vcombine.high %v1757_v12, %v1761_v16  ;;  %v1764_v22 = vld [vmem:[#allocation14 + $0x750] sm:$0xff] }
 0x480   : > { %3367 = vmatprep.subr.bf16.mxu0 %v9198_v59  ;;  %v1768_v59 = vld [vmem:[#allocation14 + $0x770] sm:$0xff] }
 0x481   : > { %v9259_v40 = vcombine.low %v1764_v22, %v1768_v59  ;;  %v3698_v12 = vld [vmem:[%s11017_s26 + $0x140] sm:$0xff] }
 0x482   : > { %3286 = vmatpush1.bf16.msra.mxu1 %v9195_v30  ;;  %v9260_v30 = vcombine.high %v1764_v22, %v1768_v59  ;;  %v3719_v59 = vld [vmem:[%s11017_s26 + $0x1e8] sm:$0xff] }
 0x483   : > { %3368 = vmatpush1.bf16.msra.mxu0 %v9197_v31  ;;  %3287 = vmatprep.subr.bf16.mxu1 %v9204_v34  ;;  %v9262_v31 = vcombine.high %v1765_v25, %v1769_v27  ;;  %v1772_v34 = vld [vmem:[#allocation14 + $0x790] sm:$0xff]  ;;  %v3721_v25 = vld [vmem:[%s11017_s26 + $0x1f8] sm:$0xff]  ;;  %v4406_v27 = vunpack.c.h.s8.bf16 %v3698_v12 }
 0x484   : > { %3369 = vmatprep.subr.bf16.mxu0 %v9206_v37  ;;  %v1776_v37 = vld [vmem:[#allocation14 + $0x7b0] sm:$0xff] }
 0x485   : > { %v9267_v43 = vcombine.low %v1772_v34, %v1776_v37 }
 0x486   : > { %3288 = vmatpush1.bf16.msra.mxu1 %v9203_v11  ;;  %v9268_v11 = vcombine.high %v1772_v34, %v1776_v37  ;;  %v3720_v34 = vld [vmem:[%s11017_s26 + $0x1f0] sm:$0xff] }
 0x487   : > { %3370 = vmatpush1.bf16.msra.mxu0 %v9205_v9  ;;  %3289 = vmatprep.subr.bf16.mxu1 %v9212_v13  ;;  %v9270_v9 = vcombine.high %v1773_v38, %v1777_v39  ;;  %v1780_v13 = vld [vmem:[#allocation14 + $0x7d0] sm:$0xff]  ;;  %v4428_v38 = vunpack.c.l.s8.bf16 %v3720_v34  ;;  %v4447_v39 = vunpack.c.h.s8.bf16 %v3719_v59 }
 0x488   : > { %3371 = vmatprep.subr.bf16.mxu0 %v9214_v14  ;;  %v1784_v14 = vld [vmem:[#allocation14 + $0x7f0] sm:$0xff] }
 0x489   : > { %v9275_v50 = vcombine.low %v1780_v13, %v1784_v14 }
 0x48a   : > { %3290 = vmatpush1.bf16.msra.mxu1 %v9211_v46  ;;  %v9276_v46 = vcombine.high %v1780_v13, %v1784_v14  ;;  %v4448_v13 = vunpack.c.h.s8.bf16 %v3720_v34 }
 0x48b   : > { %3372 = vmatpush1.bf16.msra.mxu0 %v9213_v47  ;;  %3291 = vmatprep.subr.bf16.mxu1 %v9220_v48  ;;  %v9278_v47 = vcombine.high %v1781_v15, %v1785_v42  ;;  %v3659_v48 = vld [vmem:[%s11017_s26 + $0x8] sm:$0xff]  ;;  %v3738_v15 = vld [vmem:[%s11017_s26 + $0x280] sm:$0xff] }
 0x48c   : > { %3373 = vmatprep.subr.bf16.mxu0 %v9222_v49  ;;  %v3661_v49 = vld [vmem:[%s11017_s26 + $0x18] sm:$0xff]  ;;  %v4307_v52 = vunpack.c.l.s8.bf16 %v3659_v48  ;;  %v4327_v57 = vunpack.c.h.s8.bf16 %v3659_v48 }
 0x48d   : > { %v4329_v60 = vunpack.c.h.s8.bf16 %v3661_v49 }
 0x48e   : > { %3292 = vmatpush1.bf16.msra.mxu1 %v9219_v20  ;;  %v4309_v20 = vunpack.c.l.s8.bf16 %v3661_v49  ;;  %v3759_v49 = vld [vmem:[%s11017_s26 + $0x328] sm:$0xff] }
 0x48f   : > { %3374 = vmatpush1.bf16.msra.mxu0 %v9221_v54  ;;  %3293 = vmatprep.subr.bf16.mxu1 %v9228_v55  ;;  %v3660_v54 = vld [vmem:[%s11017_s26 + $0x10] sm:$0xff]  ;;  %v4306_v55 = vunpack.c.l.s8.bf16 %v3658_v53 }
 0x490   : > { %3375 = vmatprep.subr.bf16.mxu0 %v9230_v56  ;;  %v4308_v56 = vunpack.c.l.s8.bf16 %v3660_v54 }
 0x492   : > { %3294 = vmatpush1.bf16.msra.mxu1 %v9227_v63  ;;  %v4326_v63 = vunpack.c.h.s8.bf16 %v3658_v53  ;;  %v4507_v53 = vunpack.c.l.s8.bf16 %v3759_v49 }
 0x493   : > { %3376 = vmatpush1.bf16.msra.mxu0 %v9229_v0  ;;  %3295 = vmatprep.subr.bf16.mxu1 %v9236_v1  ;;  %v4328_v0 = vunpack.c.h.s8.bf16 %v3660_v54  ;;  %v4347_v1 = vunpack.c.l.s8.bf16 %v3679_v61 }
 0x494   : > { %3377 = vmatprep.subr.bf16.mxu0 %v9238_v21  ;;  %v3678_v21 = vld [vmem:[%s11017_s26 + $0xa0] sm:$0xff] }
 0x495   : > { %v4346_v4 = vunpack.c.l.s8.bf16 %v3678_v21 }
 0x496   : > { %3296 = vmatpush1.bf16.msra.mxu1 %v9235_v58  ;;  %v4369_v58 = vunpack.c.h.s8.bf16 %v3681_v62  ;;  %v3779_v62 = vld [vmem:[%s11017_s26 + $0x3c8] sm:$0xff] }
 0x497   : > { %3378 = vmatpush1.bf16.msra.mxu0 %v9237_v6  ;;  %3297 = vmatprep.subr.bf16.mxu1 %v9244_v33  ;;  %v3699_v6 = vld [vmem:[%s11017_s26 + $0x148] sm:$0xff]  ;;  %v3701_v33 = vld [vmem:[%s11017_s26 + $0x158] sm:$0xff] }
 0x498   : > { %3379 = vmatprep.subr.bf16.mxu0 %v9246_v7  ;;  %v4366_v7 = vunpack.c.h.s8.bf16 %v3678_v21  ;;  %v4387_v32 = vunpack.c.l.s8.bf16 %v3699_v6  ;;  %v4389_v16 = vunpack.c.l.s8.bf16 %v3701_v33  ;;  %v4409_v22 = vunpack.c.h.s8.bf16 %v3701_v33  ;;  %v3799_v33 = vld [vmem:[%s11017_s26 + $0x468] sm:$0xff] }
 0x499   : > { %v4547_v21 = vunpack.c.l.s8.bf16 %v3779_v62 }
 0x49a   : > { %3298 = vmatpush1.bf16.msra.mxu1 %v9243_v17  ;;  %v3700_v17 = vld [vmem:[%s11017_s26 + $0x150] sm:$0xff] }
 0x49b   : > { %3380 = vmatpush1.bf16.msra.mxu0 %v9245_v35  ;;  %3299 = vmatprep.subr.bf16.mxu1 %v9252_v18  ;;  %v4386_v35 = vunpack.c.l.s8.bf16 %v3698_v12  ;;  %v4388_v18 = vunpack.c.l.s8.bf16 %v3700_v17  ;;  %v4587_v12 = vunpack.c.l.s8.bf16 %v3799_v33 }
 0x49c   : > { %3381 = vmatprep.subr.bf16.mxu0 %v9254_v19  ;;  %v4407_v19 = vunpack.c.h.s8.bf16 %v3699_v6 }
 0x49e   : > { %3300 = vmatpush1.bf16.msra.mxu1 %v9251_v28  ;;  %v4408_v28 = vunpack.c.h.s8.bf16 %v3700_v17 }
 0x49f   : > { %3382 = vmatpush1.bf16.msra.mxu0 %v9253_v29  ;;  %3301 = vmatprep.subr.bf16.mxu1 %v9260_v30  ;;  %v4427_v29 = vunpack.c.l.s8.bf16 %v3719_v59  ;;  %v3718_v30 = vld [vmem:[%s11017_s26 + $0x1e0] sm:$0xff] }
 0x4a0   : > { %3383 = vmatprep.subr.bf16.mxu0 %v9262_v31  ;;  %v4429_v31 = vunpack.c.l.s8.bf16 %v3721_v25  ;;  %v4426_v37 = vunpack.c.l.s8.bf16 %v3718_v30 }
 0x4a2   : > { %3302 = vmatpush1.bf16.msra.mxu1 %v9259_v40  ;;  %v4449_v40 = vunpack.c.h.s8.bf16 %v3721_v25  ;;  %v11155_v25 = vld [vmem:[%s11017_s26 + $0x508] sm:$0xff] }
 0x4a3   : > { %3384 = vmatpush1.bf16.msra.mxu0 %v9261_v10  ;;  %3303 = vmatprep.subr.bf16.mxu1 %v9268_v11  ;;  %v3739_v10 = vld [vmem:[%s11017_s26 + $0x288] sm:$0xff]  ;;  %v3741_v11 = vld [vmem:[%s11017_s26 + $0x298] sm:$0xff] }
 0x4a4   : > { %3385 = vmatprep.subr.bf16.mxu0 %v9270_v9  ;;  %v4446_v9 = vunpack.c.h.s8.bf16 %v3718_v30  ;;  %v4467_v14 = vunpack.c.l.s8.bf16 %v3739_v10  ;;  %v4469_v42 = vunpack.c.l.s8.bf16 %v3741_v11  ;;  %v4489_v48 = vunpack.c.h.s8.bf16 %v3741_v11 }
 0x4a5   : > { %v4627_v30 = vunpack.c.l.s8.bf16 %v11155_v25 }
 0x4a6   : > { %3304 = vmatpush1.bf16.msra.mxu1 %v9267_v43  ;;  %v3740_v43 = vld [vmem:[%s11017_s26 + $0x290] sm:$0xff] }
 0x4a7   : > { %3386 = vmatpush1.bf16.msra.mxu0 %v9269_v44  ;;  %3305 = vmatprep.subr.bf16.mxu1 %v9276_v46  ;;  %v4466_v44 = vunpack.c.l.s8.bf16 %v3738_v15  ;;  %v4468_v46 = vunpack.c.l.s8.bf16 %v3740_v43 }
 0x4a8   : > { %3387 = vmatprep.subr.bf16.mxu0 %v9278_v47  ;;  %v4487_v47 = vunpack.c.h.s8.bf16 %v3739_v10 }
 0x4aa   : > { %3306 = vmatpush1.bf16.msra.mxu1 %v9275_v50  ;;  %v3761_v50 = vld [vmem:[%s11017_s26 + $0x338] sm:$0xff] }
 0x4ab   : > { %3388 = vmatpush1.bf16.msra.mxu0 %v9277_v51  ;;  %5586 = vmatprep.subr.bf16.mxu1 %v4307_v52  ;;  %v4486_v51 = vunpack.c.h.s8.bf16 %v3738_v15  ;;  %v4488_v52 = vunpack.c.h.s8.bf16 %v3740_v43  ;;  %v4509_v54 = vunpack.c.l.s8.bf16 %v3761_v50 }
 0x4ac   : > { %5750 = vmatprep.subr.bf16.mxu0 %v4309_v20  ;;  %v3758_v20 = vld [vmem:[%s11017_s26 + $0x320] sm:$0xff] }
 0x4ad   : > { %3308 = vmatmul.mubr.bf16.vlgmr.msra.gmra.mrb[4].mxu1 %v11108_v36 }
 0x4ae   : > { %3390 = vmatmul.mubr.bf16.vlgmr.msra.gmra.mrb[16].mxu0 %v11108_v36  ;;  %5587 = vmatpush1.bf16.msra.mxu1 %v4306_v55  ;;  %v4367_v36 = vunpack.c.h.s8.bf16 %v3679_v61  ;;  %v3760_v55 = vld [vmem:[%s11017_s26 + $0x330] sm:$0xff]  ;;  %v4529_v61 = vunpack.c.h.s8.bf16 %v3761_v50 }
 0x4af   : > { %5751 = vmatpush1.bf16.msra.mxu0 %v4308_v56  ;;  %5588 = vmatprep.subr.bf16.mxu1 %v4327_v57  ;;  %v4506_v56 = vunpack.c.l.s8.bf16 %v3758_v20  ;;  %v4508_v57 = vunpack.c.l.s8.bf16 %v3760_v55 }
 0x4b0   : > { %5752 = vmatprep.subr.bf16.mxu0 %v4329_v60  ;;  %v4527_v60 = vunpack.c.h.s8.bf16 %v3759_v49 }
 0x4b2   : > { %5589 = vmatpush1.bf16.msra.mxu1 %v4326_v63  ;;  %v3781_v63 = vld [vmem:[%s11017_s26 + $0x3d8] sm:$0xff] }
 0x4b3   : > { %5753 = vmatpush1.bf16.msra.mxu0 %v4328_v0  ;;  %5590 = vmatprep.subr.bf16.mxu1 %v4347_v1  ;;  %v4526_v0 = vunpack.c.h.s8.bf16 %v3758_v20  ;;  %v4528_v1 = vunpack.c.h.s8.bf16 %v3760_v55  ;;  %v4549_v3 = vunpack.c.l.s8.bf16 %v3781_v63  ;;  %v4569_v6 = vunpack.c.h.s8.bf16 %v3781_v63 }
 0x4b4   : > { %5754 = vmatprep.subr.bf16.mxu0 %v4349_v2  ;;  %v3778_v2 = vld [vmem:[%s11017_s26 + $0x3c0] sm:$0xff] }
 0x4b6   : > { %5591 = vmatpush1.bf16.msra.mxu1 %v4346_v4  ;;  %v3780_v4 = vld [vmem:[%s11017_s26 + $0x3d0] sm:$0xff] }
 0x4b7   : > { %5755 = vmatpush1.bf16.msra.mxu0 %v4348_v5  ;;  %5592 = vmatprep.subr.bf16.mxu1 %v4367_v36  ;;  %v4546_v5 = vunpack.c.l.s8.bf16 %v3778_v2  ;;  %v4548_v36 = vunpack.c.l.s8.bf16 %v3780_v4 }
 0x4b8   : > { %5756 = vmatprep.subr.bf16.mxu0 %v4369_v58  ;;  %v4567_v58 = vunpack.c.h.s8.bf16 %v3779_v62 }
 0x4ba   : > { %5593 = vmatpush1.bf16.msra.mxu1 %v4366_v7  ;;  %v3801_v7 = vld [vmem:[%s11017_s26 + $0x478] sm:$0xff] }
 0x4bb   : > { %5757 = vmatpush1.bf16.msra.mxu0 %v4368_v8  ;;  %5594 = vmatprep.subr.bf16.mxu1 %v4387_v32  ;;  %v4566_v8 = vunpack.c.h.s8.bf16 %v3778_v2  ;;  %v4568_v32 = vunpack.c.h.s8.bf16 %v3780_v4  ;;  %v4589_v17 = vunpack.c.l.s8.bf16 %v3801_v7  ;;  %v4609_v59 = vunpack.c.h.s8.bf16 %v3801_v7 }
 0x4bc   : > { %5758 = vmatprep.subr.bf16.mxu0 %v4389_v16  ;;  %v3798_v16 = vld [vmem:[%s11017_s26 + $0x460] sm:$0xff] }
 0x4be   : > { %5595 = vmatpush1.bf16.msra.mxu1 %v4386_v35  ;;  %v3800_v35 = vld [vmem:[%s11017_s26 + $0x470] sm:$0xff] }
 0x4bf   : > { %5759 = vmatpush1.bf16.msra.mxu0 %v4388_v18  ;;  %5596 = vmatprep.subr.bf16.mxu1 %v4407_v19  ;;  %v4586_v18 = vunpack.c.l.s8.bf16 %v3798_v16  ;;  %v4588_v19 = vunpack.c.l.s8.bf16 %v3800_v35 }
 0x4c0   : > { %5760 = vmatprep.subr.bf16.mxu0 %v4409_v22  ;;  %v4607_v22 = vunpack.c.h.s8.bf16 %v3799_v33 }
 0x4c2   : > { %5597 = vmatpush1.bf16.msra.mxu1 %v4406_v27  ;;  %v11158_v27 = vld [vmem:[%s11017_s26 + $0x518] sm:$0xff] }
 0x4c3   : > { %5761 = vmatpush1.bf16.msra.mxu0 %v4408_v28  ;;  %5598 = vmatprep.subr.bf16.mxu1 %v4427_v29  ;;  %v4606_v28 = vunpack.c.h.s8.bf16 %v3798_v16  ;;  %v4608_v29 = vunpack.c.h.s8.bf16 %v3800_v35 }
 0x4c4   : > { %5762 = vmatprep.subr.bf16.mxu0 %v4429_v31  ;;  %v4629_v31 = vunpack.c.l.s8.bf16 %v11158_v27 }
 0x4c6   : > { %5599 = vmatpush1.bf16.msra.mxu1 %v4426_v37 }
 0x4c7   : > { %5763 = vmatpush1.bf16.msra.mxu0 %v4428_v38  ;;  %5600 = vmatprep.subr.bf16.mxu1 %v4447_v39 }
 0x4c8   : > { %5764 = vmatprep.subr.bf16.mxu0 %v4449_v40 }
 0x4ca   : > { %5601 = vmatpush1.bf16.msra.mxu1 %v4446_v9 }
 0x4cb   : > { %5765 = vmatpush1.bf16.msra.mxu0 %v4448_v13  ;;  %5602 = vmatprep.subr.bf16.mxu1 %v4467_v14 }
 0x4cc   : > { %5766 = vmatprep.subr.bf16.mxu0 %v4469_v42 }
 0x4ce   : > { %5603 = vmatpush1.bf16.msra.mxu1 %v4466_v44 }
 0x4cf   : > { %5767 = vmatpush1.bf16.msra.mxu0 %v4468_v46  ;;  %5604 = vmatprep.subr.bf16.mxu1 %v4487_v47 }
 0x4d0   : > { %5768 = vmatprep.subr.bf16.mxu0 %v4489_v48 }
 0x4d2   : > { %5605 = vmatpush1.bf16.msra.mxu1 %v4486_v51 }
 0x4d3   : > { %5769 = vmatpush1.bf16.msra.mxu0 %v4488_v52  ;;  %5606 = vmatprep.subr.bf16.mxu1 %v4507_v53 }
 0x4d4   : > { %5770 = vmatprep.subr.bf16.mxu0 %v4509_v54 }
 0x4d6   : > { %5607 = vmatpush1.bf16.msra.mxu1 %v4506_v56 }
 0x4d7   : > { %5771 = vmatpush1.bf16.msra.mxu0 %v4508_v57  ;;  %5608 = vmatprep.subr.bf16.mxu1 %v4527_v60 }
 0x4d8   : > { %5772 = vmatprep.subr.bf16.mxu0 %v4529_v61 }
 0x4da   : > { %5609 = vmatpush1.bf16.msra.mxu1 %v4526_v0 }
 0x4db   : > { %5773 = vmatpush1.bf16.msra.mxu0 %v4528_v1  ;;  %5610 = vmatprep.subr.bf16.mxu1 %v4547_v21 }
 0x4dc   : > { %5774 = vmatprep.subr.bf16.mxu0 %v4549_v3 }
 0x4de   : > { %5611 = vmatpush1.bf16.msra.mxu1 %v4546_v5 }
 0x4df   : > { %5775 = vmatpush1.bf16.msra.mxu0 %v4548_v36  ;;  %5612 = vmatprep.subr.bf16.mxu1 %v4567_v58 }
 0x4e0   : > { %5776 = vmatprep.subr.bf16.mxu0 %v4569_v6 }
 0x4e2   : > { %5613 = vmatpush1.bf16.msra.mxu1 %v4566_v8 }
 0x4e3   : > { %5777 = vmatpush1.bf16.msra.mxu0 %v4568_v32  ;;  %5614 = vmatprep.subr.bf16.mxu1 %v4587_v12 }
 0x4e4   : > { %5778 = vmatprep.subr.bf16.mxu0 %v4589_v17 }
 0x4e6   : > { %5615 = vmatpush1.bf16.msra.mxu1 %v4586_v18 }
 0x4e7   : > { %5779 = vmatpush1.bf16.msra.mxu0 %v4588_v19  ;;  %5616 = vmatprep.subr.bf16.mxu1 %v4607_v22 }
 0x4e8   : > { %5780 = vmatprep.subr.bf16.mxu0 %v4609_v59 }
 0x4ea   : > { %5617 = vmatpush1.bf16.msra.mxu1 %v4606_v28 }
 0x4eb   : > { %5781 = vmatpush1.bf16.msra.mxu0 %v4608_v29  ;;  %5627 = vmatprep.subr.bf16.mxu1 %v4627_v30 }
 0x4ec   : > { %5791 = vmatprep.subr.bf16.mxu0 %v4629_v31 }
 0x500   : > { %v3145_v34 = vpop.f32.mrb[0].mxu1  ;;  %v11162_v37 = vpop.f32.mrb[12].mxu0 }
 0x501   : > { %v3400_v38 = vrot.slane %v3145_v34, 4  ;;  %v3147_v39 = vpop.f32.mrb[1].mxu1  ;;  %v3229_v40 = vpop.f32.mrb[13].mxu0  ;;  %v3412_v7 = vrot.slane %v11162_v37, 4 }
 0x502   : > { %v3406_v10 = vrot.slane %v3147_v39, 4  ;;  %v3418_v11 = vrot.slane %v3229_v40, 4  ;;  %v3149_v9 = vpop.f32.mrb[2].mxu1  ;;  %v3231_v13 = vpop.f32.mrb[14].mxu0 }
 0x503   : > { %v3401_v14 = vadd.f32 %v3400_v38, %v3145_v34  ;;  %v3150_v15 = vpop.f32.mrb[3].mxu1  ;;  %v3232_v42 = vpop.f32.mrb[15].mxu0  ;;  %v3413_v18 = vadd.f32 %v3412_v7, %v11162_v37  ;;  %v11166_v13 = vld [vmem:[#allocation16] sm:$0xff]  ;;  %v3839_v7 = vld [vmem:[%s11017_s26 + $0x5a8] sm:$0xff] }
 0x504   : > { %v3407_v43 = vadd.f32 %v3406_v10, %v3147_v39  ;;  %v3419_v44 = vadd.f32 %v3418_v11, %v3229_v40  ;;  %v3556_v15 = vrot.slane %v11166_v13, %v11027_v24 }
 0x505   : > { %v3402_v46 = vrot.slane %v3401_v14, 2  ;;  %v3414_v31 = vrot.slane %v3413_v18, 2 }
 0x506   : > { %v3408_v47 = vrot.slane %v3407_v43, 2  ;;  %v3420_v48 = vrot.slane %v3419_v44, 2 }
 0x507   : > { %v3403_v49 = vadd.f32 %v3402_v46, %v3401_v14  ;;  %v3415_v11 = vadd.f32 %v3414_v31, %v3413_v18  ;;  %v11168_v14 = vld [vmem:[#allocation17] sm:$0xff]  ;;  %v3840_v18 = vld [vmem:[%s11017_s26 + $0x5b0] sm:$0xff] }
 0x508   : > { %v3409_v50 = vadd.f32 %v3408_v47, %v3407_v43  ;;  %v3421_v51 = vadd.f32 %v3420_v48, %v3419_v44  ;;  %v3605_v46 = vrot.slane %v11168_v14, %v11027_v24  ;;  %v3560_v47 = vrot.slane %v11166_v13, %v11030_v26  ;;  %v3861_v31 = vld [vmem:[%s11017_s26 + $0x658] sm:$0xff] }
 0x509   : > { %v3404_v52 = vrot.slane %v3403_v49, 1  ;;  %v3416_v9 = vrot.slane %v3415_v11, 1 }
 0x50a   : > { %v3410_v53 = vrot.slane %v3409_v50, 1  ;;  %v3422_v20 = vrot.slane %v3421_v51, 1 }
 0x50b   : > { %v3405_v54 = vadd.f32 %v3404_v52, %v3403_v49  ;;  %v3417_v42 = vadd.f32 %v3416_v9, %v3415_v11  ;;  %v3568_v49 = vrot.slane %v11166_v13, %v11094_v45  ;;  %v3858_v11 = vld [vmem:[%s11017_s26 + $0x640] sm:$0xff]  ;;  %v3860_v9 = vld [vmem:[%s11017_s26 + $0x650] sm:$0xff] }
 0x50c   : > { %v3411_v55 = vadd.f32 %v3410_v53, %v3409_v50  ;;  %v3423_v56 = vadd.f32 %v3422_v20, %v3421_v51  ;;  %v3609_v20 = vrot.slane %v11168_v14, %v11030_v26 }
 0x50d   : > { %v3448_v57 = vmul.f32 0.125, %v3405_v54  ;;  %v3450_v52 = vmul.f32 0.125, %v3417_v42  ;;  %v4706_v42 = vunpack.c.l.s8.bf16 %v3858_v11 }
 0x50e   : > { %v3449_v60 = vmul.f32 0.125, %v3411_v55  ;;  %v3451_v61 = vmul.f32 0.125, %v3423_v56  ;;  %v3617_v55 = vrot.slane %v11168_v14, %v11094_v45 }
 0x50f   : > { %v3456_v62 = vsub.f32 %v3145_v34, %v3448_v57 }
 0x510   : > { %v3457_v63 = vsub.f32 %v3147_v39, %v3449_v60  ;;  %v3459_v0 = vsub.f32 %v3229_v40, %v3451_v61  ;;  %v11183_v61 = vsub.f32 %v11162_v37, %v3450_v52  ;;  %v4647_v37 = vunpack.c.h.s8.bf16 %v11155_v25 }
 0x511   : > { %v3464_v1 = vmul.f32 %v3456_v62, %v3456_v62  ;;  %v4667_v25 = vunpack.c.l.s8.bf16 %v3839_v7 }
 0x512   : > { %v3465_v21 = vmul.f32 %v3457_v63, %v3457_v63  ;;  %v3467_v2 = vmul.f32 %v3459_v0, %v3459_v0 }
 0x513   : > { %v3472_v3 = vrot.slane %v3464_v1, 4 }
 0x514   : > { %v3478_v4 = vrot.slane %v3465_v21, 4  ;;  %v3490_v5 = vrot.slane %v3467_v2, 4 }
 0x515   : > { %v3473_v36 = vadd.f32 %v3472_v3, %v3464_v1 }
 0x516   : > { %v3479_v58 = vadd.f32 %v3478_v4, %v3465_v21  ;;  %v3491_v6 = vadd.f32 %v3490_v5, %v3467_v2  ;;  %v3818_v2 = vld [vmem:[%s11017_s26 + $0x500] sm:$0xff] }
 0x517   : > { %v3474_v33 = vrot.slane %v3473_v36, 2 }
 0x518   : > { %v3480_v8 = vrot.slane %v3479_v58, 2  ;;  %v3492_v32 = vrot.slane %v3491_v6, 2 }
 0x519   : > { %v3475_v12 = vadd.f32 %v3474_v33, %v3473_v36  ;;  %v4626_v36 = vunpack.c.l.s8.bf16 %v3818_v2  ;;  %v4649_v33 = vunpack.c.h.s8.bf16 %v11158_v27 }
 0x51a   : > { %v3481_v16 = vadd.f32 %v3480_v8, %v3479_v58  ;;  %v3493_v17 = vadd.f32 %v3492_v32, %v3491_v6  ;;  %v3841_v8 = vld [vmem:[%s11017_s26 + $0x5b8] sm:$0xff] }
 0x51b   : > { %v3476_v35 = vrot.slane %v3475_v12, 1  ;;  %v4669_v27 = vunpack.c.l.s8.bf16 %v3841_v8 }
 0x51c   : > { %v3482_v19 = vrot.slane %v3481_v16, 1  ;;  %v3494_v22 = vrot.slane %v3493_v17, 1 }
 0x51d   : > { %v3477_v59 = vadd.f32 %v3476_v35, %v3475_v12  ;;  %v3838_v35 = vld [vmem:[%s11017_s26 + $0x5a0] sm:$0xff] }
 0x51e   : > { %v3483_v28 = vadd.f32 %v3482_v19, %v3481_v16  ;;  %v3495_v29 = vadd.f32 %v3494_v22, %v3493_v17  ;;  %v4646_v16 = vunpack.c.h.s8.bf16 %v3818_v2  ;;  %v4666_v22 = vunpack.c.l.s8.bf16 %v3838_v35 }
 0x51f   : > { %v3520_v30 = vmul.f32 0.125, %v3477_v59  ;;  %v4668_v59 = vunpack.c.l.s8.bf16 %v3840_v18 }
 0x520   : > { %v3521_v34 = vmul.f32 0.125, %v3483_v28  ;;  %v3523_v38 = vmul.f32 0.125, %v3495_v29  ;;  %v4687_v28 = vunpack.c.h.s8.bf16 %v3839_v7  ;;  %v4689_v29 = vunpack.c.h.s8.bf16 %v3841_v8 }
 0x521   : > { %v3528_v39 = vadd.f32 1e-05, %v3520_v30  ;;  %v3859_v30 = vld [vmem:[%s11017_s26 + $0x648] sm:$0xff] }
 0x522   : > { %v3529_v40 = vadd.f32 1e-05, %v3521_v34  ;;  %v3531_v10 = vadd.f32 1e-05, %v3523_v38  ;;  %v4686_v38 = vunpack.c.h.s8.bf16 %v3838_v35 }
 0x523   : > { %9858 = vrsqrt.f32 %v3528_v39  ;;  %v4688_v39 = vunpack.c.h.s8.bf16 %v3840_v18 }
 0x524   : > { %9860 = vrsqrt.f32 %v3529_v40  ;;  %v4707_v40 = vunpack.c.l.s8.bf16 %v3859_v30 }
 0x525   : > { %9862 = vrsqrt.f32 %v3531_v10  ;;  %v4709_v10 = vunpack.c.l.s8.bf16 %v3861_v31 }
 0x52d   : > { %v9859_v43 = vpop.eup %9858 }
 0x52e   : > { %v3544_v44 = vmul.f32 %v9859_v43, %v3456_v62  ;;  %v9861_v48 = vpop.eup %9860  ;;  %v4708_v43 = vunpack.c.l.s8.bf16 %v3860_v9 }
 0x52f   : > { %v9863_v50 = vpop.eup %9862  ;;  %v3545_v53 = vmul.f32 %v9861_v48, %v3457_v63  ;;  %v3820_v63 = vld [vmem:[%s11017_s26 + $0x510] sm:$0xff]  ;;  %v3881_v48 = vld [vmem:[%s11017_s26 + $0x6f8] sm:$0xff] }
 0x530   : > { %v3593_v51 = vmul.f32 %v3556_v15, %v3544_v44  ;;  %v3547_v54 = vmul.f32 %v9863_v50, %v3459_v0  ;;  %v3466_v0 = vmul.f32 %v11183_v61, %v11183_v61  ;;  %v4628_v58 = vunpack.c.l.s8.bf16 %v3820_v63 }
 0x531   : > { %v3594_v57 = vmul.f32 %v3560_v47, %v3545_v53  ;;  %v4648_v17 = vunpack.c.h.s8.bf16 %v3820_v63  ;;  %v4727_v44 = vunpack.c.h.s8.bf16 %v3859_v30  ;;  %v3879_v47 = vld [vmem:[%s11017_s26 + $0x6e8] sm:$0xff]  ;;  %v4726_v50 = vunpack.c.h.s8.bf16 %v3858_v11  ;;  %v3938_v11 = vld [vmem:[%s11017_s26 + $0x8c0] sm:$0xff] }
 0x532   : > { %v3642_v56 = vadd.f32 %v3605_v46, %v3593_v51  ;;  %v3596_v60 = vmul.f32 %v3568_v49, %v3547_v54  ;;  %v3484_v12 = vrot.slane %v3466_v0, 4  ;;  %v4729_v46 = vunpack.c.h.s8.bf16 %v3861_v31  ;;  %v3880_v54 = vld [vmem:[%s11017_s26 + $0x6f0] sm:$0xff]  ;;  %v3939_v31 = vld [vmem:[%s11017_s26 + $0x8c8] sm:$0xff] }
 0x533   : > { %v3643_v62 = vadd.f32 %v3609_v20, %v3594_v57  ;;  %v4728_v51 = vunpack.c.h.s8.bf16 %v3860_v9  ;;  %v4747_v52 = vunpack.c.l.s8.bf16 %v3879_v47  ;;  %v4749_v53 = vunpack.c.l.s8.bf16 %v3881_v48  ;;  %v3878_v20 = vld [vmem:[%s11017_s26 + $0x6e0] sm:$0xff]  ;;  %v3940_v9 = vld [vmem:[%s11017_s26 + $0x8d0] sm:$0xff] }
 0x534   : > { %v3650_v1 = vmax.f32 %v3642_v56, 0.0  ;;  %v3645_v21 = vadd.f32 %v3617_v55, %v3596_v60  ;;  %v3485_v19 = vadd.f32 %v3484_v12, %v3466_v0  ;;  %v4746_v56 = vunpack.c.l.s8.bf16 %v3878_v20 }
 0x535   : > { %v3651_v3 = vmax.f32 %v3643_v62, 0.0  ;;  %v4748_v57 = vunpack.c.l.s8.bf16 %v3880_v54  ;;  %v4767_v60 = vunpack.c.h.s8.bf16 %v3879_v47  ;;  %v4769_v62 = vunpack.c.h.s8.bf16 %v3881_v48 }
 0x536   : > { %v3653_v4 = vmax.f32 %v3645_v21, 0.0  ;;  %v11191_v6 = vpack.c.bf16 %v3650_v1, %v3650_v1  ;;  %v3486_v34 = vrot.slane %v3485_v19, 2  ;;  %v3899_v1 = vld [vmem:[%s11017_s26 + $0x788] sm:$0xff]  ;;  %v3901_v21 = vld [vmem:[%s11017_s26 + $0x798] sm:$0xff]  ;;  %v4766_v63 = vunpack.c.h.s8.bf16 %v3878_v20 }
 0x537   : > { %v11189_v5 = vpack.c.bf16 %v3651_v3, %v3651_v3  ;;  %v4768_v3 = vunpack.c.h.s8.bf16 %v3880_v54  ;;  %v4789_v0 = vunpack.c.l.s8.bf16 %v3901_v21  ;;  %v4807_v8 = vunpack.c.h.s8.bf16 %v3899_v1 }
 0x538   : > { %v11199_v32 = vpack.c.bf16 %v3653_v4, %v3653_v4  ;;  %v3487_v15 = vadd.f32 %v3486_v34, %v3485_v19  ;;  %v4787_v4 = vunpack.c.l.s8.bf16 %v3899_v1  ;;  %v4809_v12 = vunpack.c.h.s8.bf16 %v3901_v21  ;;  %v3918_v19 = vld [vmem:[%s11017_s26 + $0x820] sm:$0xff]  ;;  %v3941_v34 = vld [vmem:[%s11017_s26 + $0x8d8] sm:$0xff] }
 0x539   : > { %5618 = vmatprep.mubr.bf16.mxu1 %v11189_v5  ;;  %5782 = vmatprep.mubr.bf16.mxu0 %v11189_v5  ;;  %v4887_v47 = vunpack.c.h.s8.bf16 %v3939_v31  ;;  %v4889_v48 = vunpack.c.h.s8.bf16 %v3941_v34  ;;  %v3613_v20 = vrot.slane %v11168_v14, %v11091_v41 }
 0x53a   : > { %5619 = vmatmul.mubr.bf16.vlgmr.msra.gmra.mrb[8].mxu1 %v11191_v6  ;;  %5783 = vmatmul.mubr.bf16.vlgmr.msra.gmra.mrb[20].mxu0 %v11191_v6  ;;  %v3488_v49 = vrot.slane %v3487_v15, 1 }
 0x53b   : > { %5628 = vmatpush1.bf16.msra.mxu1 %v4626_v36  ;;  %5792 = vmatpush1.bf16.msra.mxu0 %v4628_v58  ;;  %v3898_v36 = vld [vmem:[%s11017_s26 + $0x780] sm:$0xff]  ;;  %v3900_v58 = vld [vmem:[%s11017_s26 + $0x790] sm:$0xff] }
 0x53c   : > { %5659 = vmatprep.mubr.bf16.mxu1 %v11199_v32  ;;  %5823 = vmatprep.mubr.bf16.mxu0 %v11199_v32  ;;  %v3489_v55 = vadd.f32 %v3488_v49, %v3487_v15  ;;  %v4788_v7 = vunpack.c.l.s8.bf16 %v3900_v58  ;;  %v3959_v49 = vld [vmem:[%s11017_s26 + $0x968] sm:$0xff] }
 0x53d   : > { %5629 = vmatprep.subr.bf16.mxu1 %v4647_v37  ;;  %5793 = vmatprep.subr.bf16.mxu0 %v4649_v33  ;;  %v4786_v33 = vunpack.c.l.s8.bf16 %v3898_v36  ;;  %v4927_v1 = vunpack.c.h.s8.bf16 %v3959_v49 }
 0x53e   : > { %v3522_v2 = vmul.f32 0.125, %v3489_v55  ;;  %v3958_v55 = vld [vmem:[%s11017_s26 + $0x960] sm:$0xff] }
 0x53f   : > { %5630 = vmatpush1.bf16.msra.mxu1 %v4646_v16  ;;  %5794 = vmatpush1.bf16.msra.mxu0 %v4648_v17  ;;  %v3919_v16 = vld [vmem:[%s11017_s26 + $0x828] sm:$0xff]  ;;  %v3921_v17 = vld [vmem:[%s11017_s26 + $0x838] sm:$0xff] }
 0x540   : > { %5631 = vmatprep.subr.bf16.mxu1 %v4667_v25  ;;  %5795 = vmatprep.subr.bf16.mxu0 %v4669_v27  ;;  %v3530_v37 = vadd.f32 1e-05, %v3522_v2  ;;  %v4806_v25 = vunpack.c.h.s8.bf16 %v3898_v36  ;;  %v4808_v27 = vunpack.c.h.s8.bf16 %v3900_v58  ;;  %v4827_v35 = vunpack.c.l.s8.bf16 %v3919_v16  ;;  %v3979_v2 = vld [vmem:[%s11017_s26 + $0xa08] sm:$0xff] }
 0x541   : > { %v4829_v18 = vunpack.c.l.s8.bf16 %v3921_v17  ;;  %v4849_v30 = vunpack.c.h.s8.bf16 %v3921_v17  ;;  %v4947_v36 = vunpack.c.l.s8.bf16 %v3979_v2 }
 0x542   : > { %9864 = vrsqrt.f32 %v3530_v37  ;;  %v3978_v37 = vld [vmem:[%s11017_s26 + $0xa00] sm:$0xff] }
 0x543   : > { %5632 = vmatpush1.bf16.msra.mxu1 %v4666_v22  ;;  %5796 = vmatpush1.bf16.msra.mxu0 %v4668_v59  ;;  %v3920_v22 = vld [vmem:[%s11017_s26 + $0x830] sm:$0xff]  ;;  %v4826_v59 = vunpack.c.l.s8.bf16 %v3918_v19 }
 0x544   : > { %5633 = vmatprep.subr.bf16.mxu1 %v4687_v28  ;;  %5797 = vmatprep.subr.bf16.mxu0 %v4689_v29  ;;  %v4828_v28 = vunpack.c.l.s8.bf16 %v3920_v22  ;;  %v4847_v29 = vunpack.c.h.s8.bf16 %v3919_v16  ;;  %v4967_v16 = vunpack.c.h.s8.bf16 %v3979_v2 }
 0x547   : > { %5634 = vmatpush1.bf16.msra.mxu1 %v4686_v38  ;;  %5798 = vmatpush1.bf16.msra.mxu0 %v4688_v39  ;;  %v4846_v38 = vunpack.c.h.s8.bf16 %v3918_v19  ;;  %v4848_v39 = vunpack.c.h.s8.bf16 %v3920_v22 }
 0x548   : > { %5635 = vmatprep.subr.bf16.mxu1 %v4707_v40  ;;  %5799 = vmatprep.subr.bf16.mxu0 %v4709_v10  ;;  %v4867_v40 = vunpack.c.l.s8.bf16 %v3939_v31  ;;  %v4869_v10 = vunpack.c.l.s8.bf16 %v3941_v34 }
 0x54b   : > { %5636 = vmatpush1.bf16.msra.mxu1 %v4706_v42  ;;  %5800 = vmatpush1.bf16.msra.mxu0 %v4708_v43  ;;  %v4866_v42 = vunpack.c.l.s8.bf16 %v3938_v11  ;;  %v4868_v43 = vunpack.c.l.s8.bf16 %v3940_v9 }
 0x54c   : > { %5637 = vmatprep.subr.bf16.mxu1 %v4727_v44  ;;  %5801 = vmatprep.subr.bf16.mxu0 %v4729_v46  ;;  %v9865_v15 = vpop.eup %9864  ;;  %v3564_v46 = vrot.slane %v11166_v13, %v11091_v41 }
 0x54d   : > { %v3546_v44 = vmul.f32 %v9865_v15, %v11183_v61  ;;  %v4907_v61 = vunpack.c.l.s8.bf16 %v3959_v49 }
 0x54f   : > { %5638 = vmatpush1.bf16.msra.mxu1 %v4726_v50  ;;  %5802 = vmatpush1.bf16.msra.mxu0 %v4728_v51  ;;  %v3961_v50 = vld [vmem:[%s11017_s26 + $0x978] sm:$0xff]  ;;  %v4886_v51 = vunpack.c.h.s8.bf16 %v3938_v11 }
 0x550   : > { %5639 = vmatprep.subr.bf16.mxu1 %v4747_v52  ;;  %5803 = vmatprep.subr.bf16.mxu0 %v4749_v53  ;;  %v4888_v52 = vunpack.c.h.s8.bf16 %v3940_v9  ;;  %v3595_v53 = vmul.f32 %v3564_v46, %v3546_v44  ;;  %v4909_v54 = vunpack.c.l.s8.bf16 %v3961_v50  ;;  %v4929_v21 = vunpack.c.h.s8.bf16 %v3961_v50 }
 0x553   : > { %5640 = vmatpush1.bf16.msra.mxu1 %v4746_v56  ;;  %5804 = vmatpush1.bf16.msra.mxu0 %v4748_v57  ;;  %v3960_v56 = vld [vmem:[%s11017_s26 + $0x970] sm:$0xff]  ;;  %v4906_v57 = vunpack.c.l.s8.bf16 %v3958_v55 }
 0x554   : > { %5641 = vmatprep.subr.bf16.mxu1 %v4767_v60  ;;  %5805 = vmatprep.subr.bf16.mxu0 %v4769_v62  ;;  %v4908_v60 = vunpack.c.l.s8.bf16 %v3960_v56  ;;  %v3644_v62 = vadd.f32 %v3613_v20, %v3595_v53 }
 0x557   : > { %5642 = vmatpush1.bf16.msra.mxu1 %v4766_v63  ;;  %5806 = vmatpush1.bf16.msra.mxu0 %v4768_v3  ;;  %v3981_v63 = vld [vmem:[%s11017_s26 + $0xa18] sm:$0xff]  ;;  %v4926_v3 = vunpack.c.h.s8.bf16 %v3958_v55  ;;  %v4018_v55 = vld [vmem:[%s11017_s26 + $0xb40] sm:$0xff] }
 0x558   : > { %5643 = vmatprep.subr.bf16.mxu1 %v4787_v4  ;;  %5807 = vmatprep.subr.bf16.mxu0 %v4789_v0  ;;  %v4928_v4 = vunpack.c.h.s8.bf16 %v3960_v56  ;;  %v3652_v0 = vmax.f32 %v3644_v62, 0.0  ;;  %v4949_v58 = vunpack.c.l.s8.bf16 %v3981_v63  ;;  %v4969_v17 = vunpack.c.h.s8.bf16 %v3981_v63  ;;  %v4020_v56 = vld [vmem:[%s11017_s26 + $0xb50] sm:$0xff] }
 0x559   : > { %v5028_v2 = vunpack.c.l.s8.bf16 %v4020_v56 }
 0x55b   : > { %5644 = vmatpush1.bf16.msra.mxu1 %v4786_v33  ;;  %5808 = vmatpush1.bf16.msra.mxu0 %v4788_v7  ;;  %v3980_v33 = vld [vmem:[%s11017_s26 + $0xa10] sm:$0xff]  ;;  %v4946_v7 = vunpack.c.l.s8.bf16 %v3978_v37 }
 0x55c   : > { %5645 = vmatprep.subr.bf16.mxu1 %v4807_v8  ;;  %5809 = vmatprep.subr.bf16.mxu0 %v4809_v12  ;;  %v4948_v8 = vunpack.c.l.s8.bf16 %v3980_v33  ;;  %v11240_v12 = vpack.c.bf16 %v3652_v0, %v3652_v0 }
 0x55f   : > { %5646 = vmatpush1.bf16.msra.mxu1 %v4806_v25  ;;  %5810 = vmatpush1.bf16.msra.mxu0 %v4808_v27  ;;  %v3999_v25 = vld [vmem:[%s11017_s26 + $0xaa8] sm:$0xff]  ;;  %v4001_v27 = vld [vmem:[%s11017_s26 + $0xab8] sm:$0xff] }
 0x560   : > { %5647 = vmatprep.subr.bf16.mxu1 %v4827_v35  ;;  %5811 = vmatprep.subr.bf16.mxu0 %v4829_v18  ;;  %v4966_v35 = vunpack.c.h.s8.bf16 %v3978_v37  ;;  %v4968_v18 = vunpack.c.h.s8.bf16 %v3980_v33  ;;  %v4987_v19 = vunpack.c.l.s8.bf16 %v3999_v25  ;;  %v4989_v22 = vunpack.c.l.s8.bf16 %v4001_v27  ;;  %v4041_v37 = vld [vmem:[%s11017_s26 + $0xbf8] sm:$0xff] }
 0x563   : > { %5648 = vmatpush1.bf16.msra.mxu1 %v4826_v59  ;;  %5812 = vmatpush1.bf16.msra.mxu0 %v4828_v28  ;;  %v3998_v59 = vld [vmem:[%s11017_s26 + $0xaa0] sm:$0xff]  ;;  %v4000_v28 = vld [vmem:[%s11017_s26 + $0xab0] sm:$0xff] }
 0x564   : > { %5649 = vmatprep.subr.bf16.mxu1 %v4847_v29  ;;  %5813 = vmatprep.subr.bf16.mxu0 %v4849_v30  ;;  %v4986_v30 = vunpack.c.l.s8.bf16 %v3998_v59  ;;  %v4988_v31 = vunpack.c.l.s8.bf16 %v4000_v28 }
 0x567   : > { %5650 = vmatpush1.bf16.msra.mxu1 %v4846_v38  ;;  %5814 = vmatpush1.bf16.msra.mxu0 %v4848_v39 }
 0x568   : > { %5651 = vmatprep.subr.bf16.mxu1 %v4867_v40  ;;  %5815 = vmatprep.subr.bf16.mxu0 %v4869_v10  ;;  %v5007_v40 = vunpack.c.h.s8.bf16 %v3999_v25  ;;  %v5009_v10 = vunpack.c.h.s8.bf16 %v4001_v27 }
 0x56b   : > { %5652 = vmatpush1.bf16.msra.mxu1 %v4866_v42  ;;  %5816 = vmatpush1.bf16.msra.mxu0 %v4868_v43  ;;  %v4019_v42 = vld [vmem:[%s11017_s26 + $0xb48] sm:$0xff]  ;;  %v4021_v43 = vld [vmem:[%s11017_s26 + $0xb58] sm:$0xff] }
 0x56c   : > { %5653 = vmatprep.subr.bf16.mxu1 %v4887_v47  ;;  %5817 = vmatprep.subr.bf16.mxu0 %v4889_v48  ;;  %v5049_v0 = vunpack.c.h.s8.bf16 %v4021_v43 }
 0x56f   : > { %5654 = vmatpush1.bf16.msra.mxu1 %v4886_v51  ;;  %5818 = vmatpush1.bf16.msra.mxu0 %v4888_v52  ;;  %v5006_v51 = vunpack.c.h.s8.bf16 %v3998_v59  ;;  %v5008_v52 = vunpack.c.h.s8.bf16 %v4000_v28 }
 0x570   : > { %5655 = vmatprep.subr.bf16.mxu1 %v4907_v61  ;;  %5819 = vmatprep.subr.bf16.mxu0 %v4909_v54  ;;  %v5027_v61 = vunpack.c.l.s8.bf16 %v4019_v42  ;;  %v5029_v54 = vunpack.c.l.s8.bf16 %v4021_v43  ;;  %v4061_v43 = vld [vmem:[%s11017_s26 + $0xc98] sm:$0xff] }
 0x573   : > { %5656 = vmatpush1.bf16.msra.mxu1 %v4906_v57  ;;  %5820 = vmatpush1.bf16.msra.mxu0 %v4908_v60 }
 0x574   : > { %5657 = vmatprep.subr.bf16.mxu1 %v4927_v1  ;;  %5821 = vmatprep.subr.bf16.mxu0 %v4929_v21  ;;  %v5026_v21 = vunpack.c.l.s8.bf16 %v4018_v55 }
 0x577   : > { %5658 = vmatpush1.bf16.msra.mxu1 %v4926_v3  ;;  %5822 = vmatpush1.bf16.msra.mxu0 %v4928_v4  ;;  %v5047_v4 = vunpack.c.h.s8.bf16 %v4019_v42  ;;  %v5089_v42 = vunpack.c.h.s8.bf16 %v4041_v37 }
 0x578   : > { %5668 = vmatprep.subr.bf16.mxu1 %v4947_v36  ;;  %5832 = vmatprep.subr.bf16.mxu0 %v4949_v58  ;;  %v4039_v58 = vld [vmem:[%s11017_s26 + $0xbe8] sm:$0xff] }
 0x57a   : > { %5660 = vmatmul.mubr.bf16.vlgmr.msra.gmra.mrb[8].mxu1 %v11240_v12  ;;  %5824 = vmatmul.mubr.bf16.vlgmr.msra.gmra.mrb[20].mxu0 %v11240_v12 }
 0x57b   : > { %5669 = vmatpush1.bf16.msra.mxu1 %v4946_v7  ;;  %5833 = vmatpush1.bf16.msra.mxu0 %v4948_v8 }
 0x57c   : > { %5670 = vmatprep.subr.bf16.mxu1 %v4967_v16  ;;  %5834 = vmatprep.subr.bf16.mxu0 %v4969_v17  ;;  %v5046_v16 = vunpack.c.h.s8.bf16 %v4018_v55  ;;  %v5048_v17 = vunpack.c.h.s8.bf16 %v4020_v56 }
 0x57f   : > { %5671 = vmatpush1.bf16.msra.mxu1 %v4966_v35  ;;  %5835 = vmatpush1.bf16.msra.mxu0 %v4968_v18  ;;  %v5067_v35 = vunpack.c.l.s8.bf16 %v4039_v58  ;;  %v5069_v18 = vunpack.c.l.s8.bf16 %v4041_v37 }
 0x580   : > { %v11248_v29 = vpop.f32.mrb[4].mxu1  ;;  %5672 = vmatprep.subr.bf16.mxu1 %v4987_v19  ;;  %5836 = vmatprep.subr.bf16.mxu0 %v4989_v22  ;;  %v4038_v19 = vld [vmem:[%s11017_s26 + $0xbe0] sm:$0xff]  ;;  %v4040_v22 = vld [vmem:[%s11017_s26 + $0xbf0] sm:$0xff] }
 0x581   : > { %v3424_v34 = vrot.slane %v11248_v29, 4  ;;  %v11251_v38 = vpop.f32.mrb[16].mxu0  ;;  %v11253_v39 = vpop.f32.mrb[5].mxu1 }
 0x582   : > { %v3430_v11 = vrot.slane %v11253_v39, 4  ;;  %v11256_v9 = vpop.f32.mrb[17].mxu0  ;;  %v3313_v15 = vpop.f32.mrb[6].mxu1  ;;  %v3436_v56 = vrot.slane %v11251_v38, 4 }
 0x583   : > { %v3425_v44 = vadd.f32 %v3424_v34, %v11248_v29  ;;  %v3442_v46 = vrot.slane %v11256_v9, 4  ;;  %v3395_v47 = vpop.f32.mrb[18].mxu0  ;;  %v3314_v48 = vpop.f32.mrb[7].mxu1  ;;  %5673 = vmatpush1.bf16.msra.mxu1 %v4986_v30  ;;  %5837 = vmatpush1.bf16.msra.mxu0 %v4988_v31  ;;  %v5066_v34 = vunpack.c.l.s8.bf16 %v4038_v19  ;;  %v5087_v15 = vunpack.c.h.s8.bf16 %v4039_v58 }
 0x584   : > { %v3431_v49 = vadd.f32 %v3430_v11, %v11253_v39  ;;  %v3396_v50 = vpop.f32.mrb[19].mxu0  ;;  %5674 = vmatprep.subr.bf16.mxu1 %v5007_v40  ;;  %5838 = vmatprep.subr.bf16.mxu0 %v5009_v10  ;;  %v5068_v40 = vunpack.c.l.s8.bf16 %v4040_v22  ;;  %v5088_v48 = vunpack.c.h.s8.bf16 %v4040_v22  ;;  %v3437_v37 = vadd.f32 %v3436_v56, %v11251_v38 }
 0x585   : > { %v3426_v53 = vrot.slane %v3425_v44, 2  ;;  %v3443_v20 = vadd.f32 %v3442_v46, %v11256_v9 }
 0x586   : > { %v3432_v57 = vrot.slane %v3431_v49, 2 }
 0x587   : > { %v3427_v60 = vadd.f32 %v3426_v53, %v3425_v44  ;;  %v3444_v62 = vrot.slane %v3443_v20, 2  ;;  %5675 = vmatpush1.bf16.msra.mxu1 %v5006_v51  ;;  %5839 = vmatpush1.bf16.msra.mxu0 %v5008_v52  ;;  %v5109_v52 = vunpack.c.l.s8.bf16 %v4061_v43  ;;  %v4058_v53 = vld [vmem:[%s11017_s26 + $0xc80] sm:$0xff] }
 0x588   : > { %v3433_v1 = vadd.f32 %v3432_v57, %v3431_v49  ;;  %5676 = vmatprep.subr.bf16.mxu1 %v5027_v61  ;;  %5840 = vmatprep.subr.bf16.mxu0 %v5029_v54 }
 0x589   : > { %v3428_v63 = vrot.slane %v3427_v60, 1  ;;  %v3445_v3 = vadd.f32 %v3444_v62, %v3443_v20  ;;  %v4060_v20 = vld [vmem:[%s11017_s26 + $0xc90] sm:$0xff] }
 0x58a   : > { %v3434_v36 = vrot.slane %v3433_v1, 1  ;;  %v5108_v62 = vunpack.c.l.s8.bf16 %v4060_v20 }
 0x58b   : > { %v3429_v33 = vadd.f32 %v3428_v63, %v3427_v60  ;;  %v3446_v7 = vrot.slane %v3445_v3, 1  ;;  %5677 = vmatpush1.bf16.msra.mxu1 %v5026_v21  ;;  %5841 = vmatpush1.bf16.msra.mxu0 %v5028_v2  ;;  %v5106_v60 = vunpack.c.l.s8.bf16 %v4058_v53  ;;  %v5129_v63 = vunpack.c.h.s8.bf16 %v4061_v43 }
 0x58c   : > { %v3435_v8 = vadd.f32 %v3434_v36, %v3433_v1  ;;  %5678 = vmatprep.subr.bf16.mxu1 %v5047_v4  ;;  %5842 = vmatprep.subr.bf16.mxu0 %v5049_v0  ;;  %v4079_v4 = vld [vmem:[%s11017_s26 + $0xd28] sm:$0xff]  ;;  %v4081_v0 = vld [vmem:[%s11017_s26 + $0xd38] sm:$0xff] }
 0x58d   : > { %v3452_v25 = vmul.f32 0.125, %v3429_v33  ;;  %v3447_v27 = vadd.f32 %v3446_v7, %v3445_v3  ;;  %v5126_v7 = vunpack.c.h.s8.bf16 %v4058_v53  ;;  %v4100_v53 = vld [vmem:[%s11017_s26 + $0xdd0] sm:$0xff] }
 0x58e   : > { %v3453_v59 = vmul.f32 0.125, %v3435_v8  ;;  %v5128_v8 = vunpack.c.h.s8.bf16 %v4060_v20  ;;  %v11300_v20 = vsub.s32 4, %v11024_v23 }
 0x58f   : > { %v11271_v28 = vsub.f32 %v11248_v29, %v3452_v25  ;;  %v3455_v30 = vmul.f32 0.125, %v3447_v27  ;;  %5679 = vmatpush1.bf16.msra.mxu1 %v5046_v16  ;;  %5843 = vmatpush1.bf16.msra.mxu0 %v5048_v17  ;;  %v5147_v25 = vunpack.c.l.s8.bf16 %v4079_v4  ;;  %v5149_v27 = vunpack.c.l.s8.bf16 %v4081_v0 }
 0x590   : > { %v11274_v31 = vsub.f32 %v11253_v39, %v3453_v59  ;;  %5680 = vmatprep.subr.bf16.mxu1 %v5067_v35  ;;  %5844 = vmatprep.subr.bf16.mxu0 %v5069_v18  ;;  %v4059_v39 = vld [vmem:[%s11017_s26 + $0xc88] sm:$0xff]  ;;  %v4078_v35 = vld [vmem:[%s11017_s26 + $0xd20] sm:$0xff]  ;;  %v4080_v18 = vld [vmem:[%s11017_s26 + $0xd30] sm:$0xff] }
 0x591   : > { %v3468_v10 = vmul.f32 %v11271_v28, %v11271_v28  ;;  %v11279_v11 = vsub.f32 %v11256_v9, %v3455_v30  ;;  %v5086_v9 = vunpack.c.h.s8.bf16 %v4038_v19  ;;  %v5107_v51 = vunpack.c.l.s8.bf16 %v4059_v39 }
 0x592   : > { %v3469_v29 = vmul.f32 %v11274_v31, %v11274_v31  ;;  %v5127_v2 = vunpack.c.h.s8.bf16 %v4059_v39  ;;  %v3438_v30 = vrot.slane %v3437_v37, 2  ;;  %v5169_v39 = vunpack.c.h.s8.bf16 %v4081_v0  ;;  %v4118_v0 = vld [vmem:[%s11017_s26 + $0xe60] sm:$0xff] }
 0x593   : > { %v3496_v44 = vrot.slane %v3468_v10, 4  ;;  %v3471_v46 = vmul.f32 %v11279_v11, %v11279_v11  ;;  %5681 = vmatpush1.bf16.msra.mxu1 %v5066_v34  ;;  %5845 = vmatpush1.bf16.msra.mxu0 %v5068_v40  ;;  %v5146_v40 = vunpack.c.l.s8.bf16 %v4078_v35 }
 0x594   : > { %v3502_v47 = vrot.slane %v3469_v29, 4  ;;  %5682 = vmatprep.subr.bf16.mxu1 %v5087_v15  ;;  %5846 = vmatprep.subr.bf16.mxu0 %v5089_v42 }
 0x595   : > { %v3497_v49 = vadd.f32 %v3496_v44, %v3468_v10  ;;  %v3514_v50 = vrot.slane %v3471_v46, 4  ;;  %v5148_v10 = vunpack.c.l.s8.bf16 %v4080_v18  ;;  %v4099_v44 = vld [vmem:[%s11017_s26 + $0xdc8] sm:$0xff] }
 0x596   : > { %v3503_v61 = vadd.f32 %v3502_v47, %v3469_v29  ;;  %v5167_v29 = vunpack.c.h.s8.bf16 %v4079_v4  ;;  %v5207_v56 = vunpack.c.h.s8.bf16 %v4099_v44  ;;  %v5208_v4 = vunpack.c.h.s8.bf16 %v4100_v53 }
 0x597   : > { %v3498_v54 = vrot.slane %v3497_v49, 2  ;;  %v3515_v55 = vadd.f32 %v3514_v50, %v3471_v46  ;;  %5683 = vmatpush1.bf16.msra.mxu1 %v5086_v9  ;;  %5847 = vmatpush1.bf16.msra.mxu0 %v5088_v48  ;;  %v4101_v46 = vld [vmem:[%s11017_s26 + $0xdd8] sm:$0xff]  ;;  %v3439_v9 = vadd.f32 %v3438_v30, %v3437_v37  ;;  %v5166_v48 = vunpack.c.h.s8.bf16 %v4078_v35 }
 0x598   : > { %v3504_v57 = vrot.slane %v3503_v61, 2  ;;  %5684 = vmatprep.subr.bf16.mxu1 %v5107_v51  ;;  %5848 = vmatprep.subr.bf16.mxu0 %v5109_v52  ;;  %v5187_v50 = vunpack.c.l.s8.bf16 %v4099_v44  ;;  %v5189_v51 = vunpack.c.l.s8.bf16 %v4101_v46  ;;  %v4098_v52 = vld [vmem:[%s11017_s26 + $0xdc0] sm:$0xff]  ;;  %v5226_v35 = vunpack.c.l.s8.bf16 %v4118_v0 }
 0x599   : > { %v3499_v1 = vadd.f32 %v3498_v54, %v3497_v49  ;;  %v3516_v21 = vrot.slane %v3515_v55, 2  ;;  %v5168_v49 = vunpack.c.h.s8.bf16 %v4080_v18  ;;  %v5186_v54 = vunpack.c.l.s8.bf16 %v4098_v52 }
 0x59a   : > { %v3505_v3 = vadd.f32 %v3504_v57, %v3503_v61  ;;  %v3440_v61 = vrot.slane %v3439_v9, 1  ;;  %v5209_v57 = vunpack.c.h.s8.bf16 %v4101_v46 }
 0x59b   : > { %v3500_v36 = vrot.slane %v3499_v1, 1  ;;  %v3517_v58 = vadd.f32 %v3516_v21, %v3515_v55  ;;  %5685 = vmatpush1.bf16.msra.mxu1 %v5106_v60  ;;  %5849 = vmatpush1.bf16.msra.mxu0 %v5108_v62  ;;  %v5188_v55 = vunpack.c.l.s8.bf16 %v4100_v53  ;;  %v11303_v60 = vsub.s32 5, %v11024_v23  ;;  %v4119_v62 = vld [vmem:[%s11017_s26 + $0xe68] sm:$0xff] }
 0x59c   : > { %v3506_v33 = vrot.slane %v3505_v3, 1  ;;  %5686 = vmatprep.subr.bf16.mxu1 %v5127_v2  ;;  %5850 = vmatprep.subr.bf16.mxu0 %v5129_v63  ;;  %v11308_v21 = vsub.s32 7, %v11024_v23  ;;  %v3572_v2 = vrot.slane %v11166_v13, %v11300_v20  ;;  %v3441_v63 = vadd.f32 %v3440_v61, %v3439_v9 }
 0x59d   : > { %v3501_v16 = vadd.f32 %v3500_v36, %v3499_v1  ;;  %v3518_v17 = vrot.slane %v3517_v58, 1  ;;  %v4121_v1 = vld [vmem:[%s11017_s26 + $0xe78] sm:$0xff] }
 0x59e   : > { %v3507_v19 = vadd.f32 %v3506_v33, %v3505_v3  ;;  %v5206_v3 = vunpack.c.h.s8.bf16 %v4098_v52  ;;  %v5229_v37 = vunpack.c.l.s8.bf16 %v4121_v1  ;;  %v4120_v33 = vld [vmem:[%s11017_s26 + $0xe70] sm:$0xff] }
 0x59f   : > { %v3524_v22 = vmul.f32 0.125, %v3501_v16  ;;  %v3519_v59 = vadd.f32 %v3518_v17, %v3517_v58  ;;  %5687 = vmatpush1.bf16.msra.mxu1 %v5126_v7  ;;  %5851 = vmatpush1.bf16.msra.mxu0 %v5128_v8  ;;  %v5227_v58 = vunpack.c.l.s8.bf16 %v4119_v62  ;;  %v3621_v8 = vrot.slane %v11168_v14, %v11300_v20 }
 0x5a0   : > { %v3525_v34 = vmul.f32 0.125, %v3507_v19  ;;  %5688 = vmatprep.subr.bf16.mxu1 %v5147_v25  ;;  %5852 = vmatprep.subr.bf16.mxu0 %v5149_v27  ;;  %v3576_v16 = vrot.slane %v11166_v13, %v11303_v60  ;;  %v3625_v25 = vrot.slane %v11168_v14, %v11303_v60  ;;  %v3584_v27 = vrot.slane %v11166_v13, %v11308_v21 }
 0x5a1   : > { %v3532_v15 = vadd.f32 1e-05, %v3524_v22  ;;  %v3527_v42 = vmul.f32 0.125, %v3519_v59  ;;  %v3454_v22 = vmul.f32 0.125, %v3441_v63  ;;  %v5228_v59 = vunpack.c.l.s8.bf16 %v4120_v33 }
 0x5a2   : > { %v3533_v43 = vadd.f32 1e-05, %v3525_v34  ;;  %v3633_v34 = vrot.slane %v11168_v14, %v11308_v21  ;;  %v5249_v13 = vunpack.c.h.s8.bf16 %v4121_v1  ;;  %v5248_v44 = vunpack.c.h.s8.bf16 %v4120_v33 }
 0x5a3   : > { %9866 = vrsqrt.f32 %v3532_v15  ;;  %v3535_v47 = vadd.f32 1e-05, %v3527_v42  ;;  %5689 = vmatpush1.bf16.msra.mxu1 %v5146_v40  ;;  %5853 = vmatpush1.bf16.msra.mxu0 %v5148_v10  ;;  %v5247_v40 = vunpack.c.h.s8.bf16 %v4119_v62  ;;  %v4139_v42 = vld [vmem:[%s11017_s26 + $0xf08] sm:$0xff]  ;;  %v4161_v62 = vld [vmem:[%s11017_s26 + $0xfb8] sm:$0xff] }
 0x5a4   : > { %9868 = vrsqrt.f32 %v3533_v43  ;;  %5690 = vmatprep.subr.bf16.mxu1 %v5167_v29  ;;  %5854 = vmatprep.subr.bf16.mxu0 %v5169_v39  ;;  %v4141_v29 = vld [vmem:[%s11017_s26 + $0xf18] sm:$0xff] }
 0x5a5   : > { %9870 = vrsqrt.f32 %v3535_v47  ;;  %v5267_v47 = vunpack.c.l.s8.bf16 %v4139_v42  ;;  %v5269_v9 = vunpack.c.l.s8.bf16 %v4141_v29 }
 0x5a7   : > { %5691 = vmatpush1.bf16.msra.mxu1 %v5166_v48  ;;  %5855 = vmatpush1.bf16.msra.mxu0 %v5168_v49  ;;  %v4138_v48 = vld [vmem:[%s11017_s26 + $0xf00] sm:$0xff]  ;;  %v4140_v49 = vld [vmem:[%s11017_s26 + $0xf10] sm:$0xff] }
 0x5a8   : > { %5692 = vmatprep.subr.bf16.mxu1 %v5187_v50  ;;  %5856 = vmatprep.subr.bf16.mxu0 %v5189_v51  ;;  %v5266_v53 = vunpack.c.l.s8.bf16 %v4138_v48  ;;  %v5268_v61 = vunpack.c.l.s8.bf16 %v4140_v49  ;;  %v5286_v63 = vunpack.c.h.s8.bf16 %v4138_v48 }
 0x5ab   : > { %5693 = vmatpush1.bf16.msra.mxu1 %v5186_v54  ;;  %5857 = vmatpush1.bf16.msra.mxu0 %v5188_v55  ;;  %v5287_v55 = vunpack.c.h.s8.bf16 %v4139_v42  ;;  %v4201_v42 = vld [vmem:[%s11017_s26 + $0x10f8] sm:$0xff] }
 0x5ac   : > { %5694 = vmatprep.subr.bf16.mxu1 %v5207_v56  ;;  %5858 = vmatprep.subr.bf16.mxu0 %v5209_v57  ;;  %v5289_v56 = vunpack.c.h.s8.bf16 %v4141_v29  ;;  %v4159_v57 = vld [vmem:[%s11017_s26 + $0xfa8] sm:$0xff] }
 0x5ad   : > { %v9867_v36 = vpop.eup %9866 }
 0x5ae   : > { %v3548_v7 = vmul.f32 %v9867_v36, %v11271_v28  ;;  %v9869_v17 = vpop.eup %9868  ;;  %v4158_v36 = vld [vmem:[%s11017_s26 + $0xfa0] sm:$0xff] }
 0x5af   : > { %v9871_v18 = vpop.eup %9870  ;;  %v3549_v28 = vmul.f32 %v9869_v17, %v11274_v31  ;;  %5695 = vmatpush1.bf16.msra.mxu1 %v5206_v3  ;;  %5859 = vmatpush1.bf16.msra.mxu0 %v5208_v4  ;;  %v11330_v31 = vsub.f32 %v11251_v38, %v3454_v22  ;;  %v5288_v3 = vunpack.c.h.s8.bf16 %v4140_v49  ;;  %v5307_v4 = vunpack.c.l.s8.bf16 %v4159_v57  ;;  %v4179_v17 = vld [vmem:[%s11017_s26 + $0x1048] sm:$0xff] }
 0x5b0   : > { %v3597_v19 = vmul.f32 %v3572_v2, %v3548_v7  ;;  %v3551_v30 = vmul.f32 %v9871_v18, %v11279_v11  ;;  %5696 = vmatprep.subr.bf16.mxu1 %v5227_v58  ;;  %5860 = vmatprep.subr.bf16.mxu0 %v5229_v37  ;;  %v5246_v11 = vunpack.c.h.s8.bf16 %v4118_v0  ;;  %v5309_v0 = vunpack.c.l.s8.bf16 %v4161_v62  ;;  %v4160_v58 = vld [vmem:[%s11017_s26 + $0xfb0] sm:$0xff] }
 0x5b1   : > { %v3598_v15 = vmul.f32 %v3576_v16, %v3549_v28  ;;  %v3470_v38 = vmul.f32 %v11330_v31, %v11330_v31  ;;  %v5306_v33 = vunpack.c.l.s8.bf16 %v4158_v36  ;;  %v5308_v7 = vunpack.c.l.s8.bf16 %v4160_v58  ;;  %v4178_v28 = vld [vmem:[%s11017_s26 + $0x1040] sm:$0xff] }
 0x5b2   : > { %v3646_v10 = vadd.f32 %v3621_v8, %v3597_v19  ;;  %v3600_v39 = vmul.f32 %v3584_v27, %v3551_v30  ;;  %v5327_v8 = vunpack.c.h.s8.bf16 %v4159_v57  ;;  %v5329_v16 = vunpack.c.h.s8.bf16 %v4161_v62  ;;  %v4218_v62 = vld [vmem:[%s11017_s26 + $0x1180] sm:$0xff] }
 0x5b3   : > { %v3647_v43 = vadd.f32 %v3625_v25, %v3598_v15  ;;  %5697 = vmatpush1.bf16.msra.mxu1 %v5226_v35  ;;  %5861 = vmatpush1.bf16.msra.mxu0 %v5228_v59  ;;  %v3508_v2 = vrot.slane %v3470_v38, 4  ;;  %v4181_v25 = vld [vmem:[%s11017_s26 + $0x1058] sm:$0xff]  ;;  %v5326_v35 = vunpack.c.h.s8.bf16 %v4158_v36  ;;  %v5328_v18 = vunpack.c.h.s8.bf16 %v4160_v58  ;;  %v4180_v59 = vld [vmem:[%s11017_s26 + $0x1050] sm:$0xff]  ;;  %v4199_v15 = vld [vmem:[%s11017_s26 + $0x10e8] sm:$0xff] }
 0x5b4   : > { %v3654_v14 = vmax.f32 %v3646_v10, 0.0  ;;  %v3649_v46 = vadd.f32 %v3633_v34, %v3600_v39  ;;  %5698 = vmatprep.subr.bf16.mxu1 %v5247_v40  ;;  %5862 = vmatprep.subr.bf16.mxu0 %v5249_v13  ;;  %v5347_v19 = vunpack.c.l.s8.bf16 %v4179_v17  ;;  %v5349_v22 = vunpack.c.l.s8.bf16 %v4181_v25  ;;  %v4239_v58 = vld [vmem:[%s11017_s26 + $0x1228] sm:$0xff] }
 0x5b5   : > { %v3655_v50 = vmax.f32 %v3647_v43, 0.0  ;;  %v3509_v37 = vadd.f32 %v3508_v2, %v3470_v38  ;;  %v5346_v34 = vunpack.c.l.s8.bf16 %v4178_v28  ;;  %v5348_v40 = vunpack.c.l.s8.bf16 %v4180_v59  ;;  %v4221_v38 = vld [vmem:[%s11017_s26 + $0x1198] sm:$0xff]  ;;  %v4220_v2 = vld [vmem:[%s11017_s26 + $0x1190] sm:$0xff] }
 0x5b6   : > { %v3657_v51 = vmax.f32 %v3649_v46, 0.0  ;;  %v11338_v54 = vpack.c.bf16 %v3654_v14, %v3654_v14  ;;  %v5367_v13 = vunpack.c.h.s8.bf16 %v4179_v17  ;;  %v5369_v10 = vunpack.c.h.s8.bf16 %v4181_v25  ;;  %v4198_v14 = vld [vmem:[%s11017_s26 + $0x10e0] sm:$0xff]  ;;  %v4200_v46 = vld [vmem:[%s11017_s26 + $0x10f0] sm:$0xff] }
 0x5b7   : > { %v11336_v52 = vpack.c.bf16 %v3655_v50, %v3655_v50  ;;  %5699 = vmatpush1.bf16.msra.mxu1 %v5246_v11  ;;  %5863 = vmatpush1.bf16.msra.mxu0 %v5248_v44  ;;  %v3510_v27 = vrot.slane %v3509_v37, 2  ;;  %v5366_v39 = vunpack.c.h.s8.bf16 %v4178_v28  ;;  %v5368_v43 = vunpack.c.h.s8.bf16 %v4180_v59  ;;  %v4238_v17 = vld [vmem:[%s11017_s26 + $0x1220] sm:$0xff]  ;;  %v4240_v25 = vld [vmem:[%s11017_s26 + $0x1230] sm:$0xff]  ;;  %v4261_v28 = vld [vmem:[%s11017_s26 + $0x12d8] sm:$0xff] }
 0x5b8   : > { %5709 = vmatprep.subr.bf16.mxu1 %v5267_v47  ;;  %5873 = vmatprep.subr.bf16.mxu0 %v5269_v9  ;;  %v11344_v1 = vpack.c.bf16 %v3657_v51, %v3657_v51  ;;  %v5387_v11 = vunpack.c.l.s8.bf16 %v4199_v15  ;;  %v5389_v44 = vunpack.c.l.s8.bf16 %v4201_v42  ;;  %v5386_v9 = vunpack.c.l.s8.bf16 %v4198_v14  ;;  %v4219_v51 = vld [vmem:[%s11017_s26 + $0x1188] sm:$0xff] }
 0x5b9   : > { %5700 = vmatprep.mubr.bf16.mxu1 %v11336_v52  ;;  %5864 = vmatprep.mubr.bf16.mxu0 %v11336_v52  ;;  %v3511_v30 = vadd.f32 %v3510_v27, %v3509_v37  ;;  %v5388_v48 = vunpack.c.l.s8.bf16 %v4200_v46  ;;  %v5407_v49 = vunpack.c.h.s8.bf16 %v4199_v15  ;;  %v5409_v50 = vunpack.c.h.s8.bf16 %v4201_v42  ;;  %v4241_v37 = vld [vmem:[%s11017_s26 + $0x1238] sm:$0xff]  ;;  %v4260_v15 = vld [vmem:[%s11017_s26 + $0x12d0] sm:$0xff] }
 0x5ba   : > { %5701 = vmatmul.mubr.bf16.vlgmr.msra.gmra.mrb[8].mxu1 %v11338_v54  ;;  %5865 = vmatmul.mubr.bf16.vlgmr.msra.gmra.mrb[20].mxu0 %v11338_v54  ;;  %v5429_v57 = vunpack.c.l.s8.bf16 %v4221_v38  ;;  %v5449_v36 = vunpack.c.h.s8.bf16 %v4221_v38  ;;  %v5466_v27 = vunpack.c.l.s8.bf16 %v4238_v17  ;;  %v5486_v59 = vunpack.c.h.s8.bf16 %v4238_v17 }
 0x5bb   : > { %5710 = vmatpush1.bf16.msra.mxu1 %v5266_v53  ;;  %5874 = vmatpush1.bf16.msra.mxu0 %v5268_v61  ;;  %v3512_v29 = vrot.slane %v3511_v30, 1  ;;  %v5406_v61 = vunpack.c.h.s8.bf16 %v4198_v14  ;;  %v5529_v14 = vunpack.c.h.s8.bf16 %v4261_v28 }
 0x5bc   : > { %5741 = vmatprep.mubr.bf16.mxu1 %v11344_v1  ;;  %5905 = vmatprep.mubr.bf16.mxu0 %v11344_v1 }
 0x5bd   : > { %5711 = vmatprep.subr.bf16.mxu1 %v5287_v55  ;;  %5875 = vmatprep.subr.bf16.mxu0 %v5289_v56  ;;  %v3513_v47 = vadd.f32 %v3512_v29, %v3511_v30  ;;  %v5408_v55 = vunpack.c.h.s8.bf16 %v4200_v46  ;;  %v5427_v56 = vunpack.c.l.s8.bf16 %v4219_v51  ;;  %v5488_v30 = vunpack.c.h.s8.bf16 %v4240_v25  ;;  %v4279_v46 = vld [vmem:[%s11017_s26 + $0x1368] sm:$0xff] }
 0x5bf   : > { %5712 = vmatpush1.bf16.msra.mxu1 %v5286_v63  ;;  %5876 = vmatpush1.bf16.msra.mxu0 %v5288_v3  ;;  %v3526_v53 = vmul.f32 0.125, %v3513_v47  ;;  %v5426_v3 = vunpack.c.l.s8.bf16 %v4218_v62  ;;  %v4281_v47 = vld [vmem:[%s11017_s26 + $0x1378] sm:$0xff] }
 0x5c0   : > { %5713 = vmatprep.subr.bf16.mxu1 %v5307_v4  ;;  %5877 = vmatprep.subr.bf16.mxu0 %v5309_v0  ;;  %v5428_v4 = vunpack.c.l.s8.bf16 %v4220_v2  ;;  %v5447_v0 = vunpack.c.h.s8.bf16 %v4219_v51  ;;  %v5549_v38 = vunpack.c.l.s8.bf16 %v4281_v47 }
 0x5c1   : > { %v3534_v63 = vadd.f32 1e-05, %v3526_v53  ;;  %v4278_v53 = vld [vmem:[%s11017_s26 + $0x1360] sm:$0xff] }
 0x5c3   : > { %5714 = vmatpush1.bf16.msra.mxu1 %v5306_v33  ;;  %5878 = vmatpush1.bf16.msra.mxu0 %v5308_v7  ;;  %9872 = vrsqrt.f32 %v3534_v63  ;;  %v5446_v33 = vunpack.c.h.s8.bf16 %v4218_v62  ;;  %v5448_v7 = vunpack.c.h.s8.bf16 %v4220_v2  ;;  %v5567_v62 = vunpack.c.h.s8.bf16 %v4279_v46  ;;  %v3663_v63 = vld [vmem:[%s11017_s26 + $0x28] sm:$0xff] }
 0x5c4   : > { %5715 = vmatprep.subr.bf16.mxu1 %v5327_v8  ;;  %5879 = vmatprep.subr.bf16.mxu0 %v5329_v16  ;;  %v5467_v8 = vunpack.c.l.s8.bf16 %v4239_v58  ;;  %v5469_v16 = vunpack.c.l.s8.bf16 %v4241_v37  ;;  %v5569_v2 = vunpack.c.h.s8.bf16 %v4281_v47 }
 0x5c7   : > { %5716 = vmatpush1.bf16.msra.mxu1 %v5326_v35  ;;  %5880 = vmatpush1.bf16.msra.mxu0 %v5328_v18  ;;  %v5468_v35 = vunpack.c.l.s8.bf16 %v4240_v25  ;;  %v5487_v18 = vunpack.c.h.s8.bf16 %v4239_v58  ;;  %v4311_v58 = vunpack.c.l.s8.bf16 %v3663_v63  ;;  %v4331_v25 = vunpack.c.h.s8.bf16 %v3663_v63 }
 0x5c8   : > { %5717 = vmatprep.subr.bf16.mxu1 %v5347_v19  ;;  %5881 = vmatprep.subr.bf16.mxu0 %v5349_v22  ;;  %v5489_v19 = vunpack.c.h.s8.bf16 %v4241_v37  ;;  %v4259_v22 = vld [vmem:[%s11017_s26 + $0x12c8] sm:$0xff] }
 0x5cb   : > { %5718 = vmatpush1.bf16.msra.mxu1 %v5346_v34  ;;  %5882 = vmatpush1.bf16.msra.mxu0 %v5348_v40  ;;  %v11371_v34 = vsub.s32 6, %v11024_v23  ;;  %v5507_v40 = vunpack.c.l.s8.bf16 %v4259_v22  ;;  %v5527_v23 = vunpack.c.h.s8.bf16 %v4259_v22 }
 0x5cc   : > { %5719 = vmatprep.subr.bf16.mxu1 %v5367_v13  ;;  %5883 = vmatprep.subr.bf16.mxu0 %v5369_v10  ;;  %v5509_v13 = vunpack.c.l.s8.bf16 %v4261_v28  ;;  %v4258_v10 = vld [vmem:[%s11017_s26 + $0x12c0] sm:$0xff] }
 0x5cd   : > { %v9873_v42 = vpop.eup %9872  ;;  %v5506_v29 = vunpack.c.l.s8.bf16 %v4258_v10 }
 0x5cf   : > { %5720 = vmatpush1.bf16.msra.mxu1 %v5366_v39  ;;  %5884 = vmatpush1.bf16.msra.mxu0 %v5368_v43  ;;  %v5508_v39 = vunpack.c.l.s8.bf16 %v4260_v15  ;;  %v3550_v43 = vmul.f32 %v9873_v42, %v11330_v31  ;;  %v5547_v31 = vunpack.c.l.s8.bf16 %v4279_v46  ;;  %v3704_v46 = vld [vmem:[%s11017_s26 + $0x170] sm:$0xff] }
 0x5d0   : > { %5721 = vmatprep.subr.bf16.mxu1 %v5387_v11  ;;  %5885 = vmatprep.subr.bf16.mxu0 %v5389_v44  ;;  %v9914_v11 = vld [vmem:[#allocation16] sm:$0xff] }
 0x5d1   : > { %v3580_v44 = vrot.slane %v9914_v11, %v11371_v34 }
 0x5d3   : > { %5722 = vmatpush1.bf16.msra.mxu1 %v5386_v9  ;;  %5886 = vmatpush1.bf16.msra.mxu0 %v5388_v48  ;;  %v5526_v9 = vunpack.c.h.s8.bf16 %v4258_v10  ;;  %v5528_v48 = vunpack.c.h.s8.bf16 %v4260_v15 }
 0x5d4   : > { %5723 = vmatprep.subr.bf16.mxu1 %v5407_v49  ;;  %5887 = vmatprep.subr.bf16.mxu0 %v5409_v50  ;;  %v3599_v49 = vmul.f32 %v3580_v44, %v3550_v43  ;;  %v9915_v50 = vld [vmem:[#allocation17] sm:$0xff] }
 0x5d5   : > { %v3629_v51 = vrot.slane %v9915_v50, %v11371_v34  ;;  %v3723_v50 = vld [vmem:[%s11017_s26 + $0x208] sm:$0xff] }
 0x5d7   : > { %5724 = vmatpush1.bf16.msra.mxu1 %v5406_v61  ;;  %5888 = vmatpush1.bf16.msra.mxu0 %v5408_v55  ;;  %v4280_v61 = vld [vmem:[%s11017_s26 + $0x1370] sm:$0xff]  ;;  %v5546_v55 = vunpack.c.l.s8.bf16 %v4278_v53 }
 0x5d8   : > { %5725 = vmatprep.subr.bf16.mxu1 %v5427_v56  ;;  %5889 = vmatprep.subr.bf16.mxu0 %v5429_v57  ;;  %v5548_v56 = vunpack.c.l.s8.bf16 %v4280_v61  ;;  %v3648_v57 = vadd.f32 %v3629_v51, %v3599_v49  ;;  %v3725_v51 = vld [vmem:[%s11017_s26 + $0x218] sm:$0xff] }
 0x5d9   : > { %v4453_v63 = vunpack.c.h.s8.bf16 %v3725_v51 }
 0x5db   : > { %5726 = vmatpush1.bf16.msra.mxu1 %v5426_v3  ;;  %5890 = vmatpush1.bf16.msra.mxu0 %v5428_v4  ;;  %v3665_v3 = vld [vmem:[%s11017_s26 + $0x38] sm:$0xff]  ;;  %v5566_v4 = vunpack.c.h.s8.bf16 %v4278_v53  ;;  %v4431_v53 = vunpack.c.l.s8.bf16 %v3723_v50 }
 0x5dc   : > { %5727 = vmatprep.subr.bf16.mxu1 %v5447_v0  ;;  %5891 = vmatprep.subr.bf16.mxu0 %v5449_v36  ;;  %v5568_v0 = vunpack.c.h.s8.bf16 %v4280_v61  ;;  %v3656_v36 = vmax.f32 %v3648_v57, 0.0  ;;  %v4313_v37 = vunpack.c.l.s8.bf16 %v3665_v3  ;;  %v3722_v61 = vld [vmem:[%s11017_s26 + $0x200] sm:$0xff] }
 0x5dd   : > { %v4430_v57 = vunpack.c.l.s8.bf16 %v3722_v61 }
 0x5df   : > { %5728 = vmatpush1.bf16.msra.mxu1 %v5446_v33  ;;  %5892 = vmatpush1.bf16.msra.mxu0 %v5448_v7  ;;  %v3662_v33 = vld [vmem:[%s11017_s26 + $0x20] sm:$0xff]  ;;  %v3664_v7 = vld [vmem:[%s11017_s26 + $0x30] sm:$0xff] }
 0x5e0   : > { %5729 = vmatprep.subr.bf16.mxu1 %v5467_v8  ;;  %5893 = vmatprep.subr.bf16.mxu0 %v5469_v16  ;;  %v4310_v8 = vunpack.c.l.s8.bf16 %v3662_v33  ;;  %v11386_v16 = vpack.c.bf16 %v3656_v36, %v3656_v36  ;;  %v4312_v17 = vunpack.c.l.s8.bf16 %v3664_v7  ;;  %v4332_v22 = vunpack.c.h.s8.bf16 %v3664_v7  ;;  %v3744_v7 = vld [vmem:[%s11017_s26 + $0x2b0] sm:$0xff] }
 0x5e3   : > { %5730 = vmatpush1.bf16.msra.mxu1 %v5466_v27  ;;  %5894 = vmatpush1.bf16.msra.mxu0 %v5468_v35  ;;  %v4333_v27 = vunpack.c.h.s8.bf16 %v3665_v3  ;;  %v3683_v35 = vld [vmem:[%s11017_s26 + $0xc8] sm:$0xff] }
 0x5e4   : > { %5731 = vmatprep.subr.bf16.mxu1 %v5487_v18  ;;  %5895 = vmatprep.subr.bf16.mxu0 %v5489_v19  ;;  %v3685_v18 = vld [vmem:[%s11017_s26 + $0xd8] sm:$0xff]  ;;  %v4330_v19 = vunpack.c.h.s8.bf16 %v3662_v33  ;;  %v4351_v28 = vunpack.c.l.s8.bf16 %v3683_v35  ;;  %v4371_v15 = vunpack.c.h.s8.bf16 %v3683_v35  ;;  %v3743_v3 = vld [vmem:[%s11017_s26 + $0x2a8] sm:$0xff] }
 0x5e5   : > { %v4373_v42 = vunpack.c.h.s8.bf16 %v3685_v18  ;;  %v3763_v35 = vld [vmem:[%s11017_s26 + $0x348] sm:$0xff] }
 0x5e7   : > { %5732 = vmatpush1.bf16.msra.mxu1 %v5486_v59  ;;  %5896 = vmatpush1.bf16.msra.mxu0 %v5488_v30  ;;  %v3682_v59 = vld [vmem:[%s11017_s26 + $0xc0] sm:$0xff]  ;;  %v4353_v30 = vunpack.c.l.s8.bf16 %v3685_v18  ;;  %v3765_v18 = vld [vmem:[%s11017_s26 + $0x358] sm:$0xff] }
 0x5e8   : > { %5733 = vmatprep.subr.bf16.mxu1 %v5507_v40  ;;  %5897 = vmatprep.subr.bf16.mxu0 %v5509_v13  ;;  %v3684_v40 = vld [vmem:[%s11017_s26 + $0xd0] sm:$0xff]  ;;  %v4350_v13 = vunpack.c.l.s8.bf16 %v3682_v59  ;;  %v4370_v43 = vunpack.c.h.s8.bf16 %v3682_v59  ;;  %v3762_v59 = vld [vmem:[%s11017_s26 + $0x340] sm:$0xff] }
 0x5e9   : > { %v4352_v10 = vunpack.c.l.s8.bf16 %v3684_v40  ;;  %v4372_v11 = vunpack.c.h.s8.bf16 %v3684_v40  ;;  %v3764_v40 = vld [vmem:[%s11017_s26 + $0x350] sm:$0xff] }
 0x5eb   : > { %5734 = vmatpush1.bf16.msra.mxu1 %v5506_v29  ;;  %5898 = vmatpush1.bf16.msra.mxu0 %v5508_v39  ;;  %v3703_v29 = vld [vmem:[%s11017_s26 + $0x168] sm:$0xff]  ;;  %v3705_v39 = vld [vmem:[%s11017_s26 + $0x178] sm:$0xff] }
 0x5ec   : > { %5735 = vmatprep.subr.bf16.mxu1 %v5527_v23  ;;  %5899 = vmatprep.subr.bf16.mxu0 %v5529_v14  ;;  %v4391_v44 = vunpack.c.l.s8.bf16 %v3703_v29  ;;  %v3702_v23 = vld [vmem:[%s11017_s26 + $0x160] sm:$0xff]  ;;  %v4393_v14 = vunpack.c.l.s8.bf16 %v3705_v39  ;;  %v4413_v49 = vunpack.c.h.s8.bf16 %v3705_v39  ;;  %v3785_v39 = vld [vmem:[%s11017_s26 + $0x3f8] sm:$0xff] }
 0x5ed   : > { %v4390_v47 = vunpack.c.l.s8.bf16 %v3702_v23 }
 0x5ef   : > { %5736 = vmatpush1.bf16.msra.mxu1 %v5526_v9  ;;  %5900 = vmatpush1.bf16.msra.mxu0 %v5528_v48  ;;  %v4392_v9 = vunpack.c.l.s8.bf16 %v3704_v46  ;;  %v4411_v48 = vunpack.c.h.s8.bf16 %v3703_v29  ;;  %v3783_v29 = vld [vmem:[%s11017_s26 + $0x3e8] sm:$0xff] }
 0x5f0   : > { %5737 = vmatprep.subr.bf16.mxu1 %v5547_v31  ;;  %5901 = vmatprep.subr.bf16.mxu0 %v5549_v38  ;;  %v4410_v31 = vunpack.c.h.s8.bf16 %v3702_v23  ;;  %v4412_v38 = vunpack.c.h.s8.bf16 %v3704_v46  ;;  %v3782_v23 = vld [vmem:[%s11017_s26 + $0x3e0] sm:$0xff]  ;;  %v3784_v46 = vld [vmem:[%s11017_s26 + $0x3f0] sm:$0xff] }
 0x5f3   : > { %5738 = vmatpush1.bf16.msra.mxu1 %v5546_v55  ;;  %5902 = vmatpush1.bf16.msra.mxu0 %v5548_v56  ;;  %v4433_v55 = vunpack.c.l.s8.bf16 %v3725_v51  ;;  %v3724_v56 = vld [vmem:[%s11017_s26 + $0x210] sm:$0xff]  ;;  %v3805_v51 = vld [vmem:[%s11017_s26 + $0x498] sm:$0xff] }
 0x5f4   : > { %5739 = vmatprep.subr.bf16.mxu1 %v5567_v62  ;;  %5903 = vmatprep.subr.bf16.mxu0 %v5569_v2  ;;  %v4432_v62 = vunpack.c.l.s8.bf16 %v3724_v56  ;;  %v4451_v2 = vunpack.c.h.s8.bf16 %v3723_v50  ;;  %v4452_v36 = vunpack.c.h.s8.bf16 %v3724_v56  ;;  %v3803_v50 = vld [vmem:[%s11017_s26 + $0x488] sm:$0xff]  ;;  %v3804_v56 = vld [vmem:[%s11017_s26 + $0x490] sm:$0xff] }
 0x5f7   : > { %5740 = vmatpush1.bf16.msra.mxu1 %v5566_v4  ;;  %5904 = vmatpush1.bf16.msra.mxu0 %v5568_v0  ;;  %v3745_v4 = vld [vmem:[%s11017_s26 + $0x2b8] sm:$0xff]  ;;  %v4450_v0 = vunpack.c.h.s8.bf16 %v3722_v61  ;;  %v3802_v61 = vld [vmem:[%s11017_s26 + $0x480] sm:$0xff] }
 0x5f8   : > { %5914 = vmatprep.subr.bf16.mxu1 %v4311_v58  ;;  %6078 = vmatprep.subr.bf16.mxu0 %v4313_v37  ;;  %v4471_v58 = vunpack.c.l.s8.bf16 %v3743_v3  ;;  %v3742_v37 = vld [vmem:[%s11017_s26 + $0x2a0] sm:$0xff]  ;;  %v4473_v33 = vunpack.c.l.s8.bf16 %v3745_v4 }
 0x5fa   : > { %5742 = vmatmul.mubr.bf16.vlgmr.msra.gmra.mrb[8].mxu1 %v11386_v16  ;;  %5906 = vmatmul.mubr.bf16.vlgmr.msra.gmra.mrb[20].mxu0 %v11386_v16 }
 0x5fb   : > { %5915 = vmatpush1.bf16.msra.mxu1 %v4310_v8  ;;  %5946 = vmatprep.mubr.bf16.mxu1 %v11189_v5  ;;  %v4470_v8 = vunpack.c.l.s8.bf16 %v3742_v37 }
 0x5fc   : > { %6079 = vmatpush1.bf16.msra.mxu0 %v4312_v17  ;;  %6110 = vmatprep.mubr.bf16.mxu0 %v11189_v5  ;;  %v4472_v17 = vunpack.c.l.s8.bf16 %v3744_v7 }
 0x5fd   : > { %5916 = vmatprep.subr.bf16.mxu1 %v4331_v25  ;;  %6080 = vmatprep.subr.bf16.mxu0 %v4333_v27  ;;  %v4491_v25 = vunpack.c.h.s8.bf16 %v3743_v3  ;;  %v4493_v27 = vunpack.c.h.s8.bf16 %v3745_v4  ;;  %v3823_v3 = vld [vmem:[%s11017_s26 + $0x528] sm:$0xff]  ;;  %v3825_v4 = vld [vmem:[%s11017_s26 + $0x538] sm:$0xff] }
 0x5ff   : > { %5917 = vmatpush1.bf16.msra.mxu1 %v4330_v19  ;;  %v4490_v19 = vunpack.c.h.s8.bf16 %v3742_v37  ;;  %v3822_v37 = vld [vmem:[%s11017_s26 + $0x520] sm:$0xff] }
 0x600   : > { %6081 = vmatpush1.bf16.msra.mxu0 %v4332_v22  ;;  %5918 = vmatprep.subr.bf16.mxu1 %v4351_v28  ;;  %v4492_v22 = vunpack.c.h.s8.bf16 %v3744_v7  ;;  %v4511_v28 = vunpack.c.l.s8.bf16 %v3763_v35  ;;  %v3824_v7 = vld [vmem:[%s11017_s26 + $0x530] sm:$0xff] }
 0x601   : > { %6082 = vmatprep.subr.bf16.mxu0 %v4353_v30  ;;  %v4513_v30 = vunpack.c.l.s8.bf16 %v3765_v18 }
 0x603   : > { %5919 = vmatpush1.bf16.msra.mxu1 %v4350_v13  ;;  %v4510_v13 = vunpack.c.l.s8.bf16 %v3762_v59 }
 0x604   : > { %6083 = vmatpush1.bf16.msra.mxu0 %v4352_v10  ;;  %5920 = vmatprep.subr.bf16.mxu1 %v4371_v15  ;;  %v4512_v10 = vunpack.c.l.s8.bf16 %v3764_v40  ;;  %v4531_v15 = vunpack.c.h.s8.bf16 %v3763_v35  ;;  %v4653_v35 = vunpack.c.h.s8.bf16 %v3825_v4 }
 0x605   : > { %6084 = vmatprep.subr.bf16.mxu0 %v4373_v42  ;;  %v4533_v42 = vunpack.c.h.s8.bf16 %v3765_v18  ;;  %v3845_v18 = vld [vmem:[%s11017_s26 + $0x5d8] sm:$0xff] }
 0x607   : > { %5921 = vmatpush1.bf16.msra.mxu1 %v4370_v43  ;;  %v4530_v43 = vunpack.c.h.s8.bf16 %v3762_v59  ;;  %v3842_v59 = vld [vmem:[%s11017_s26 + $0x5c0] sm:$0xff] }
 0x608   : > { %6085 = vmatpush1.bf16.msra.mxu0 %v4372_v11  ;;  %5922 = vmatprep.subr.bf16.mxu1 %v4391_v44  ;;  %v4532_v11 = vunpack.c.h.s8.bf16 %v3764_v40  ;;  %v4551_v44 = vunpack.c.l.s8.bf16 %v3783_v29  ;;  %v3844_v40 = vld [vmem:[%s11017_s26 + $0x5d0] sm:$0xff] }
 0x609   : > { %6086 = vmatprep.subr.bf16.mxu0 %v4393_v14  ;;  %v4553_v14 = vunpack.c.l.s8.bf16 %v3785_v39 }
 0x60b   : > { %5923 = vmatpush1.bf16.msra.mxu1 %v4390_v47  ;;  %v4550_v47 = vunpack.c.l.s8.bf16 %v3782_v23 }
 0x60c   : > { %6087 = vmatpush1.bf16.msra.mxu0 %v4392_v9  ;;  %5924 = vmatprep.subr.bf16.mxu1 %v4411_v48  ;;  %v4552_v9 = vunpack.c.l.s8.bf16 %v3784_v46  ;;  %v4571_v48 = vunpack.c.h.s8.bf16 %v3783_v29  ;;  %v3863_v29 = vld [vmem:[%s11017_s26 + $0x668] sm:$0xff] }
 0x60d   : > { %6088 = vmatprep.subr.bf16.mxu0 %v4413_v49  ;;  %v4573_v49 = vunpack.c.h.s8.bf16 %v3785_v39  ;;  %v3865_v39 = vld [vmem:[%s11017_s26 + $0x678] sm:$0xff] }
 0x60f   : > { %5925 = vmatpush1.bf16.msra.mxu1 %v4410_v31  ;;  %v4570_v31 = vunpack.c.h.s8.bf16 %v3782_v23  ;;  %v3862_v23 = vld [vmem:[%s11017_s26 + $0x660] sm:$0xff] }
 0x610   : > { %6089 = vmatpush1.bf16.msra.mxu0 %v4412_v38  ;;  %5926 = vmatprep.subr.bf16.mxu1 %v4431_v53  ;;  %v4572_v38 = vunpack.c.h.s8.bf16 %v3784_v46  ;;  %v4591_v53 = vunpack.c.l.s8.bf16 %v3803_v50  ;;  %v3864_v46 = vld [vmem:[%s11017_s26 + $0x670] sm:$0xff] }
 0x611   : > { %6090 = vmatprep.subr.bf16.mxu0 %v4433_v55  ;;  %v4593_v55 = vunpack.c.l.s8.bf16 %v3805_v51 }
 0x613   : > { %5927 = vmatpush1.bf16.msra.mxu1 %v4430_v57  ;;  %v4590_v57 = vunpack.c.l.s8.bf16 %v3802_v61 }
 0x614   : > { %6091 = vmatpush1.bf16.msra.mxu0 %v4432_v62  ;;  %5928 = vmatprep.subr.bf16.mxu1 %v4451_v2  ;;  %v4592_v62 = vunpack.c.l.s8.bf16 %v3804_v56  ;;  %v4611_v2 = vunpack.c.h.s8.bf16 %v3803_v50  ;;  %v3883_v50 = vld [vmem:[%s11017_s26 + $0x708] sm:$0xff] }
 0x615   : > { %6092 = vmatprep.subr.bf16.mxu0 %v4453_v63  ;;  %v4613_v63 = vunpack.c.h.s8.bf16 %v3805_v51  ;;  %v3885_v51 = vld [vmem:[%s11017_s26 + $0x718] sm:$0xff] }
 0x617   : > { %5929 = vmatpush1.bf16.msra.mxu1 %v4450_v0  ;;  %v4610_v0 = vunpack.c.h.s8.bf16 %v3802_v61  ;;  %v3882_v61 = vld [vmem:[%s11017_s26 + $0x700] sm:$0xff] }
 0x618   : > { %6093 = vmatpush1.bf16.msra.mxu0 %v4452_v36  ;;  %5930 = vmatprep.subr.bf16.mxu1 %v4471_v58  ;;  %v4612_v36 = vunpack.c.h.s8.bf16 %v3804_v56  ;;  %v4631_v58 = vunpack.c.l.s8.bf16 %v3823_v3  ;;  %v3884_v56 = vld [vmem:[%s11017_s26 + $0x710] sm:$0xff] }
 0x619   : > { %6094 = vmatprep.subr.bf16.mxu0 %v4473_v33  ;;  %v4633_v33 = vunpack.c.l.s8.bf16 %v3825_v4  ;;  %v3905_v4 = vld [vmem:[%s11017_s26 + $0x7b8] sm:$0xff] }
 0x61b   : > { %5931 = vmatpush1.bf16.msra.mxu1 %v4470_v8  ;;  %v4630_v8 = vunpack.c.l.s8.bf16 %v3822_v37 }
 0x61c   : > { %6095 = vmatpush1.bf16.msra.mxu0 %v4472_v17  ;;  %5932 = vmatprep.subr.bf16.mxu1 %v4491_v25  ;;  %v4632_v17 = vunpack.c.l.s8.bf16 %v3824_v7  ;;  %v4651_v25 = vunpack.c.h.s8.bf16 %v3823_v3  ;;  %v3903_v3 = vld [vmem:[%s11017_s26 + $0x7a8] sm:$0xff] }
 0x61d   : > { %6096 = vmatprep.subr.bf16.mxu0 %v4493_v27  ;;  %v3843_v27 = vld [vmem:[%s11017_s26 + $0x5c8] sm:$0xff] }
 0x61f   : > { %5933 = vmatpush1.bf16.msra.mxu1 %v4490_v19  ;;  %v4650_v19 = vunpack.c.h.s8.bf16 %v3822_v37  ;;  %v3902_v37 = vld [vmem:[%s11017_s26 + $0x7a0] sm:$0xff] }
 0x620   : > { %6097 = vmatpush1.bf16.msra.mxu0 %v4492_v22  ;;  %5934 = vmatprep.subr.bf16.mxu1 %v4511_v28  ;;  %v4652_v22 = vunpack.c.h.s8.bf16 %v3824_v7  ;;  %v4671_v28 = vunpack.c.l.s8.bf16 %v3843_v27  ;;  %v3904_v7 = vld [vmem:[%s11017_s26 + $0x7b0] sm:$0xff] }
 0x621   : > { %6098 = vmatprep.subr.bf16.mxu0 %v4513_v30  ;;  %v4673_v30 = vunpack.c.l.s8.bf16 %v3845_v18 }
 0x623   : > { %5935 = vmatpush1.bf16.msra.mxu1 %v4510_v13  ;;  %v4670_v13 = vunpack.c.l.s8.bf16 %v3842_v59 }
 0x624   : > { %6099 = vmatpush1.bf16.msra.mxu0 %v4512_v10  ;;  %5936 = vmatprep.subr.bf16.mxu1 %v4531_v15  ;;  %v4672_v10 = vunpack.c.l.s8.bf16 %v3844_v40  ;;  %v4691_v15 = vunpack.c.h.s8.bf16 %v3843_v27  ;;  %v4813_v27 = vunpack.c.h.s8.bf16 %v3905_v4 }
 0x625   : > { %6100 = vmatprep.subr.bf16.mxu0 %v4533_v42  ;;  %v4693_v42 = vunpack.c.h.s8.bf16 %v3845_v18  ;;  %v3925_v18 = vld [vmem:[%s11017_s26 + $0x858] sm:$0xff] }
 0x627   : > { %5937 = vmatpush1.bf16.msra.mxu1 %v4530_v43  ;;  %v4690_v43 = vunpack.c.h.s8.bf16 %v3842_v59  ;;  %v3922_v59 = vld [vmem:[%s11017_s26 + $0x840] sm:$0xff] }
 0x628   : > { %6101 = vmatpush1.bf16.msra.mxu0 %v4532_v11  ;;  %5938 = vmatprep.subr.bf16.mxu1 %v4551_v44  ;;  %v4692_v11 = vunpack.c.h.s8.bf16 %v3844_v40  ;;  %v4711_v44 = vunpack.c.l.s8.bf16 %v3863_v29  ;;  %v3924_v40 = vld [vmem:[%s11017_s26 + $0x850] sm:$0xff] }
 0x629   : > { %6102 = vmatprep.subr.bf16.mxu0 %v4553_v14  ;;  %v4713_v14 = vunpack.c.l.s8.bf16 %v3865_v39 }
 0x62b   : > { %5939 = vmatpush1.bf16.msra.mxu1 %v4550_v47  ;;  %v4710_v47 = vunpack.c.l.s8.bf16 %v3862_v23 }
 0x62c   : > { %6103 = vmatpush1.bf16.msra.mxu0 %v4552_v9  ;;  %5940 = vmatprep.subr.bf16.mxu1 %v4571_v48  ;;  %v4712_v9 = vunpack.c.l.s8.bf16 %v3864_v46  ;;  %v4731_v48 = vunpack.c.h.s8.bf16 %v3863_v29  ;;  %v3943_v29 = vld [vmem:[%s11017_s26 + $0x8e8] sm:$0xff] }
 0x62d   : > { %6104 = vmatprep.subr.bf16.mxu0 %v4573_v49  ;;  %v4733_v49 = vunpack.c.h.s8.bf16 %v3865_v39  ;;  %v3945_v39 = vld [vmem:[%s11017_s26 + $0x8f8] sm:$0xff] }
 0x62f   : > { %5941 = vmatpush1.bf16.msra.mxu1 %v4570_v31  ;;  %v4730_v31 = vunpack.c.h.s8.bf16 %v3862_v23  ;;  %v3942_v23 = vld [vmem:[%s11017_s26 + $0x8e0] sm:$0xff] }
 0x630   : > { %6105 = vmatpush1.bf16.msra.mxu0 %v4572_v38  ;;  %5942 = vmatprep.subr.bf16.mxu1 %v4591_v53  ;;  %v4732_v38 = vunpack.c.h.s8.bf16 %v3864_v46  ;;  %v4751_v53 = vunpack.c.l.s8.bf16 %v3883_v50  ;;  %v3944_v46 = vld [vmem:[%s11017_s26 + $0x8f0] sm:$0xff] }
 0x631   : > { %6106 = vmatprep.subr.bf16.mxu0 %v4593_v55  ;;  %v4753_v55 = vunpack.c.l.s8.bf16 %v3885_v51 }
 0x633   : > { %5943 = vmatpush1.bf16.msra.mxu1 %v4590_v57  ;;  %v4750_v57 = vunpack.c.l.s8.bf16 %v3882_v61 }
 0x634   : > { %6107 = vmatpush1.bf16.msra.mxu0 %v4592_v62  ;;  %5944 = vmatprep.subr.bf16.mxu1 %v4611_v2  ;;  %v4752_v62 = vunpack.c.l.s8.bf16 %v3884_v56  ;;  %v4771_v2 = vunpack.c.h.s8.bf16 %v3883_v50  ;;  %v3963_v50 = vld [vmem:[%s11017_s26 + $0x988] sm:$0xff] }
 0x635   : > { %6108 = vmatprep.subr.bf16.mxu0 %v4613_v63  ;;  %v4773_v63 = vunpack.c.h.s8.bf16 %v3885_v51  ;;  %v3965_v51 = vld [vmem:[%s11017_s26 + $0x998] sm:$0xff] }
 0x637   : > { %5945 = vmatpush1.bf16.msra.mxu1 %v4610_v0  ;;  %v4770_v0 = vunpack.c.h.s8.bf16 %v3882_v61  ;;  %v3962_v61 = vld [vmem:[%s11017_s26 + $0x980] sm:$0xff] }
 0x638   : > { %6109 = vmatpush1.bf16.msra.mxu0 %v4612_v36  ;;  %5955 = vmatprep.subr.bf16.mxu1 %v4631_v58  ;;  %v4772_v36 = vunpack.c.h.s8.bf16 %v3884_v56  ;;  %v4791_v58 = vunpack.c.l.s8.bf16 %v3903_v3  ;;  %v3964_v56 = vld [vmem:[%s11017_s26 + $0x990] sm:$0xff] }
 0x639   : > { %6119 = vmatprep.subr.bf16.mxu0 %v4633_v33  ;;  %v4793_v33 = vunpack.c.l.s8.bf16 %v3905_v4  ;;  %v3985_v4 = vld [vmem:[%s11017_s26 + $0xa38] sm:$0xff] }
 0x63a   : > { %5947 = vmatmul.mubr.bf16.vlgmr.msra.gmra.mrb[12].mxu1 %v11191_v6 }
 0x63b   : > { %6111 = vmatmul.mubr.bf16.vlgmr.msra.gmra.mrb[24].mxu0 %v11191_v6  ;;  %5956 = vmatpush1.bf16.msra.mxu1 %v4630_v8  ;;  %v4790_v8 = vunpack.c.l.s8.bf16 %v3902_v37 }
 0x63c   : > { %5987 = vmatprep.mubr.bf16.mxu1 %v11199_v32  ;;  %6120 = vmatpush1.bf16.msra.mxu0 %v4632_v17  ;;  %v4792_v17 = vunpack.c.l.s8.bf16 %v3904_v7 }
 0x63d   : > { %6151 = vmatprep.mubr.bf16.mxu0 %v11199_v32  ;;  %5957 = vmatprep.subr.bf16.mxu1 %v4651_v25  ;;  %v4811_v25 = vunpack.c.h.s8.bf16 %v3903_v3  ;;  %v3983_v3 = vld [vmem:[%s11017_s26 + $0xa28] sm:$0xff] }
 0x63e   : > { %6121 = vmatprep.subr.bf16.mxu0 %v4653_v35  ;;  %v3923_v35 = vld [vmem:[%s11017_s26 + $0x848] sm:$0xff] }
 0x63f   : > { %5958 = vmatpush1.bf16.msra.mxu1 %v4650_v19  ;;  %v4810_v19 = vunpack.c.h.s8.bf16 %v3902_v37  ;;  %v3982_v37 = vld [vmem:[%s11017_s26 + $0xa20] sm:$0xff] }
 0x640   : > { %6122 = vmatpush1.bf16.msra.mxu0 %v4652_v22  ;;  %5959 = vmatprep.subr.bf16.mxu1 %v4671_v28  ;;  %v4812_v22 = vunpack.c.h.s8.bf16 %v3904_v7  ;;  %v4831_v28 = vunpack.c.l.s8.bf16 %v3923_v35  ;;  %v3984_v7 = vld [vmem:[%s11017_s26 + $0xa30] sm:$0xff] }
 0x641   : > { %6123 = vmatprep.subr.bf16.mxu0 %v4673_v30  ;;  %v4833_v30 = vunpack.c.l.s8.bf16 %v3925_v18 }
 0x643   : > { %5960 = vmatpush1.bf16.msra.mxu1 %v4670_v13  ;;  %v4830_v13 = vunpack.c.l.s8.bf16 %v3922_v59 }
 0x644   : > { %6124 = vmatpush1.bf16.msra.mxu0 %v4672_v10  ;;  %5961 = vmatprep.subr.bf16.mxu1 %v4691_v15  ;;  %v4832_v10 = vunpack.c.l.s8.bf16 %v3924_v40  ;;  %v4851_v15 = vunpack.c.h.s8.bf16 %v3923_v35  ;;  %v4973_v35 = vunpack.c.h.s8.bf16 %v3985_v4 }
 0x645   : > { %6125 = vmatprep.subr.bf16.mxu0 %v4693_v42  ;;  %v4853_v42 = vunpack.c.h.s8.bf16 %v3925_v18  ;;  %v4005_v18 = vld [vmem:[%s11017_s26 + $0xad8] sm:$0xff] }
 0x647   : > { %5962 = vmatpush1.bf16.msra.mxu1 %v4690_v43  ;;  %v4850_v43 = vunpack.c.h.s8.bf16 %v3922_v59  ;;  %v4002_v59 = vld [vmem:[%s11017_s26 + $0xac0] sm:$0xff] }
 0x648   : > { %6126 = vmatpush1.bf16.msra.mxu0 %v4692_v11  ;;  %5963 = vmatprep.subr.bf16.mxu1 %v4711_v44  ;;  %v4852_v11 = vunpack.c.h.s8.bf16 %v3924_v40  ;;  %v4871_v44 = vunpack.c.l.s8.bf16 %v3943_v29  ;;  %v4004_v40 = vld [vmem:[%s11017_s26 + $0xad0] sm:$0xff] }
 0x649   : > { %6127 = vmatprep.subr.bf16.mxu0 %v4713_v14  ;;  %v4873_v14 = vunpack.c.l.s8.bf16 %v3945_v39 }
 0x64b   : > { %5964 = vmatpush1.bf16.msra.mxu1 %v4710_v47  ;;  %v4870_v47 = vunpack.c.l.s8.bf16 %v3942_v23 }
 0x64c   : > { %6128 = vmatpush1.bf16.msra.mxu0 %v4712_v9  ;;  %5965 = vmatprep.subr.bf16.mxu1 %v4731_v48  ;;  %v4872_v9 = vunpack.c.l.s8.bf16 %v3944_v46  ;;  %v4891_v48 = vunpack.c.h.s8.bf16 %v3943_v29  ;;  %v4023_v29 = vld [vmem:[%s11017_s26 + $0xb68] sm:$0xff] }
 0x64d   : > { %6129 = vmatprep.subr.bf16.mxu0 %v4733_v49  ;;  %v4893_v49 = vunpack.c.h.s8.bf16 %v3945_v39  ;;  %v4025_v39 = vld [vmem:[%s11017_s26 + $0xb78] sm:$0xff] }
 0x64f   : > { %5966 = vmatpush1.bf16.msra.mxu1 %v4730_v31  ;;  %v4890_v31 = vunpack.c.h.s8.bf16 %v3942_v23  ;;  %v4022_v23 = vld [vmem:[%s11017_s26 + $0xb60] sm:$0xff] }
 0x650   : > { %6130 = vmatpush1.bf16.msra.mxu0 %v4732_v38  ;;  %5967 = vmatprep.subr.bf16.mxu1 %v4751_v53  ;;  %v4892_v38 = vunpack.c.h.s8.bf16 %v3944_v46  ;;  %v4911_v53 = vunpack.c.l.s8.bf16 %v3963_v50  ;;  %v4024_v46 = vld [vmem:[%s11017_s26 + $0xb70] sm:$0xff] }
 0x651   : > { %6131 = vmatprep.subr.bf16.mxu0 %v4753_v55  ;;  %v4913_v55 = vunpack.c.l.s8.bf16 %v3965_v51 }
 0x653   : > { %5968 = vmatpush1.bf16.msra.mxu1 %v4750_v57  ;;  %v4910_v57 = vunpack.c.l.s8.bf16 %v3962_v61 }
 0x654   : > { %6132 = vmatpush1.bf16.msra.mxu0 %v4752_v62  ;;  %5969 = vmatprep.subr.bf16.mxu1 %v4771_v2  ;;  %v4912_v62 = vunpack.c.l.s8.bf16 %v3964_v56  ;;  %v4931_v2 = vunpack.c.h.s8.bf16 %v3963_v50  ;;  %v4043_v50 = vld [vmem:[%s11017_s26 + $0xc08] sm:$0xff] }
 0x655   : > { %6133 = vmatprep.subr.bf16.mxu0 %v4773_v63  ;;  %v4933_v63 = vunpack.c.h.s8.bf16 %v3965_v51  ;;  %v4045_v51 = vld [vmem:[%s11017_s26 + $0xc18] sm:$0xff] }
 0x657   : > { %5970 = vmatpush1.bf16.msra.mxu1 %v4770_v0  ;;  %v4930_v0 = vunpack.c.h.s8.bf16 %v3962_v61  ;;  %v4042_v61 = vld [vmem:[%s11017_s26 + $0xc00] sm:$0xff] }
 0x658   : > { %6134 = vmatpush1.bf16.msra.mxu0 %v4772_v36  ;;  %5971 = vmatprep.subr.bf16.mxu1 %v4791_v58  ;;  %v4932_v36 = vunpack.c.h.s8.bf16 %v3964_v56  ;;  %v4951_v58 = vunpack.c.l.s8.bf16 %v3983_v3  ;;  %v4044_v56 = vld [vmem:[%s11017_s26 + $0xc10] sm:$0xff] }
 0x659   : > { %6135 = vmatprep.subr.bf16.mxu0 %v4793_v33  ;;  %v4953_v33 = vunpack.c.l.s8.bf16 %v3985_v4  ;;  %v4065_v4 = vld [vmem:[%s11017_s26 + $0xcb8] sm:$0xff] }
 0x65b   : > { %5972 = vmatpush1.bf16.msra.mxu1 %v4790_v8  ;;  %v4950_v8 = vunpack.c.l.s8.bf16 %v3982_v37 }
 0x65c   : > { %6136 = vmatpush1.bf16.msra.mxu0 %v4792_v17  ;;  %5973 = vmatprep.subr.bf16.mxu1 %v4811_v25  ;;  %v4952_v17 = vunpack.c.l.s8.bf16 %v3984_v7  ;;  %v4971_v25 = vunpack.c.h.s8.bf16 %v3983_v3  ;;  %v4063_v3 = vld [vmem:[%s11017_s26 + $0xca8] sm:$0xff] }
 0x65d   : > { %6137 = vmatprep.subr.bf16.mxu0 %v4813_v27  ;;  %v4003_v27 = vld [vmem:[%s11017_s26 + $0xac8] sm:$0xff] }
 0x65f   : > { %5974 = vmatpush1.bf16.msra.mxu1 %v4810_v19  ;;  %v4970_v19 = vunpack.c.h.s8.bf16 %v3982_v37  ;;  %v4062_v37 = vld [vmem:[%s11017_s26 + $0xca0] sm:$0xff] }
 0x660   : > { %6138 = vmatpush1.bf16.msra.mxu0 %v4812_v22  ;;  %5975 = vmatprep.subr.bf16.mxu1 %v4831_v28  ;;  %v4972_v22 = vunpack.c.h.s8.bf16 %v3984_v7  ;;  %v4991_v28 = vunpack.c.l.s8.bf16 %v4003_v27  ;;  %v4064_v7 = vld [vmem:[%s11017_s26 + $0xcb0] sm:$0xff] }
 0x661   : > { %6139 = vmatprep.subr.bf16.mxu0 %v4833_v30  ;;  %v4993_v30 = vunpack.c.l.s8.bf16 %v4005_v18 }
 0x663   : > { %5976 = vmatpush1.bf16.msra.mxu1 %v4830_v13  ;;  %v4990_v13 = vunpack.c.l.s8.bf16 %v4002_v59 }
 0x664   : > { %6140 = vmatpush1.bf16.msra.mxu0 %v4832_v10  ;;  %5977 = vmatprep.subr.bf16.mxu1 %v4851_v15  ;;  %v4992_v10 = vunpack.c.l.s8.bf16 %v4004_v40  ;;  %v5011_v15 = vunpack.c.h.s8.bf16 %v4003_v27  ;;  %v5133_v27 = vunpack.c.h.s8.bf16 %v4065_v4 }
 0x665   : > { %6141 = vmatprep.subr.bf16.mxu0 %v4853_v42  ;;  %v5013_v42 = vunpack.c.h.s8.bf16 %v4005_v18  ;;  %v4085_v18 = vld [vmem:[%s11017_s26 + $0xd58] sm:$0xff] }
 0x667   : > { %5978 = vmatpush1.bf16.msra.mxu1 %v4850_v43  ;;  %v5010_v43 = vunpack.c.h.s8.bf16 %v4002_v59  ;;  %v4082_v59 = vld [vmem:[%s11017_s26 + $0xd40] sm:$0xff] }
 0x668   : > { %6142 = vmatpush1.bf16.msra.mxu0 %v4852_v11  ;;  %5979 = vmatprep.subr.bf16.mxu1 %v4871_v44  ;;  %v5012_v11 = vunpack.c.h.s8.bf16 %v4004_v40  ;;  %v5031_v44 = vunpack.c.l.s8.bf16 %v4023_v29  ;;  %v4084_v40 = vld [vmem:[%s11017_s26 + $0xd50] sm:$0xff] }
 0x669   : > { %6143 = vmatprep.subr.bf16.mxu0 %v4873_v14  ;;  %v5033_v14 = vunpack.c.l.s8.bf16 %v4025_v39 }
 0x66b   : > { %5980 = vmatpush1.bf16.msra.mxu1 %v4870_v47  ;;  %v5030_v47 = vunpack.c.l.s8.bf16 %v4022_v23 }
 0x66c   : > { %6144 = vmatpush1.bf16.msra.mxu0 %v4872_v9  ;;  %5981 = vmatprep.subr.bf16.mxu1 %v4891_v48  ;;  %v5032_v9 = vunpack.c.l.s8.bf16 %v4024_v46  ;;  %v5051_v48 = vunpack.c.h.s8.bf16 %v4023_v29  ;;  %v4103_v29 = vld [vmem:[%s11017_s26 + $0xde8] sm:$0xff] }
 0x66d   : > { %6145 = vmatprep.subr.bf16.mxu0 %v4893_v49  ;;  %v5053_v49 = vunpack.c.h.s8.bf16 %v4025_v39  ;;  %v4105_v39 = vld [vmem:[%s11017_s26 + $0xdf8] sm:$0xff] }
 0x66f   : > { %5982 = vmatpush1.bf16.msra.mxu1 %v4890_v31  ;;  %v5050_v31 = vunpack.c.h.s8.bf16 %v4022_v23  ;;  %v4102_v23 = vld [vmem:[%s11017_s26 + $0xde0] sm:$0xff] }
 0x670   : > { %6146 = vmatpush1.bf16.msra.mxu0 %v4892_v38  ;;  %5983 = vmatprep.subr.bf16.mxu1 %v4911_v53  ;;  %v5052_v38 = vunpack.c.h.s8.bf16 %v4024_v46  ;;  %v5071_v53 = vunpack.c.l.s8.bf16 %v4043_v50  ;;  %v4104_v46 = vld [vmem:[%s11017_s26 + $0xdf0] sm:$0xff] }
 0x671   : > { %6147 = vmatprep.subr.bf16.mxu0 %v4913_v55  ;;  %v5073_v55 = vunpack.c.l.s8.bf16 %v4045_v51 }
 0x673   : > { %5984 = vmatpush1.bf16.msra.mxu1 %v4910_v57  ;;  %v5070_v57 = vunpack.c.l.s8.bf16 %v4042_v61 }
 0x674   : > { %6148 = vmatpush1.bf16.msra.mxu0 %v4912_v62  ;;  %5985 = vmatprep.subr.bf16.mxu1 %v4931_v2  ;;  %v5072_v62 = vunpack.c.l.s8.bf16 %v4044_v56  ;;  %v5091_v2 = vunpack.c.h.s8.bf16 %v4043_v50  ;;  %v4123_v50 = vld [vmem:[%s11017_s26 + $0xe88] sm:$0xff] }
 0x675   : > { %6149 = vmatprep.subr.bf16.mxu0 %v4933_v63  ;;  %v5093_v63 = vunpack.c.h.s8.bf16 %v4045_v51  ;;  %v4125_v51 = vld [vmem:[%s11017_s26 + $0xe98] sm:$0xff] }
 0x677   : > { %5986 = vmatpush1.bf16.msra.mxu1 %v4930_v0  ;;  %v5090_v0 = vunpack.c.h.s8.bf16 %v4042_v61  ;;  %v4122_v61 = vld [vmem:[%s11017_s26 + $0xe80] sm:$0xff] }
 0x678   : > { %6150 = vmatpush1.bf16.msra.mxu0 %v4932_v36  ;;  %5996 = vmatprep.subr.bf16.mxu1 %v4951_v58  ;;  %v5092_v36 = vunpack.c.h.s8.bf16 %v4044_v56  ;;  %v5111_v58 = vunpack.c.l.s8.bf16 %v4063_v3  ;;  %v4124_v56 = vld [vmem:[%s11017_s26 + $0xe90] sm:$0xff] }
 0x679   : > { %6160 = vmatprep.subr.bf16.mxu0 %v4953_v33  ;;  %v5113_v33 = vunpack.c.l.s8.bf16 %v4065_v4  ;;  %v4145_v4 = vld [vmem:[%s11017_s26 + $0xf38] sm:$0xff] }
 0x67a   : > { %5988 = vmatmul.mubr.bf16.vlgmr.msra.gmra.mrb[12].mxu1 %v11240_v12 }
 0x67b   : > { %6152 = vmatmul.mubr.bf16.vlgmr.msra.gmra.mrb[24].mxu0 %v11240_v12  ;;  %5997 = vmatpush1.bf16.msra.mxu1 %v4950_v8  ;;  %v5110_v8 = vunpack.c.l.s8.bf16 %v4062_v37 }
 0x67c   : > { %6028 = vmatprep.mubr.bf16.mxu1 %v11336_v52  ;;  %6161 = vmatpush1.bf16.msra.mxu0 %v4952_v17  ;;  %v5112_v17 = vunpack.c.l.s8.bf16 %v4064_v7 }
 0x67d   : > { %6192 = vmatprep.mubr.bf16.mxu0 %v11336_v52  ;;  %5998 = vmatprep.subr.bf16.mxu1 %v4971_v25  ;;  %v5131_v25 = vunpack.c.h.s8.bf16 %v4063_v3  ;;  %v4143_v3 = vld [vmem:[%s11017_s26 + $0xf28] sm:$0xff] }
 0x67e   : > { %6162 = vmatprep.subr.bf16.mxu0 %v4973_v35  ;;  %v4083_v35 = vld [vmem:[%s11017_s26 + $0xd48] sm:$0xff] }
 0x67f   : > { %5999 = vmatpush1.bf16.msra.mxu1 %v4970_v19  ;;  %v5130_v19 = vunpack.c.h.s8.bf16 %v4062_v37  ;;  %v4142_v37 = vld [vmem:[%s11017_s26 + $0xf20] sm:$0xff] }
 0x680   : > { %6163 = vmatpush1.bf16.msra.mxu0 %v4972_v22  ;;  %6000 = vmatprep.subr.bf16.mxu1 %v4991_v28  ;;  %v5132_v22 = vunpack.c.h.s8.bf16 %v4064_v7  ;;  %v5151_v28 = vunpack.c.l.s8.bf16 %v4083_v35  ;;  %v4144_v7 = vld [vmem:[%s11017_s26 + $0xf30] sm:$0xff] }
 0x681   : > { %6164 = vmatprep.subr.bf16.mxu0 %v4993_v30  ;;  %v5153_v30 = vunpack.c.l.s8.bf16 %v4085_v18 }
 0x683   : > { %6001 = vmatpush1.bf16.msra.mxu1 %v4990_v13  ;;  %v5150_v13 = vunpack.c.l.s8.bf16 %v4082_v59 }
 0x684   : > { %6165 = vmatpush1.bf16.msra.mxu0 %v4992_v10  ;;  %6002 = vmatprep.subr.bf16.mxu1 %v5011_v15  ;;  %v5152_v10 = vunpack.c.l.s8.bf16 %v4084_v40  ;;  %v5171_v15 = vunpack.c.h.s8.bf16 %v4083_v35  ;;  %v5293_v35 = vunpack.c.h.s8.bf16 %v4145_v4 }
 0x685   : > { %6166 = vmatprep.subr.bf16.mxu0 %v5013_v42  ;;  %v5173_v42 = vunpack.c.h.s8.bf16 %v4085_v18  ;;  %v4165_v18 = vld [vmem:[%s11017_s26 + $0xfd8] sm:$0xff] }
 0x687   : > { %6003 = vmatpush1.bf16.msra.mxu1 %v5010_v43  ;;  %v5170_v43 = vunpack.c.h.s8.bf16 %v4082_v59  ;;  %v4162_v59 = vld [vmem:[%s11017_s26 + $0xfc0] sm:$0xff] }
 0x688   : > { %6167 = vmatpush1.bf16.msra.mxu0 %v5012_v11  ;;  %6004 = vmatprep.subr.bf16.mxu1 %v5031_v44  ;;  %v5172_v11 = vunpack.c.h.s8.bf16 %v4084_v40  ;;  %v5191_v44 = vunpack.c.l.s8.bf16 %v4103_v29  ;;  %v4164_v40 = vld [vmem:[%s11017_s26 + $0xfd0] sm:$0xff] }
 0x689   : > { %6168 = vmatprep.subr.bf16.mxu0 %v5033_v14  ;;  %v5193_v14 = vunpack.c.l.s8.bf16 %v4105_v39 }
 0x68b   : > { %6005 = vmatpush1.bf16.msra.mxu1 %v5030_v47  ;;  %v5190_v47 = vunpack.c.l.s8.bf16 %v4102_v23 }
 0x68c   : > { %6169 = vmatpush1.bf16.msra.mxu0 %v5032_v9  ;;  %6006 = vmatprep.subr.bf16.mxu1 %v5051_v48  ;;  %v5192_v9 = vunpack.c.l.s8.bf16 %v4104_v46  ;;  %v5211_v48 = vunpack.c.h.s8.bf16 %v4103_v29  ;;  %v4183_v29 = vld [vmem:[%s11017_s26 + $0x1068] sm:$0xff] }
 0x68d   : > { %6170 = vmatprep.subr.bf16.mxu0 %v5053_v49  ;;  %v5213_v49 = vunpack.c.h.s8.bf16 %v4105_v39  ;;  %v4185_v39 = vld [vmem:[%s11017_s26 + $0x1078] sm:$0xff] }
 0x68f   : > { %6007 = vmatpush1.bf16.msra.mxu1 %v5050_v31  ;;  %v5210_v31 = vunpack.c.h.s8.bf16 %v4102_v23  ;;  %v4182_v23 = vld [vmem:[%s11017_s26 + $0x1060] sm:$0xff] }
 0x690   : > { %6171 = vmatpush1.bf16.msra.mxu0 %v5052_v38  ;;  %6008 = vmatprep.subr.bf16.mxu1 %v5071_v53  ;;  %v5212_v38 = vunpack.c.h.s8.bf16 %v4104_v46  ;;  %v5231_v53 = vunpack.c.l.s8.bf16 %v4123_v50  ;;  %v4184_v46 = vld [vmem:[%s11017_s26 + $0x1070] sm:$0xff] }
 0x691   : > { %6172 = vmatprep.subr.bf16.mxu0 %v5073_v55  ;;  %v5233_v55 = vunpack.c.l.s8.bf16 %v4125_v51 }
 0x693   : > { %6009 = vmatpush1.bf16.msra.mxu1 %v5070_v57  ;;  %v5230_v57 = vunpack.c.l.s8.bf16 %v4122_v61 }
 0x694   : > { %6173 = vmatpush1.bf16.msra.mxu0 %v5072_v62  ;;  %6010 = vmatprep.subr.bf16.mxu1 %v5091_v2  ;;  %v5232_v62 = vunpack.c.l.s8.bf16 %v4124_v56  ;;  %v5251_v2 = vunpack.c.h.s8.bf16 %v4123_v50  ;;  %v4203_v50 = vld [vmem:[%s11017_s26 + $0x1108] sm:$0xff] }
 0x695   : > { %6174 = vmatprep.subr.bf16.mxu0 %v5093_v63  ;;  %v5253_v63 = vunpack.c.h.s8.bf16 %v4125_v51  ;;  %v4205_v51 = vld [vmem:[%s11017_s26 + $0x1118] sm:$0xff] }
 0x697   : > { %6011 = vmatpush1.bf16.msra.mxu1 %v5090_v0  ;;  %v5250_v0 = vunpack.c.h.s8.bf16 %v4122_v61  ;;  %v4202_v61 = vld [vmem:[%s11017_s26 + $0x1100] sm:$0xff] }
 0x698   : > { %6175 = vmatpush1.bf16.msra.mxu0 %v5092_v36  ;;  %6012 = vmatprep.subr.bf16.mxu1 %v5111_v58  ;;  %v5252_v36 = vunpack.c.h.s8.bf16 %v4124_v56  ;;  %v5271_v58 = vunpack.c.l.s8.bf16 %v4143_v3 }
 0x699   : > { %6176 = vmatprep.subr.bf16.mxu0 %v5113_v33  ;;  %v5273_v33 = vunpack.c.l.s8.bf16 %v4145_v4 }
 0x69b   : > { %6013 = vmatpush1.bf16.msra.mxu1 %v5110_v8  ;;  %v5270_v8 = vunpack.c.l.s8.bf16 %v4142_v37 }
 0x69c   : > { %6177 = vmatpush1.bf16.msra.mxu0 %v5112_v17  ;;  %6014 = vmatprep.subr.bf16.mxu1 %v5131_v25  ;;  %v5272_v17 = vunpack.c.l.s8.bf16 %v4144_v7  ;;  %v5291_v25 = vunpack.c.h.s8.bf16 %v4143_v3 }
 0x69d   : > { %6178 = vmatprep.subr.bf16.mxu0 %v5133_v27  ;;  %v4163_v27 = vld [vmem:[%s11017_s26 + $0xfc8] sm:$0xff] }
 0x69f   : > { %6015 = vmatpush1.bf16.msra.mxu1 %v5130_v19  ;;  %v5290_v19 = vunpack.c.h.s8.bf16 %v4142_v37 }
 0x6a0   : > { %6179 = vmatpush1.bf16.msra.mxu0 %v5132_v22  ;;  %6016 = vmatprep.subr.bf16.mxu1 %v5151_v28  ;;  %v5292_v22 = vunpack.c.h.s8.bf16 %v4144_v7  ;;  %v5311_v28 = vunpack.c.l.s8.bf16 %v4163_v27  ;;  %v5413_v7 = vunpack.c.h.s8.bf16 %v4205_v51 }
 0x6a1   : > { %6180 = vmatprep.subr.bf16.mxu0 %v5153_v30  ;;  %v5313_v30 = vunpack.c.l.s8.bf16 %v4165_v18 }
 0x6a3   : > { %6017 = vmatpush1.bf16.msra.mxu1 %v5150_v13  ;;  %v5310_v13 = vunpack.c.l.s8.bf16 %v4162_v59 }
 0x6a4   : > { %6181 = vmatpush1.bf16.msra.mxu0 %v5152_v10  ;;  %6018 = vmatprep.subr.bf16.mxu1 %v5171_v15  ;;  %v5312_v10 = vunpack.c.l.s8.bf16 %v4164_v40  ;;  %v5331_v15 = vunpack.c.h.s8.bf16 %v4163_v27 }
 0x6a5   : > { %6182 = vmatprep.subr.bf16.mxu0 %v5173_v42  ;;  %v5333_v42 = vunpack.c.h.s8.bf16 %v4165_v18  ;;  %v4222_v18 = vld [vmem:[%s11017_s26 + $0x11a0] sm:$0xff] }
 0x6a7   : > { %6019 = vmatpush1.bf16.msra.mxu1 %v5170_v43  ;;  %v5330_v43 = vunpack.c.h.s8.bf16 %v4162_v59 }
 0x6a8   : > { %6183 = vmatpush1.bf16.msra.mxu0 %v5172_v11  ;;  %6020 = vmatprep.subr.bf16.mxu1 %v5191_v44  ;;  %v5332_v11 = vunpack.c.h.s8.bf16 %v4164_v40  ;;  %v5351_v44 = vunpack.c.l.s8.bf16 %v4183_v29 }
 0x6a9   : > { %6184 = vmatprep.subr.bf16.mxu0 %v5193_v14  ;;  %v5353_v14 = vunpack.c.l.s8.bf16 %v4185_v39 }
 0x6ab   : > { %6021 = vmatpush1.bf16.msra.mxu1 %v5190_v47  ;;  %v5350_v47 = vunpack.c.l.s8.bf16 %v4182_v23 }
 0x6ac   : > { %6185 = vmatpush1.bf16.msra.mxu0 %v5192_v9  ;;  %6022 = vmatprep.subr.bf16.mxu1 %v5211_v48  ;;  %v5352_v9 = vunpack.c.l.s8.bf16 %v4184_v46  ;;  %v5371_v48 = vunpack.c.h.s8.bf16 %v4183_v29 }
 0x6ad   : > { %6186 = vmatprep.subr.bf16.mxu0 %v5213_v49  ;;  %v5373_v49 = vunpack.c.h.s8.bf16 %v4185_v39  ;;  %v4242_v39 = vld [vmem:[%s11017_s26 + $0x1240] sm:$0xff] }
 0x6af   : > { %6023 = vmatpush1.bf16.msra.mxu1 %v5210_v31  ;;  %v5370_v31 = vunpack.c.h.s8.bf16 %v4182_v23 }
 0x6b0   : > { %6187 = vmatpush1.bf16.msra.mxu0 %v5212_v38  ;;  %6024 = vmatprep.subr.bf16.mxu1 %v5231_v53  ;;  %v5372_v38 = vunpack.c.h.s8.bf16 %v4184_v46  ;;  %v5391_v53 = vunpack.c.l.s8.bf16 %v4203_v50 }
 0x6b1   : > { %6188 = vmatprep.subr.bf16.mxu0 %v5233_v55 }
 0x6b3   : > { %6025 = vmatpush1.bf16.msra.mxu1 %v5230_v57  ;;  %v5393_v57 = vunpack.c.l.s8.bf16 %v4205_v51  ;;  %v4262_v51 = vld [vmem:[%s11017_s26 + $0x12e0] sm:$0xff] }
 0x6b4   : > { %6189 = vmatpush1.bf16.msra.mxu0 %v5232_v62  ;;  %6026 = vmatprep.subr.bf16.mxu1 %v5251_v2  ;;  %v4204_v62 = vld [vmem:[%s11017_s26 + $0x1110] sm:$0xff] }
 0x6b5   : > { %6190 = vmatprep.subr.bf16.mxu0 %v5253_v63  ;;  %v5392_v37 = vunpack.c.l.s8.bf16 %v4204_v62  ;;  %v5412_v27 = vunpack.c.h.s8.bf16 %v4204_v62 }
 0x6b7   : > { %6027 = vmatpush1.bf16.msra.mxu1 %v5250_v0  ;;  %v5390_v0 = vunpack.c.l.s8.bf16 %v4202_v61 }
 0x6b8   : > { %6191 = vmatpush1.bf16.msra.mxu0 %v5252_v36  ;;  %6037 = vmatprep.subr.bf16.mxu1 %v5271_v58 }
 0x6b9   : > { %6201 = vmatprep.subr.bf16.mxu0 %v5273_v33  ;;  %v5411_v33 = vunpack.c.h.s8.bf16 %v4203_v50 }
 0x6ba   : > { %6029 = vmatmul.mubr.bf16.vlgmr.msra.gmra.mrb[12].mxu1 %v11338_v54 }
 0x6bb   : > { %6193 = vmatmul.mubr.bf16.vlgmr.msra.gmra.mrb[24].mxu0 %v11338_v54  ;;  %6038 = vmatpush1.bf16.msra.mxu1 %v5270_v8  ;;  %v4223_v8 = vld [vmem:[%s11017_s26 + $0x11a8] sm:$0xff] }
 0x6bc   : > { %6069 = vmatprep.mubr.bf16.mxu1 %v11344_v1  ;;  %6202 = vmatpush1.bf16.msra.mxu0 %v5272_v17  ;;  %v4225_v17 = vld [vmem:[%s11017_s26 + $0x11b8] sm:$0xff] }
 0x6bd   : > { %6233 = vmatprep.mubr.bf16.mxu0 %v11344_v1  ;;  %6039 = vmatprep.subr.bf16.mxu1 %v5291_v25  ;;  %v5410_v25 = vunpack.c.h.s8.bf16 %v4202_v61  ;;  %v5453_v40 = vunpack.c.h.s8.bf16 %v4225_v17 }
 0x6be   : > { %6203 = vmatprep.subr.bf16.mxu0 %v5293_v35  ;;  %v5431_v35 = vunpack.c.l.s8.bf16 %v4223_v8 }
 0x6bf   : > { %6040 = vmatpush1.bf16.msra.mxu1 %v5290_v19  ;;  %v5433_v19 = vunpack.c.l.s8.bf16 %v4225_v17 }
 0x6c0   : > { %6204 = vmatpush1.bf16.msra.mxu0 %v5292_v22  ;;  %6041 = vmatprep.subr.bf16.mxu1 %v5311_v28  ;;  %v4224_v22 = vld [vmem:[%s11017_s26 + $0x11b0] sm:$0xff]  ;;  %v5430_v28 = vunpack.c.l.s8.bf16 %v4222_v18 }
 0x6c1   : > { %6205 = vmatprep.subr.bf16.mxu0 %v5313_v30  ;;  %v5432_v59 = vunpack.c.l.s8.bf16 %v4224_v22  ;;  %v5451_v30 = vunpack.c.h.s8.bf16 %v4223_v8 }
 0x6c3   : > { %6042 = vmatpush1.bf16.msra.mxu1 %v5310_v13  ;;  %v4243_v13 = vld [vmem:[%s11017_s26 + $0x1248] sm:$0xff] }
 0x6c4   : > { %6206 = vmatpush1.bf16.msra.mxu0 %v5312_v10  ;;  %6043 = vmatprep.subr.bf16.mxu1 %v5331_v15  ;;  %v4245_v10 = vld [vmem:[%s11017_s26 + $0x1258] sm:$0xff]  ;;  %v5450_v15 = vunpack.c.h.s8.bf16 %v4222_v18  ;;  %v5471_v29 = vunpack.c.l.s8.bf16 %v4243_v13 }
 0x6c5   : > { %6207 = vmatprep.subr.bf16.mxu0 %v5333_v42  ;;  %v5452_v42 = vunpack.c.h.s8.bf16 %v4224_v22  ;;  %v5493_v46 = vunpack.c.h.s8.bf16 %v4245_v10  ;;  %v3669_v18 = vld [vmem:[%s11017_s26 + $0x58] sm:$0xff] }
 0x6c7   : > { %6044 = vmatpush1.bf16.msra.mxu1 %v5330_v43  ;;  %v5473_v43 = vunpack.c.l.s8.bf16 %v4245_v10 }
 0x6c8   : > { %6208 = vmatpush1.bf16.msra.mxu0 %v5332_v11  ;;  %6045 = vmatprep.subr.bf16.mxu1 %v5351_v44  ;;  %v4244_v11 = vld [vmem:[%s11017_s26 + $0x1250] sm:$0xff]  ;;  %v5470_v44 = vunpack.c.l.s8.bf16 %v4242_v39 }
 0x6c9   : > { %6209 = vmatprep.subr.bf16.mxu0 %v5353_v14  ;;  %v5472_v23 = vunpack.c.l.s8.bf16 %v4244_v11  ;;  %v5491_v14 = vunpack.c.h.s8.bf16 %v4243_v13 }
 0x6cb   : > { %6046 = vmatpush1.bf16.msra.mxu1 %v5350_v47  ;;  %v4263_v47 = vld [vmem:[%s11017_s26 + $0x12e8] sm:$0xff] }
 0x6cc   : > { %6210 = vmatpush1.bf16.msra.mxu0 %v5352_v9  ;;  %6047 = vmatprep.subr.bf16.mxu1 %v5371_v48  ;;  %v4265_v9 = vld [vmem:[%s11017_s26 + $0x12f8] sm:$0xff]  ;;  %v5490_v48 = vunpack.c.h.s8.bf16 %v4242_v39  ;;  %v5511_v50 = vunpack.c.l.s8.bf16 %v4263_v47 }
 0x6cd   : > { %v11511_v55 = vpop.f32.mrb[8].mxu1  ;;  %v11513_v56 = vpop.f32.mrb[20].mxu0  ;;  %6211 = vmatprep.subr.bf16.mxu0 %v5373_v49  ;;  %v5492_v49 = vunpack.c.h.s8.bf16 %v4244_v11  ;;  %v5533_v62 = vunpack.c.h.s8.bf16 %v4265_v9  ;;  %v3689_v39 = vld [vmem:[%s11017_s26 + $0xf8] sm:$0xff] }
 0x6ce   : > { %v11516_v2 = vpop.f32.mrb[9].mxu1  ;;  %v11518_v63 = vpop.f32.mrb[21].mxu0 }
 0x6cf   : > { %v5747_v3 = vpop.f32.mrb[10].mxu1  ;;  %v5911_v4 = vpop.f32.mrb[22].mxu0  ;;  %6048 = vmatpush1.bf16.msra.mxu1 %v5370_v31  ;;  %v5513_v31 = vunpack.c.l.s8.bf16 %v4265_v9 }
 0x6d0   : > { %6212 = vmatpush1.bf16.msra.mxu0 %v5372_v38  ;;  %v5748_v36 = vpop.f32.mrb[11].mxu1  ;;  %v5912_v58 = vpop.f32.mrb[23].mxu0  ;;  %6049 = vmatprep.subr.bf16.mxu1 %v5391_v53  ;;  %v4264_v38 = vld [vmem:[%s11017_s26 + $0x12f0] sm:$0xff]  ;;  %v5510_v53 = vunpack.c.l.s8.bf16 %v4262_v51  ;;  %v4283_v3 = vld [vmem:[%s11017_s26 + $0x1388] sm:$0xff]  ;;  %v4285_v4 = vld [vmem:[%s11017_s26 + $0x1398] sm:$0xff] }
 0x6d1   : > { %6213 = vmatprep.subr.bf16.mxu0 %v5393_v57  ;;  %v5512_v61 = vunpack.c.l.s8.bf16 %v4264_v38  ;;  %v5531_v57 = vunpack.c.h.s8.bf16 %v4263_v47  ;;  %v5532_v36 = vunpack.c.h.s8.bf16 %v4264_v38  ;;  %v5551_v58 = vunpack.c.l.s8.bf16 %v4283_v3 }
 0x6d3   : > { %6050 = vmatpush1.bf16.msra.mxu1 %v5390_v0  ;;  %v5530_v0 = vunpack.c.h.s8.bf16 %v4262_v51  ;;  %v3709_v51 = vld [vmem:[%s11017_s26 + $0x198] sm:$0xff] }
 0x6d4   : > { %6214 = vmatpush1.bf16.msra.mxu0 %v5392_v37  ;;  %6051 = vmatprep.subr.bf16.mxu1 %v5411_v33  ;;  %v4282_v37 = vld [vmem:[%s11017_s26 + $0x1380] sm:$0xff]  ;;  %v5553_v33 = vunpack.c.l.s8.bf16 %v4285_v4 }
 0x6d5   : > { %6215 = vmatprep.subr.bf16.mxu0 %v5413_v7  ;;  %v4284_v7 = vld [vmem:[%s11017_s26 + $0x1390] sm:$0xff]  ;;  %v5550_v8 = vunpack.c.l.s8.bf16 %v4282_v37 }
 0x6d6   : > { %v5552_v17 = vunpack.c.l.s8.bf16 %v4284_v7  ;;  %v5572_v22 = vunpack.c.h.s8.bf16 %v4284_v7 }
 0x6d7   : > { %6052 = vmatpush1.bf16.msra.mxu1 %v5410_v25  ;;  %v5571_v25 = vunpack.c.h.s8.bf16 %v4283_v3 }
 0x6d8   : > { %6216 = vmatpush1.bf16.msra.mxu0 %v5412_v27  ;;  %6053 = vmatprep.subr.bf16.mxu1 %v5431_v35  ;;  %v5573_v27 = vunpack.c.h.s8.bf16 %v4285_v4  ;;  %v3667_v35 = vld [vmem:[%s11017_s26 + $0x48] sm:$0xff] }
 0x6d9   : > { %6217 = vmatprep.subr.bf16.mxu0 %v5433_v19  ;;  %v5570_v19 = vunpack.c.h.s8.bf16 %v4282_v37  ;;  %v3729_v37 = vld [vmem:[%s11017_s26 + $0x238] sm:$0xff] }
 0x6db   : > { %6054 = vmatpush1.bf16.msra.mxu1 %v5430_v28  ;;  %v4315_v28 = vunpack.c.l.s8.bf16 %v3667_v35 }
 0x6dc   : > { %6218 = vmatpush1.bf16.msra.mxu0 %v5432_v59  ;;  %6055 = vmatprep.subr.bf16.mxu1 %v5451_v30  ;;  %v3666_v59 = vld [vmem:[%s11017_s26 + $0x40] sm:$0xff]  ;;  %v4317_v30 = vunpack.c.l.s8.bf16 %v3669_v18 }
 0x6dd   : > { %6219 = vmatprep.subr.bf16.mxu0 %v5453_v40  ;;  %v3668_v40 = vld [vmem:[%s11017_s26 + $0x50] sm:$0xff]  ;;  %v4314_v13 = vunpack.c.l.s8.bf16 %v3666_v59 }
 0x6de   : > { %v4316_v10 = vunpack.c.l.s8.bf16 %v3668_v40  ;;  %v4336_v11 = vunpack.c.h.s8.bf16 %v3668_v40 }
 0x6df   : > { %6056 = vmatpush1.bf16.msra.mxu1 %v5450_v15  ;;  %v4335_v15 = vunpack.c.h.s8.bf16 %v3667_v35 }
 0x6e0   : > { %6220 = vmatpush1.bf16.msra.mxu0 %v5452_v42  ;;  %6057 = vmatprep.subr.bf16.mxu1 %v5471_v29  ;;  %v3687_v42 = vld [vmem:[%s11017_s26 + $0xe8] sm:$0xff]  ;;  %v4337_v29 = vunpack.c.h.s8.bf16 %v3669_v18 }
 0x6e1   : > { %6221 = vmatprep.subr.bf16.mxu0 %v5473_v43  ;;  %v4334_v43 = vunpack.c.h.s8.bf16 %v3666_v59  ;;  %v3749_v59 = vld [vmem:[%s11017_s26 + $0x2d8] sm:$0xff] }
 0x6e3   : > { %6058 = vmatpush1.bf16.msra.mxu1 %v5470_v44  ;;  %v4355_v44 = vunpack.c.l.s8.bf16 %v3687_v42 }
 0x6e4   : > { %6222 = vmatpush1.bf16.msra.mxu0 %v5472_v23  ;;  %6059 = vmatprep.subr.bf16.mxu1 %v5491_v14  ;;  %v3686_v23 = vld [vmem:[%s11017_s26 + $0xe0] sm:$0xff]  ;;  %v4357_v14 = vunpack.c.l.s8.bf16 %v3689_v39 }
 0x6e5   : > { %6223 = vmatprep.subr.bf16.mxu0 %v5493_v46  ;;  %v3688_v46 = vld [vmem:[%s11017_s26 + $0xf0] sm:$0xff]  ;;  %v4354_v47 = vunpack.c.l.s8.bf16 %v3686_v23 }
 0x6e6   : > { %v4356_v9 = vunpack.c.l.s8.bf16 %v3688_v46  ;;  %v4376_v38 = vunpack.c.h.s8.bf16 %v3688_v46 }
 0x6e7   : > { %6060 = vmatpush1.bf16.msra.mxu1 %v5490_v48  ;;  %v4375_v48 = vunpack.c.h.s8.bf16 %v3687_v42  ;;  %v3748_v42 = vld [vmem:[%s11017_s26 + $0x2d0] sm:$0xff] }
 0x6e8   : > { %6224 = vmatpush1.bf16.msra.mxu0 %v5492_v49  ;;  %6061 = vmatprep.subr.bf16.mxu1 %v5511_v50  ;;  %v4377_v49 = vunpack.c.h.s8.bf16 %v3689_v39  ;;  %v3707_v50 = vld [vmem:[%s11017_s26 + $0x188] sm:$0xff]  ;;  %v4476_v39 = vunpack.c.l.s8.bf16 %v3748_v42  ;;  %v4496_v46 = vunpack.c.h.s8.bf16 %v3748_v42 }
 0x6e9   : > { %6225 = vmatprep.subr.bf16.mxu0 %v5513_v31  ;;  %v4374_v31 = vunpack.c.h.s8.bf16 %v3686_v23  ;;  %v3769_v23 = vld [vmem:[%s11017_s26 + $0x378] sm:$0xff] }
 0x6eb   : > { %6062 = vmatpush1.bf16.msra.mxu1 %v5510_v53  ;;  %v4395_v53 = vunpack.c.l.s8.bf16 %v3707_v50 }
 0x6ec   : > { %6226 = vmatpush1.bf16.msra.mxu0 %v5512_v61  ;;  %6063 = vmatprep.subr.bf16.mxu1 %v5531_v57  ;;  %v3706_v61 = vld [vmem:[%s11017_s26 + $0x180] sm:$0xff]  ;;  %v4397_v57 = vunpack.c.l.s8.bf16 %v3709_v51 }
 0x6ed   : > { %6227 = vmatprep.subr.bf16.mxu0 %v5533_v62  ;;  %v3708_v62 = vld [vmem:[%s11017_s26 + $0x190] sm:$0xff]  ;;  %v4394_v3 = vunpack.c.l.s8.bf16 %v3706_v61 }
 0x6ee   : > { %v4396_v4 = vunpack.c.l.s8.bf16 %v3708_v62  ;;  %v4416_v7 = vunpack.c.h.s8.bf16 %v3708_v62 }
 0x6ef   : > { %6064 = vmatpush1.bf16.msra.mxu1 %v5530_v0  ;;  %v4415_v0 = vunpack.c.h.s8.bf16 %v3707_v50 }
 0x6f0   : > { %6228 = vmatpush1.bf16.msra.mxu0 %v5532_v36  ;;  %6065 = vmatprep.subr.bf16.mxu1 %v5551_v58  ;;  %v4417_v36 = vunpack.c.h.s8.bf16 %v3709_v51  ;;  %v3727_v58 = vld [vmem:[%s11017_s26 + $0x228] sm:$0xff] }
 0x6f1   : > { %6229 = vmatprep.subr.bf16.mxu0 %v5553_v33  ;;  %v4414_v33 = vunpack.c.h.s8.bf16 %v3706_v61  ;;  %v3789_v61 = vld [vmem:[%s11017_s26 + $0x418] sm:$0xff] }
 0x6f3   : > { %6066 = vmatpush1.bf16.msra.mxu1 %v5550_v8  ;;  %v4435_v8 = vunpack.c.l.s8.bf16 %v3727_v58 }
 0x6f4   : > { %6230 = vmatpush1.bf16.msra.mxu0 %v5552_v17  ;;  %6067 = vmatprep.subr.bf16.mxu1 %v5571_v25  ;;  %v3726_v17 = vld [vmem:[%s11017_s26 + $0x220] sm:$0xff]  ;;  %v4437_v25 = vunpack.c.l.s8.bf16 %v3729_v37 }
 0x6f5   : > { %6231 = vmatprep.subr.bf16.mxu0 %v5573_v27  ;;  %v3728_v27 = vld [vmem:[%s11017_s26 + $0x230] sm:$0xff]  ;;  %v4434_v35 = vunpack.c.l.s8.bf16 %v3726_v17 }
 0x6f6   : > { %v4436_v18 = vunpack.c.l.s8.bf16 %v3728_v27  ;;  %v4456_v40 = vunpack.c.h.s8.bf16 %v3728_v27 }
 0x6f7   : > { %6068 = vmatpush1.bf16.msra.mxu1 %v5570_v19  ;;  %v4455_v19 = vunpack.c.h.s8.bf16 %v3727_v58 }
 0x6f8   : > { %6232 = vmatpush1.bf16.msra.mxu0 %v5572_v22  ;;  %6242 = vmatprep.subr.bf16.mxu1 %v4315_v28  ;;  %v4457_v22 = vunpack.c.h.s8.bf16 %v3729_v37  ;;  %v3747_v28 = vld [vmem:[%s11017_s26 + $0x2c8] sm:$0xff] }
 0x6f9   : > { %6406 = vmatprep.subr.bf16.mxu0 %v4317_v30  ;;  %v4454_v30 = vunpack.c.h.s8.bf16 %v3726_v17  ;;  %v3809_v17 = vld [vmem:[%s11017_s26 + $0x4b8] sm:$0xff] }
 0x6fa   : > { %6070 = vmatmul.mubr.bf16.vlgmr.msra.gmra.mrb[12].mxu1 %v11386_v16 }
 0x6fb   : > { %6234 = vmatmul.mubr.bf16.vlgmr.msra.gmra.mrb[24].mxu0 %v11386_v16  ;;  %6243 = vmatpush1.bf16.msra.mxu1 %v4314_v13  ;;  %v4475_v13 = vunpack.c.l.s8.bf16 %v3747_v28 }
 0x6fc   : > { %6274 = vmatprep.mubr.bf16.mxu1 %v11189_v5  ;;  %6407 = vmatpush1.bf16.msra.mxu0 %v4316_v10  ;;  %v3746_v10 = vld [vmem:[%s11017_s26 + $0x2c0] sm:$0xff] }
 0x6fd   : > { %6438 = vmatprep.mubr.bf16.mxu0 %v11189_v5  ;;  %6244 = vmatprep.subr.bf16.mxu1 %v4335_v15  ;;  %v4477_v15 = vunpack.c.l.s8.bf16 %v3749_v59 }
 0x6fe   : > { %6408 = vmatprep.subr.bf16.mxu0 %v4337_v29  ;;  %v4474_v29 = vunpack.c.l.s8.bf16 %v3746_v10 }
 0x6ff   : > { %6245 = vmatpush1.bf16.msra.mxu1 %v4334_v43  ;;  %v4495_v43 = vunpack.c.h.s8.bf16 %v3747_v28 }
 0x700   : > { %6409 = vmatpush1.bf16.msra.mxu0 %v4336_v11  ;;  %6246 = vmatprep.subr.bf16.mxu1 %v4355_v44  ;;  %v4497_v11 = vunpack.c.h.s8.bf16 %v3749_v59  ;;  %v3767_v44 = vld [vmem:[%s11017_s26 + $0x368] sm:$0xff] }
 0x701   : > { %6410 = vmatprep.subr.bf16.mxu0 %v4357_v14  ;;  %v4494_v14 = vunpack.c.h.s8.bf16 %v3746_v10  ;;  %v3829_v10 = vld [vmem:[%s11017_s26 + $0x558] sm:$0xff] }
 0x703   : > { %6247 = vmatpush1.bf16.msra.mxu1 %v4354_v47  ;;  %v4515_v47 = vunpack.c.l.s8.bf16 %v3767_v44 }
 0x704   : > { %6411 = vmatpush1.bf16.msra.mxu0 %v4356_v9  ;;  %6248 = vmatprep.subr.bf16.mxu1 %v4375_v48  ;;  %v3766_v9 = vld [vmem:[%s11017_s26 + $0x360] sm:$0xff]  ;;  %v4517_v48 = vunpack.c.l.s8.bf16 %v3769_v23 }
 0x705   : > { %6412 = vmatprep.subr.bf16.mxu0 %v4377_v49  ;;  %v3768_v49 = vld [vmem:[%s11017_s26 + $0x370] sm:$0xff]  ;;  %v4514_v50 = vunpack.c.l.s8.bf16 %v3766_v9 }
 0x706   : > { %v4516_v51 = vunpack.c.l.s8.bf16 %v3768_v49  ;;  %v4536_v62 = vunpack.c.h.s8.bf16 %v3768_v49 }
 0x707   : > { %6249 = vmatpush1.bf16.msra.mxu1 %v4374_v31  ;;  %v4535_v31 = vunpack.c.h.s8.bf16 %v3767_v44 }
 0x708   : > { %6413 = vmatpush1.bf16.msra.mxu0 %v4376_v38  ;;  %6250 = vmatprep.subr.bf16.mxu1 %v4395_v53  ;;  %v4537_v38 = vunpack.c.h.s8.bf16 %v3769_v23  ;;  %v3787_v53 = vld [vmem:[%s11017_s26 + $0x408] sm:$0xff] }
 0x709   : > { %6414 = vmatprep.subr.bf16.mxu0 %v4397_v57  ;;  %v4534_v57 = vunpack.c.h.s8.bf16 %v3766_v9  ;;  %v3849_v9 = vld [vmem:[%s11017_s26 + $0x5f8] sm:$0xff] }
 0x70b   : > { %6251 = vmatpush1.bf16.msra.mxu1 %v4394_v3  ;;  %v4555_v3 = vunpack.c.l.s8.bf16 %v3787_v53 }
 0x70c   : > { %6415 = vmatpush1.bf16.msra.mxu0 %v4396_v4  ;;  %6252 = vmatprep.subr.bf16.mxu1 %v4415_v0  ;;  %v3786_v4 = vld [vmem:[%s11017_s26 + $0x400] sm:$0xff]  ;;  %v4557_v0 = vunpack.c.l.s8.bf16 %v3789_v61 }
 0x70d   : > { %6416 = vmatprep.subr.bf16.mxu0 %v4417_v36  ;;  %v3788_v36 = vld [vmem:[%s11017_s26 + $0x410] sm:$0xff]  ;;  %v4554_v58 = vunpack.c.l.s8.bf16 %v3786_v4 }
 0x70e   : > { %v4556_v37 = vunpack.c.l.s8.bf16 %v3788_v36  ;;  %v4576_v27 = vunpack.c.h.s8.bf16 %v3788_v36 }
 0x70f   : > { %6253 = vmatpush1.bf16.msra.mxu1 %v4414_v33  ;;  %v4575_v33 = vunpack.c.h.s8.bf16 %v3787_v53 }
 0x710   : > { %6417 = vmatpush1.bf16.msra.mxu0 %v4416_v7  ;;  %6254 = vmatprep.subr.bf16.mxu1 %v4435_v8  ;;  %v4577_v7 = vunpack.c.h.s8.bf16 %v3789_v61  ;;  %v3807_v8 = vld [vmem:[%s11017_s26 + $0x4a8] sm:$0xff] }
 0x711   : > { %6418 = vmatprep.subr.bf16.mxu0 %v4437_v25  ;;  %v4574_v25 = vunpack.c.h.s8.bf16 %v3786_v4  ;;  %v3869_v4 = vld [vmem:[%s11017_s26 + $0x698] sm:$0xff] }
 0x713   : > { %6255 = vmatpush1.bf16.msra.mxu1 %v4434_v35  ;;  %v4595_v35 = vunpack.c.l.s8.bf16 %v3807_v8 }
 0x714   : > { %6419 = vmatpush1.bf16.msra.mxu0 %v4436_v18  ;;  %6256 = vmatprep.subr.bf16.mxu1 %v4455_v19  ;;  %v3806_v18 = vld [vmem:[%s11017_s26 + $0x4a0] sm:$0xff]  ;;  %v4597_v19 = vunpack.c.l.s8.bf16 %v3809_v17 }
 0x715   : > { %6420 = vmatprep.subr.bf16.mxu0 %v4457_v22  ;;  %v3808_v22 = vld [vmem:[%s11017_s26 + $0x4b0] sm:$0xff]  ;;  %v4594_v28 = vunpack.c.l.s8.bf16 %v3806_v18 }
 0x716   : > { %v4596_v59 = vunpack.c.l.s8.bf16 %v3808_v22  ;;  %v4616_v42 = vunpack.c.h.s8.bf16 %v3808_v22 }
 0x717   : > { %6257 = vmatpush1.bf16.msra.mxu1 %v4454_v30  ;;  %v4615_v30 = vunpack.c.h.s8.bf16 %v3807_v8 }
 0x718   : > { %6421 = vmatpush1.bf16.msra.mxu0 %v4456_v40  ;;  %6258 = vmatprep.subr.bf16.mxu1 %v4475_v13  ;;  %v4617_v40 = vunpack.c.h.s8.bf16 %v3809_v17  ;;  %v3827_v13 = vld [vmem:[%s11017_s26 + $0x548] sm:$0xff] }
 0x719   : > { %6422 = vmatprep.subr.bf16.mxu0 %v4477_v15  ;;  %v4614_v15 = vunpack.c.h.s8.bf16 %v3806_v18  ;;  %v3889_v18 = vld [vmem:[%s11017_s26 + $0x738] sm:$0xff] }
 0x71b   : > { %6259 = vmatpush1.bf16.msra.mxu1 %v4474_v29  ;;  %v4635_v29 = vunpack.c.l.s8.bf16 %v3827_v13 }
 0x71c   : > { %6423 = vmatpush1.bf16.msra.mxu0 %v4476_v39  ;;  %6260 = vmatprep.subr.bf16.mxu1 %v4495_v43  ;;  %v3826_v39 = vld [vmem:[%s11017_s26 + $0x540] sm:$0xff]  ;;  %v4637_v43 = vunpack.c.l.s8.bf16 %v3829_v10 }
 0x71d   : > { %6424 = vmatprep.subr.bf16.mxu0 %v4497_v11  ;;  %v3828_v11 = vld [vmem:[%s11017_s26 + $0x550] sm:$0xff]  ;;  %v4634_v44 = vunpack.c.l.s8.bf16 %v3826_v39 }
 0x71e   : > { %v4636_v23 = vunpack.c.l.s8.bf16 %v3828_v11  ;;  %v4656_v49 = vunpack.c.h.s8.bf16 %v3828_v11 }
 0x71f   : > { %6261 = vmatpush1.bf16.msra.mxu1 %v4494_v14  ;;  %v4655_v14 = vunpack.c.h.s8.bf16 %v3827_v13 }
 0x720   : > { %6425 = vmatpush1.bf16.msra.mxu0 %v4496_v46  ;;  %6262 = vmatprep.subr.bf16.mxu1 %v4515_v47  ;;  %v3847_v46 = vld [vmem:[%s11017_s26 + $0x5e8] sm:$0xff]  ;;  %v4657_v47 = vunpack.c.h.s8.bf16 %v3829_v10 }
 0x721   : > { %6426 = vmatprep.subr.bf16.mxu0 %v4517_v48  ;;  %v4654_v48 = vunpack.c.h.s8.bf16 %v3826_v39  ;;  %v3909_v39 = vld [vmem:[%s11017_s26 + $0x7d8] sm:$0xff] }
 0x723   : > { %6263 = vmatpush1.bf16.msra.mxu1 %v4514_v50  ;;  %v4675_v50 = vunpack.c.l.s8.bf16 %v3847_v46 }
 0x724   : > { %6427 = vmatpush1.bf16.msra.mxu0 %v4516_v51  ;;  %6264 = vmatprep.subr.bf16.mxu1 %v4535_v31  ;;  %v3846_v51 = vld [vmem:[%s11017_s26 + $0x5e0] sm:$0xff]  ;;  %v4677_v31 = vunpack.c.l.s8.bf16 %v3849_v9 }
 0x725   : > { %6428 = vmatprep.subr.bf16.mxu0 %v4537_v38  ;;  %v3848_v38 = vld [vmem:[%s11017_s26 + $0x5f0] sm:$0xff]  ;;  %v4674_v53 = vunpack.c.l.s8.bf16 %v3846_v51 }
 0x726   : > { %v4676_v61 = vunpack.c.l.s8.bf16 %v3848_v38  ;;  %v4696_v36 = vunpack.c.h.s8.bf16 %v3848_v38 }
 0x727   : > { %6265 = vmatpush1.bf16.msra.mxu1 %v4534_v57  ;;  %v4695_v57 = vunpack.c.h.s8.bf16 %v3847_v46  ;;  %v3908_v46 = vld [vmem:[%s11017_s26 + $0x7d0] sm:$0xff] }
 0x728   : > { %6429 = vmatpush1.bf16.msra.mxu0 %v4536_v62  ;;  %6266 = vmatprep.subr.bf16.mxu1 %v4555_v3  ;;  %v4697_v62 = vunpack.c.h.s8.bf16 %v3849_v9  ;;  %v3867_v3 = vld [vmem:[%s11017_s26 + $0x688] sm:$0xff]  ;;  %v4796_v9 = vunpack.c.l.s8.bf16 %v3908_v46  ;;  %v4816_v38 = vunpack.c.h.s8.bf16 %v3908_v46 }
 0x729   : > { %6430 = vmatprep.subr.bf16.mxu0 %v4557_v0  ;;  %v4694_v0 = vunpack.c.h.s8.bf16 %v3846_v51  ;;  %v3929_v51 = vld [vmem:[%s11017_s26 + $0x878] sm:$0xff] }
 0x72b   : > { %6267 = vmatpush1.bf16.msra.mxu1 %v4554_v58  ;;  %v4715_v58 = vunpack.c.l.s8.bf16 %v3867_v3 }
 0x72c   : > { %6431 = vmatpush1.bf16.msra.mxu0 %v4556_v37  ;;  %6268 = vmatprep.subr.bf16.mxu1 %v4575_v33  ;;  %v3866_v37 = vld [vmem:[%s11017_s26 + $0x680] sm:$0xff]  ;;  %v4717_v33 = vunpack.c.l.s8.bf16 %v3869_v4 }
 0x72d   : > { %6432 = vmatprep.subr.bf16.mxu0 %v4577_v7  ;;  %v3868_v7 = vld [vmem:[%s11017_s26 + $0x690] sm:$0xff]  ;;  %v4714_v8 = vunpack.c.l.s8.bf16 %v3866_v37 }
 0x72e   : > { %v4716_v17 = vunpack.c.l.s8.bf16 %v3868_v7  ;;  %v4736_v22 = vunpack.c.h.s8.bf16 %v3868_v7 }
 0x72f   : > { %6269 = vmatpush1.bf16.msra.mxu1 %v4574_v25  ;;  %v4735_v25 = vunpack.c.h.s8.bf16 %v3867_v3 }
 0x730   : > { %6433 = vmatpush1.bf16.msra.mxu0 %v4576_v27  ;;  %6270 = vmatprep.subr.bf16.mxu1 %v4595_v35  ;;  %v4737_v27 = vunpack.c.h.s8.bf16 %v3869_v4  ;;  %v3887_v35 = vld [vmem:[%s11017_s26 + $0x728] sm:$0xff] }
 0x731   : > { %6434 = vmatprep.subr.bf16.mxu0 %v4597_v19  ;;  %v4734_v19 = vunpack.c.h.s8.bf16 %v3866_v37  ;;  %v3949_v37 = vld [vmem:[%s11017_s26 + $0x918] sm:$0xff] }
 0x733   : > { %6271 = vmatpush1.bf16.msra.mxu1 %v4594_v28  ;;  %v4755_v28 = vunpack.c.l.s8.bf16 %v3887_v35 }
 0x734   : > { %6435 = vmatpush1.bf16.msra.mxu0 %v4596_v59  ;;  %6272 = vmatprep.subr.bf16.mxu1 %v4615_v30  ;;  %v3886_v59 = vld [vmem:[%s11017_s26 + $0x720] sm:$0xff]  ;;  %v4757_v30 = vunpack.c.l.s8.bf16 %v3889_v18 }
 0x735   : > { %6436 = vmatprep.subr.bf16.mxu0 %v4617_v40  ;;  %v3888_v40 = vld [vmem:[%s11017_s26 + $0x730] sm:$0xff]  ;;  %v4754_v13 = vunpack.c.l.s8.bf16 %v3886_v59 }
 0x736   : > { %v4756_v10 = vunpack.c.l.s8.bf16 %v3888_v40  ;;  %v4776_v11 = vunpack.c.h.s8.bf16 %v3888_v40 }
 0x737   : > { %6273 = vmatpush1.bf16.msra.mxu1 %v4614_v15  ;;  %v4775_v15 = vunpack.c.h.s8.bf16 %v3887_v35 }
 0x738   : > { %6437 = vmatpush1.bf16.msra.mxu0 %v4616_v42  ;;  %6283 = vmatprep.subr.bf16.mxu1 %v4635_v29  ;;  %v4777_v42 = vunpack.c.h.s8.bf16 %v3889_v18  ;;  %v3907_v29 = vld [vmem:[%s11017_s26 + $0x7c8] sm:$0xff] }
 0x739   : > { %6447 = vmatprep.subr.bf16.mxu0 %v4637_v43  ;;  %v4774_v43 = vunpack.c.h.s8.bf16 %v3886_v59  ;;  %v3969_v59 = vld [vmem:[%s11017_s26 + $0x9b8] sm:$0xff] }
 0x73a   : > { %6275 = vmatmul.mubr.bf16.vlgmr.msra.gmra.mrb[16].mxu1 %v11191_v6 }
 0x73b   : > { %6439 = vmatmul.mubr.bf16.vlgmr.msra.gmra.mrb[28].mxu0 %v11191_v6  ;;  %6284 = vmatpush1.bf16.msra.mxu1 %v4634_v44  ;;  %v4795_v44 = vunpack.c.l.s8.bf16 %v3907_v29 }
 0x73c   : > { %6315 = vmatprep.mubr.bf16.mxu1 %v11199_v32  ;;  %6448 = vmatpush1.bf16.msra.mxu0 %v4636_v23  ;;  %v3906_v23 = vld [vmem:[%s11017_s26 + $0x7c0] sm:$0xff] }
 0x73d   : > { %6479 = vmatprep.mubr.bf16.mxu0 %v11199_v32  ;;  %6285 = vmatprep.subr.bf16.mxu1 %v4655_v14  ;;  %v4797_v14 = vunpack.c.l.s8.bf16 %v3909_v39 }
 0x73e   : > { %6449 = vmatprep.subr.bf16.mxu0 %v4657_v47  ;;  %v4794_v47 = vunpack.c.l.s8.bf16 %v3906_v23 }
 0x73f   : > { %6286 = vmatpush1.bf16.msra.mxu1 %v4654_v48  ;;  %v4815_v48 = vunpack.c.h.s8.bf16 %v3907_v29 }
 0x740   : > { %6450 = vmatpush1.bf16.msra.mxu0 %v4656_v49  ;;  %6287 = vmatprep.subr.bf16.mxu1 %v4675_v50  ;;  %v4817_v49 = vunpack.c.h.s8.bf16 %v3909_v39  ;;  %v3927_v50 = vld [vmem:[%s11017_s26 + $0x868] sm:$0xff] }
 0x741   : > { %6451 = vmatprep.subr.bf16.mxu0 %v4677_v31  ;;  %v4814_v31 = vunpack.c.h.s8.bf16 %v3906_v23  ;;  %v3989_v23 = vld [vmem:[%s11017_s26 + $0xa58] sm:$0xff] }
 0x743   : > { %6288 = vmatpush1.bf16.msra.mxu1 %v4674_v53  ;;  %v4835_v53 = vunpack.c.l.s8.bf16 %v3927_v50 }
 0x744   : > { %6452 = vmatpush1.bf16.msra.mxu0 %v4676_v61  ;;  %6289 = vmatprep.subr.bf16.mxu1 %v4695_v57  ;;  %v3926_v61 = vld [vmem:[%s11017_s26 + $0x860] sm:$0xff]  ;;  %v4837_v57 = vunpack.c.l.s8.bf16 %v3929_v51 }
 0x745   : > { %6453 = vmatprep.subr.bf16.mxu0 %v4697_v62  ;;  %v3928_v62 = vld [vmem:[%s11017_s26 + $0x870] sm:$0xff]  ;;  %v4834_v3 = vunpack.c.l.s8.bf16 %v3926_v61 }
 0x746   : > { %v4836_v4 = vunpack.c.l.s8.bf16 %v3928_v62  ;;  %v4856_v7 = vunpack.c.h.s8.bf16 %v3928_v62 }
 0x747   : > { %6290 = vmatpush1.bf16.msra.mxu1 %v4694_v0  ;;  %v4855_v0 = vunpack.c.h.s8.bf16 %v3927_v50 }
 0x748   : > { %6454 = vmatpush1.bf16.msra.mxu0 %v4696_v36  ;;  %6291 = vmatprep.subr.bf16.mxu1 %v4715_v58  ;;  %v4857_v36 = vunpack.c.h.s8.bf16 %v3929_v51  ;;  %v3947_v58 = vld [vmem:[%s11017_s26 + $0x908] sm:$0xff] }
 0x749   : > { %6455 = vmatprep.subr.bf16.mxu0 %v4717_v33  ;;  %v4854_v33 = vunpack.c.h.s8.bf16 %v3926_v61  ;;  %v4009_v61 = vld [vmem:[%s11017_s26 + $0xaf8] sm:$0xff] }
 0x74b   : > { %6292 = vmatpush1.bf16.msra.mxu1 %v4714_v8  ;;  %v4875_v8 = vunpack.c.l.s8.bf16 %v3947_v58 }
 0x74c   : > { %6456 = vmatpush1.bf16.msra.mxu0 %v4716_v17  ;;  %6293 = vmatprep.subr.bf16.mxu1 %v4735_v25  ;;  %v3946_v17 = vld [vmem:[%s11017_s26 + $0x900] sm:$0xff]  ;;  %v4877_v25 = vunpack.c.l.s8.bf16 %v3949_v37 }
 0x74d   : > { %6457 = vmatprep.subr.bf16.mxu0 %v4737_v27  ;;  %v3948_v27 = vld [vmem:[%s11017_s26 + $0x910] sm:$0xff]  ;;  %v4874_v35 = vunpack.c.l.s8.bf16 %v3946_v17 }
 0x74e   : > { %v4876_v18 = vunpack.c.l.s8.bf16 %v3948_v27  ;;  %v4896_v40 = vunpack.c.h.s8.bf16 %v3948_v27 }
 0x74f   : > { %6294 = vmatpush1.bf16.msra.mxu1 %v4734_v19  ;;  %v4895_v19 = vunpack.c.h.s8.bf16 %v3947_v58 }
 0x750   : > { %6458 = vmatpush1.bf16.msra.mxu0 %v4736_v22  ;;  %6295 = vmatprep.subr.bf16.mxu1 %v4755_v28  ;;  %v4897_v22 = vunpack.c.h.s8.bf16 %v3949_v37  ;;  %v3967_v28 = vld [vmem:[%s11017_s26 + $0x9a8] sm:$0xff] }
 0x751   : > { %6459 = vmatprep.subr.bf16.mxu0 %v4757_v30  ;;  %v4894_v30 = vunpack.c.h.s8.bf16 %v3946_v17  ;;  %v4029_v17 = vld [vmem:[%s11017_s26 + $0xb98] sm:$0xff] }
 0x753   : > { %6296 = vmatpush1.bf16.msra.mxu1 %v4754_v13  ;;  %v4915_v13 = vunpack.c.l.s8.bf16 %v3967_v28 }
 0x754   : > { %6460 = vmatpush1.bf16.msra.mxu0 %v4756_v10  ;;  %6297 = vmatprep.subr.bf16.mxu1 %v4775_v15  ;;  %v3966_v10 = vld [vmem:[%s11017_s26 + $0x9a0] sm:$0xff]  ;;  %v4917_v15 = vunpack.c.l.s8.bf16 %v3969_v59 }
 0x755   : > { %6461 = vmatprep.subr.bf16.mxu0 %v4777_v42  ;;  %v3968_v42 = vld [vmem:[%s11017_s26 + $0x9b0] sm:$0xff]  ;;  %v4914_v29 = vunpack.c.l.s8.bf16 %v3966_v10 }
 0x756   : > { %v4916_v39 = vunpack.c.l.s8.bf16 %v3968_v42  ;;  %v4936_v46 = vunpack.c.h.s8.bf16 %v3968_v42 }
 0x757   : > { %6298 = vmatpush1.bf16.msra.mxu1 %v4774_v43  ;;  %v4935_v43 = vunpack.c.h.s8.bf16 %v3967_v28 }
 0x758   : > { %6462 = vmatpush1.bf16.msra.mxu0 %v4776_v11  ;;  %6299 = vmatprep.subr.bf16.mxu1 %v4795_v44  ;;  %v4937_v11 = vunpack.c.h.s8.bf16 %v3969_v59  ;;  %v3987_v44 = vld [vmem:[%s11017_s26 + $0xa48] sm:$0xff] }
 0x759   : > { %6463 = vmatprep.subr.bf16.mxu0 %v4797_v14  ;;  %v4934_v14 = vunpack.c.h.s8.bf16 %v3966_v10  ;;  %v4049_v10 = vld [vmem:[%s11017_s26 + $0xc38] sm:$0xff] }
 0x75b   : > { %6300 = vmatpush1.bf16.msra.mxu1 %v4794_v47  ;;  %v4955_v47 = vunpack.c.l.s8.bf16 %v3987_v44 }
 0x75c   : > { %6464 = vmatpush1.bf16.msra.mxu0 %v4796_v9  ;;  %6301 = vmatprep.subr.bf16.mxu1 %v4815_v48  ;;  %v3986_v9 = vld [vmem:[%s11017_s26 + $0xa40] sm:$0xff]  ;;  %v4957_v48 = vunpack.c.l.s8.bf16 %v3989_v23 }
 0x75d   : > { %6465 = vmatprep.subr.bf16.mxu0 %v4817_v49  ;;  %v3988_v49 = vld [vmem:[%s11017_s26 + $0xa50] sm:$0xff]  ;;  %v4954_v50 = vunpack.c.l.s8.bf16 %v3986_v9 }
 0x75e   : > { %v4956_v51 = vunpack.c.l.s8.bf16 %v3988_v49  ;;  %v4976_v62 = vunpack.c.h.s8.bf16 %v3988_v49 }
 0x75f   : > { %6302 = vmatpush1.bf16.msra.mxu1 %v4814_v31  ;;  %v4975_v31 = vunpack.c.h.s8.bf16 %v3987_v44 }
 0x760   : > { %6466 = vmatpush1.bf16.msra.mxu0 %v4816_v38  ;;  %6303 = vmatprep.subr.bf16.mxu1 %v4835_v53  ;;  %v4007_v38 = vld [vmem:[%s11017_s26 + $0xae8] sm:$0xff]  ;;  %v4977_v53 = vunpack.c.h.s8.bf16 %v3989_v23 }
 0x761   : > { %6467 = vmatprep.subr.bf16.mxu0 %v4837_v57  ;;  %v4974_v57 = vunpack.c.h.s8.bf16 %v3986_v9  ;;  %v4069_v9 = vld [vmem:[%s11017_s26 + $0xcd8] sm:$0xff] }
 0x763   : > { %6304 = vmatpush1.bf16.msra.mxu1 %v4834_v3  ;;  %v4995_v3 = vunpack.c.l.s8.bf16 %v4007_v38 }
 0x764   : > { %6468 = vmatpush1.bf16.msra.mxu0 %v4836_v4  ;;  %6305 = vmatprep.subr.bf16.mxu1 %v4855_v0  ;;  %v4006_v4 = vld [vmem:[%s11017_s26 + $0xae0] sm:$0xff]  ;;  %v4997_v0 = vunpack.c.l.s8.bf16 %v4009_v61 }
 0x765   : > { %6469 = vmatprep.subr.bf16.mxu0 %v4857_v36  ;;  %v4008_v36 = vld [vmem:[%s11017_s26 + $0xaf0] sm:$0xff]  ;;  %v4994_v58 = vunpack.c.l.s8.bf16 %v4006_v4 }
 0x766   : > { %v4996_v37 = vunpack.c.l.s8.bf16 %v4008_v36  ;;  %v5016_v27 = vunpack.c.h.s8.bf16 %v4008_v36 }
 0x767   : > { %6306 = vmatpush1.bf16.msra.mxu1 %v4854_v33  ;;  %v5015_v33 = vunpack.c.h.s8.bf16 %v4007_v38  ;;  %v4068_v38 = vld [vmem:[%s11017_s26 + $0xcd0] sm:$0xff] }
 0x768   : > { %6470 = vmatpush1.bf16.msra.mxu0 %v4856_v7  ;;  %6307 = vmatprep.subr.bf16.mxu1 %v4875_v8  ;;  %v5017_v7 = vunpack.c.h.s8.bf16 %v4009_v61  ;;  %v4027_v8 = vld [vmem:[%s11017_s26 + $0xb88] sm:$0xff]  ;;  %v5116_v61 = vunpack.c.l.s8.bf16 %v4068_v38  ;;  %v5136_v36 = vunpack.c.h.s8.bf16 %v4068_v38 }
 0x769   : > { %6471 = vmatprep.subr.bf16.mxu0 %v4877_v25  ;;  %v5014_v25 = vunpack.c.h.s8.bf16 %v4006_v4  ;;  %v4089_v4 = vld [vmem:[%s11017_s26 + $0xd78] sm:$0xff] }
 0x76b   : > { %6308 = vmatpush1.bf16.msra.mxu1 %v4874_v35  ;;  %v5035_v35 = vunpack.c.l.s8.bf16 %v4027_v8 }
 0x76c   : > { %6472 = vmatpush1.bf16.msra.mxu0 %v4876_v18  ;;  %6309 = vmatprep.subr.bf16.mxu1 %v4895_v19  ;;  %v4026_v18 = vld [vmem:[%s11017_s26 + $0xb80] sm:$0xff]  ;;  %v5037_v19 = vunpack.c.l.s8.bf16 %v4029_v17 }
 0x76d   : > { %6473 = vmatprep.subr.bf16.mxu0 %v4897_v22  ;;  %v4028_v22 = vld [vmem:[%s11017_s26 + $0xb90] sm:$0xff]  ;;  %v5034_v28 = vunpack.c.l.s8.bf16 %v4026_v18 }
 0x76e   : > { %v5036_v59 = vunpack.c.l.s8.bf16 %v4028_v22  ;;  %v5056_v42 = vunpack.c.h.s8.bf16 %v4028_v22 }
 0x76f   : > { %6310 = vmatpush1.bf16.msra.mxu1 %v4894_v30  ;;  %v5055_v30 = vunpack.c.h.s8.bf16 %v4027_v8 }
 0x770   : > { %6474 = vmatpush1.bf16.msra.mxu0 %v4896_v40  ;;  %6311 = vmatprep.subr.bf16.mxu1 %v4915_v13  ;;  %v5057_v40 = vunpack.c.h.s8.bf16 %v4029_v17  ;;  %v4047_v13 = vld [vmem:[%s11017_s26 + $0xc28] sm:$0xff] }
 0x771   : > { %6475 = vmatprep.subr.bf16.mxu0 %v4917_v15  ;;  %v5054_v15 = vunpack.c.h.s8.bf16 %v4026_v18  ;;  %v4109_v18 = vld [vmem:[%s11017_s26 + $0xe18] sm:$0xff] }
 0x773   : > { %6312 = vmatpush1.bf16.msra.mxu1 %v4914_v29  ;;  %v5075_v29 = vunpack.c.l.s8.bf16 %v4047_v13 }
 0x774   : > { %6476 = vmatpush1.bf16.msra.mxu0 %v4916_v39  ;;  %6313 = vmatprep.subr.bf16.mxu1 %v4935_v43  ;;  %v4046_v39 = vld [vmem:[%s11017_s26 + $0xc20] sm:$0xff]  ;;  %v5077_v43 = vunpack.c.l.s8.bf16 %v4049_v10 }
 0x775   : > { %6477 = vmatprep.subr.bf16.mxu0 %v4937_v11  ;;  %v4048_v11 = vld [vmem:[%s11017_s26 + $0xc30] sm:$0xff]  ;;  %v5074_v44 = vunpack.c.l.s8.bf16 %v4046_v39 }
 0x776   : > { %v5076_v23 = vunpack.c.l.s8.bf16 %v4048_v11  ;;  %v5096_v49 = vunpack.c.h.s8.bf16 %v4048_v11 }
 0x777   : > { %6314 = vmatpush1.bf16.msra.mxu1 %v4934_v14  ;;  %v5095_v14 = vunpack.c.h.s8.bf16 %v4047_v13 }
 0x778   : > { %6478 = vmatpush1.bf16.msra.mxu0 %v4936_v46  ;;  %6324 = vmatprep.subr.bf16.mxu1 %v4955_v47  ;;  %v5097_v46 = vunpack.c.h.s8.bf16 %v4049_v10  ;;  %v4067_v47 = vld [vmem:[%s11017_s26 + $0xcc8] sm:$0xff] }
 0x779   : > { %6488 = vmatprep.subr.bf16.mxu0 %v4957_v48  ;;  %v5094_v48 = vunpack.c.h.s8.bf16 %v4046_v39  ;;  %v4129_v39 = vld [vmem:[%s11017_s26 + $0xeb8] sm:$0xff] }
 0x77a   : > { %6316 = vmatmul.mubr.bf16.vlgmr.msra.gmra.mrb[16].mxu1 %v11240_v12 }
 0x77b   : > { %6480 = vmatmul.mubr.bf16.vlgmr.msra.gmra.mrb[28].mxu0 %v11240_v12  ;;  %6325 = vmatpush1.bf16.msra.mxu1 %v4954_v50  ;;  %v5115_v50 = vunpack.c.l.s8.bf16 %v4067_v47 }
 0x77c   : > { %6356 = vmatprep.mubr.bf16.mxu1 %v11336_v52  ;;  %6489 = vmatpush1.bf16.msra.mxu0 %v4956_v51  ;;  %v4066_v51 = vld [vmem:[%s11017_s26 + $0xcc0] sm:$0xff] }
 0x77d   : > { %6520 = vmatprep.mubr.bf16.mxu0 %v11336_v52  ;;  %6326 = vmatprep.subr.bf16.mxu1 %v4975_v31  ;;  %v5117_v31 = vunpack.c.l.s8.bf16 %v4069_v9 }
 0x77e   : > { %6490 = vmatprep.subr.bf16.mxu0 %v4977_v53  ;;  %v5114_v53 = vunpack.c.l.s8.bf16 %v4066_v51 }
 0x77f   : > { %6327 = vmatpush1.bf16.msra.mxu1 %v4974_v57  ;;  %v5135_v57 = vunpack.c.h.s8.bf16 %v4067_v47 }
 0x780   : > { %6491 = vmatpush1.bf16.msra.mxu0 %v4976_v62  ;;  %6328 = vmatprep.subr.bf16.mxu1 %v4995_v3  ;;  %v5137_v62 = vunpack.c.h.s8.bf16 %v4069_v9  ;;  %v4087_v3 = vld [vmem:[%s11017_s26 + $0xd68] sm:$0xff] }
 0x781   : > { %6492 = vmatprep.subr.bf16.mxu0 %v4997_v0  ;;  %v5134_v0 = vunpack.c.h.s8.bf16 %v4066_v51  ;;  %v4149_v51 = vld [vmem:[%s11017_s26 + $0xf58] sm:$0xff] }
 0x783   : > { %6329 = vmatpush1.bf16.msra.mxu1 %v4994_v58  ;;  %v5155_v58 = vunpack.c.l.s8.bf16 %v4087_v3 }
 0x784   : > { %6493 = vmatpush1.bf16.msra.mxu0 %v4996_v37  ;;  %6330 = vmatprep.subr.bf16.mxu1 %v5015_v33  ;;  %v4086_v37 = vld [vmem:[%s11017_s26 + $0xd60] sm:$0xff]  ;;  %v5157_v33 = vunpack.c.l.s8.bf16 %v4089_v4 }
 0x785   : > { %6494 = vmatprep.subr.bf16.mxu0 %v5017_v7  ;;  %v4088_v7 = vld [vmem:[%s11017_s26 + $0xd70] sm:$0xff]  ;;  %v5154_v8 = vunpack.c.l.s8.bf16 %v4086_v37 }
 0x786   : > { %v5156_v17 = vunpack.c.l.s8.bf16 %v4088_v7  ;;  %v5176_v22 = vunpack.c.h.s8.bf16 %v4088_v7 }
 0x787   : > { %6331 = vmatpush1.bf16.msra.mxu1 %v5014_v25  ;;  %v5175_v25 = vunpack.c.h.s8.bf16 %v4087_v3 }
 0x788   : > { %6495 = vmatpush1.bf16.msra.mxu0 %v5016_v27  ;;  %6332 = vmatprep.subr.bf16.mxu1 %v5035_v35  ;;  %v5177_v27 = vunpack.c.h.s8.bf16 %v4089_v4  ;;  %v4107_v35 = vld [vmem:[%s11017_s26 + $0xe08] sm:$0xff] }
 0x789   : > { %6496 = vmatprep.subr.bf16.mxu0 %v5037_v19  ;;  %v5174_v19 = vunpack.c.h.s8.bf16 %v4086_v37  ;;  %v4169_v37 = vld [vmem:[%s11017_s26 + $0xff8] sm:$0xff] }
 0x78b   : > { %6333 = vmatpush1.bf16.msra.mxu1 %v5034_v28  ;;  %v5195_v28 = vunpack.c.l.s8.bf16 %v4107_v35 }
 0x78c   : > { %6497 = vmatpush1.bf16.msra.mxu0 %v5036_v59  ;;  %6334 = vmatprep.subr.bf16.mxu1 %v5055_v30  ;;  %v4106_v59 = vld [vmem:[%s11017_s26 + $0xe00] sm:$0xff]  ;;  %v5197_v30 = vunpack.c.l.s8.bf16 %v4109_v18 }
 0x78d   : > { %6498 = vmatprep.subr.bf16.mxu0 %v5057_v40  ;;  %v4108_v40 = vld [vmem:[%s11017_s26 + $0xe10] sm:$0xff]  ;;  %v5194_v13 = vunpack.c.l.s8.bf16 %v4106_v59 }
 0x78e   : > { %v5196_v10 = vunpack.c.l.s8.bf16 %v4108_v40  ;;  %v5216_v11 = vunpack.c.h.s8.bf16 %v4108_v40 }
 0x78f   : > { %6335 = vmatpush1.bf16.msra.mxu1 %v5054_v15  ;;  %v5215_v15 = vunpack.c.h.s8.bf16 %v4107_v35 }
 0x790   : > { %6499 = vmatpush1.bf16.msra.mxu0 %v5056_v42  ;;  %6336 = vmatprep.subr.bf16.mxu1 %v5075_v29  ;;  %v5217_v42 = vunpack.c.h.s8.bf16 %v4109_v18  ;;  %v4127_v29 = vld [vmem:[%s11017_s26 + $0xea8] sm:$0xff] }
 0x791   : > { %6500 = vmatprep.subr.bf16.mxu0 %v5077_v43  ;;  %v5214_v43 = vunpack.c.h.s8.bf16 %v4106_v59  ;;  %v4189_v59 = vld [vmem:[%s11017_s26 + $0x1098] sm:$0xff] }
 0x793   : > { %6337 = vmatpush1.bf16.msra.mxu1 %v5074_v44  ;;  %v5235_v44 = vunpack.c.l.s8.bf16 %v4127_v29 }
 0x794   : > { %6501 = vmatpush1.bf16.msra.mxu0 %v5076_v23  ;;  %6338 = vmatprep.subr.bf16.mxu1 %v5095_v14  ;;  %v4126_v23 = vld [vmem:[%s11017_s26 + $0xea0] sm:$0xff]  ;;  %v5237_v14 = vunpack.c.l.s8.bf16 %v4129_v39 }
 0x795   : > { %6502 = vmatprep.subr.bf16.mxu0 %v5097_v46  ;;  %v4128_v46 = vld [vmem:[%s11017_s26 + $0xeb0] sm:$0xff]  ;;  %v5234_v47 = vunpack.c.l.s8.bf16 %v4126_v23 }
 0x796   : > { %v5236_v9 = vunpack.c.l.s8.bf16 %v4128_v46  ;;  %v5256_v38 = vunpack.c.h.s8.bf16 %v4128_v46 }
 0x797   : > { %6339 = vmatpush1.bf16.msra.mxu1 %v5094_v48  ;;  %v5255_v48 = vunpack.c.h.s8.bf16 %v4127_v29 }
 0x798   : > { %6503 = vmatpush1.bf16.msra.mxu0 %v5096_v49  ;;  %6340 = vmatprep.subr.bf16.mxu1 %v5115_v50  ;;  %v5257_v49 = vunpack.c.h.s8.bf16 %v4129_v39  ;;  %v4147_v50 = vld [vmem:[%s11017_s26 + $0xf48] sm:$0xff] }
 0x799   : > { %6504 = vmatprep.subr.bf16.mxu0 %v5117_v31  ;;  %v5254_v31 = vunpack.c.h.s8.bf16 %v4126_v23  ;;  %v4209_v23 = vld [vmem:[%s11017_s26 + $0x1138] sm:$0xff] }
 0x79b   : > { %6341 = vmatpush1.bf16.msra.mxu1 %v5114_v53  ;;  %v5275_v53 = vunpack.c.l.s8.bf16 %v4147_v50 }
 0x79c   : > { %6505 = vmatpush1.bf16.msra.mxu0 %v5116_v61  ;;  %6342 = vmatprep.subr.bf16.mxu1 %v5135_v57  ;;  %v4146_v61 = vld [vmem:[%s11017_s26 + $0xf40] sm:$0xff]  ;;  %v5277_v57 = vunpack.c.l.s8.bf16 %v4149_v51 }
 0x79d   : > { %6506 = vmatprep.subr.bf16.mxu0 %v5137_v62  ;;  %v4148_v62 = vld [vmem:[%s11017_s26 + $0xf50] sm:$0xff]  ;;  %v5274_v3 = vunpack.c.l.s8.bf16 %v4146_v61 }
 0x79e   : > { %v5276_v4 = vunpack.c.l.s8.bf16 %v4148_v62  ;;  %v5296_v7 = vunpack.c.h.s8.bf16 %v4148_v62 }
 0x79f   : > { %6343 = vmatpush1.bf16.msra.mxu1 %v5134_v0  ;;  %v5295_v0 = vunpack.c.h.s8.bf16 %v4147_v50  ;;  %v4208_v50 = vld [vmem:[%s11017_s26 + $0x1130] sm:$0xff] }
 0x7a0   : > { %6507 = vmatpush1.bf16.msra.mxu0 %v5136_v36  ;;  %6344 = vmatprep.subr.bf16.mxu1 %v5155_v58  ;;  %v4167_v36 = vld [vmem:[%s11017_s26 + $0xfe8] sm:$0xff]  ;;  %v5297_v58 = vunpack.c.h.s8.bf16 %v4149_v51 }
 0x7a1   : > { %6508 = vmatprep.subr.bf16.mxu0 %v5157_v33  ;;  %v5294_v33 = vunpack.c.h.s8.bf16 %v4146_v61 }
 0x7a3   : > { %6345 = vmatpush1.bf16.msra.mxu1 %v5154_v8  ;;  %v5315_v8 = vunpack.c.l.s8.bf16 %v4167_v36 }
 0x7a4   : > { %6509 = vmatpush1.bf16.msra.mxu0 %v5156_v17  ;;  %6346 = vmatprep.subr.bf16.mxu1 %v5175_v25  ;;  %v4166_v17 = vld [vmem:[%s11017_s26 + $0xfe0] sm:$0xff]  ;;  %v5317_v25 = vunpack.c.l.s8.bf16 %v4169_v37 }
 0x7a5   : > { %6510 = vmatprep.subr.bf16.mxu0 %v5177_v27  ;;  %v4168_v27 = vld [vmem:[%s11017_s26 + $0xff0] sm:$0xff]  ;;  %v5314_v35 = vunpack.c.l.s8.bf16 %v4166_v17 }
 0x7a6   : > { %v5316_v18 = vunpack.c.l.s8.bf16 %v4168_v27  ;;  %v5336_v40 = vunpack.c.h.s8.bf16 %v4168_v27  ;;  %v4228_v27 = vld [vmem:[%s11017_s26 + $0x11d0] sm:$0xff] }
 0x7a7   : > { %6347 = vmatpush1.bf16.msra.mxu1 %v5174_v19  ;;  %v5335_v19 = vunpack.c.h.s8.bf16 %v4167_v36  ;;  %v5417_v36 = vunpack.c.h.s8.bf16 %v4209_v23 }
 0x7a8   : > { %6511 = vmatpush1.bf16.msra.mxu0 %v5176_v22  ;;  %6348 = vmatprep.subr.bf16.mxu1 %v5195_v28  ;;  %v5337_v22 = vunpack.c.h.s8.bf16 %v4169_v37  ;;  %v4187_v28 = vld [vmem:[%s11017_s26 + $0x1088] sm:$0xff]  ;;  %v4229_v37 = vld [vmem:[%s11017_s26 + $0x11d8] sm:$0xff] }
 0x7a9   : > { %6512 = vmatprep.subr.bf16.mxu0 %v5197_v30  ;;  %v5334_v30 = vunpack.c.h.s8.bf16 %v4166_v17  ;;  %v4226_v17 = vld [vmem:[%s11017_s26 + $0x11c0] sm:$0xff] }
 0x7ab   : > { %6349 = vmatpush1.bf16.msra.mxu1 %v5194_v13  ;;  %v5355_v13 = vunpack.c.l.s8.bf16 %v4187_v28 }
 0x7ac   : > { %6513 = vmatpush1.bf16.msra.mxu0 %v5196_v10  ;;  %6350 = vmatprep.subr.bf16.mxu1 %v5215_v15  ;;  %v4186_v10 = vld [vmem:[%s11017_s26 + $0x1080] sm:$0xff]  ;;  %v5357_v15 = vunpack.c.l.s8.bf16 %v4189_v59 }
 0x7ad   : > { %6514 = vmatprep.subr.bf16.mxu0 %v5217_v42  ;;  %v4188_v42 = vld [vmem:[%s11017_s26 + $0x1090] sm:$0xff]  ;;  %v5354_v29 = vunpack.c.l.s8.bf16 %v4186_v10 }
 0x7ae   : > { %v5356_v39 = vunpack.c.l.s8.bf16 %v4188_v42  ;;  %v5376_v46 = vunpack.c.h.s8.bf16 %v4188_v42  ;;  %v4248_v42 = vld [vmem:[%s11017_s26 + $0x1270] sm:$0xff] }
 0x7af   : > { %6351 = vmatpush1.bf16.msra.mxu1 %v5214_v43  ;;  %v5375_v43 = vunpack.c.h.s8.bf16 %v4187_v28  ;;  %v4247_v28 = vld [vmem:[%s11017_s26 + $0x1268] sm:$0xff] }
 0x7b0   : > { %6515 = vmatpush1.bf16.msra.mxu0 %v5216_v11  ;;  %6352 = vmatprep.subr.bf16.mxu1 %v5235_v44  ;;  %v5377_v11 = vunpack.c.h.s8.bf16 %v4189_v59  ;;  %v4207_v44 = vld [vmem:[%s11017_s26 + $0x1128] sm:$0xff]  ;;  %v4249_v59 = vld [vmem:[%s11017_s26 + $0x1278] sm:$0xff] }
 0x7b1   : > { %6516 = vmatprep.subr.bf16.mxu0 %v5237_v14  ;;  %v5374_v14 = vunpack.c.h.s8.bf16 %v4186_v10  ;;  %v4246_v10 = vld [vmem:[%s11017_s26 + $0x1260] sm:$0xff] }
 0x7b3   : > { %6353 = vmatpush1.bf16.msra.mxu1 %v5234_v47  ;;  %v5395_v47 = vunpack.c.l.s8.bf16 %v4207_v44 }
 0x7b4   : > { %6517 = vmatpush1.bf16.msra.mxu0 %v5236_v9  ;;  %6354 = vmatprep.subr.bf16.mxu1 %v5255_v48  ;;  %v4206_v9 = vld [vmem:[%s11017_s26 + $0x1120] sm:$0xff] }
 0x7b5   : > { %6518 = vmatprep.subr.bf16.mxu0 %v5257_v49  ;;  %v5397_v49 = vunpack.c.l.s8.bf16 %v4209_v23  ;;  %v5394_v61 = vunpack.c.l.s8.bf16 %v4206_v9  ;;  %v4269_v23 = vld [vmem:[%s11017_s26 + $0x1318] sm:$0xff] }
 0x7b7   : > { %6355 = vmatpush1.bf16.msra.mxu1 %v5254_v31 }
 0x7b8   : > { %6519 = vmatpush1.bf16.msra.mxu0 %v5256_v38  ;;  %6365 = vmatprep.subr.bf16.mxu1 %v5275_v53 }
 0x7b9   : > { %6529 = vmatprep.subr.bf16.mxu0 %v5277_v57 }
 0x7ba   : > { %6357 = vmatmul.mubr.bf16.vlgmr.msra.gmra.mrb[16].mxu1 %v11338_v54 }
 0x7bb   : > { %6521 = vmatmul.mubr.bf16.vlgmr.msra.gmra.mrb[28].mxu0 %v11338_v54  ;;  %6366 = vmatpush1.bf16.msra.mxu1 %v5274_v3  ;;  %v5396_v3 = vunpack.c.l.s8.bf16 %v4208_v50 }
 0x7bc   : > { %6397 = vmatprep.mubr.bf16.mxu1 %v11344_v1  ;;  %6530 = vmatpush1.bf16.msra.mxu0 %v5276_v4  ;;  %v5415_v4 = vunpack.c.h.s8.bf16 %v4207_v44  ;;  %v4267_v44 = vld [vmem:[%s11017_s26 + $0x1308] sm:$0xff] }
 0x7bd   : > { %6561 = vmatprep.mubr.bf16.mxu0 %v11344_v1  ;;  %6367 = vmatprep.subr.bf16.mxu1 %v5295_v0 }
 0x7be   : > { %6531 = vmatprep.subr.bf16.mxu0 %v5297_v58  ;;  %v4227_v58 = vld [vmem:[%s11017_s26 + $0x11c8] sm:$0xff] }
 0x7bf   : > { %6368 = vmatpush1.bf16.msra.mxu1 %v5294_v33  ;;  %v5414_v33 = vunpack.c.h.s8.bf16 %v4206_v9  ;;  %v4266_v9 = vld [vmem:[%s11017_s26 + $0x1300] sm:$0xff] }
 0x7c0   : > { %6532 = vmatpush1.bf16.msra.mxu0 %v5296_v7  ;;  %6369 = vmatprep.subr.bf16.mxu1 %v5315_v8  ;;  %v5416_v7 = vunpack.c.h.s8.bf16 %v4208_v50  ;;  %v5435_v8 = vunpack.c.l.s8.bf16 %v4227_v58  ;;  %v4268_v50 = vld [vmem:[%s11017_s26 + $0x1310] sm:$0xff] }
 0x7c1   : > { %6533 = vmatprep.subr.bf16.mxu0 %v5317_v25  ;;  %v5437_v25 = vunpack.c.l.s8.bf16 %v4229_v37 }
 0x7c3   : > { %6370 = vmatpush1.bf16.msra.mxu1 %v5314_v35  ;;  %v5434_v35 = vunpack.c.l.s8.bf16 %v4226_v17 }
 0x7c4   : > { %6534 = vmatpush1.bf16.msra.mxu0 %v5316_v18  ;;  %6371 = vmatprep.subr.bf16.mxu1 %v5335_v19  ;;  %v5436_v18 = vunpack.c.l.s8.bf16 %v4228_v27  ;;  %v5455_v19 = vunpack.c.h.s8.bf16 %v4227_v58 }
 0x7c5   : > { %6535 = vmatprep.subr.bf16.mxu0 %v5337_v22  ;;  %v5457_v22 = vunpack.c.h.s8.bf16 %v4229_v37  ;;  %v4286_v37 = vld [vmem:[%s11017_s26 + $0x13a0] sm:$0xff] }
 0x7c7   : > { %6372 = vmatpush1.bf16.msra.mxu1 %v5334_v30  ;;  %v5454_v30 = vunpack.c.h.s8.bf16 %v4226_v17 }
 0x7c8   : > { %6536 = vmatpush1.bf16.msra.mxu0 %v5336_v40  ;;  %6373 = vmatprep.subr.bf16.mxu1 %v5355_v13  ;;  %v5456_v40 = vunpack.c.h.s8.bf16 %v4228_v27  ;;  %v5475_v13 = vunpack.c.l.s8.bf16 %v4247_v28 }
 0x7c9   : > { %6537 = vmatprep.subr.bf16.mxu0 %v5357_v15  ;;  %v5477_v15 = vunpack.c.l.s8.bf16 %v4249_v59 }
 0x7cb   : > { %6374 = vmatpush1.bf16.msra.mxu1 %v5354_v29  ;;  %v5474_v29 = vunpack.c.l.s8.bf16 %v4246_v10 }
 0x7cc   : > { %6538 = vmatpush1.bf16.msra.mxu0 %v5356_v39  ;;  %6375 = vmatprep.subr.bf16.mxu1 %v5375_v43  ;;  %v5476_v39 = vunpack.c.l.s8.bf16 %v4248_v42  ;;  %v5495_v43 = vunpack.c.h.s8.bf16 %v4247_v28 }
 0x7cd   : > { %v11663_v48 = vpop.f32.mrb[12].mxu1  ;;  %6539 = vmatprep.subr.bf16.mxu0 %v5377_v11  ;;  %v5497_v11 = vunpack.c.h.s8.bf16 %v4249_v59  ;;  %v3670_v59 = vld [vmem:[%s11017_s26 + $0x60] sm:$0xff] }
 0x7ce   : > { %v11666_v51 = vpop.f32.mrb[24].mxu0  ;;  %v11668_v31 = vpop.f32.mrb[13].mxu1 }
 0x7cf   : > { %v11670_v38 = vpop.f32.mrb[25].mxu0  ;;  %v6075_v53 = vpop.f32.mrb[14].mxu1  ;;  %6376 = vmatpush1.bf16.msra.mxu1 %v5374_v14  ;;  %v5494_v14 = vunpack.c.h.s8.bf16 %v4246_v10 }
 0x7d0   : > { %v6239_v57 = vpop.f32.mrb[26].mxu0  ;;  %6540 = vmatpush1.bf16.msra.mxu0 %v5376_v46  ;;  %v6076_v62 = vpop.f32.mrb[15].mxu1  ;;  %6377 = vmatprep.subr.bf16.mxu1 %v5395_v47  ;;  %v5496_v46 = vunpack.c.h.s8.bf16 %v4248_v42  ;;  %v5515_v47 = vunpack.c.l.s8.bf16 %v4267_v44  ;;  %v5514_v53 = vunpack.c.l.s8.bf16 %v4266_v9  ;;  %v3691_v42 = vld [vmem:[%s11017_s26 + $0x108] sm:$0xff] }
 0x7d1   : > { %v6240_v0 = vpop.f32.mrb[27].mxu0  ;;  %6541 = vmatprep.subr.bf16.mxu0 %v5397_v49  ;;  %v5517_v49 = vunpack.c.l.s8.bf16 %v4269_v23  ;;  %v5535_v57 = vunpack.c.h.s8.bf16 %v4267_v44  ;;  %v5537_v62 = vunpack.c.h.s8.bf16 %v4269_v23  ;;  %v4359_v44 = vunpack.c.l.s8.bf16 %v3691_v42  ;;  %v3690_v23 = vld [vmem:[%s11017_s26 + $0x100] sm:$0xff] }
 0x7d2   : > { %v5534_v0 = vunpack.c.h.s8.bf16 %v4266_v9 }
 0x7d3   : > { %6378 = vmatpush1.bf16.msra.mxu1 %v5394_v61  ;;  %v5516_v61 = vunpack.c.l.s8.bf16 %v4268_v50 }
 0x7d4   : > { %6542 = vmatpush1.bf16.msra.mxu0 %v5396_v3  ;;  %6379 = vmatprep.subr.bf16.mxu1 %v5415_v4  ;;  %v4287_v3 = vld [vmem:[%s11017_s26 + $0x13a8] sm:$0xff]  ;;  %v4289_v4 = vld [vmem:[%s11017_s26 + $0x13b8] sm:$0xff] }
 0x7d5   : > { %6543 = vmatprep.subr.bf16.mxu0 %v5417_v36  ;;  %v5536_v36 = vunpack.c.h.s8.bf16 %v4268_v50  ;;  %v5555_v58 = vunpack.c.l.s8.bf16 %v4287_v3  ;;  %v5577_v27 = vunpack.c.h.s8.bf16 %v4289_v4 }
 0x7d7   : > { %6380 = vmatpush1.bf16.msra.mxu1 %v5414_v33  ;;  %v5557_v33 = vunpack.c.l.s8.bf16 %v4289_v4  ;;  %v3710_v4 = vld [vmem:[%s11017_s26 + $0x1a0] sm:$0xff] }
 0x7d8   : > { %6544 = vmatpush1.bf16.msra.mxu0 %v5416_v7  ;;  %6381 = vmatprep.subr.bf16.mxu1 %v5435_v8  ;;  %v4288_v7 = vld [vmem:[%s11017_s26 + $0x13b0] sm:$0xff]  ;;  %v5554_v8 = vunpack.c.l.s8.bf16 %v4286_v37 }
 0x7d9   : > { %6545 = vmatprep.subr.bf16.mxu0 %v5437_v25  ;;  %v5556_v17 = vunpack.c.l.s8.bf16 %v4288_v7  ;;  %v5575_v25 = vunpack.c.h.s8.bf16 %v4287_v3 }
 0x7db   : > { %6382 = vmatpush1.bf16.msra.mxu1 %v5434_v35  ;;  %v3671_v35 = vld [vmem:[%s11017_s26 + $0x68] sm:$0xff] }
 0x7dc   : > { %6546 = vmatpush1.bf16.msra.mxu0 %v5436_v18  ;;  %6383 = vmatprep.subr.bf16.mxu1 %v5455_v19  ;;  %v3673_v18 = vld [vmem:[%s11017_s26 + $0x78] sm:$0xff]  ;;  %v5574_v19 = vunpack.c.h.s8.bf16 %v4286_v37  ;;  %v4319_v28 = vunpack.c.l.s8.bf16 %v3671_v35 }
 0x7dd   : > { %6547 = vmatprep.subr.bf16.mxu0 %v5457_v22  ;;  %v5576_v22 = vunpack.c.h.s8.bf16 %v4288_v7 }
 0x7df   : > { %6384 = vmatpush1.bf16.msra.mxu1 %v5454_v30  ;;  %v4321_v30 = vunpack.c.l.s8.bf16 %v3673_v18 }
 0x7e0   : > { %6548 = vmatpush1.bf16.msra.mxu0 %v5456_v40  ;;  %6385 = vmatprep.subr.bf16.mxu1 %v5475_v13  ;;  %v3672_v40 = vld [vmem:[%s11017_s26 + $0x70] sm:$0xff]  ;;  %v4318_v13 = vunpack.c.l.s8.bf16 %v3670_v59 }
 0x7e1   : > { %6549 = vmatprep.subr.bf16.mxu0 %v5477_v15  ;;  %v4320_v10 = vunpack.c.l.s8.bf16 %v3672_v40  ;;  %v4339_v15 = vunpack.c.h.s8.bf16 %v3671_v35 }
 0x7e3   : > { %6386 = vmatpush1.bf16.msra.mxu1 %v5474_v29  ;;  %v4341_v29 = vunpack.c.h.s8.bf16 %v3673_v18  ;;  %v3730_v18 = vld [vmem:[%s11017_s26 + $0x240] sm:$0xff] }
 0x7e4   : > { %6550 = vmatpush1.bf16.msra.mxu0 %v5476_v39  ;;  %6387 = vmatprep.subr.bf16.mxu1 %v5495_v43  ;;  %v3693_v39 = vld [vmem:[%s11017_s26 + $0x118] sm:$0xff]  ;;  %v4338_v43 = vunpack.c.h.s8.bf16 %v3670_v59 }
 0x7e5   : > { %6551 = vmatprep.subr.bf16.mxu0 %v5497_v11  ;;  %v4340_v11 = vunpack.c.h.s8.bf16 %v3672_v40  ;;  %v4381_v50 = vunpack.c.h.s8.bf16 %v3693_v39 }
 0x7e7   : > { %6388 = vmatpush1.bf16.msra.mxu1 %v5494_v14  ;;  %v4361_v14 = vunpack.c.l.s8.bf16 %v3693_v39  ;;  %v3750_v39 = vld [vmem:[%s11017_s26 + $0x2e0] sm:$0xff] }
 0x7e8   : > { %6552 = vmatpush1.bf16.msra.mxu0 %v5496_v46  ;;  %6389 = vmatprep.subr.bf16.mxu1 %v5515_v47  ;;  %v3692_v46 = vld [vmem:[%s11017_s26 + $0x110] sm:$0xff]  ;;  %v4358_v47 = vunpack.c.l.s8.bf16 %v3690_v23 }
 0x7e9   : > { %6553 = vmatprep.subr.bf16.mxu0 %v5517_v49  ;;  %v4360_v9 = vunpack.c.l.s8.bf16 %v3692_v46  ;;  %v4379_v49 = vunpack.c.h.s8.bf16 %v3691_v42 }
 0x7eb   : > { %6390 = vmatpush1.bf16.msra.mxu1 %v5514_v53  ;;  %v3711_v53 = vld [vmem:[%s11017_s26 + $0x1a8] sm:$0xff] }
 0x7ec   : > { %6554 = vmatpush1.bf16.msra.mxu0 %v5516_v61  ;;  %6391 = vmatprep.subr.bf16.mxu1 %v5535_v57  ;;  %v3713_v61 = vld [vmem:[%s11017_s26 + $0x1b8] sm:$0xff]  ;;  %v4378_v57 = vunpack.c.h.s8.bf16 %v3690_v23  ;;  %v4399_v3 = vunpack.c.l.s8.bf16 %v3711_v53 }
 0x7ed   : > { %6555 = vmatprep.subr.bf16.mxu0 %v5537_v62  ;;  %v4380_v62 = vunpack.c.h.s8.bf16 %v3692_v46  ;;  %v4421_v7 = vunpack.c.h.s8.bf16 %v3713_v61 }
 0x7ef   : > { %6392 = vmatpush1.bf16.msra.mxu1 %v5534_v0  ;;  %v4401_v0 = vunpack.c.l.s8.bf16 %v3713_v61  ;;  %v3770_v61 = vld [vmem:[%s11017_s26 + $0x380] sm:$0xff] }
 0x7f0   : > { %6556 = vmatpush1.bf16.msra.mxu0 %v5536_v36  ;;  %6393 = vmatprep.subr.bf16.mxu1 %v5555_v58  ;;  %v3712_v36 = vld [vmem:[%s11017_s26 + $0x1b0] sm:$0xff]  ;;  %v4398_v58 = vunpack.c.l.s8.bf16 %v3710_v4 }
 0x7f1   : > { %6557 = vmatprep.subr.bf16.mxu0 %v5557_v33  ;;  %v4400_v37 = vunpack.c.l.s8.bf16 %v3712_v36  ;;  %v4419_v33 = vunpack.c.h.s8.bf16 %v3711_v53 }
 0x7f3   : > { %6394 = vmatpush1.bf16.msra.mxu1 %v5554_v8  ;;  %v3731_v8 = vld [vmem:[%s11017_s26 + $0x248] sm:$0xff] }
 0x7f4   : > { %6558 = vmatpush1.bf16.msra.mxu0 %v5556_v17  ;;  %6395 = vmatprep.subr.bf16.mxu1 %v5575_v25  ;;  %v3733_v17 = vld [vmem:[%s11017_s26 + $0x258] sm:$0xff]  ;;  %v4418_v25 = vunpack.c.h.s8.bf16 %v3710_v4  ;;  %v4439_v35 = vunpack.c.l.s8.bf16 %v3731_v8 }
 0x7f5   : > { %6559 = vmatprep.subr.bf16.mxu0 %v5577_v27  ;;  %v4420_v27 = vunpack.c.h.s8.bf16 %v3712_v36  ;;  %v4461_v40 = vunpack.c.h.s8.bf16 %v3733_v17 }
 0x7f7   : > { %6396 = vmatpush1.bf16.msra.mxu1 %v5574_v19  ;;  %v4441_v19 = vunpack.c.l.s8.bf16 %v3733_v17  ;;  %v3790_v17 = vld [vmem:[%s11017_s26 + $0x420] sm:$0xff] }
 0x7f8   : > { %6560 = vmatpush1.bf16.msra.mxu0 %v5576_v22  ;;  %6570 = vmatprep.subr.bf16.mxu1 %v4319_v28  ;;  %v3732_v22 = vld [vmem:[%s11017_s26 + $0x250] sm:$0xff]  ;;  %v4438_v28 = vunpack.c.l.s8.bf16 %v3730_v18 }
 0x7f9   : > { %6734 = vmatprep.subr.bf16.mxu0 %v4321_v30  ;;  %v4440_v59 = vunpack.c.l.s8.bf16 %v3732_v22  ;;  %v4459_v30 = vunpack.c.h.s8.bf16 %v3731_v8  ;;  %v4460_v42 = vunpack.c.h.s8.bf16 %v3732_v22 }
 0x7fa   : > { %6398 = vmatmul.mubr.bf16.vlgmr.msra.gmra.mrb[16].mxu1 %v11386_v16 }
 0x7fb   : > { %6562 = vmatmul.mubr.bf16.vlgmr.msra.gmra.mrb[28].mxu0 %v11386_v16  ;;  %6571 = vmatpush1.bf16.msra.mxu1 %v4318_v13  ;;  %v3751_v13 = vld [vmem:[%s11017_s26 + $0x2e8] sm:$0xff] }
 0x7fc   : > { %6602 = vmatprep.mubr.bf16.mxu1 %v11189_v5  ;;  %6735 = vmatpush1.bf16.msra.mxu0 %v4320_v10  ;;  %v3753_v10 = vld [vmem:[%s11017_s26 + $0x2f8] sm:$0xff] }
 0x7fd   : > { %6766 = vmatprep.mubr.bf16.mxu0 %v11189_v5  ;;  %6572 = vmatprep.subr.bf16.mxu1 %v4339_v15  ;;  %v4458_v15 = vunpack.c.h.s8.bf16 %v3730_v18  ;;  %v4501_v46 = vunpack.c.h.s8.bf16 %v3753_v10 }
 0x7fe   : > { %6736 = vmatprep.subr.bf16.mxu0 %v4341_v29  ;;  %v4479_v29 = vunpack.c.l.s8.bf16 %v3751_v13 }
 0x7ff   : > { %6573 = vmatpush1.bf16.msra.mxu1 %v4338_v43  ;;  %v4481_v43 = vunpack.c.l.s8.bf16 %v3753_v10  ;;  %v3810_v10 = vld [vmem:[%s11017_s26 + $0x4c0] sm:$0xff] }
 0x800   : > { %6737 = vmatpush1.bf16.msra.mxu0 %v4340_v11  ;;  %6574 = vmatprep.subr.bf16.mxu1 %v4359_v44  ;;  %v3752_v11 = vld [vmem:[%s11017_s26 + $0x2f0] sm:$0xff]  ;;  %v4478_v44 = vunpack.c.l.s8.bf16 %v3750_v39 }
 0x801   : > { %6738 = vmatprep.subr.bf16.mxu0 %v4361_v14  ;;  %v4480_v23 = vunpack.c.l.s8.bf16 %v3752_v11  ;;  %v4499_v14 = vunpack.c.h.s8.bf16 %v3751_v13 }
 0x803   : > { %6575 = vmatpush1.bf16.msra.mxu1 %v4358_v47  ;;  %v3771_v47 = vld [vmem:[%s11017_s26 + $0x388] sm:$0xff] }
 0x804   : > { %6739 = vmatpush1.bf16.msra.mxu0 %v4360_v9  ;;  %6576 = vmatprep.subr.bf16.mxu1 %v4379_v49  ;;  %v3773_v9 = vld [vmem:[%s11017_s26 + $0x398] sm:$0xff]  ;;  %v4498_v49 = vunpack.c.h.s8.bf16 %v3750_v39  ;;  %v4519_v53 = vunpack.c.l.s8.bf16 %v3771_v47 }
 0x805   : > { %6740 = vmatprep.subr.bf16.mxu0 %v4381_v50  ;;  %v4500_v50 = vunpack.c.h.s8.bf16 %v3752_v11  ;;  %v4541_v36 = vunpack.c.h.s8.bf16 %v3773_v9 }
 0x807   : > { %6577 = vmatpush1.bf16.msra.mxu1 %v4378_v57  ;;  %v4521_v57 = vunpack.c.l.s8.bf16 %v3773_v9  ;;  %v3830_v9 = vld [vmem:[%s11017_s26 + $0x560] sm:$0xff] }
 0x808   : > { %6741 = vmatpush1.bf16.msra.mxu0 %v4380_v62  ;;  %6578 = vmatprep.subr.bf16.mxu1 %v4399_v3  ;;  %v3772_v62 = vld [vmem:[%s11017_s26 + $0x390] sm:$0xff]  ;;  %v4518_v3 = vunpack.c.l.s8.bf16 %v3770_v61 }
 0x809   : > { %6742 = vmatprep.subr.bf16.mxu0 %v4401_v0  ;;  %v4520_v4 = vunpack.c.l.s8.bf16 %v3772_v62  ;;  %v4539_v0 = vunpack.c.h.s8.bf16 %v3771_v47 }
 0x80b   : > { %6579 = vmatpush1.bf16.msra.mxu1 %v4398_v58  ;;  %v3791_v58 = vld [vmem:[%s11017_s26 + $0x428] sm:$0xff] }
 0x80c   : > { %6743 = vmatpush1.bf16.msra.mxu0 %v4400_v37  ;;  %6580 = vmatprep.subr.bf16.mxu1 %v4419_v33  ;;  %v3793_v37 = vld [vmem:[%s11017_s26 + $0x438] sm:$0xff]  ;;  %v4538_v33 = vunpack.c.h.s8.bf16 %v3770_v61  ;;  %v4559_v8 = vunpack.c.l.s8.bf16 %v3791_v58 }
 0x80d   : > { %6744 = vmatprep.subr.bf16.mxu0 %v4421_v7  ;;  %v4540_v7 = vunpack.c.h.s8.bf16 %v3772_v62  ;;  %v4581_v22 = vunpack.c.h.s8.bf16 %v3793_v37  ;;  %v3851_v62 = vld [vmem:[%s11017_s26 + $0x608] sm:$0xff] }
 0x80f   : > { %6581 = vmatpush1.bf16.msra.mxu1 %v4418_v25  ;;  %v4561_v25 = vunpack.c.l.s8.bf16 %v3793_v37  ;;  %v3850_v37 = vld [vmem:[%s11017_s26 + $0x600] sm:$0xff] }
 0x810   : > { %6745 = vmatpush1.bf16.msra.mxu0 %v4420_v27  ;;  %6582 = vmatprep.subr.bf16.mxu1 %v4439_v35  ;;  %v3792_v27 = vld [vmem:[%s11017_s26 + $0x430] sm:$0xff]  ;;  %v4558_v35 = vunpack.c.l.s8.bf16 %v3790_v17 }
 0x811   : > { %6746 = vmatprep.subr.bf16.mxu0 %v4441_v19  ;;  %v4560_v18 = vunpack.c.l.s8.bf16 %v3792_v27  ;;  %v4579_v19 = vunpack.c.h.s8.bf16 %v3791_v58  ;;  %v4679_v58 = vunpack.c.l.s8.bf16 %v3851_v62 }
 0x813   : > { %6583 = vmatpush1.bf16.msra.mxu1 %v4438_v28  ;;  %v3811_v28 = vld [vmem:[%s11017_s26 + $0x4c8] sm:$0xff] }
 0x814   : > { %6747 = vmatpush1.bf16.msra.mxu0 %v4440_v59  ;;  %6584 = vmatprep.subr.bf16.mxu1 %v4459_v30  ;;  %v3813_v59 = vld [vmem:[%s11017_s26 + $0x4d8] sm:$0xff]  ;;  %v4578_v30 = vunpack.c.h.s8.bf16 %v3790_v17  ;;  %v4599_v13 = vunpack.c.l.s8.bf16 %v3811_v28 }
 0x815   : > { %6748 = vmatprep.subr.bf16.mxu0 %v4461_v40  ;;  %v4580_v40 = vunpack.c.h.s8.bf16 %v3792_v27  ;;  %v4621_v11 = vunpack.c.h.s8.bf16 %v3813_v59 }
 0x817   : > { %6585 = vmatpush1.bf16.msra.mxu1 %v4458_v15  ;;  %v4601_v15 = vunpack.c.l.s8.bf16 %v3813_v59  ;;  %v3870_v59 = vld [vmem:[%s11017_s26 + $0x6a0] sm:$0xff] }
 0x818   : > { %6749 = vmatpush1.bf16.msra.mxu0 %v4460_v42  ;;  %6586 = vmatprep.subr.bf16.mxu1 %v4479_v29  ;;  %v3812_v42 = vld [vmem:[%s11017_s26 + $0x4d0] sm:$0xff]  ;;  %v4598_v29 = vunpack.c.l.s8.bf16 %v3810_v10 }
 0x819   : > { %6750 = vmatprep.subr.bf16.mxu0 %v4481_v43  ;;  %v4600_v39 = vunpack.c.l.s8.bf16 %v3812_v42  ;;  %v4619_v43 = vunpack.c.h.s8.bf16 %v3811_v28 }
 0x81b   : > { %6587 = vmatpush1.bf16.msra.mxu1 %v4478_v44  ;;  %v3831_v44 = vld [vmem:[%s11017_s26 + $0x568] sm:$0xff] }
 0x81c   : > { %6751 = vmatpush1.bf16.msra.mxu0 %v4480_v23  ;;  %6588 = vmatprep.subr.bf16.mxu1 %v4499_v14  ;;  %v3833_v23 = vld [vmem:[%s11017_s26 + $0x578] sm:$0xff]  ;;  %v4618_v14 = vunpack.c.h.s8.bf16 %v3810_v10  ;;  %v4639_v47 = vunpack.c.l.s8.bf16 %v3831_v44 }
 0x81d   : > { %6752 = vmatprep.subr.bf16.mxu0 %v4501_v46  ;;  %v4620_v46 = vunpack.c.h.s8.bf16 %v3812_v42 }
 0x81f   : > { %6589 = vmatpush1.bf16.msra.mxu1 %v4498_v49  ;;  %v4641_v49 = vunpack.c.l.s8.bf16 %v3833_v23 }
 0x820   : > { %6753 = vmatpush1.bf16.msra.mxu0 %v4500_v50  ;;  %6590 = vmatprep.subr.bf16.mxu1 %v4519_v53  ;;  %v3832_v50 = vld [vmem:[%s11017_s26 + $0x570] sm:$0xff]  ;;  %v4638_v53 = vunpack.c.l.s8.bf16 %v3830_v9 }
 0x821   : > { %6754 = vmatprep.subr.bf16.mxu0 %v4521_v57  ;;  %v4640_v61 = vunpack.c.l.s8.bf16 %v3832_v50  ;;  %v4659_v57 = vunpack.c.h.s8.bf16 %v3831_v44 }
 0x823   : > { %6591 = vmatpush1.bf16.msra.mxu1 %v4518_v3  ;;  %v4661_v3 = vunpack.c.h.s8.bf16 %v3833_v23  ;;  %v3890_v23 = vld [vmem:[%s11017_s26 + $0x740] sm:$0xff] }
 0x824   : > { %6755 = vmatpush1.bf16.msra.mxu0 %v4520_v4  ;;  %6592 = vmatprep.subr.bf16.mxu1 %v4539_v0  ;;  %v3853_v4 = vld [vmem:[%s11017_s26 + $0x618] sm:$0xff]  ;;  %v4658_v0 = vunpack.c.h.s8.bf16 %v3830_v9 }
 0x825   : > { %6756 = vmatprep.subr.bf16.mxu0 %v4541_v36  ;;  %v4660_v36 = vunpack.c.h.s8.bf16 %v3832_v50  ;;  %v4701_v27 = vunpack.c.h.s8.bf16 %v3853_v4 }
 0x827   : > { %6593 = vmatpush1.bf16.msra.mxu1 %v4538_v33  ;;  %v4681_v33 = vunpack.c.l.s8.bf16 %v3853_v4  ;;  %v3910_v4 = vld [vmem:[%s11017_s26 + $0x7e0] sm:$0xff] }
 0x828   : > { %6757 = vmatpush1.bf16.msra.mxu0 %v4540_v7  ;;  %6594 = vmatprep.subr.bf16.mxu1 %v4559_v8  ;;  %v3852_v7 = vld [vmem:[%s11017_s26 + $0x610] sm:$0xff]  ;;  %v4678_v8 = vunpack.c.l.s8.bf16 %v3850_v37 }
 0x829   : > { %6758 = vmatprep.subr.bf16.mxu0 %v4561_v25  ;;  %v4680_v17 = vunpack.c.l.s8.bf16 %v3852_v7  ;;  %v4699_v25 = vunpack.c.h.s8.bf16 %v3851_v62 }
 0x82b   : > { %6595 = vmatpush1.bf16.msra.mxu1 %v4558_v35  ;;  %v3871_v35 = vld [vmem:[%s11017_s26 + $0x6a8] sm:$0xff] }
 0x82c   : > { %6759 = vmatpush1.bf16.msra.mxu0 %v4560_v18  ;;  %6596 = vmatprep.subr.bf16.mxu1 %v4579_v19  ;;  %v3873_v18 = vld [vmem:[%s11017_s26 + $0x6b8] sm:$0xff]  ;;  %v4698_v19 = vunpack.c.h.s8.bf16 %v3850_v37  ;;  %v4719_v28 = vunpack.c.l.s8.bf16 %v3871_v35 }
 0x82d   : > { %6760 = vmatprep.subr.bf16.mxu0 %v4581_v22  ;;  %v4700_v22 = vunpack.c.h.s8.bf16 %v3852_v7  ;;  %v4741_v42 = vunpack.c.h.s8.bf16 %v3873_v18 }
 0x82f   : > { %6597 = vmatpush1.bf16.msra.mxu1 %v4578_v30  ;;  %v4721_v30 = vunpack.c.l.s8.bf16 %v3873_v18  ;;  %v3930_v18 = vld [vmem:[%s11017_s26 + $0x880] sm:$0xff] }
 0x830   : > { %6761 = vmatpush1.bf16.msra.mxu0 %v4580_v40  ;;  %6598 = vmatprep.subr.bf16.mxu1 %v4599_v13  ;;  %v3872_v40 = vld [vmem:[%s11017_s26 + $0x6b0] sm:$0xff]  ;;  %v4718_v13 = vunpack.c.l.s8.bf16 %v3870_v59 }
 0x831   : > { %6762 = vmatprep.subr.bf16.mxu0 %v4601_v15  ;;  %v4720_v10 = vunpack.c.l.s8.bf16 %v3872_v40  ;;  %v4739_v15 = vunpack.c.h.s8.bf16 %v3871_v35 }
 0x833   : > { %6599 = vmatpush1.bf16.msra.mxu1 %v4598_v29  ;;  %v3891_v29 = vld [vmem:[%s11017_s26 + $0x748] sm:$0xff] }
 0x834   : > { %6763 = vmatpush1.bf16.msra.mxu0 %v4600_v39  ;;  %6600 = vmatprep.subr.bf16.mxu1 %v4619_v43  ;;  %v3893_v39 = vld [vmem:[%s11017_s26 + $0x758] sm:$0xff]  ;;  %v4738_v43 = vunpack.c.h.s8.bf16 %v3870_v59  ;;  %v4759_v44 = vunpack.c.l.s8.bf16 %v3891_v29 }
 0x835   : > { %6764 = vmatprep.subr.bf16.mxu0 %v4621_v11  ;;  %v4740_v11 = vunpack.c.h.s8.bf16 %v3872_v40  ;;  %v4781_v50 = vunpack.c.h.s8.bf16 %v3893_v39 }
 0x837   : > { %6601 = vmatpush1.bf16.msra.mxu1 %v4618_v14  ;;  %v4761_v14 = vunpack.c.l.s8.bf16 %v3893_v39  ;;  %v3950_v39 = vld [vmem:[%s11017_s26 + $0x920] sm:$0xff] }
 0x838   : > { %6765 = vmatpush1.bf16.msra.mxu0 %v4620_v46  ;;  %6611 = vmatprep.subr.bf16.mxu1 %v4639_v47  ;;  %v3892_v46 = vld [vmem:[%s11017_s26 + $0x750] sm:$0xff]  ;;  %v4758_v47 = vunpack.c.l.s8.bf16 %v3890_v23 }
 0x839   : > { %6775 = vmatprep.subr.bf16.mxu0 %v4641_v49  ;;  %v4760_v9 = vunpack.c.l.s8.bf16 %v3892_v46  ;;  %v4779_v49 = vunpack.c.h.s8.bf16 %v3891_v29  ;;  %v4780_v62 = vunpack.c.h.s8.bf16 %v3892_v46 }
 0x83a   : > { %6603 = vmatmul.mubr.bf16.vlgmr.msra.gmra.mrb[20].mxu1 %v11191_v6 }
 0x83b   : > { %6767 = vmatmul.mubr.bf16.vlgmr.msra.gmra.mrb[32].mxu0 %v11191_v6  ;;  %6612 = vmatpush1.bf16.msra.mxu1 %v4638_v53  ;;  %v3911_v53 = vld [vmem:[%s11017_s26 + $0x7e8] sm:$0xff] }
 0x83c   : > { %6643 = vmatprep.mubr.bf16.mxu1 %v11199_v32  ;;  %6776 = vmatpush1.bf16.msra.mxu0 %v4640_v61  ;;  %v3913_v61 = vld [vmem:[%s11017_s26 + $0x7f8] sm:$0xff] }
 0x83d   : > { %6807 = vmatprep.mubr.bf16.mxu0 %v11199_v32  ;;  %6613 = vmatprep.subr.bf16.mxu1 %v4659_v57  ;;  %v4778_v57 = vunpack.c.h.s8.bf16 %v3890_v23  ;;  %v4821_v7 = vunpack.c.h.s8.bf16 %v3913_v61 }
 0x83e   : > { %6777 = vmatprep.subr.bf16.mxu0 %v4661_v3  ;;  %v4799_v3 = vunpack.c.l.s8.bf16 %v3911_v53 }
 0x83f   : > { %6614 = vmatpush1.bf16.msra.mxu1 %v4658_v0  ;;  %v4801_v0 = vunpack.c.l.s8.bf16 %v3913_v61  ;;  %v3970_v61 = vld [vmem:[%s11017_s26 + $0x9c0] sm:$0xff] }
 0x840   : > { %6778 = vmatpush1.bf16.msra.mxu0 %v4660_v36  ;;  %6615 = vmatprep.subr.bf16.mxu1 %v4679_v58  ;;  %v3912_v36 = vld [vmem:[%s11017_s26 + $0x7f0] sm:$0xff]  ;;  %v4798_v58 = vunpack.c.l.s8.bf16 %v3910_v4 }
 0x841   : > { %6779 = vmatprep.subr.bf16.mxu0 %v4681_v33  ;;  %v4800_v37 = vunpack.c.l.s8.bf16 %v3912_v36  ;;  %v4819_v33 = vunpack.c.h.s8.bf16 %v3911_v53 }
 0x843   : > { %6616 = vmatpush1.bf16.msra.mxu1 %v4678_v8  ;;  %v3931_v8 = vld [vmem:[%s11017_s26 + $0x888] sm:$0xff] }
 0x844   : > { %6780 = vmatpush1.bf16.msra.mxu0 %v4680_v17  ;;  %6617 = vmatprep.subr.bf16.mxu1 %v4699_v25  ;;  %v3933_v17 = vld [vmem:[%s11017_s26 + $0x898] sm:$0xff]  ;;  %v4818_v25 = vunpack.c.h.s8.bf16 %v3910_v4  ;;  %v4839_v35 = vunpack.c.l.s8.bf16 %v3931_v8 }
 0x845   : > { %6781 = vmatprep.subr.bf16.mxu0 %v4701_v27  ;;  %v4820_v27 = vunpack.c.h.s8.bf16 %v3912_v36  ;;  %v4861_v40 = vunpack.c.h.s8.bf16 %v3933_v17 }
 0x847   : > { %6618 = vmatpush1.bf16.msra.mxu1 %v4698_v19  ;;  %v4841_v19 = vunpack.c.l.s8.bf16 %v3933_v17  ;;  %v3990_v17 = vld [vmem:[%s11017_s26 + $0xa60] sm:$0xff] }
 0x848   : > { %6782 = vmatpush1.bf16.msra.mxu0 %v4700_v22  ;;  %6619 = vmatprep.subr.bf16.mxu1 %v4719_v28  ;;  %v3932_v22 = vld [vmem:[%s11017_s26 + $0x890] sm:$0xff]  ;;  %v4838_v28 = vunpack.c.l.s8.bf16 %v3930_v18 }
 0x849   : > { %6783 = vmatprep.subr.bf16.mxu0 %v4721_v30  ;;  %v4840_v59 = vunpack.c.l.s8.bf16 %v3932_v22  ;;  %v4859_v30 = vunpack.c.h.s8.bf16 %v3931_v8 }
 0x84b   : > { %6620 = vmatpush1.bf16.msra.mxu1 %v4718_v13  ;;  %v3951_v13 = vld [vmem:[%s11017_s26 + $0x928] sm:$0xff] }
 0x84c   : > { %6784 = vmatpush1.bf16.msra.mxu0 %v4720_v10  ;;  %6621 = vmatprep.subr.bf16.mxu1 %v4739_v15  ;;  %v3953_v10 = vld [vmem:[%s11017_s26 + $0x938] sm:$0xff]  ;;  %v4858_v15 = vunpack.c.h.s8.bf16 %v3930_v18  ;;  %v4879_v29 = vunpack.c.l.s8.bf16 %v3951_v13 }
 0x84d   : > { %6785 = vmatprep.subr.bf16.mxu0 %v4741_v42  ;;  %v4860_v42 = vunpack.c.h.s8.bf16 %v3932_v22  ;;  %v4901_v46 = vunpack.c.h.s8.bf16 %v3953_v10  ;;  %v4011_v22 = vld [vmem:[%s11017_s26 + $0xb08] sm:$0xff] }
 0x84f   : > { %6622 = vmatpush1.bf16.msra.mxu1 %v4738_v43  ;;  %v4881_v43 = vunpack.c.l.s8.bf16 %v3953_v10  ;;  %v4010_v10 = vld [vmem:[%s11017_s26 + $0xb00] sm:$0xff] }
 0x850   : > { %6786 = vmatpush1.bf16.msra.mxu0 %v4740_v11  ;;  %6623 = vmatprep.subr.bf16.mxu1 %v4759_v44  ;;  %v3952_v11 = vld [vmem:[%s11017_s26 + $0x930] sm:$0xff]  ;;  %v4878_v44 = vunpack.c.l.s8.bf16 %v3950_v39 }
 0x851   : > { %6787 = vmatprep.subr.bf16.mxu0 %v4761_v14  ;;  %v4880_v23 = vunpack.c.l.s8.bf16 %v3952_v11  ;;  %v4899_v14 = vunpack.c.h.s8.bf16 %v3951_v13  ;;  %v4999_v13 = vunpack.c.l.s8.bf16 %v4011_v22 }
 0x853   : > { %6624 = vmatpush1.bf16.msra.mxu1 %v4758_v47  ;;  %v3971_v47 = vld [vmem:[%s11017_s26 + $0x9c8] sm:$0xff] }
 0x854   : > { %6788 = vmatpush1.bf16.msra.mxu0 %v4760_v9  ;;  %6625 = vmatprep.subr.bf16.mxu1 %v4779_v49  ;;  %v3973_v9 = vld [vmem:[%s11017_s26 + $0x9d8] sm:$0xff]  ;;  %v4898_v49 = vunpack.c.h.s8.bf16 %v3950_v39  ;;  %v4919_v53 = vunpack.c.l.s8.bf16 %v3971_v47 }
 0x855   : > { %6789 = vmatprep.subr.bf16.mxu0 %v4781_v50  ;;  %v4900_v50 = vunpack.c.h.s8.bf16 %v3952_v11  ;;  %v4941_v36 = vunpack.c.h.s8.bf16 %v3973_v9 }
 0x857   : > { %6626 = vmatpush1.bf16.msra.mxu1 %v4778_v57  ;;  %v4921_v57 = vunpack.c.l.s8.bf16 %v3973_v9  ;;  %v4030_v9 = vld [vmem:[%s11017_s26 + $0xba0] sm:$0xff] }
 0x858   : > { %6790 = vmatpush1.bf16.msra.mxu0 %v4780_v62  ;;  %6627 = vmatprep.subr.bf16.mxu1 %v4799_v3  ;;  %v3972_v62 = vld [vmem:[%s11017_s26 + $0x9d0] sm:$0xff]  ;;  %v4918_v3 = vunpack.c.l.s8.bf16 %v3970_v61 }
 0x859   : > { %6791 = vmatprep.subr.bf16.mxu0 %v4801_v0  ;;  %v4920_v4 = vunpack.c.l.s8.bf16 %v3972_v62  ;;  %v4939_v0 = vunpack.c.h.s8.bf16 %v3971_v47 }
 0x85b   : > { %6628 = vmatpush1.bf16.msra.mxu1 %v4798_v58  ;;  %v3991_v58 = vld [vmem:[%s11017_s26 + $0xa68] sm:$0xff] }
 0x85c   : > { %6792 = vmatpush1.bf16.msra.mxu0 %v4800_v37  ;;  %6629 = vmatprep.subr.bf16.mxu1 %v4819_v33  ;;  %v3993_v37 = vld [vmem:[%s11017_s26 + $0xa78] sm:$0xff]  ;;  %v4938_v33 = vunpack.c.h.s8.bf16 %v3970_v61  ;;  %v4959_v8 = vunpack.c.l.s8.bf16 %v3991_v58 }
 0x85d   : > { %6793 = vmatprep.subr.bf16.mxu0 %v4821_v7  ;;  %v4940_v7 = vunpack.c.h.s8.bf16 %v3972_v62 }
 0x85f   : > { %6630 = vmatpush1.bf16.msra.mxu1 %v4818_v25  ;;  %v4961_v25 = vunpack.c.l.s8.bf16 %v3993_v37 }
 0x860   : > { %6794 = vmatpush1.bf16.msra.mxu0 %v4820_v27  ;;  %6631 = vmatprep.subr.bf16.mxu1 %v4839_v35  ;;  %v3992_v27 = vld [vmem:[%s11017_s26 + $0xa70] sm:$0xff]  ;;  %v4958_v35 = vunpack.c.l.s8.bf16 %v3990_v17 }
 0x861   : > { %6795 = vmatprep.subr.bf16.mxu0 %v4841_v19  ;;  %v4960_v18 = vunpack.c.l.s8.bf16 %v3992_v27  ;;  %v4979_v19 = vunpack.c.h.s8.bf16 %v3991_v58 }
 0x863   : > { %6632 = vmatpush1.bf16.msra.mxu1 %v4838_v28  ;;  %v4981_v28 = vunpack.c.h.s8.bf16 %v3993_v37  ;;  %v4050_v37 = vld [vmem:[%s11017_s26 + $0xc40] sm:$0xff] }
 0x864   : > { %6796 = vmatpush1.bf16.msra.mxu0 %v4840_v59  ;;  %6633 = vmatprep.subr.bf16.mxu1 %v4859_v30  ;;  %v4013_v59 = vld [vmem:[%s11017_s26 + $0xb18] sm:$0xff]  ;;  %v4978_v30 = vunpack.c.h.s8.bf16 %v3990_v17 }
 0x865   : > { %6797 = vmatprep.subr.bf16.mxu0 %v4861_v40  ;;  %v4980_v40 = vunpack.c.h.s8.bf16 %v3992_v27  ;;  %v5021_v11 = vunpack.c.h.s8.bf16 %v4013_v59 }
 0x867   : > { %6634 = vmatpush1.bf16.msra.mxu1 %v4858_v15  ;;  %v5001_v15 = vunpack.c.l.s8.bf16 %v4013_v59  ;;  %v4070_v59 = vld [vmem:[%s11017_s26 + $0xce0] sm:$0xff] }
 0x868   : > { %6798 = vmatpush1.bf16.msra.mxu0 %v4860_v42  ;;  %6635 = vmatprep.subr.bf16.mxu1 %v4879_v29  ;;  %v4012_v42 = vld [vmem:[%s11017_s26 + $0xb10] sm:$0xff]  ;;  %v4998_v29 = vunpack.c.l.s8.bf16 %v4010_v10 }
 0x869   : > { %6799 = vmatprep.subr.bf16.mxu0 %v4881_v43  ;;  %v5000_v39 = vunpack.c.l.s8.bf16 %v4012_v42  ;;  %v5019_v43 = vunpack.c.h.s8.bf16 %v4011_v22 }
 0x86b   : > { %6636 = vmatpush1.bf16.msra.mxu1 %v4878_v44  ;;  %v4031_v44 = vld [vmem:[%s11017_s26 + $0xba8] sm:$0xff] }
 0x86c   : > { %6800 = vmatpush1.bf16.msra.mxu0 %v4880_v23  ;;  %6637 = vmatprep.subr.bf16.mxu1 %v4899_v14  ;;  %v4033_v23 = vld [vmem:[%s11017_s26 + $0xbb8] sm:$0xff]  ;;  %v5018_v14 = vunpack.c.h.s8.bf16 %v4010_v10  ;;  %v5039_v47 = vunpack.c.l.s8.bf16 %v4031_v44 }
 0x86d   : > { %6801 = vmatprep.subr.bf16.mxu0 %v4901_v46  ;;  %v5020_v46 = vunpack.c.h.s8.bf16 %v4012_v42  ;;  %v5061_v62 = vunpack.c.h.s8.bf16 %v4033_v23 }
 0x86f   : > { %6638 = vmatpush1.bf16.msra.mxu1 %v4898_v49  ;;  %v5041_v49 = vunpack.c.l.s8.bf16 %v4033_v23  ;;  %v4090_v23 = vld [vmem:[%s11017_s26 + $0xd80] sm:$0xff] }
 0x870   : > { %6802 = vmatpush1.bf16.msra.mxu0 %v4900_v50  ;;  %6639 = vmatprep.subr.bf16.mxu1 %v4919_v53  ;;  %v4032_v50 = vld [vmem:[%s11017_s26 + $0xbb0] sm:$0xff]  ;;  %v5038_v53 = vunpack.c.l.s8.bf16 %v4030_v9 }
 0x871   : > { %6803 = vmatprep.subr.bf16.mxu0 %v4921_v57  ;;  %v5040_v61 = vunpack.c.l.s8.bf16 %v4032_v50  ;;  %v5059_v57 = vunpack.c.h.s8.bf16 %v4031_v44 }
 0x873   : > { %6640 = vmatpush1.bf16.msra.mxu1 %v4918_v3  ;;  %v4051_v3 = vld [vmem:[%s11017_s26 + $0xc48] sm:$0xff] }
 0x874   : > { %6804 = vmatpush1.bf16.msra.mxu0 %v4920_v4  ;;  %6641 = vmatprep.subr.bf16.mxu1 %v4939_v0  ;;  %v4053_v4 = vld [vmem:[%s11017_s26 + $0xc58] sm:$0xff]  ;;  %v5058_v0 = vunpack.c.h.s8.bf16 %v4030_v9  ;;  %v5079_v58 = vunpack.c.l.s8.bf16 %v4051_v3 }
 0x875   : > { %6805 = vmatprep.subr.bf16.mxu0 %v4941_v36  ;;  %v5060_v36 = vunpack.c.h.s8.bf16 %v4032_v50  ;;  %v5101_v27 = vunpack.c.h.s8.bf16 %v4053_v4 }
 0x877   : > { %6642 = vmatpush1.bf16.msra.mxu1 %v4938_v33  ;;  %v5081_v33 = vunpack.c.l.s8.bf16 %v4053_v4  ;;  %v4110_v4 = vld [vmem:[%s11017_s26 + $0xe20] sm:$0xff] }
 0x878   : > { %6806 = vmatpush1.bf16.msra.mxu0 %v4940_v7  ;;  %6652 = vmatprep.subr.bf16.mxu1 %v4959_v8  ;;  %v4052_v7 = vld [vmem:[%s11017_s26 + $0xc50] sm:$0xff]  ;;  %v5078_v8 = vunpack.c.l.s8.bf16 %v4050_v37 }
 0x879   : > { %6816 = vmatprep.subr.bf16.mxu0 %v4961_v25  ;;  %v5080_v17 = vunpack.c.l.s8.bf16 %v4052_v7  ;;  %v5099_v25 = vunpack.c.h.s8.bf16 %v4051_v3  ;;  %v5100_v22 = vunpack.c.h.s8.bf16 %v4052_v7 }
 0x87a   : > { %6644 = vmatmul.mubr.bf16.vlgmr.msra.gmra.mrb[20].mxu1 %v11240_v12 }
 0x87b   : > { %6808 = vmatmul.mubr.bf16.vlgmr.msra.gmra.mrb[32].mxu0 %v11240_v12  ;;  %6653 = vmatpush1.bf16.msra.mxu1 %v4958_v35  ;;  %v4071_v35 = vld [vmem:[%s11017_s26 + $0xce8] sm:$0xff] }
 0x87c   : > { %6684 = vmatprep.mubr.bf16.mxu1 %v11336_v52  ;;  %6817 = vmatpush1.bf16.msra.mxu0 %v4960_v18  ;;  %v4073_v18 = vld [vmem:[%s11017_s26 + $0xcf8] sm:$0xff] }
 0x87d   : > { %6848 = vmatprep.mubr.bf16.mxu0 %v11336_v52  ;;  %6654 = vmatprep.subr.bf16.mxu1 %v4979_v19  ;;  %v5098_v19 = vunpack.c.h.s8.bf16 %v4050_v37  ;;  %v5141_v42 = vunpack.c.h.s8.bf16 %v4073_v18 }
 0x87e   : > { %6818 = vmatprep.subr.bf16.mxu0 %v4981_v28  ;;  %v5119_v28 = vunpack.c.l.s8.bf16 %v4071_v35 }
 0x87f   : > { %6655 = vmatpush1.bf16.msra.mxu1 %v4978_v30  ;;  %v5121_v30 = vunpack.c.l.s8.bf16 %v4073_v18  ;;  %v4130_v18 = vld [vmem:[%s11017_s26 + $0xec0] sm:$0xff] }
 0x880   : > { %6819 = vmatpush1.bf16.msra.mxu0 %v4980_v40  ;;  %6656 = vmatprep.subr.bf16.mxu1 %v4999_v13  ;;  %v4072_v40 = vld [vmem:[%s11017_s26 + $0xcf0] sm:$0xff]  ;;  %v5118_v13 = vunpack.c.l.s8.bf16 %v4070_v59 }
 0x881   : > { %6820 = vmatprep.subr.bf16.mxu0 %v5001_v15  ;;  %v5120_v10 = vunpack.c.l.s8.bf16 %v4072_v40  ;;  %v5139_v15 = vunpack.c.h.s8.bf16 %v4071_v35 }
 0x883   : > { %6657 = vmatpush1.bf16.msra.mxu1 %v4998_v29  ;;  %v4091_v29 = vld [vmem:[%s11017_s26 + $0xd88] sm:$0xff] }
 0x884   : > { %6821 = vmatpush1.bf16.msra.mxu0 %v5000_v39  ;;  %6658 = vmatprep.subr.bf16.mxu1 %v5019_v43  ;;  %v4093_v39 = vld [vmem:[%s11017_s26 + $0xd98] sm:$0xff]  ;;  %v5138_v43 = vunpack.c.h.s8.bf16 %v4070_v59  ;;  %v5159_v44 = vunpack.c.l.s8.bf16 %v4091_v29 }
 0x885   : > { %6822 = vmatprep.subr.bf16.mxu0 %v5021_v11  ;;  %v5140_v11 = vunpack.c.h.s8.bf16 %v4072_v40  ;;  %v5181_v50 = vunpack.c.h.s8.bf16 %v4093_v39 }
 0x887   : > { %6659 = vmatpush1.bf16.msra.mxu1 %v5018_v14  ;;  %v5161_v14 = vunpack.c.l.s8.bf16 %v4093_v39  ;;  %v4150_v39 = vld [vmem:[%s11017_s26 + $0xf60] sm:$0xff] }
 0x888   : > { %6823 = vmatpush1.bf16.msra.mxu0 %v5020_v46  ;;  %6660 = vmatprep.subr.bf16.mxu1 %v5039_v47  ;;  %v4092_v46 = vld [vmem:[%s11017_s26 + $0xd90] sm:$0xff]  ;;  %v5158_v47 = vunpack.c.l.s8.bf16 %v4090_v23 }
 0x889   : > { %6824 = vmatprep.subr.bf16.mxu0 %v5041_v49  ;;  %v5160_v9 = vunpack.c.l.s8.bf16 %v4092_v46  ;;  %v5179_v49 = vunpack.c.h.s8.bf16 %v4091_v29 }
 0x88b   : > { %6661 = vmatpush1.bf16.msra.mxu1 %v5038_v53  ;;  %v4111_v53 = vld [vmem:[%s11017_s26 + $0xe28] sm:$0xff] }
 0x88c   : > { %6825 = vmatpush1.bf16.msra.mxu0 %v5040_v61  ;;  %6662 = vmatprep.subr.bf16.mxu1 %v5059_v57  ;;  %v4113_v61 = vld [vmem:[%s11017_s26 + $0xe38] sm:$0xff]  ;;  %v5178_v57 = vunpack.c.h.s8.bf16 %v4090_v23  ;;  %v5199_v3 = vunpack.c.l.s8.bf16 %v4111_v53 }
 0x88d   : > { %6826 = vmatprep.subr.bf16.mxu0 %v5061_v62  ;;  %v5180_v62 = vunpack.c.h.s8.bf16 %v4092_v46  ;;  %v5221_v7 = vunpack.c.h.s8.bf16 %v4113_v61  ;;  %v4171_v46 = vld [vmem:[%s11017_s26 + $0x1008] sm:$0xff] }
 0x88f   : > { %6663 = vmatpush1.bf16.msra.mxu1 %v5058_v0  ;;  %v5201_v0 = vunpack.c.l.s8.bf16 %v4113_v61  ;;  %v4170_v61 = vld [vmem:[%s11017_s26 + $0x1000] sm:$0xff] }
 0x890   : > { %6827 = vmatpush1.bf16.msra.mxu0 %v5060_v36  ;;  %6664 = vmatprep.subr.bf16.mxu1 %v5079_v58  ;;  %v4112_v36 = vld [vmem:[%s11017_s26 + $0xe30] sm:$0xff]  ;;  %v5198_v58 = vunpack.c.l.s8.bf16 %v4110_v4 }
 0x891   : > { %6828 = vmatprep.subr.bf16.mxu0 %v5081_v33  ;;  %v5200_v37 = vunpack.c.l.s8.bf16 %v4112_v36  ;;  %v5219_v33 = vunpack.c.h.s8.bf16 %v4111_v53  ;;  %v5319_v53 = vunpack.c.l.s8.bf16 %v4171_v46 }
 0x893   : > { %6665 = vmatpush1.bf16.msra.mxu1 %v5078_v8  ;;  %v4131_v8 = vld [vmem:[%s11017_s26 + $0xec8] sm:$0xff] }
 0x894   : > { %6829 = vmatpush1.bf16.msra.mxu0 %v5080_v17  ;;  %6666 = vmatprep.subr.bf16.mxu1 %v5099_v25  ;;  %v4133_v17 = vld [vmem:[%s11017_s26 + $0xed8] sm:$0xff]  ;;  %v5218_v25 = vunpack.c.h.s8.bf16 %v4110_v4  ;;  %v5239_v35 = vunpack.c.l.s8.bf16 %v4131_v8 }
 0x895   : > { %6830 = vmatprep.subr.bf16.mxu0 %v5101_v27  ;;  %v5220_v27 = vunpack.c.h.s8.bf16 %v4112_v36  ;;  %v5261_v40 = vunpack.c.h.s8.bf16 %v4133_v17 }
 0x897   : > { %6667 = vmatpush1.bf16.msra.mxu1 %v5098_v19  ;;  %v5241_v19 = vunpack.c.l.s8.bf16 %v4133_v17  ;;  %v4190_v17 = vld [vmem:[%s11017_s26 + $0x10a0] sm:$0xff] }
 0x898   : > { %6831 = vmatpush1.bf16.msra.mxu0 %v5100_v22  ;;  %6668 = vmatprep.subr.bf16.mxu1 %v5119_v28  ;;  %v4132_v22 = vld [vmem:[%s11017_s26 + $0xed0] sm:$0xff]  ;;  %v5238_v28 = vunpack.c.l.s8.bf16 %v4130_v18 }
 0x899   : > { %6832 = vmatprep.subr.bf16.mxu0 %v5121_v30  ;;  %v5240_v59 = vunpack.c.l.s8.bf16 %v4132_v22  ;;  %v5259_v30 = vunpack.c.h.s8.bf16 %v4131_v8 }
 0x89b   : > { %6669 = vmatpush1.bf16.msra.mxu1 %v5118_v13  ;;  %v4151_v13 = vld [vmem:[%s11017_s26 + $0xf68] sm:$0xff] }
 0x89c   : > { %6833 = vmatpush1.bf16.msra.mxu0 %v5120_v10  ;;  %6670 = vmatprep.subr.bf16.mxu1 %v5139_v15  ;;  %v4153_v10 = vld [vmem:[%s11017_s26 + $0xf78] sm:$0xff]  ;;  %v5258_v15 = vunpack.c.h.s8.bf16 %v4130_v18  ;;  %v5279_v29 = vunpack.c.l.s8.bf16 %v4151_v13 }
 0x89d   : > { %6834 = vmatprep.subr.bf16.mxu0 %v5141_v42  ;;  %v5260_v42 = vunpack.c.h.s8.bf16 %v4132_v22 }
 0x89f   : > { %6671 = vmatpush1.bf16.msra.mxu1 %v5138_v43  ;;  %v5281_v43 = vunpack.c.l.s8.bf16 %v4153_v10 }
 0x8a0   : > { %6835 = vmatpush1.bf16.msra.mxu0 %v5140_v11  ;;  %6672 = vmatprep.subr.bf16.mxu1 %v5159_v44  ;;  %v4152_v11 = vld [vmem:[%s11017_s26 + $0xf70] sm:$0xff]  ;;  %v5278_v44 = vunpack.c.l.s8.bf16 %v4150_v39 }
 0x8a1   : > { %6836 = vmatprep.subr.bf16.mxu0 %v5161_v14  ;;  %v5280_v23 = vunpack.c.l.s8.bf16 %v4152_v11  ;;  %v5299_v14 = vunpack.c.h.s8.bf16 %v4151_v13 }
 0x8a3   : > { %6673 = vmatpush1.bf16.msra.mxu1 %v5158_v47  ;;  %v5301_v47 = vunpack.c.h.s8.bf16 %v4153_v10  ;;  %v4210_v10 = vld [vmem:[%s11017_s26 + $0x1140] sm:$0xff] }
 0x8a4   : > { %6837 = vmatpush1.bf16.msra.mxu0 %v5160_v9  ;;  %6674 = vmatprep.subr.bf16.mxu1 %v5179_v49  ;;  %v4173_v9 = vld [vmem:[%s11017_s26 + $0x1018] sm:$0xff]  ;;  %v5298_v49 = vunpack.c.h.s8.bf16 %v4150_v39 }
 0x8a5   : > { %6838 = vmatprep.subr.bf16.mxu0 %v5181_v50  ;;  %v5300_v50 = vunpack.c.h.s8.bf16 %v4152_v11  ;;  %v5341_v36 = vunpack.c.h.s8.bf16 %v4173_v9 }
 0x8a7   : > { %6675 = vmatpush1.bf16.msra.mxu1 %v5178_v57  ;;  %v5321_v57 = vunpack.c.l.s8.bf16 %v4173_v9 }
 0x8a8   : > { %6839 = vmatpush1.bf16.msra.mxu0 %v5180_v62  ;;  %6676 = vmatprep.subr.bf16.mxu1 %v5199_v3  ;;  %v4172_v62 = vld [vmem:[%s11017_s26 + $0x1010] sm:$0xff]  ;;  %v5318_v3 = vunpack.c.l.s8.bf16 %v4170_v61 }
 0x8a9   : > { %6840 = vmatprep.subr.bf16.mxu0 %v5201_v0  ;;  %v5320_v4 = vunpack.c.l.s8.bf16 %v4172_v62  ;;  %v5339_v0 = vunpack.c.h.s8.bf16 %v4171_v46 }
 0x8ab   : > { %6677 = vmatpush1.bf16.msra.mxu1 %v5198_v58  ;;  %v4191_v58 = vld [vmem:[%s11017_s26 + $0x10a8] sm:$0xff] }
 0x8ac   : > { %6841 = vmatpush1.bf16.msra.mxu0 %v5200_v37  ;;  %6678 = vmatprep.subr.bf16.mxu1 %v5219_v33  ;;  %v4193_v37 = vld [vmem:[%s11017_s26 + $0x10b8] sm:$0xff]  ;;  %v5338_v33 = vunpack.c.h.s8.bf16 %v4170_v61  ;;  %v5359_v8 = vunpack.c.l.s8.bf16 %v4191_v58 }
 0x8ad   : > { %6842 = vmatprep.subr.bf16.mxu0 %v5221_v7  ;;  %v5340_v7 = vunpack.c.h.s8.bf16 %v4172_v62  ;;  %v5381_v22 = vunpack.c.h.s8.bf16 %v4193_v37  ;;  %v4233_v61 = vld [vmem:[%s11017_s26 + $0x11f8] sm:$0xff] }
 0x8af   : > { %6679 = vmatpush1.bf16.msra.mxu1 %v5218_v25  ;;  %v5361_v25 = vunpack.c.l.s8.bf16 %v4193_v37 }
 0x8b0   : > { %6843 = vmatpush1.bf16.msra.mxu0 %v5220_v27  ;;  %6680 = vmatprep.subr.bf16.mxu1 %v5239_v35  ;;  %v4192_v27 = vld [vmem:[%s11017_s26 + $0x10b0] sm:$0xff]  ;;  %v5358_v35 = vunpack.c.l.s8.bf16 %v4190_v17 }
 0x8b1   : > { %6844 = vmatprep.subr.bf16.mxu0 %v5241_v19  ;;  %v5360_v18 = vunpack.c.l.s8.bf16 %v4192_v27  ;;  %v5379_v19 = vunpack.c.h.s8.bf16 %v4191_v58 }
 0x8b3   : > { %6681 = vmatpush1.bf16.msra.mxu1 %v5238_v28  ;;  %v4211_v28 = vld [vmem:[%s11017_s26 + $0x1148] sm:$0xff] }
 0x8b4   : > { %6845 = vmatpush1.bf16.msra.mxu0 %v5240_v59  ;;  %6682 = vmatprep.subr.bf16.mxu1 %v5259_v30  ;;  %v4213_v59 = vld [vmem:[%s11017_s26 + $0x1158] sm:$0xff]  ;;  %v5378_v30 = vunpack.c.h.s8.bf16 %v4190_v17  ;;  %v5399_v13 = vunpack.c.l.s8.bf16 %v4211_v28  ;;  %v5419_v9 = vunpack.c.h.s8.bf16 %v4211_v28 }
 0x8b5   : > { %6846 = vmatprep.subr.bf16.mxu0 %v5261_v40  ;;  %v5380_v40 = vunpack.c.h.s8.bf16 %v4192_v27  ;;  %v4253_v17 = vld [vmem:[%s11017_s26 + $0x1298] sm:$0xff] }
 0x8b7   : > { %6683 = vmatpush1.bf16.msra.mxu1 %v5258_v15 }
 0x8b8   : > { %6847 = vmatpush1.bf16.msra.mxu0 %v5260_v42  ;;  %6693 = vmatprep.subr.bf16.mxu1 %v5279_v29  ;;  %v5401_v42 = vunpack.c.l.s8.bf16 %v4213_v59  ;;  %v4212_v29 = vld [vmem:[%s11017_s26 + $0x1150] sm:$0xff] }
 0x8b9   : > { %6857 = vmatprep.subr.bf16.mxu0 %v5281_v43  ;;  %v5420_v62 = vunpack.c.h.s8.bf16 %v4212_v29 }
 0x8ba   : > { %6685 = vmatmul.mubr.bf16.vlgmr.msra.gmra.mrb[20].mxu1 %v11338_v54 }
 0x8bb   : > { %6849 = vmatmul.mubr.bf16.vlgmr.msra.gmra.mrb[32].mxu0 %v11338_v54  ;;  %6694 = vmatpush1.bf16.msra.mxu1 %v5278_v44 }
 0x8bc   : > { %6725 = vmatprep.mubr.bf16.mxu1 %v11344_v1  ;;  %6858 = vmatpush1.bf16.msra.mxu0 %v5280_v23  ;;  %v5398_v23 = vunpack.c.l.s8.bf16 %v4210_v10 }
 0x8bd   : > { %6889 = vmatprep.mubr.bf16.mxu0 %v11344_v1  ;;  %6695 = vmatprep.subr.bf16.mxu1 %v5299_v14 }
 0x8be   : > { %6859 = vmatprep.subr.bf16.mxu0 %v5301_v47  ;;  %v5400_v47 = vunpack.c.l.s8.bf16 %v4212_v29 }
 0x8bf   : > { %6696 = vmatpush1.bf16.msra.mxu1 %v5298_v49 }
 0x8c0   : > { %6860 = vmatpush1.bf16.msra.mxu0 %v5300_v50  ;;  %6697 = vmatprep.subr.bf16.mxu1 %v5319_v53  ;;  %v5421_v50 = vunpack.c.h.s8.bf16 %v4213_v59  ;;  %v4231_v53 = vld [vmem:[%s11017_s26 + $0x11e8] sm:$0xff] }
 0x8c1   : > { %6861 = vmatprep.subr.bf16.mxu0 %v5321_v57  ;;  %v5418_v57 = vunpack.c.h.s8.bf16 %v4210_v10  ;;  %v4273_v10 = vld [vmem:[%s11017_s26 + $0x1338] sm:$0xff] }
 0x8c3   : > { %6698 = vmatpush1.bf16.msra.mxu1 %v5318_v3  ;;  %v5439_v3 = vunpack.c.l.s8.bf16 %v4231_v53 }
 0x8c4   : > { %6862 = vmatpush1.bf16.msra.mxu0 %v5320_v4  ;;  %6699 = vmatprep.subr.bf16.mxu1 %v5339_v0  ;;  %v4230_v4 = vld [vmem:[%s11017_s26 + $0x11e0] sm:$0xff]  ;;  %v5441_v0 = vunpack.c.l.s8.bf16 %v4233_v61 }
 0x8c5   : > { %6863 = vmatprep.subr.bf16.mxu0 %v5341_v36  ;;  %v4232_v36 = vld [vmem:[%s11017_s26 + $0x11f0] sm:$0xff]  ;;  %v5438_v58 = vunpack.c.l.s8.bf16 %v4230_v4 }
 0x8c6   : > { %v5440_v37 = vunpack.c.l.s8.bf16 %v4232_v36  ;;  %v5460_v27 = vunpack.c.h.s8.bf16 %v4232_v36  ;;  %v4292_v36 = vld [vmem:[%s11017_s26 + $0x13d0] sm:$0xff] }
 0x8c7   : > { %6700 = vmatpush1.bf16.msra.mxu1 %v5338_v33  ;;  %v5459_v33 = vunpack.c.h.s8.bf16 %v4231_v53  ;;  %v4291_v53 = vld [vmem:[%s11017_s26 + $0x13c8] sm:$0xff] }
 0x8c8   : > { %6864 = vmatpush1.bf16.msra.mxu0 %v5340_v7  ;;  %6701 = vmatprep.subr.bf16.mxu1 %v5359_v8  ;;  %v5461_v7 = vunpack.c.h.s8.bf16 %v4233_v61  ;;  %v4251_v8 = vld [vmem:[%s11017_s26 + $0x1288] sm:$0xff]  ;;  %v4293_v61 = vld [vmem:[%s11017_s26 + $0x13d8] sm:$0xff] }
 0x8c9   : > { %6865 = vmatprep.subr.bf16.mxu0 %v5361_v25  ;;  %v5458_v25 = vunpack.c.h.s8.bf16 %v4230_v4  ;;  %v4290_v4 = vld [vmem:[%s11017_s26 + $0x13c0] sm:$0xff] }
 0x8cb   : > { %6702 = vmatpush1.bf16.msra.mxu1 %v5358_v35  ;;  %v5479_v35 = vunpack.c.l.s8.bf16 %v4251_v8 }
 0x8cc   : > { %6866 = vmatpush1.bf16.msra.mxu0 %v5360_v18  ;;  %6703 = vmatprep.subr.bf16.mxu1 %v5379_v19  ;;  %v4250_v18 = vld [vmem:[%s11017_s26 + $0x1280] sm:$0xff]  ;;  %v5481_v19 = vunpack.c.l.s8.bf16 %v4253_v17 }
 0x8cd   : > { %v11815_v15 = vpop.f32.mrb[16].mxu1  ;;  %6867 = vmatprep.subr.bf16.mxu0 %v5381_v22  ;;  %v4252_v22 = vld [vmem:[%s11017_s26 + $0x1290] sm:$0xff]  ;;  %v5478_v28 = vunpack.c.l.s8.bf16 %v4250_v18 }
 0x8ce   : > { %v11818_v39 = vpop.f32.mrb[28].mxu0  ;;  %v11820_v43 = vpop.f32.mrb[17].mxu1  ;;  %v5480_v59 = vunpack.c.l.s8.bf16 %v4252_v22  ;;  %v5500_v29 = vunpack.c.h.s8.bf16 %v4252_v22  ;;  %v3676_v22 = vld [vmem:[%s11017_s26 + $0x90] sm:$0xff] }
 0x8cf   : > { %v11822_v11 = vpop.f32.mrb[29].mxu0  ;;  %v6403_v44 = vpop.f32.mrb[18].mxu1  ;;  %6704 = vmatpush1.bf16.msra.mxu1 %v5378_v30  ;;  %v5499_v30 = vunpack.c.h.s8.bf16 %v4251_v8  ;;  %v3675_v8 = vld [vmem:[%s11017_s26 + $0x88] sm:$0xff] }
 0x8d0   : > { %v6567_v14 = vpop.f32.mrb[30].mxu0  ;;  %6868 = vmatpush1.bf16.msra.mxu0 %v5380_v40  ;;  %v6404_v46 = vpop.f32.mrb[19].mxu1  ;;  %6705 = vmatprep.subr.bf16.mxu1 %v5399_v13  ;;  %v5501_v40 = vunpack.c.h.s8.bf16 %v4253_v17  ;;  %v4271_v13 = vld [vmem:[%s11017_s26 + $0x1328] sm:$0xff]  ;;  %v3677_v17 = vld [vmem:[%s11017_s26 + $0x98] sm:$0xff] }
 0x8d1   : > { %v6568_v49 = vpop.f32.mrb[31].mxu0  ;;  %6869 = vmatprep.subr.bf16.mxu0 %v5401_v42  ;;  %v5498_v42 = vunpack.c.h.s8.bf16 %v4250_v18  ;;  %v5519_v44 = vunpack.c.l.s8.bf16 %v4271_v13  ;;  %v5521_v14 = vunpack.c.l.s8.bf16 %v4273_v10  ;;  %v4272_v46 = vld [vmem:[%s11017_s26 + $0x1330] sm:$0xff]  ;;  %v3674_v18 = vld [vmem:[%s11017_s26 + $0x80] sm:$0xff] }
 0x8d2   : > { %v5539_v49 = vunpack.c.h.s8.bf16 %v4271_v13  ;;  %v4345_v13 = vunpack.c.h.s8.bf16 %v3677_v17 }
 0x8d3   : > { %6706 = vmatpush1.bf16.msra.mxu1 %v5398_v23  ;;  %v4270_v23 = vld [vmem:[%s11017_s26 + $0x1320] sm:$0xff] }
 0x8d4   : > { %6870 = vmatpush1.bf16.msra.mxu0 %v5400_v47  ;;  %6707 = vmatprep.subr.bf16.mxu1 %v5419_v9  ;;  %v5518_v47 = vunpack.c.l.s8.bf16 %v4270_v23  ;;  %v5520_v9 = vunpack.c.l.s8.bf16 %v4272_v46 }
 0x8d5   : > { %6871 = vmatprep.subr.bf16.mxu0 %v5421_v50  ;;  %v5541_v50 = vunpack.c.h.s8.bf16 %v4273_v10  ;;  %v3697_v10 = vld [vmem:[%s11017_s26 + $0x138] sm:$0xff] }
 0x8d7   : > { %6708 = vmatpush1.bf16.msra.mxu1 %v5418_v57  ;;  %v5538_v57 = vunpack.c.h.s8.bf16 %v4270_v23  ;;  %v3694_v23 = vld [vmem:[%s11017_s26 + $0x120] sm:$0xff] }
 0x8d8   : > { %6872 = vmatpush1.bf16.msra.mxu0 %v5420_v62  ;;  %6709 = vmatprep.subr.bf16.mxu1 %v5439_v3  ;;  %v5540_v62 = vunpack.c.h.s8.bf16 %v4272_v46  ;;  %v5559_v3 = vunpack.c.l.s8.bf16 %v4291_v53  ;;  %v3696_v46 = vld [vmem:[%s11017_s26 + $0x130] sm:$0xff] }
 0x8d9   : > { %6873 = vmatprep.subr.bf16.mxu0 %v5441_v0  ;;  %v5561_v0 = vunpack.c.l.s8.bf16 %v4293_v61 }
 0x8db   : > { %6710 = vmatpush1.bf16.msra.mxu1 %v5438_v58  ;;  %v5558_v58 = vunpack.c.l.s8.bf16 %v4290_v4 }
 0x8dc   : > { %6874 = vmatpush1.bf16.msra.mxu0 %v5440_v37  ;;  %6711 = vmatprep.subr.bf16.mxu1 %v5459_v33  ;;  %v5560_v37 = vunpack.c.l.s8.bf16 %v4292_v36  ;;  %v5579_v33 = vunpack.c.h.s8.bf16 %v4291_v53  ;;  %v3715_v53 = vld [vmem:[%s11017_s26 + $0x1c8] sm:$0xff] }
 0x8dd   : > { %6875 = vmatprep.subr.bf16.mxu0 %v5461_v7  ;;  %v5581_v7 = vunpack.c.h.s8.bf16 %v4293_v61  ;;  %v3717_v61 = vld [vmem:[%s11017_s26 + $0x1d8] sm:$0xff] }
 0x8df   : > { %6712 = vmatpush1.bf16.msra.mxu1 %v5458_v25  ;;  %v5578_v25 = vunpack.c.h.s8.bf16 %v4290_v4  ;;  %v4405_v4 = vunpack.c.l.s8.bf16 %v3717_v61 }
 0x8e0   : > { %6876 = vmatpush1.bf16.msra.mxu0 %v5460_v27  ;;  %6713 = vmatprep.subr.bf16.mxu1 %v5479_v35  ;;  %v5580_v27 = vunpack.c.h.s8.bf16 %v4292_v36  ;;  %v4323_v35 = vunpack.c.l.s8.bf16 %v3675_v8 }
 0x8e1   : > { %6877 = vmatprep.subr.bf16.mxu0 %v5481_v19  ;;  %v4325_v19 = vunpack.c.l.s8.bf16 %v3677_v17 }
 0x8e3   : > { %6714 = vmatpush1.bf16.msra.mxu1 %v5478_v28  ;;  %v4322_v28 = vunpack.c.l.s8.bf16 %v3674_v18 }
 0x8e4   : > { %6878 = vmatpush1.bf16.msra.mxu0 %v5480_v59  ;;  %6715 = vmatprep.subr.bf16.mxu1 %v5499_v30  ;;  %v4324_v59 = vunpack.c.l.s8.bf16 %v3676_v22  ;;  %v4343_v30 = vunpack.c.h.s8.bf16 %v3675_v8  ;;  %v3737_v8 = vld [vmem:[%s11017_s26 + $0x278] sm:$0xff] }
 0x8e5   : > { %6879 = vmatprep.subr.bf16.mxu0 %v5501_v40  ;;  %v3695_v40 = vld [vmem:[%s11017_s26 + $0x128] sm:$0xff] }
 0x8e7   : > { %6716 = vmatpush1.bf16.msra.mxu1 %v5498_v42  ;;  %v4342_v42 = vunpack.c.h.s8.bf16 %v3674_v18  ;;  %v4445_v18 = vunpack.c.l.s8.bf16 %v3737_v8 }
 0x8e8   : > { %6880 = vmatpush1.bf16.msra.mxu0 %v5500_v29  ;;  %6717 = vmatprep.subr.bf16.mxu1 %v5519_v44  ;;  %v4344_v29 = vunpack.c.h.s8.bf16 %v3676_v22  ;;  %v4363_v44 = vunpack.c.l.s8.bf16 %v3695_v40 }
 0x8e9   : > { %6881 = vmatprep.subr.bf16.mxu0 %v5521_v14  ;;  %v4365_v14 = vunpack.c.l.s8.bf16 %v3697_v10 }
 0x8eb   : > { %6718 = vmatpush1.bf16.msra.mxu1 %v5518_v47  ;;  %v4362_v47 = vunpack.c.l.s8.bf16 %v3694_v23 }
 0x8ec   : > { %6882 = vmatpush1.bf16.msra.mxu0 %v5520_v9  ;;  %6719 = vmatprep.subr.bf16.mxu1 %v5539_v49  ;;  %v4364_v9 = vunpack.c.l.s8.bf16 %v3696_v46  ;;  %v4383_v49 = vunpack.c.h.s8.bf16 %v3695_v40  ;;  %v3755_v40 = vld [vmem:[%s11017_s26 + $0x308] sm:$0xff] }
 0x8ed   : > { %6883 = vmatprep.subr.bf16.mxu0 %v5541_v50  ;;  %v4385_v50 = vunpack.c.h.s8.bf16 %v3697_v10 }
 0x8ef   : > { %6720 = vmatpush1.bf16.msra.mxu1 %v5538_v57  ;;  %v4382_v57 = vunpack.c.h.s8.bf16 %v3694_v23 }
 0x8f0   : > { %6884 = vmatpush1.bf16.msra.mxu0 %v5540_v62  ;;  %6721 = vmatprep.subr.bf16.mxu1 %v5559_v3  ;;  %v4403_v62 = vunpack.c.l.s8.bf16 %v3715_v53  ;;  %v3714_v3 = vld [vmem:[%s11017_s26 + $0x1c0] sm:$0xff] }
 0x8f1   : > { %6885 = vmatprep.subr.bf16.mxu0 %v5561_v0  ;;  %v3716_v0 = vld [vmem:[%s11017_s26 + $0x1d0] sm:$0xff]  ;;  %v4402_v36 = vunpack.c.l.s8.bf16 %v3714_v3  ;;  %v4422_v17 = vunpack.c.h.s8.bf16 %v3714_v3 }
 0x8f3   : > { %6722 = vmatpush1.bf16.msra.mxu1 %v5558_v58  ;;  %v4404_v58 = vunpack.c.l.s8.bf16 %v3716_v0 }
 0x8f4   : > { %6886 = vmatpush1.bf16.msra.mxu0 %v5560_v37  ;;  %6723 = vmatprep.subr.bf16.mxu1 %v5579_v33  ;;  %v4423_v37 = vunpack.c.h.s8.bf16 %v3715_v53  ;;  %v4425_v33 = vunpack.c.h.s8.bf16 %v3717_v61  ;;  %v3777_v53 = vld [vmem:[%s11017_s26 + $0x3b8] sm:$0xff] }
 0x8f5   : > { %6887 = vmatprep.subr.bf16.mxu0 %v5581_v7  ;;  %v3735_v7 = vld [vmem:[%s11017_s26 + $0x268] sm:$0xff]  ;;  %v4525_v3 = vunpack.c.l.s8.bf16 %v3777_v53 }
 0x8f7   : > { %6724 = vmatpush1.bf16.msra.mxu1 %v5578_v25  ;;  %v4424_v25 = vunpack.c.h.s8.bf16 %v3716_v0 }
 0x8f8   : > { %6888 = vmatpush1.bf16.msra.mxu0 %v5580_v27  ;;  %6898 = vmatprep.subr.bf16.mxu1 %v4323_v35  ;;  %v4443_v27 = vunpack.c.l.s8.bf16 %v3735_v7  ;;  %v3734_v35 = vld [vmem:[%s11017_s26 + $0x260] sm:$0xff] }
 0x8f9   : > { %7062 = vmatprep.subr.bf16.mxu0 %v4325_v19  ;;  %v3736_v19 = vld [vmem:[%s11017_s26 + $0x270] sm:$0xff]  ;;  %v4442_v22 = vunpack.c.l.s8.bf16 %v3734_v35  ;;  %v4462_v10 = vunpack.c.h.s8.bf16 %v3734_v35 }
 0x8fa   : > { %6726 = vmatmul.mubr.bf16.vlgmr.msra.gmra.mrb[20].mxu1 %v11386_v16 }
 0x8fb   : > { %6890 = vmatmul.mubr.bf16.vlgmr.msra.gmra.mrb[32].mxu0 %v11386_v16  ;;  %6899 = vmatpush1.bf16.msra.mxu1 %v4322_v28  ;;  %v4444_v28 = vunpack.c.l.s8.bf16 %v3736_v19 }
 0x8fc   : > { %6930 = vmatprep.mubr.bf16.mxu1 %v11189_v5  ;;  %7063 = vmatpush1.bf16.msra.mxu0 %v4324_v59  ;;  %v4463_v59 = vunpack.c.h.s8.bf16 %v3735_v7  ;;  %v3797_v7 = vld [vmem:[%s11017_s26 + $0x458] sm:$0xff] }
 0x8fd   : > { %7094 = vmatprep.mubr.bf16.mxu0 %v11189_v5  ;;  %6900 = vmatprep.subr.bf16.mxu1 %v4343_v30  ;;  %v4384_v5 = vunpack.c.h.s8.bf16 %v3696_v46  ;;  %v4465_v30 = vunpack.c.h.s8.bf16 %v3737_v8  ;;  %v4565_v35 = vunpack.c.l.s8.bf16 %v3797_v7 }
 0x8fe   : > { %7064 = vmatprep.subr.bf16.mxu0 %v4345_v13  ;;  %v3757_v13 = vld [vmem:[%s11017_s26 + $0x318] sm:$0xff] }
 0x8ff   : > { %6901 = vmatpush1.bf16.msra.mxu1 %v4342_v42  ;;  %v4464_v42 = vunpack.c.h.s8.bf16 %v3736_v19  ;;  %v4485_v23 = vunpack.c.l.s8.bf16 %v3757_v13 }
 0x900   : > { %7065 = vmatpush1.bf16.msra.mxu0 %v4344_v29  ;;  %6902 = vmatprep.subr.bf16.mxu1 %v4363_v44  ;;  %v4483_v29 = vunpack.c.l.s8.bf16 %v3755_v40  ;;  %v3754_v44 = vld [vmem:[%s11017_s26 + $0x300] sm:$0xff] }
 0x901   : > { %7066 = vmatprep.subr.bf16.mxu0 %v4365_v14  ;;  %v3756_v14 = vld [vmem:[%s11017_s26 + $0x310] sm:$0xff]  ;;  %v4482_v46 = vunpack.c.l.s8.bf16 %v3754_v44  ;;  %v4502_v61 = vunpack.c.h.s8.bf16 %v3754_v44 }
 0x903   : > { %6903 = vmatpush1.bf16.msra.mxu1 %v4362_v47  ;;  %v4484_v47 = vunpack.c.l.s8.bf16 %v3756_v14 }
 0x904   : > { %7067 = vmatpush1.bf16.msra.mxu0 %v4364_v9  ;;  %6904 = vmatprep.subr.bf16.mxu1 %v4383_v49  ;;  %v4503_v9 = vunpack.c.h.s8.bf16 %v3755_v40  ;;  %v4505_v49 = vunpack.c.h.s8.bf16 %v3757_v13  ;;  %v3817_v40 = vld [vmem:[%s11017_s26 + $0x4f8] sm:$0xff] }
 0x905   : > { %7068 = vmatprep.subr.bf16.mxu0 %v4385_v50  ;;  %v3775_v50 = vld [vmem:[%s11017_s26 + $0x3a8] sm:$0xff]  ;;  %v4605_v44 = vunpack.c.l.s8.bf16 %v3817_v40 }
 0x907   : > { %6905 = vmatpush1.bf16.msra.mxu1 %v4382_v57  ;;  %v4504_v57 = vunpack.c.h.s8.bf16 %v3756_v14 }
 0x908   : > { %7069 = vmatpush1.bf16.msra.mxu0 %v4384_v5  ;;  %6906 = vmatprep.subr.bf16.mxu1 %v4403_v62  ;;  %v4523_v5 = vunpack.c.l.s8.bf16 %v3775_v50  ;;  %v3774_v62 = vld [vmem:[%s11017_s26 + $0x3a0] sm:$0xff] }
 0x909   : > { %7070 = vmatprep.subr.bf16.mxu0 %v4405_v4  ;;  %v3776_v4 = vld [vmem:[%s11017_s26 + $0x3b0] sm:$0xff]  ;;  %v4522_v0 = vunpack.c.l.s8.bf16 %v3774_v62  ;;  %v4542_v8 = vunpack.c.h.s8.bf16 %v3774_v62 }
 0x90b   : > { %6907 = vmatpush1.bf16.msra.mxu1 %v4402_v36  ;;  %v4524_v36 = vunpack.c.l.s8.bf16 %v3776_v4 }
 0x90c   : > { %7071 = vmatpush1.bf16.msra.mxu0 %v4404_v58  ;;  %6908 = vmatprep.subr.bf16.mxu1 %v4423_v37  ;;  %v4543_v58 = vunpack.c.h.s8.bf16 %v3775_v50  ;;  %v4545_v37 = vunpack.c.h.s8.bf16 %v3777_v53  ;;  %v3837_v50 = vld [vmem:[%s11017_s26 + $0x598] sm:$0xff] }
 0x90d   : > { %7072 = vmatprep.subr.bf16.mxu0 %v4425_v33  ;;  %v3795_v33 = vld [vmem:[%s11017_s26 + $0x448] sm:$0xff]  ;;  %v4645_v62 = vunpack.c.l.s8.bf16 %v3837_v50 }
 0x90f   : > { %6909 = vmatpush1.bf16.msra.mxu1 %v4422_v17  ;;  %v4544_v17 = vunpack.c.h.s8.bf16 %v3776_v4 }
 0x910   : > { %7073 = vmatpush1.bf16.msra.mxu0 %v4424_v25  ;;  %6910 = vmatprep.subr.bf16.mxu1 %v4443_v27  ;;  %v4563_v25 = vunpack.c.l.s8.bf16 %v3795_v33  ;;  %v3794_v27 = vld [vmem:[%s11017_s26 + $0x440] sm:$0xff] }
 0x911   : > { %7074 = vmatprep.subr.bf16.mxu0 %v4445_v18  ;;  %v3796_v18 = vld [vmem:[%s11017_s26 + $0x450] sm:$0xff]  ;;  %v4562_v19 = vunpack.c.l.s8.bf16 %v3794_v27  ;;  %v4582_v13 = vunpack.c.h.s8.bf16 %v3794_v27 }
 0x913   : > { %6911 = vmatpush1.bf16.msra.mxu1 %v4442_v22  ;;  %v4564_v22 = vunpack.c.l.s8.bf16 %v3796_v18 }
 0x914   : > { %7075 = vmatpush1.bf16.msra.mxu0 %v4444_v28  ;;  %6912 = vmatprep.subr.bf16.mxu1 %v4463_v59  ;;  %v4583_v28 = vunpack.c.h.s8.bf16 %v3795_v33  ;;  %v4585_v59 = vunpack.c.h.s8.bf16 %v3797_v7  ;;  %v3857_v33 = vld [vmem:[%s11017_s26 + $0x638] sm:$0xff] }
 0x915   : > { %7076 = vmatprep.subr.bf16.mxu0 %v4465_v30  ;;  %v3815_v30 = vld [vmem:[%s11017_s26 + $0x4e8] sm:$0xff]  ;;  %v4685_v27 = vunpack.c.l.s8.bf16 %v3857_v33 }
 0x917   : > { %6913 = vmatpush1.bf16.msra.mxu1 %v4462_v10  ;;  %v4584_v10 = vunpack.c.h.s8.bf16 %v3796_v18 }
 0x918   : > { %7077 = vmatpush1.bf16.msra.mxu0 %v4464_v42  ;;  %6914 = vmatprep.subr.bf16.mxu1 %v4483_v29  ;;  %v4603_v42 = vunpack.c.l.s8.bf16 %v3815_v30  ;;  %v3814_v29 = vld [vmem:[%s11017_s26 + $0x4e0] sm:$0xff] }
 0x919   : > { %7078 = vmatprep.subr.bf16.mxu0 %v4485_v23  ;;  %v3816_v23 = vld [vmem:[%s11017_s26 + $0x4f0] sm:$0xff]  ;;  %v4602_v14 = vunpack.c.l.s8.bf16 %v3814_v29  ;;  %v4622_v53 = vunpack.c.h.s8.bf16 %v3814_v29 }
 0x91b   : > { %6915 = vmatpush1.bf16.msra.mxu1 %v4482_v46  ;;  %v4604_v46 = vunpack.c.l.s8.bf16 %v3816_v23 }
 0x91c   : > { %7079 = vmatpush1.bf16.msra.mxu0 %v4484_v47  ;;  %6916 = vmatprep.subr.bf16.mxu1 %v4503_v9  ;;  %v4623_v47 = vunpack.c.h.s8.bf16 %v3815_v30  ;;  %v4625_v9 = vunpack.c.h.s8.bf16 %v3817_v40 }
 0x91d   : > { %7080 = vmatprep.subr.bf16.mxu0 %v4505_v49  ;;  %v3835_v49 = vld [vmem:[%s11017_s26 + $0x588] sm:$0xff] }
 0x91f   : > { %6917 = vmatpush1.bf16.msra.mxu1 %v4502_v61  ;;  %v4624_v61 = vunpack.c.h.s8.bf16 %v3816_v23 }
 0x920   : > { %7081 = vmatpush1.bf16.msra.mxu0 %v4504_v57  ;;  %6918 = vmatprep.subr.bf16.mxu1 %v4523_v5  ;;  %v4643_v57 = vunpack.c.l.s8.bf16 %v3835_v49  ;;  %v3834_v5 = vld [vmem:[%s11017_s26 + $0x580] sm:$0xff] }
 0x921   : > { %7082 = vmatprep.subr.bf16.mxu0 %v4525_v3  ;;  %v3836_v3 = vld [vmem:[%s11017_s26 + $0x590] sm:$0xff]  ;;  %v4642_v4 = vunpack.c.l.s8.bf16 %v3834_v5  ;;  %v4662_v7 = vunpack.c.h.s8.bf16 %v3834_v5 }
 0x923   : > { %6919 = vmatpush1.bf16.msra.mxu1 %v4522_v0  ;;  %v4644_v0 = vunpack.c.l.s8.bf16 %v3836_v3 }
 0x924   : > { %7083 = vmatpush1.bf16.msra.mxu0 %v4524_v36  ;;  %6920 = vmatprep.subr.bf16.mxu1 %v4543_v58  ;;  %v4663_v36 = vunpack.c.h.s8.bf16 %v3835_v49  ;;  %v3855_v58 = vld [vmem:[%s11017_s26 + $0x628] sm:$0xff] }
 0x925   : > { %7084 = vmatprep.subr.bf16.mxu0 %v4545_v37  ;;  %v4665_v37 = vunpack.c.h.s8.bf16 %v3837_v50 }
 0x927   : > { %6921 = vmatpush1.bf16.msra.mxu1 %v4542_v8  ;;  %v4664_v8 = vunpack.c.h.s8.bf16 %v3836_v3 }
 0x928   : > { %7085 = vmatpush1.bf16.msra.mxu0 %v4544_v17  ;;  %6922 = vmatprep.subr.bf16.mxu1 %v4563_v25  ;;  %v4683_v17 = vunpack.c.l.s8.bf16 %v3855_v58  ;;  %v3854_v25 = vld [vmem:[%s11017_s26 + $0x620] sm:$0xff] }
 0x929   : > { %7086 = vmatprep.subr.bf16.mxu0 %v4565_v35  ;;  %v3856_v35 = vld [vmem:[%s11017_s26 + $0x630] sm:$0xff]  ;;  %v4682_v18 = vunpack.c.l.s8.bf16 %v3854_v25  ;;  %v4702_v30 = vunpack.c.h.s8.bf16 %v3854_v25 }
 0x92b   : > { %6923 = vmatpush1.bf16.msra.mxu1 %v4562_v19  ;;  %v4703_v19 = vunpack.c.h.s8.bf16 %v3855_v58 }
 0x92c   : > { %7087 = vmatpush1.bf16.msra.mxu0 %v4564_v22  ;;  %6924 = vmatprep.subr.bf16.mxu1 %v4583_v28  ;;  %v4705_v22 = vunpack.c.h.s8.bf16 %v3857_v33  ;;  %v3875_v28 = vld [vmem:[%s11017_s26 + $0x6c8] sm:$0xff] }
 0x92d   : > { %7088 = vmatprep.subr.bf16.mxu0 %v4585_v59  ;;  %v3877_v59 = vld [vmem:[%s11017_s26 + $0x6d8] sm:$0xff]  ;;  %v4723_v40 = vunpack.c.l.s8.bf16 %v3875_v28  ;;  %v4743_v23 = vunpack.c.h.s8.bf16 %v3875_v28 }
 0x92f   : > { %6925 = vmatpush1.bf16.msra.mxu1 %v4582_v13  ;;  %v3874_v13 = vld [vmem:[%s11017_s26 + $0x6c0] sm:$0xff] }
 0x930   : > { %7089 = vmatpush1.bf16.msra.mxu0 %v4584_v10  ;;  %6926 = vmatprep.subr.bf16.mxu1 %v4603_v42  ;;  %v4725_v10 = vunpack.c.l.s8.bf16 %v3877_v59  ;;  %v3876_v42 = vld [vmem:[%s11017_s26 + $0x6d0] sm:$0xff]  ;;  %v4722_v29 = vunpack.c.l.s8.bf16 %v3874_v13 }
 0x931   : > { %7090 = vmatprep.subr.bf16.mxu0 %v4605_v44  ;;  %v4724_v44 = vunpack.c.l.s8.bf16 %v3876_v42  ;;  %v4744_v49 = vunpack.c.h.s8.bf16 %v3876_v42 }
 0x933   : > { %6927 = vmatpush1.bf16.msra.mxu1 %v4602_v14  ;;  %v4745_v14 = vunpack.c.h.s8.bf16 %v3877_v59 }
 0x934   : > { %7091 = vmatpush1.bf16.msra.mxu0 %v4604_v46  ;;  %6928 = vmatprep.subr.bf16.mxu1 %v4623_v47  ;;  %v3895_v46 = vld [vmem:[%s11017_s26 + $0x768] sm:$0xff]  ;;  %v3897_v47 = vld [vmem:[%s11017_s26 + $0x778] sm:$0xff] }
 0x935   : > { %7092 = vmatprep.subr.bf16.mxu0 %v4625_v9  ;;  %v4742_v9 = vunpack.c.h.s8.bf16 %v3874_v13  ;;  %v4763_v50 = vunpack.c.l.s8.bf16 %v3895_v46  ;;  %v4783_v3 = vunpack.c.h.s8.bf16 %v3895_v46 }
 0x937   : > { %6929 = vmatpush1.bf16.msra.mxu1 %v4622_v53  ;;  %v3894_v53 = vld [vmem:[%s11017_s26 + $0x760] sm:$0xff] }
 0x938   : > { %7093 = vmatpush1.bf16.msra.mxu0 %v4624_v61  ;;  %6939 = vmatprep.subr.bf16.mxu1 %v4643_v57  ;;  %v4765_v61 = vunpack.c.l.s8.bf16 %v3897_v47  ;;  %v3896_v57 = vld [vmem:[%s11017_s26 + $0x770] sm:$0xff]  ;;  %v4762_v5 = vunpack.c.l.s8.bf16 %v3894_v53  ;;  %v4782_v58 = vunpack.c.h.s8.bf16 %v3894_v53 }
 0x939   : > { %7103 = vmatprep.subr.bf16.mxu0 %v4645_v62  ;;  %v4764_v62 = vunpack.c.l.s8.bf16 %v3896_v57 }
 0x93a   : > { %6931 = vmatmul.mubr.bf16.vlgmr.msra.gmra.mrb[24].mxu1 %v11191_v6 }
 0x93b   : > { %7095 = vmatmul.mubr.bf16.vlgmr.msra.gmra.mrb[36].mxu0 %v11191_v6  ;;  %6940 = vmatpush1.bf16.msra.mxu1 %v4642_v4  ;;  %v4684_v6 = vunpack.c.l.s8.bf16 %v3856_v35  ;;  %v4785_v4 = vunpack.c.h.s8.bf16 %v3897_v47 }
 0x93c   : > { %6971 = vmatprep.mubr.bf16.mxu1 %v11199_v32  ;;  %7104 = vmatpush1.bf16.msra.mxu0 %v4644_v0  ;;  %v3915_v0 = vld [vmem:[%s11017_s26 + $0x808] sm:$0xff] }
 0x93d   : > { %7135 = vmatprep.mubr.bf16.mxu0 %v11199_v32  ;;  %6941 = vmatprep.subr.bf16.mxu1 %v4663_v36  ;;  %v4704_v32 = vunpack.c.h.s8.bf16 %v3856_v35  ;;  %v3917_v36 = vld [vmem:[%s11017_s26 + $0x818] sm:$0xff]  ;;  %v4803_v33 = vunpack.c.l.s8.bf16 %v3915_v0  ;;  %v4823_v35 = vunpack.c.h.s8.bf16 %v3915_v0 }
 0x93e   : > { %7105 = vmatprep.subr.bf16.mxu0 %v4665_v37  ;;  %v4784_v37 = vunpack.c.h.s8.bf16 %v3896_v57 }
 0x93f   : > { %6942 = vmatpush1.bf16.msra.mxu1 %v4662_v7  ;;  %v3914_v7 = vld [vmem:[%s11017_s26 + $0x800] sm:$0xff] }
 0x940   : > { %7106 = vmatpush1.bf16.msra.mxu0 %v4664_v8  ;;  %6943 = vmatprep.subr.bf16.mxu1 %v4683_v17  ;;  %v4805_v8 = vunpack.c.l.s8.bf16 %v3917_v36  ;;  %v3916_v17 = vld [vmem:[%s11017_s26 + $0x810] sm:$0xff]  ;;  %v4802_v25 = vunpack.c.l.s8.bf16 %v3914_v7 }
 0x941   : > { %7107 = vmatprep.subr.bf16.mxu0 %v4685_v27  ;;  %v4804_v27 = vunpack.c.l.s8.bf16 %v3916_v17  ;;  %v4824_v28 = vunpack.c.h.s8.bf16 %v3916_v17 }
 0x943   : > { %6944 = vmatpush1.bf16.msra.mxu1 %v4682_v18  ;;  %v4825_v18 = vunpack.c.h.s8.bf16 %v3917_v36 }
 0x944   : > { %7108 = vmatpush1.bf16.msra.mxu0 %v4684_v6  ;;  %6945 = vmatprep.subr.bf16.mxu1 %v4703_v19  ;;  %v3935_v6 = vld [vmem:[%s11017_s26 + $0x8a8] sm:$0xff]  ;;  %v3937_v19 = vld [vmem:[%s11017_s26 + $0x8b8] sm:$0xff] }
 0x945   : > { %7109 = vmatprep.subr.bf16.mxu0 %v4705_v22  ;;  %v4822_v22 = vunpack.c.h.s8.bf16 %v3914_v7  ;;  %v4843_v59 = vunpack.c.l.s8.bf16 %v3935_v6  ;;  %v4863_v42 = vunpack.c.h.s8.bf16 %v3935_v6 }
 0x947   : > { %6946 = vmatpush1.bf16.msra.mxu1 %v4702_v30  ;;  %v3934_v30 = vld [vmem:[%s11017_s26 + $0x8a0] sm:$0xff] }
 0x948   : > { %7110 = vmatpush1.bf16.msra.mxu0 %v4704_v32  ;;  %6947 = vmatprep.subr.bf16.mxu1 %v4723_v40  ;;  %v4845_v32 = vunpack.c.l.s8.bf16 %v3937_v19  ;;  %v3936_v40 = vld [vmem:[%s11017_s26 + $0x8b0] sm:$0xff]  ;;  %v4842_v13 = vunpack.c.l.s8.bf16 %v3934_v30 }
 0x949   : > { %7111 = vmatprep.subr.bf16.mxu0 %v4725_v10  ;;  %v4844_v10 = vunpack.c.l.s8.bf16 %v3936_v40  ;;  %v4864_v46 = vunpack.c.h.s8.bf16 %v3936_v40 }
 0x94b   : > { %6948 = vmatpush1.bf16.msra.mxu1 %v4722_v29  ;;  %v4865_v29 = vunpack.c.h.s8.bf16 %v3937_v19 }
 0x94c   : > { %7112 = vmatpush1.bf16.msra.mxu0 %v4724_v44  ;;  %6949 = vmatprep.subr.bf16.mxu1 %v4743_v23  ;;  %v3955_v44 = vld [vmem:[%s11017_s26 + $0x948] sm:$0xff]  ;;  %v3957_v23 = vld [vmem:[%s11017_s26 + $0x958] sm:$0xff] }
 0x94d   : > { %7113 = vmatprep.subr.bf16.mxu0 %v4745_v14  ;;  %v4862_v14 = vunpack.c.h.s8.bf16 %v3934_v30  ;;  %v4883_v47 = vunpack.c.l.s8.bf16 %v3955_v44  ;;  %v4903_v57 = vunpack.c.h.s8.bf16 %v3955_v44 }
 0x94f   : > { %6950 = vmatpush1.bf16.msra.mxu1 %v4742_v9  ;;  %v3954_v9 = vld [vmem:[%s11017_s26 + $0x940] sm:$0xff] }
 0x950   : > { %7114 = vmatpush1.bf16.msra.mxu0 %v4744_v49  ;;  %6951 = vmatprep.subr.bf16.mxu1 %v4763_v50  ;;  %v4885_v49 = vunpack.c.l.s8.bf16 %v3957_v23  ;;  %v3956_v50 = vld [vmem:[%s11017_s26 + $0x950] sm:$0xff]  ;;  %v4882_v53 = vunpack.c.l.s8.bf16 %v3954_v9 }
 0x951   : > { %7115 = vmatprep.subr.bf16.mxu0 %v4765_v61  ;;  %v4884_v61 = vunpack.c.l.s8.bf16 %v3956_v50  ;;  %v4904_v0 = vunpack.c.h.s8.bf16 %v3956_v50 }
 0x953   : > { %6952 = vmatpush1.bf16.msra.mxu1 %v4762_v5  ;;  %v4905_v5 = vunpack.c.h.s8.bf16 %v3957_v23 }
 0x954   : > { %7116 = vmatpush1.bf16.msra.mxu0 %v4764_v62  ;;  %6953 = vmatprep.subr.bf16.mxu1 %v4783_v3  ;;  %v3975_v62 = vld [vmem:[%s11017_s26 + $0x9e8] sm:$0xff]  ;;  %v3977_v3 = vld [vmem:[%s11017_s26 + $0x9f8] sm:$0xff] }
 0x955   : > { %7117 = vmatprep.subr.bf16.mxu0 %v4785_v4  ;;  %v4902_v4 = vunpack.c.h.s8.bf16 %v3954_v9  ;;  %v4923_v36 = vunpack.c.l.s8.bf16 %v3975_v62  ;;  %v4943_v17 = vunpack.c.h.s8.bf16 %v3975_v62 }
 0x957   : > { %6954 = vmatpush1.bf16.msra.mxu1 %v4782_v58  ;;  %v3974_v58 = vld [vmem:[%s11017_s26 + $0x9e0] sm:$0xff] }
 0x958   : > { %7118 = vmatpush1.bf16.msra.mxu0 %v4784_v37  ;;  %6955 = vmatprep.subr.bf16.mxu1 %v4803_v33  ;;  %v4925_v37 = vunpack.c.l.s8.bf16 %v3977_v3  ;;  %v3976_v33 = vld [vmem:[%s11017_s26 + $0x9f0] sm:$0xff]  ;;  %v4922_v7 = vunpack.c.l.s8.bf16 %v3974_v58 }
 0x959   : > { %7119 = vmatprep.subr.bf16.mxu0 %v4805_v8  ;;  %v4924_v8 = vunpack.c.l.s8.bf16 %v3976_v33  ;;  %v4944_v6 = vunpack.c.h.s8.bf16 %v3976_v33  ;;  %v4057_v33 = vld [vmem:[%s11017_s26 + $0xc78] sm:$0xff] }
 0x95b   : > { %6956 = vmatpush1.bf16.msra.mxu1 %v4802_v25  ;;  %v4945_v25 = vunpack.c.h.s8.bf16 %v3977_v3  ;;  %v4036_v3 = vld [vmem:[%s11017_s26 + $0xbd0] sm:$0xff] }
 0x95c   : > { %7120 = vmatpush1.bf16.msra.mxu0 %v4804_v27  ;;  %6957 = vmatprep.subr.bf16.mxu1 %v4823_v35  ;;  %v3995_v27 = vld [vmem:[%s11017_s26 + $0xa88] sm:$0xff]  ;;  %v3997_v35 = vld [vmem:[%s11017_s26 + $0xa98] sm:$0xff] }
 0x95d   : > { %7121 = vmatprep.subr.bf16.mxu0 %v4825_v18  ;;  %v4942_v18 = vunpack.c.h.s8.bf16 %v3974_v58  ;;  %v4963_v19 = vunpack.c.l.s8.bf16 %v3995_v27  ;;  %v4983_v40 = vunpack.c.h.s8.bf16 %v3995_v27  ;;  %v5044_v58 = vunpack.c.l.s8.bf16 %v4036_v3  ;;  %v4056_v27 = vld [vmem:[%s11017_s26 + $0xc70] sm:$0xff] }
 0x95f   : > { %6958 = vmatpush1.bf16.msra.mxu1 %v4822_v22  ;;  %v3994_v22 = vld [vmem:[%s11017_s26 + $0xa80] sm:$0xff] }
 0x960   : > { %7122 = vmatpush1.bf16.msra.mxu0 %v4824_v28  ;;  %6959 = vmatprep.subr.bf16.mxu1 %v4843_v59  ;;  %v4965_v28 = vunpack.c.l.s8.bf16 %v3997_v35  ;;  %v3996_v59 = vld [vmem:[%s11017_s26 + $0xa90] sm:$0xff]  ;;  %v4962_v30 = vunpack.c.l.s8.bf16 %v3994_v22 }
 0x961   : > { %7123 = vmatprep.subr.bf16.mxu0 %v4845_v32  ;;  %v4964_v32 = vunpack.c.l.s8.bf16 %v3996_v59  ;;  %v4984_v44 = vunpack.c.h.s8.bf16 %v3996_v59 }
 0x963   : > { %6960 = vmatpush1.bf16.msra.mxu1 %v4842_v13  ;;  %v4015_v13 = vld [vmem:[%s11017_s26 + $0xb28] sm:$0xff] }
 0x964   : > { %7124 = vmatpush1.bf16.msra.mxu0 %v4844_v10  ;;  %6961 = vmatprep.subr.bf16.mxu1 %v4863_v42  ;;  %v4985_v10 = vunpack.c.h.s8.bf16 %v3997_v35  ;;  %v4017_v42 = vld [vmem:[%s11017_s26 + $0xb38] sm:$0xff]  ;;  %v5003_v23 = vunpack.c.l.s8.bf16 %v4015_v13  ;;  %v5064_v35 = vunpack.c.h.s8.bf16 %v4036_v3 }
 0x965   : > { %7125 = vmatprep.subr.bf16.mxu0 %v4865_v29  ;;  %v4982_v29 = vunpack.c.h.s8.bf16 %v3994_v22  ;;  %v5025_v50 = vunpack.c.h.s8.bf16 %v4017_v42 }
 0x967   : > { %6962 = vmatpush1.bf16.msra.mxu1 %v4862_v14  ;;  %v4014_v14 = vld [vmem:[%s11017_s26 + $0xb20] sm:$0xff] }
 0x968   : > { %7126 = vmatpush1.bf16.msra.mxu0 %v4864_v46  ;;  %6963 = vmatprep.subr.bf16.mxu1 %v4883_v47  ;;  %v5005_v46 = vunpack.c.l.s8.bf16 %v4017_v42  ;;  %v4016_v47 = vld [vmem:[%s11017_s26 + $0xb30] sm:$0xff] }
 0x969   : > { %7127 = vmatprep.subr.bf16.mxu0 %v4885_v49  ;;  %v5004_v9 = vunpack.c.l.s8.bf16 %v4016_v47  ;;  %v5023_v49 = vunpack.c.h.s8.bf16 %v4015_v13 }
 0x96b   : > { %6964 = vmatpush1.bf16.msra.mxu1 %v4882_v53  ;;  %v4035_v53 = vld [vmem:[%s11017_s26 + $0xbc8] sm:$0xff] }
 0x96c   : > { %7128 = vmatpush1.bf16.msra.mxu0 %v4884_v61  ;;  %6965 = vmatprep.subr.bf16.mxu1 %v4903_v57  ;;  %v5022_v61 = vunpack.c.h.s8.bf16 %v4014_v14  ;;  %v4034_v57 = vld [vmem:[%s11017_s26 + $0xbc0] sm:$0xff]  ;;  %v5043_v62 = vunpack.c.l.s8.bf16 %v4035_v53 }
 0x96d   : > { %7129 = vmatprep.subr.bf16.mxu0 %v4905_v5  ;;  %v5024_v5 = vunpack.c.h.s8.bf16 %v4016_v47  ;;  %v4076_v47 = vld [vmem:[%s11017_s26 + $0xd10] sm:$0xff] }
 0x96f   : > { %6966 = vmatpush1.bf16.msra.mxu1 %v4902_v4 }
 0x970   : > { %7130 = vmatpush1.bf16.msra.mxu0 %v4904_v0  ;;  %6967 = vmatprep.subr.bf16.mxu1 %v4923_v36  ;;  %v5042_v0 = vunpack.c.l.s8.bf16 %v4034_v57  ;;  %v4055_v36 = vld [vmem:[%s11017_s26 + $0xc68] sm:$0xff] }
 0x971   : > { %7131 = vmatprep.subr.bf16.mxu0 %v4925_v37  ;;  %v5063_v37 = vunpack.c.h.s8.bf16 %v4035_v53  ;;  %v5103_v59 = vunpack.c.h.s8.bf16 %v4055_v36 }
 0x973   : > { %6968 = vmatpush1.bf16.msra.mxu1 %v4922_v7  ;;  %v11940_v7 = vld [vmem:[%s11937_s8] sm:$0xff] }
 0x974   : > { %7132 = vmatpush1.bf16.msra.mxu0 %v4924_v8  ;;  %6969 = vmatprep.subr.bf16.mxu1 %v4943_v17  ;;  %v4054_v17 = vld [vmem:[%s11017_s26 + $0xc60] sm:$0xff] }
 0x975   : > { %7133 = vmatprep.subr.bf16.mxu0 %v4945_v25  ;;  %v5062_v25 = vunpack.c.h.s8.bf16 %v4034_v57  ;;  %v5082_v22 = vunpack.c.l.s8.bf16 %v4054_v17  ;;  %v5102_v42 = vunpack.c.h.s8.bf16 %v4054_v17 }
 0x977   : > { %6970 = vmatpush1.bf16.msra.mxu1 %v4942_v18  ;;  %v5083_v18 = vunpack.c.l.s8.bf16 %v4055_v36 }
 0x978   : > { %7134 = vmatpush1.bf16.msra.mxu0 %v4944_v6  ;;  %6980 = vmatprep.subr.bf16.mxu1 %v4963_v19  ;;  %v5085_v6 = vunpack.c.l.s8.bf16 %v4057_v33  ;;  %v7247_v19 = vrot.slane %v11940_v7, %v11094_v45 }
 0x979   : > { %7144 = vmatprep.subr.bf16.mxu0 %v4965_v28  ;;  %v5084_v28 = vunpack.c.l.s8.bf16 %v4056_v27 }
 0x97a   : > { %6972 = vmatmul.mubr.bf16.vlgmr.msra.gmra.mrb[24].mxu1 %v11240_v12  ;;  %v11950_v13 = vmul.f32 %v7247_v19, %v11518_v63 }
 0x97b   : > { %7136 = vmatmul.mubr.bf16.vlgmr.msra.gmra.mrb[36].mxu0 %v11240_v12  ;;  %6981 = vmatpush1.bf16.msra.mxu1 %v4962_v30  ;;  %v5002_v12 = vunpack.c.l.s8.bf16 %v4014_v14  ;;  %v7239_v30 = vrot.slane %v11940_v7, %v11030_v26 }
 0x97c   : > { %7012 = vmatprep.mubr.bf16.mxu1 %v11336_v52  ;;  %7145 = vmatpush1.bf16.msra.mxu0 %v4964_v32  ;;  %v5105_v32 = vunpack.c.h.s8.bf16 %v4057_v33  ;;  %v7243_v33 = vrot.slane %v11940_v7, %v11091_v41 }
 0x97d   : > { %7176 = vmatprep.mubr.bf16.mxu0 %v11336_v52  ;;  %6982 = vmatprep.subr.bf16.mxu1 %v4983_v40  ;;  %v4037_v52 = vld [vmem:[%s11017_s26 + $0xbd8] sm:$0xff]  ;;  %v4075_v40 = vld [vmem:[%s11017_s26 + $0xd08] sm:$0xff]  ;;  %v11955_v14 = vmul.f32 %v7239_v30, %v11516_v2 }
 0x97e   : > { %7146 = vmatprep.subr.bf16.mxu0 %v4985_v10  ;;  %v5045_v4 = vunpack.c.l.s8.bf16 %v4037_v52  ;;  %v5065_v8 = vunpack.c.h.s8.bf16 %v4037_v52  ;;  %v4077_v10 = vld [vmem:[%s11017_s26 + $0xd18] sm:$0xff]  ;;  %v4095_v2 = vld [vmem:[%s11017_s26 + $0xda8] sm:$0xff] }
 0x97f   : > { %6983 = vmatpush1.bf16.msra.mxu1 %v4982_v29  ;;  %v5104_v29 = vunpack.c.h.s8.bf16 %v4056_v27  ;;  %v5145_v53 = vunpack.c.h.s8.bf16 %v4077_v10  ;;  %v5163_v3 = vunpack.c.l.s8.bf16 %v4095_v2  ;;  %v5183_v27 = vunpack.c.h.s8.bf16 %v4095_v2 }
 0x980   : > { %7147 = vmatpush1.bf16.msra.mxu0 %v4984_v44  ;;  %6984 = vmatprep.subr.bf16.mxu1 %v5003_v23  ;;  %v5123_v44 = vunpack.c.l.s8.bf16 %v4075_v40  ;;  %v4074_v23 = vld [vmem:[%s11017_s26 + $0xd00] sm:$0xff] }
 0x981   : > { %7148 = vmatprep.subr.bf16.mxu0 %v5005_v46  ;;  %v5125_v46 = vunpack.c.l.s8.bf16 %v4077_v10  ;;  %v5122_v63 = vunpack.c.l.s8.bf16 %v4074_v23  ;;  %v5142_v57 = vunpack.c.h.s8.bf16 %v4074_v23 }
 0x983   : > { %6985 = vmatpush1.bf16.msra.mxu1 %v5002_v12  ;;  %v7376_v12 = vrot.slane %v11950_v13, 4 }
 0x984   : > { %7149 = vmatpush1.bf16.msra.mxu0 %v5004_v9  ;;  %6986 = vmatprep.subr.bf16.mxu1 %v5023_v49  ;;  %v5124_v9 = vunpack.c.l.s8.bf16 %v4076_v47  ;;  %v5143_v49 = vunpack.c.h.s8.bf16 %v4075_v40  ;;  %v4114_v40 = vld [vmem:[%s11017_s26 + $0xe40] sm:$0xff] }
 0x985   : > { %7150 = vmatprep.subr.bf16.mxu0 %v5025_v50  ;;  %v7364_v50 = vrot.slane %v11955_v14, 4  ;;  %v7377_v52 = vadd.f32 %v7376_v12, %v11950_v13 }
 0x987   : > { %6987 = vmatpush1.bf16.msra.mxu1 %v5022_v61  ;;  %v4097_v61 = vld [vmem:[%s11017_s26 + $0xdb8] sm:$0xff] }
 0x988   : > { %7151 = vmatpush1.bf16.msra.mxu0 %v5024_v5  ;;  %6988 = vmatprep.subr.bf16.mxu1 %v5043_v62  ;;  %v7235_v5 = vrot.slane %v11940_v7, %v11027_v24  ;;  %v5144_v62 = vunpack.c.h.s8.bf16 %v4076_v47  ;;  %v5165_v36 = vunpack.c.l.s8.bf16 %v4097_v61 }
 0x989   : > { %7152 = vmatprep.subr.bf16.mxu0 %v5045_v4  ;;  %v4094_v4 = vld [vmem:[%s11017_s26 + $0xda0] sm:$0xff] }
 0x98a   : > { %v11971_v17 = vmul.f32 %v7235_v5, %v11511_v55 }
 0x98b   : > { %6989 = vmatpush1.bf16.msra.mxu1 %v5042_v0  ;;  %v7365_v0 = vadd.f32 %v7364_v50, %v11955_v14  ;;  %v4135_v50 = vld [vmem:[%s11017_s26 + $0xee8] sm:$0xff] }
 0x98c   : > { %7153 = vmatpush1.bf16.msra.mxu0 %v5044_v58  ;;  %6990 = vmatprep.subr.bf16.mxu1 %v5063_v37  ;;  %v4096_v58 = vld [vmem:[%s11017_s26 + $0xdb0] sm:$0xff]  ;;  %v7378_v37 = vrot.slane %v7377_v52, 2  ;;  %v7358_v55 = vrot.slane %v11971_v17, 4 }
 0x98d   : > { %7154 = vmatprep.subr.bf16.mxu0 %v5065_v8  ;;  %v5162_v8 = vunpack.c.l.s8.bf16 %v4094_v4  ;;  %v5184_v30 = vunpack.c.h.s8.bf16 %v4096_v58 }
 0x98e   : > { %v7379_v19 = vadd.f32 %v7378_v37, %v7377_v52  ;;  %v7359_v47 = vadd.f32 %v7358_v55, %v11971_v17  ;;  %v4137_v52 = vld [vmem:[%s11017_s26 + $0xef8] sm:$0xff] }
 0x98f   : > { %6991 = vmatpush1.bf16.msra.mxu1 %v5062_v25  ;;  %v5164_v25 = vunpack.c.l.s8.bf16 %v4096_v58  ;;  %v4136_v58 = vld [vmem:[%s11017_s26 + $0xef0] sm:$0xff] }
 0x990   : > { %7155 = vmatpush1.bf16.msra.mxu0 %v5064_v35  ;;  %6992 = vmatprep.subr.bf16.mxu1 %v5083_v18  ;;  %v7366_v35 = vrot.slane %v7365_v0, 2  ;;  %v5185_v18 = vunpack.c.h.s8.bf16 %v4097_v61  ;;  %v7360_v5 = vrot.slane %v7359_v47, 2 }
 0x991   : > { %7156 = vmatprep.subr.bf16.mxu0 %v5085_v6  ;;  %v4115_v6 = vld [vmem:[%s11017_s26 + $0xe48] sm:$0xff] }
 0x992   : > { %v7367_v10 = vadd.f32 %v7366_v35, %v7365_v0  ;;  %v5263_v35 = vunpack.c.h.s8.bf16 %v4135_v50 }
 0x993   : > { %6993 = vmatpush1.bf16.msra.mxu1 %v5082_v22  ;;  %v4117_v22 = vld [vmem:[%s11017_s26 + $0xe58] sm:$0xff] }
 0x994   : > { %7157 = vmatpush1.bf16.msra.mxu0 %v5084_v28  ;;  %6994 = vmatprep.subr.bf16.mxu1 %v5103_v59  ;;  %v11976_v28 = vmul.f32 %v7243_v33, %v11513_v56  ;;  %v5182_v59 = vunpack.c.h.s8.bf16 %v4094_v4  ;;  %v7255_v56 = vrot.slane %v11940_v7, %v11303_v60  ;;  %v4134_v4 = vld [vmem:[%s11017_s26 + $0xee0] sm:$0xff] }
 0x995   : > { %7158 = vmatprep.subr.bf16.mxu0 %v5105_v32  ;;  %v5203_v32 = vunpack.c.l.s8.bf16 %v4115_v6 }
 0x996   : > { %v7370_v23 = vrot.slane %v11976_v28, 4  ;;  %v11987_v2 = vmul.f32 %v7255_v56, %v11668_v31 }
 0x997   : > { %6995 = vmatpush1.bf16.msra.mxu1 %v5102_v42  ;;  %v5205_v42 = vunpack.c.l.s8.bf16 %v4117_v22 }
 0x998   : > { %7159 = vmatpush1.bf16.msra.mxu0 %v5104_v29  ;;  %6996 = vmatprep.subr.bf16.mxu1 %v5123_v44  ;;  %v4116_v29 = vld [vmem:[%s11017_s26 + $0xe50] sm:$0xff]  ;;  %v7380_v44 = vrot.slane %v7379_v19, 1  ;;  %v7371_v61 = vadd.f32 %v7370_v23, %v11976_v28  ;;  %v7388_v31 = vrot.slane %v11987_v2, 4 }
 0x999   : > { %7160 = vmatprep.subr.bf16.mxu0 %v5125_v46  ;;  %v5202_v46 = vunpack.c.l.s8.bf16 %v4114_v40  ;;  %v5204_v12 = vunpack.c.l.s8.bf16 %v4116_v29 }
 0x99a   : > { %v7372_v33 = vrot.slane %v7371_v61, 2  ;;  %v7389_v55 = vadd.f32 %v7388_v31, %v11987_v2 }
 0x99b   : > { %6997 = vmatpush1.bf16.msra.mxu1 %v5122_v63  ;;  %v5223_v63 = vunpack.c.h.s8.bf16 %v4115_v6  ;;  %v5265_v6 = vunpack.c.h.s8.bf16 %v4137_v52 }
 0x99c   : > { %7161 = vmatpush1.bf16.msra.mxu0 %v5124_v9  ;;  %6998 = vmatprep.subr.bf16.mxu1 %v5143_v49  ;;  %v7368_v9 = vrot.slane %v7367_v10, 1  ;;  %v5225_v49 = vunpack.c.h.s8.bf16 %v4117_v22 }
 0x99d   : > { %7162 = vmatprep.subr.bf16.mxu0 %v5145_v53  ;;  %v7381_v53 = vadd.f32 %v7380_v44, %v7379_v19  ;;  %v4155_v19 = vld [vmem:[%s11017_s26 + $0xf88] sm:$0xff] }
 0x99e   : > { %v7369_v0 = vadd.f32 %v7368_v9, %v7367_v10  ;;  %v5262_v10 = vunpack.c.h.s8.bf16 %v4134_v4  ;;  %v5283_v44 = vunpack.c.l.s8.bf16 %v4155_v19 }
 0x99f   : > { %6999 = vmatpush1.bf16.msra.mxu1 %v5142_v57  ;;  %v5222_v57 = vunpack.c.h.s8.bf16 %v4114_v40  ;;  %v7481_v37 = vmul.f32 0.125, %v7381_v53  ;;  %v7263_v40 = vrot.slane %v11940_v7, %v11308_v21 }
 0x9a0   : > { %7163 = vmatpush1.bf16.msra.mxu0 %v5144_v62  ;;  %7000 = vmatprep.subr.bf16.mxu1 %v5163_v3  ;;  %v5224_v62 = vunpack.c.h.s8.bf16 %v4116_v29  ;;  %v5243_v3 = vunpack.c.l.s8.bf16 %v4135_v50  ;;  %v5264_v29 = vunpack.c.h.s8.bf16 %v4136_v58 }
 0x9a1   : > { %7164 = vmatprep.subr.bf16.mxu0 %v5165_v36  ;;  %v5245_v36 = vunpack.c.l.s8.bf16 %v4137_v52  ;;  %v11996_v22 = vsub.f32 %v11950_v13, %v7481_v37  ;;  %v4154_v13 = vld [vmem:[%s11017_s26 + $0xf80] sm:$0xff] }
 0x9a2   : > { %v5282_v50 = vunpack.c.l.s8.bf16 %v4154_v13 }
 0x9a3   : > { %7001 = vmatpush1.bf16.msra.mxu1 %v5162_v8  ;;  %v5242_v8 = vunpack.c.l.s8.bf16 %v4134_v4 }
 0x9a4   : > { %7165 = vmatpush1.bf16.msra.mxu0 %v5164_v25  ;;  %7002 = vmatprep.subr.bf16.mxu1 %v5183_v27  ;;  %v7361_v25 = vadd.f32 %v7360_v5, %v7359_v47  ;;  %v5244_v27 = vunpack.c.l.s8.bf16 %v4136_v58  ;;  %v7521_v47 = vmul.f32 %v11996_v22, %v11996_v22 }
 0x9a5   : > { %7166 = vmatprep.subr.bf16.mxu0 %v5185_v18  ;;  %v7479_v18 = vmul.f32 0.125, %v7369_v0 }
 0x9a7   : > { %7003 = vmatpush1.bf16.msra.mxu1 %v5182_v59  ;;  %v7251_v59 = vrot.slane %v11940_v7, %v11300_v20  ;;  %v12006_v56 = vsub.f32 %v11955_v14, %v7479_v18 }
 0x9a8   : > { %7167 = vmatpush1.bf16.msra.mxu0 %v5184_v30  ;;  %7004 = vmatprep.subr.bf16.mxu1 %v5203_v32  ;;  %v4157_v30 = vld [vmem:[%s11017_s26 + $0xf98] sm:$0xff]  ;;  %v7373_v32 = vadd.f32 %v7372_v33, %v7371_v61  ;;  %v5303_v61 = vunpack.c.h.s8.bf16 %v4155_v19  ;;  %v4174_v33 = vld [vmem:[%s11017_s26 + $0x1020] sm:$0xff] }
 0x9a9   : > { %7168 = vmatprep.subr.bf16.mxu0 %v5205_v42  ;;  %v7362_v42 = vrot.slane %v7361_v25, 1  ;;  %v5285_v23 = vunpack.c.l.s8.bf16 %v4157_v30  ;;  %v7519_v52 = vmul.f32 %v12006_v56, %v12006_v56 }
 0x9aa   : > { %v7374_v9 = vrot.slane %v7373_v32, 1 }
 0x9ab   : > { %7005 = vmatpush1.bf16.msra.mxu1 %v5202_v46  ;;  %v4156_v46 = vld [vmem:[%s11017_s26 + $0xf90] sm:$0xff]  ;;  %v7363_v14 = vadd.f32 %v7362_v42, %v7361_v25 }
 0x9ac   : > { %7169 = vmatpush1.bf16.msra.mxu0 %v5204_v12  ;;  %7006 = vmatprep.subr.bf16.mxu1 %v5223_v63  ;;  %v12012_v12 = vmul.f32 %v7251_v59, %v11663_v48  ;;  %v7390_v63 = vrot.slane %v7389_v55, 2  ;;  %v5284_v53 = vunpack.c.l.s8.bf16 %v4156_v46  ;;  %v7556_v48 = vrot.slane %v7521_v47, 4 }
 0x9ad   : > { %7170 = vmatprep.subr.bf16.mxu0 %v5225_v49  ;;  %v12015_v49 = vmul.f32 %v7263_v40, %v11670_v38  ;;  %v5305_v38 = vunpack.c.h.s8.bf16 %v4157_v30  ;;  %v7375_v4 = vadd.f32 %v7374_v9, %v7373_v32  ;;  %v7478_v58 = vmul.f32 0.125, %v7363_v14 }
 0x9ae   : > { %v7382_v5 = vrot.slane %v12012_v12, 4  ;;  %v5304_v37 = vunpack.c.h.s8.bf16 %v4156_v46  ;;  %v5322_v59 = vunpack.c.l.s8.bf16 %v4174_v33 }
 0x9af   : > { %7007 = vmatpush1.bf16.msra.mxu1 %v5222_v57  ;;  %v4175_v57 = vld [vmem:[%s11017_s26 + $0x1028] sm:$0xff]  ;;  %v7400_v0 = vrot.slane %v12015_v49, 4 }
 0x9b0   : > { %7171 = vmatpush1.bf16.msra.mxu0 %v5224_v62  ;;  %7008 = vmatprep.subr.bf16.mxu1 %v5243_v3  ;;  %v7391_v62 = vadd.f32 %v7390_v63, %v7389_v55  ;;  %v4177_v3 = vld [vmem:[%s11017_s26 + $0x1038] sm:$0xff]  ;;  %v5323_v31 = vunpack.c.l.s8.bf16 %v4175_v57  ;;  %v7383_v18 = vadd.f32 %v7382_v5, %v12012_v12  ;;  %v12032_v55 = vsub.f32 %v11971_v17, %v7478_v58 }
 0x9b1   : > { %7172 = vmatprep.subr.bf16.mxu0 %v5245_v36  ;;  %v5302_v36 = vunpack.c.h.s8.bf16 %v4154_v13  ;;  %v5325_v25 = vunpack.c.l.s8.bf16 %v4177_v3  ;;  %v7401_v19 = vadd.f32 %v7400_v0, %v12015_v49  ;;  %v5343_v30 = vunpack.c.h.s8.bf16 %v4175_v57  ;;  %v4197_v17 = vld [vmem:[%s11017_s26 + $0x10d8] sm:$0xff]  ;;  %v4196_v57 = vld [vmem:[%s11017_s26 + $0x10d0] sm:$0xff] }
 0x9b2   : > { %v5345_v40 = vunpack.c.h.s8.bf16 %v4177_v3  ;;  %v5342_v63 = vunpack.c.h.s8.bf16 %v4174_v33  ;;  %v7518_v9 = vmul.f32 %v12032_v55, %v12032_v55  ;;  %v4215_v33 = vld [vmem:[%s11017_s26 + $0x1168] sm:$0xff] }
 0x9b3   : > { %7009 = vmatpush1.bf16.msra.mxu1 %v5242_v8  ;;  %v7544_v8 = vrot.slane %v7519_v52, 4 }
 0x9b4   : > { %7173 = vmatpush1.bf16.msra.mxu0 %v5244_v27  ;;  %7010 = vmatprep.subr.bf16.mxu1 %v5263_v35  ;;  %v4176_v27 = vld [vmem:[%s11017_s26 + $0x1030] sm:$0xff]  ;;  %v7557_v35 = vadd.f32 %v7556_v48, %v7521_v47  ;;  %v7402_v47 = vrot.slane %v7401_v19, 2  ;;  %v7538_v0 = vrot.slane %v7518_v9, 4 }
 0x9b5   : > { %7174 = vmatprep.subr.bf16.mxu0 %v5265_v6  ;;  %v7480_v6 = vmul.f32 0.125, %v7375_v4  ;;  %v7545_v32 = vadd.f32 %v7544_v8, %v7519_v52 }
 0x9b6   : > { %v7558_v42 = vrot.slane %v7557_v35, 2  ;;  %v7403_v3 = vadd.f32 %v7402_v47, %v7401_v19 }
 0x9b7   : > { %7011 = vmatpush1.bf16.msra.mxu1 %v5262_v10  ;;  %v4195_v10 = vld [vmem:[%s11017_s26 + $0x10c8] sm:$0xff]  ;;  %v12042_v46 = vsub.f32 %v11976_v28, %v7480_v6 }
 0x9b8   : > { %7175 = vmatpush1.bf16.msra.mxu0 %v5264_v29  ;;  %7021 = vmatprep.subr.bf16.mxu1 %v5283_v44  ;;  %v7384_v29 = vrot.slane %v7383_v18, 2  ;;  %v7259_v44 = vrot.slane %v11940_v7, %v11371_v34  ;;  %v5363_v14 = vunpack.c.l.s8.bf16 %v4195_v10  ;;  %v7546_v7 = vrot.slane %v7545_v32, 2 }
 0x9b9   : > { %7185 = vmatprep.subr.bf16.mxu0 %v5285_v23  ;;  %v12038_v23 = vld [vmem:[%s11937_s8 + $0x8] sm:$0xff]  ;;  %v7559_v28 = vadd.f32 %v7558_v42, %v7557_v35  ;;  %v5383_v58 = vunpack.c.h.s8.bf16 %v4195_v10  ;;  %v7404_v6 = vrot.slane %v7403_v3, 1  ;;  %v4216_v42 = vld [vmem:[%s11017_s26 + $0x1170] sm:$0xff] }
 0x9ba   : > { %7013 = vmatmul.mubr.bf16.vlgmr.msra.gmra.mrb[24].mxu1 %v11338_v54  ;;  %v7271_v52 = vrot.slane %v12038_v23, %v11030_v26  ;;  %v7385_v48 = vadd.f32 %v7384_v29, %v7383_v18  ;;  %v12051_v5 = vmul.f32 %v7259_v44, %v11666_v51  ;;  %v5385_v51 = vunpack.c.h.s8.bf16 %v4197_v17  ;;  %v4217_v18 = vld [vmem:[%s11017_s26 + $0x1178] sm:$0xff] }
 0x9bb   : > { %7177 = vmatmul.mubr.bf16.vlgmr.msra.gmra.mrb[36].mxu0 %v11338_v54  ;;  %7022 = vmatpush1.bf16.msra.mxu1 %v5282_v50  ;;  %v7392_v54 = vrot.slane %v7391_v62, 1  ;;  %v5344_v50 = vunpack.c.h.s8.bf16 %v4176_v27  ;;  %v7560_v8 = vrot.slane %v7559_v28, 1 }
 0x9bc   : > { %7053 = vmatprep.mubr.bf16.mxu1 %v11344_v1  ;;  %7186 = vmatpush1.bf16.msra.mxu0 %v5284_v53  ;;  %v4194_v53 = vld [vmem:[%s11017_s26 + $0x10c0] sm:$0xff] }
 0x9bd   : > { %7217 = vmatprep.mubr.bf16.mxu0 %v11344_v1  ;;  %7023 = vmatprep.subr.bf16.mxu1 %v5303_v61  ;;  %v5324_v1 = vunpack.c.l.s8.bf16 %v4176_v27  ;;  %v7393_v13 = vadd.f32 %v7392_v54, %v7391_v62  ;;  %v5365_v61 = vunpack.c.l.s8.bf16 %v4197_v17  ;;  %v5362_v4 = vunpack.c.l.s8.bf16 %v4194_v53 }
 0x9be   : > { %7187 = vmatprep.subr.bf16.mxu0 %v5305_v38  ;;  %v7520_v38 = vmul.f32 %v12042_v46, %v12042_v46  ;;  %v7394_v27 = vrot.slane %v12051_v5, 4  ;;  %v5382_v19 = vunpack.c.h.s8.bf16 %v4194_v53  ;;  %v7561_v29 = vadd.f32 %v7560_v8, %v7559_v28 }
 0x9bf   : > { %7024 = vmatpush1.bf16.msra.mxu1 %v5302_v36  ;;  %v7483_v62 = vmul.f32 0.125, %v7393_v13  ;;  %v5364_v36 = vunpack.c.l.s8.bf16 %v4196_v57  ;;  %v5404_v28 = vunpack.c.l.s8.bf16 %v4216_v42 }
 0x9c0   : > { %7188 = vmatpush1.bf16.msra.mxu0 %v5304_v37  ;;  %7025 = vmatprep.subr.bf16.mxu1 %v5323_v31  ;;  %v7547_v37 = vadd.f32 %v7546_v7, %v7545_v32  ;;  %v12056_v31 = vmul.f32 %v7271_v52, %v11820_v43  ;;  %v7550_v54 = vrot.slane %v7520_v38, 4  ;;  %v5384_v43 = vunpack.c.h.s8.bf16 %v4196_v57 }
 0x9c1   : > { %7189 = vmatprep.subr.bf16.mxu0 %v5325_v25  ;;  %v7386_v25 = vrot.slane %v7385_v48, 1  ;;  %v12061_v35 = vsub.f32 %v11987_v2, %v7483_v62  ;;  %v5405_v2 = vunpack.c.l.s8.bf16 %v4217_v18  ;;  %v7395_v13 = vadd.f32 %v7394_v27, %v12051_v5 }
 0x9c2   : > { %v7548_v32 = vrot.slane %v7547_v37, 1 }
 0x9c3   : > { %7026 = vmatpush1.bf16.msra.mxu1 %v5322_v59  ;;  %v7539_v59 = vadd.f32 %v7538_v0, %v7518_v9  ;;  %v7387_v44 = vadd.f32 %v7386_v25, %v7385_v48  ;;  %v7523_v17 = vmul.f32 %v12061_v35, %v12061_v35  ;;  %v7551_v9 = vadd.f32 %v7550_v54, %v7520_v38  ;;  %v4237_v25 = vld [vmem:[%s11017_s26 + $0x1218] sm:$0xff] }
 0x9c4   : > { %7190 = vmatpush1.bf16.msra.mxu0 %v5324_v1  ;;  %7027 = vmatprep.subr.bf16.mxu1 %v5343_v30  ;;  %v5403_v1 = vunpack.c.l.s8.bf16 %v4215_v33  ;;  %v4214_v30 = vld [vmem:[%s11017_s26 + $0x1160] sm:$0xff]  ;;  %v5423_v48 = vunpack.c.h.s8.bf16 %v4215_v33  ;;  %v7549_v62 = vadd.f32 %v7548_v32, %v7547_v37  ;;  %v5425_v38 = vunpack.c.h.s8.bf16 %v4217_v18 }
 0x9c5   : > { %7191 = vmatprep.subr.bf16.mxu0 %v5345_v40  ;;  %v7412_v40 = vrot.slane %v12056_v31, 4  ;;  %v5402_v7 = vunpack.c.l.s8.bf16 %v4214_v30  ;;  %v7540_v52 = vrot.slane %v7539_v59, 2  ;;  %v7568_v8 = vrot.slane %v7523_v17, 4 }
 0x9c6   : > { %v7552_v27 = vrot.slane %v7551_v9, 2  ;;  %v7267_v37 = vrot.slane %v12038_v23, %v11027_v24  ;;  %v5424_v33 = vunpack.c.h.s8.bf16 %v4216_v42 }
 0x9c7   : > { %7028 = vmatpush1.bf16.msra.mxu1 %v5342_v63 }
 0x9c8   : > { %7192 = vmatpush1.bf16.msra.mxu0 %v5344_v50  ;;  %7029 = vmatprep.subr.bf16.mxu1 %v5363_v14  ;;  %v7405_v50 = vadd.f32 %v7404_v6, %v7403_v3  ;;  %v4235_v3 = vld [vmem:[%s11017_s26 + $0x1208] sm:$0xff]  ;;  %v5422_v6 = vunpack.c.h.s8.bf16 %v4214_v30 }
 0x9c9   : > { %7193 = vmatprep.subr.bf16.mxu0 %v5365_v61  ;;  %v5443_v18 = vunpack.c.l.s8.bf16 %v4235_v3 }
 0x9ca   : > { %v7485_v54 = vmul.f32 0.125, %v7405_v50  ;;  %v7569_v50 = vadd.f32 %v7568_v8, %v7523_v17  ;;  %v4254_v8 = vld [vmem:[%s11017_s26 + $0x12a0] sm:$0xff] }
 0x9cb   : > { %7030 = vmatpush1.bf16.msra.mxu1 %v5362_v4  ;;  %v7413_v4 = vadd.f32 %v7412_v40, %v12056_v31  ;;  %v7279_v40 = vrot.slane %v12038_v23, %v11094_v45 }
 0x9cc   : > { %7194 = vmatpush1.bf16.msra.mxu0 %v5364_v36  ;;  %7031 = vmatprep.subr.bf16.mxu1 %v5383_v58  ;;  %v7661_v36 = vmul.f32 0.125, %v7561_v29  ;;  %v7482_v58 = vmul.f32 0.125, %v7387_v44  ;;  %v4236_v29 = vld [vmem:[%s11017_s26 + $0x1210] sm:$0xff]  ;;  %v12091_v42 = vsub.f32 %v12015_v49, %v7485_v54  ;;  %v5465_v49 = vunpack.c.h.s8.bf16 %v4237_v25 }
 0x9cd   : > { %v12066_v10 = vpop.f32.mrb[20].mxu1  ;;  %7195 = vmatprep.subr.bf16.mxu0 %v5385_v51  ;;  %v7396_v51 = vrot.slane %v7395_v13, 2  ;;  %v7414_v32 = vrot.slane %v7413_v4, 2  ;;  %v12097_v17 = vmul.f32 %v7279_v40, %v11822_v11 }
 0x9ce   : > { %v12072_v47 = vpop.f32.mrb[32].mxu0  ;;  %v12074_v63 = vpop.f32.mrb[21].mxu1  ;;  %v7681_v44 = vadd.f32 1e-05, %v7661_v36  ;;  %v12088_v30 = vsub.f32 %v12012_v12, %v7482_v58  ;;  %v5464_v58 = vunpack.c.h.s8.bf16 %v4236_v29 }
 0x9cf   : > { %v12076_v14 = vpop.f32.mrb[33].mxu0  ;;  %v6731_v53 = vpop.f32.mrb[22].mxu1  ;;  %7032 = vmatpush1.bf16.msra.mxu1 %v5382_v19  ;;  %v7541_v19 = vadd.f32 %v7540_v52, %v7539_v59  ;;  %v7397_v59 = vadd.f32 %v7396_v51, %v7395_v13  ;;  %v7415_v13 = vadd.f32 %v7414_v32, %v7413_v4  ;;  %v12111_v4 = vld [vmem:[%s12108_s10] sm:$0xff] }
 0x9d0   : > { %v6895_v61 = vpop.f32.mrb[34].mxu0  ;;  %7196 = vmatpush1.bf16.msra.mxu0 %v5384_v43  ;;  %v6732_v57 = vpop.f32.mrb[23].mxu1  ;;  %7033 = vmatprep.subr.bf16.mxu1 %v5403_v1  ;;  %v4234_v43 = vld [vmem:[%s11017_s26 + $0x1200] sm:$0xff]  ;;  %v7659_v1 = vmul.f32 0.125, %v7549_v62  ;;  %v7553_v53 = vadd.f32 %v7552_v27, %v7551_v9  ;;  %v4255_v9 = vld [vmem:[%s11017_s26 + $0x12a8] sm:$0xff]  ;;  %9874 = vrsqrt.f32 %v7681_v44  ;;  %v7570_v62 = vrot.slane %v7569_v50, 2 }
 0x9d1   : > { %v6896_v0 = vpop.f32.mrb[35].mxu0  ;;  %7197 = vmatprep.subr.bf16.mxu0 %v5405_v2  ;;  %v5445_v2 = vunpack.c.l.s8.bf16 %v4237_v25  ;;  %v7542_v52 = vrot.slane %v7541_v19, 1  ;;  %v12094_v61 = vmul.f32 %v7267_v37, %v11815_v15  ;;  %v5444_v57 = vunpack.c.l.s8.bf16 %v4236_v29 }
 0x9d2   : > { %v7679_v12 = vadd.f32 1e-05, %v7659_v1  ;;  %v7398_v15 = vrot.slane %v7397_v59, 1  ;;  %v12103_v0 = vld [vmem:[%s11017_s26 + $0x12b8] sm:$0xff]  ;;  %v5462_v11 = vunpack.c.h.s8.bf16 %v4234_v43  ;;  %v5483_v51 = vunpack.c.l.s8.bf16 %v4255_v9  ;;  %v12122_v1 = vld [vmem:[%s12119_s14] sm:$0xff] }
 0x9d3   : > { %7034 = vmatpush1.bf16.msra.mxu1 %v5402_v7  ;;  %v5442_v7 = vunpack.c.l.s8.bf16 %v4234_v43  ;;  %v7406_v36 = vrot.slane %v12094_v61, 4  ;;  %v7416_v25 = vrot.slane %v7415_v13, 1  ;;  %v7424_v27 = vrot.slane %v12097_v17, 4 }
 0x9d4   : > { %7198 = vmatpush1.bf16.msra.mxu0 %v5404_v28  ;;  %7035 = vmatprep.subr.bf16.mxu1 %v5423_v48  ;;  %v5463_v28 = vunpack.c.h.s8.bf16 %v4235_v3  ;;  %v7522_v48 = vmul.f32 %v12088_v30, %v12088_v30  ;;  %v7525_v3 = vmul.f32 %v12091_v42, %v12091_v42  ;;  %9876 = vrsqrt.f32 %v7679_v12 }
 0x9d5   : > { %7199 = vmatprep.subr.bf16.mxu0 %v5425_v38  ;;  %v7554_v38 = vrot.slane %v7553_v53, 1  ;;  %v5485_v54 = vunpack.c.l.s8.bf16 %v12103_v0  ;;  %v7543_v37 = vadd.f32 %v7542_v52, %v7541_v19  ;;  %v7571_v43 = vadd.f32 %v7570_v62, %v7569_v50 }
 0x9d6   : > { %v7580_v40 = vrot.slane %v7525_v3, 4  ;;  %v7407_v44 = vadd.f32 %v7406_v36, %v12094_v61  ;;  %v7756_v50 = vrot.slane %v12111_v4, %v11094_v45  ;;  %v7425_v52 = vadd.f32 %v7424_v27, %v12097_v17  ;;  %v4274_v27 = vld [vmem:[%s11017_s26 + $0x1340] sm:$0xff] }
 0x9d7   : > { %7036 = vmatpush1.bf16.msra.mxu1 %v5422_v6  ;;  %v4256_v6 = vld [vmem:[%s11017_s26 + $0x12b0] sm:$0xff]  ;;  %v7555_v32 = vadd.f32 %v7554_v38, %v7553_v53  ;;  %v5505_v53 = vunpack.c.h.s8.bf16 %v12103_v0  ;;  %v7658_v12 = vmul.f32 0.125, %v7543_v37  ;;  %v7572_v62 = vrot.slane %v7571_v43, 1  ;;  %v4277_v38 = vld [vmem:[%s11017_s26 + $0x1358] sm:$0xff] }
 0x9d8   : > { %7200 = vmatpush1.bf16.msra.mxu0 %v5424_v33  ;;  %7037 = vmatprep.subr.bf16.mxu1 %v5443_v18  ;;  %v7562_v33 = vrot.slane %v7522_v48, 4  ;;  %v7399_v18 = vadd.f32 %v7398_v15, %v7397_v59  ;;  %v5484_v19 = vunpack.c.l.s8.bf16 %v4256_v6  ;;  %v5503_v59 = vunpack.c.h.s8.bf16 %v4255_v9 }
 0x9d9   : > { %7201 = vmatprep.subr.bf16.mxu0 %v5445_v2  ;;  %v5482_v2 = vunpack.c.l.s8.bf16 %v4254_v8  ;;  %v7660_v9 = vmul.f32 0.125, %v7555_v32  ;;  %v7408_v0 = vrot.slane %v7407_v44, 2  ;;  %v7426_v37 = vrot.slane %v7425_v52, 2 }
 0x9da   : > { %v7484_v15 = vmul.f32 0.125, %v7399_v18  ;;  %v7678_v18 = vadd.f32 1e-05, %v7658_v12 }
 0x9db   : > { %7038 = vmatpush1.bf16.msra.mxu1 %v5442_v7  ;;  %v7417_v7 = vadd.f32 %v7416_v25, %v7415_v13  ;;  %v5502_v13 = vunpack.c.h.s8.bf16 %v4254_v8  ;;  %v5525_v8 = vunpack.c.l.s8.bf16 %v4277_v38  ;;  %v7409_v36 = vadd.f32 %v7408_v0, %v7407_v44 }
 0x9dc   : > { %7202 = vmatpush1.bf16.msra.mxu0 %v5444_v57  ;;  %7039 = vmatprep.subr.bf16.mxu1 %v5463_v28  ;;  %v4275_v57 = vld [vmem:[%s11017_s26 + $0x1348] sm:$0xff] }
 0x9dd   : > { %7203 = vmatprep.subr.bf16.mxu0 %v5465_v49  ;;  %v7563_v49 = vadd.f32 %v7562_v33, %v7522_v48  ;;  %v5504_v48 = vunpack.c.h.s8.bf16 %v4256_v6  ;;  %v5523_v25 = vunpack.c.l.s8.bf16 %v4275_v57  ;;  %v4276_v33 = vld [vmem:[%s11017_s26 + $0x1350] sm:$0xff]  ;;  %v5543_v29 = vunpack.c.h.s8.bf16 %v4275_v57 }
 0x9de   : > { %v5524_v12 = vunpack.c.l.s8.bf16 %v4276_v33 }
 0x9df   : > { %7040 = vmatpush1.bf16.msra.mxu1 %v5462_v11  ;;  %v7581_v11 = vadd.f32 %v7580_v40, %v7525_v3  ;;  %v7287_v3 = vrot.slane %v12038_v23, %v11303_v60  ;;  %v7564_v32 = vrot.slane %v7563_v49, 2  ;;  %v12144_v40 = vsub.f32 %v12051_v5, %v7484_v15 }
 0x9e0   : > { %7204 = vmatpush1.bf16.msra.mxu0 %v5464_v58  ;;  %7041 = vmatprep.subr.bf16.mxu1 %v5483_v51  ;;  %v9875_v58 = vpop.eup %9874  ;;  %v7275_v51 = vrot.slane %v12038_v23, %v11091_v41 }
 0x9e1   : > { %7205 = vmatprep.subr.bf16.mxu0 %v5485_v54  ;;  %v7487_v54 = vmul.f32 0.125, %v7417_v7  ;;  %v9877_v28 = vpop.eup %9876  ;;  %v7721_v6 = vmul.f32 %v9875_v58, %v11996_v22  ;;  %v5522_v7 = vunpack.c.l.s8.bf16 %v4274_v27  ;;  %v12154_v15 = vmul.f32 %v7287_v3, %v12074_v63  ;;  %v4297_v58 = vld [vmem:[%s11017_s26 + $0x13f8] sm:$0xff] }
 0x9e2   : > { %v5545_v22 = vunpack.c.h.s8.bf16 %v4277_v38  ;;  %v7719_v44 = vmul.f32 %v9877_v28, %v12006_v56  ;;  %v7410_v63 = vrot.slane %v7409_v36, 1  ;;  %v5544_v38 = vunpack.c.h.s8.bf16 %v4276_v33  ;;  %v4294_v28 = vld [vmem:[%s11017_s26 + $0x13e0] sm:$0xff] }
 0x9e3   : > { %7042 = vmatpush1.bf16.msra.mxu1 %v5482_v2  ;;  %v7573_v2 = vadd.f32 %v7572_v62, %v7571_v43  ;;  %v12151_v5 = vsub.f32 %v12056_v31, %v7487_v54  ;;  %v7427_v43 = vadd.f32 %v7426_v37, %v7425_v52  ;;  %v4295_v62 = vld [vmem:[%s11017_s26 + $0x13e8] sm:$0xff]  ;;  %v5542_v31 = vunpack.c.h.s8.bf16 %v4274_v27 }
 0x9e4   : > { %7206 = vmatpush1.bf16.msra.mxu0 %v5484_v19  ;;  %7043 = vmatprep.subr.bf16.mxu1 %v5503_v59  ;;  %v7680_v19 = vadd.f32 1e-05, %v7660_v9  ;;  %v7582_v59 = vrot.slane %v7581_v11, 2  ;;  %v7565_v9 = vadd.f32 %v7564_v32, %v7563_v49  ;;  %v7844_v52 = vmul.f32 %v7756_v50, %v7721_v6 }
 0x9e5   : > { %7207 = vmatprep.subr.bf16.mxu0 %v5505_v53  ;;  %v12148_v53 = vmul.f32 %v7275_v51, %v11818_v39  ;;  %v7524_v39 = vmul.f32 %v12144_v40, %v12144_v40  ;;  %v5563_v56 = vunpack.c.l.s8.bf16 %v4295_v62  ;;  %v7527_v49 = vmul.f32 %v12151_v5, %v12151_v5 }
 0x9e6   : > { %9878 = vrsqrt.f32 %v7680_v19  ;;  %v7583_v57 = vadd.f32 %v7582_v59, %v7581_v11  ;;  %v7428_v51 = vrot.slane %v7427_v43, 1  ;;  %v5565_v11 = vunpack.c.l.s8.bf16 %v4297_v58 }
 0x9e7   : > { %7044 = vmatpush1.bf16.msra.mxu1 %v5502_v13  ;;  %v7663_v13 = vmul.f32 0.125, %v7573_v2  ;;  %v7418_v0 = vrot.slane %v12148_v53, 4  ;;  %v7566_v54 = vrot.slane %v7565_v9, 1  ;;  %v7574_v27 = vrot.slane %v7524_v39, 4 }
 0x9e8   : > { %7208 = vmatpush1.bf16.msra.mxu0 %v5504_v48  ;;  %7045 = vmatprep.subr.bf16.mxu1 %v5523_v25  ;;  %v7436_v48 = vrot.slane %v12154_v15, 4  ;;  %v4296_v25 = vld [vmem:[%s11017_s26 + $0x13f0] sm:$0xff]  ;;  %v12542_v37 = vrot.slane %v12111_v4, %v11030_v26  ;;  %9880 = vrsqrt.f32 %v7678_v18  ;;  %v12543_v33 = vrot.slane %v12122_v1, %v11094_v45  ;;  %s10350_s26 = sshll.u32 %s10465_s19, 4  ;;  %s10351_s26 = int_to_ptr.vmem [resolvable:$false] %s10350_s26 }
 0x9e9   : > { %7209 = vmatprep.subr.bf16.mxu0 %v5525_v8  ;;  %v7683_v50 = vadd.f32 1e-05, %v7663_v13  ;;  %v5562_v8 = vunpack.c.l.s8.bf16 %v4294_v28  ;;  %v7411_v2 = vadd.f32 %v7410_v63, %v7409_v36  ;;  %v7419_v19 = vadd.f32 %v7418_v0, %v12148_v53  ;;  %s10352_s17 = scalar_lea.vmem %s10351_s26, 256  ;;  %p10353_p0 = scmp.lt.s32.totalorder %s12382_s27, %s10351_s26 }
 0x9ea   : > { %v7842_v3 = vmul.f32 %v12542_v37, %v7719_v44  ;;  %v7967_v32 = vadd.f32 %v12543_v33, %v7844_v52  ;;  %v5564_v6 = vunpack.c.l.s8.bf16 %v4296_v25  ;;  %v5583_v59 = vunpack.c.h.s8.bf16 %v4295_v62  ;;  %p10354_p9 = scmp.lt.s32.totalorder %s10352_s17, %s10346_s15 }
 0x9eb   : > { %7046 = vmatpush1.bf16.msra.mxu1 %v5522_v7  ;;  %v7592_v7 = vrot.slane %v7527_v49, 4  ;;  %v5585_v18 = vunpack.c.h.s8.bf16 %v4297_v58  ;;  %v7567_v44 = vadd.f32 %v7566_v54, %v7565_v9  ;;  %v7575_v13 = vadd.f32 %v7574_v27, %v7524_v39  ;;  %v9791_v9 = vld [vmem:[%s11925_s29 + $0xc] ss:$80 sps:$4 sm:$0xff]  }
 0x9ec   : > { %7210 = vmatpush1.bf16.msra.mxu0 %v5524_v12  ;;  %7047 = vmatprep.subr.bf16.mxu1 %v5543_v29  ;;  %v7584_v29 = vrot.slane %v7583_v57, 1  ;;  %v7429_v12 = vadd.f32 %v7428_v51, %v7427_v43  ;;  %9882 = vrsqrt.f32 %v7683_v50  ;;  %v5582_v63 = vunpack.c.h.s8.bf16 %v4294_v28  ;;  %p10355_p10 = por %p10354_p9, %p10353_p0 }
 0x9ed   : > { %7211 = vmatprep.subr.bf16.mxu0 %v5545_v22  ;;  %v7437_v22 = vadd.f32 %v7436_v48, %v12154_v15  ;;  %v7987_v0 = vmax.f32 %v7967_v32, 0.0  ;;  %v7486_v62 = vmul.f32 0.125, %v7411_v2  ;;  %v7283_v43 = vrot.slane %v12038_v23, %v11300_v20 }
 0x9ee   : > { %v7585_v52 = vadd.f32 %v7584_v29, %v7583_v57  ;;  %v5584_v58 = vunpack.c.h.s8.bf16 %v4296_v25  ;;  %v7489_v51 = vmul.f32 0.125, %v7429_v12  ;;  %v7295_v57 = vrot.slane %v12038_v23, %v11308_v21  ;;  %p10356_p12 = pnand %p10355_p10, %p10349_p13 }
 0x9ef   : > { %7048 = vmatpush1.bf16.msra.mxu1 %v5542_v31  ;;  %v12544_v31 = vrot.slane %v12122_v1, %v11030_v26  ;;  %v7438_v48 = vrot.slane %v7437_v22, 2  ;;  %v7662_v28 = vmul.f32 0.125, %v7567_v44  ;;  %v7576_v54 = vrot.slane %v7575_v13, 2 }
 0x9f0   : > { %7212 = vmatpush1.bf16.msra.mxu0 %v5544_v38  ;;  %7049 = vmatprep.subr.bf16.mxu1 %v5563_v56  ;;  %v7420_v38 = vrot.slane %v7419_v19, 2  ;;  %v9879_v39 = vpop.eup %9878  ;;  %v7593_v56 = vadd.f32 %v7592_v7, %v7527_v49  ;;  %v8007_v50 = vpack.c.bf16 %v7987_v0, %v7987_v0  ;;  %v7665_v37 = vmul.f32 0.125, %v7585_v52 }
 0x9f1   : > { %7213 = vmatprep.subr.bf16.mxu0 %v5565_v11  ;;  %v7965_v36 = vadd.f32 %v12544_v31, %v7842_v3  ;;  %v9788_v11 = vld [vmem:[%s11925_s29 + $0x4] ss:$80 sps:$4 sm:$0xff]   ;;  %v12185_v3 = vsub.f32 %v12094_v61, %v7486_v62  ;;  %v12188_v29 = vmul.f32 %v7283_v43, %v12066_v10  ;;  %v12191_v33 = vsub.f32 %v12097_v17, %v7489_v51 }
 0x9f2   : > { %v7421_v25 = vadd.f32 %v7420_v38, %v7419_v19  ;;  %v9881_v49 = vpop.eup %9880  ;;  %v7439_v32 = vadd.f32 %v7438_v48, %v7437_v22  ;;  %v12194_v2 = vmul.f32 %v7295_v57, %v12076_v14  ;;  %v7577_v61 = vadd.f32 %v7576_v54, %v7575_v13  ;;  %v9794_v62 = vld [vmem:[%s11925_s29 + $0xa4] ss:$80 sps:$4 sm:$0xff]  }
 0x9f3   : > { %7050 = vmatpush1.bf16.msra.mxu1 %v5562_v8  ;;  %v7985_v27 = vmax.f32 %v7965_v36, 0.0  ;;  %v7594_v8 = vrot.slane %v7593_v56, 2  ;;  %v7720_v10 = vmul.f32 %v9879_v39, %v12042_v46  ;;  %v7685_v14 = vadd.f32 1e-05, %v7665_v37  ;;  %v9797_v36 = vld [vmem:[%s11925_s29 + $0xac] ss:$80 sps:$4 sm:$0xff]  }
 0x9f4   : > { %7214 = vmatpush1.bf16.msra.mxu0 %v5564_v6  ;;  %7051 = vmatprep.subr.bf16.mxu1 %v5583_v59  ;;  %v7682_v6 = vadd.f32 1e-05, %v7662_v28  ;;  %v7752_v59 = vrot.slane %v12111_v4, %v11091_v41  ;;  %v7526_v7 = vmul.f32 %v12185_v3, %v12185_v3  ;;  %v7422_v12 = vrot.slane %v7421_v25, 1 }
 0x9f5   : > { %7215 = vmatprep.subr.bf16.mxu0 %v5585_v18  ;;  %v8005_v19 = vpack.c.bf16 %v7985_v27, %v7985_v27  ;;  %v7430_v22 = vrot.slane %v12188_v29, 4  ;;  %v9789_v18 = vld [vmem:[%s11925_s29 + $0x8] ss:$80 sps:$4 sm:$0xff]   ;;  %v7595_v44 = vadd.f32 %v7594_v8, %v7593_v56  ;;  %v7529_v46 = vmul.f32 %v12191_v33, %v12191_v33 }
 0x9f6   : > { %v9883_v17 = vpop.eup %9882  ;;  %v7440_v13 = vrot.slane %v7439_v32, 1  ;;  %v7448_v31 = vrot.slane %v12194_v2, 4  ;;  %v7718_v52 = vmul.f32 %v9881_v49, %v12032_v55  ;;  %9884 = vrsqrt.f32 %v7682_v6  ;;  %v9795_v6 = vld [vmem:[%s11925_s29 + $0xa8] ss:$80 sps:$4 sm:$0xff]  }
 0x9f7   : > { %7052 = vmatpush1.bf16.msra.mxu1 %v5582_v63  ;;  %v7744_v63 = vrot.slane %v12111_v4, %v11027_v24  ;;  %v7578_v0 = vrot.slane %v7577_v61, 1  ;;  %v7843_v38 = vmul.f32 %v7752_v59, %v7720_v10  ;;  %v7723_v43 = vmul.f32 %v9883_v17, %v12061_v35  ;;  %v9792_v17 = vld [vmem:[%s11925_s29 + $0xa0] ss:$80 sps:$4 sm:$0xff]  }
 0x9f8   : > { %7216 = vmatpush1.bf16.msra.mxu0 %v5584_v58  ;;  %8304 = vmatprep.subr.bf16.mxu1 %v9791_v9  ;;  %v7875_v58 = vrot.slane %v12122_v1, %v11091_v41  ;;  %v7764_v9 = vrot.slane %v12111_v4, %v11303_v60  ;;  %9886 = vrsqrt.f32 %v7685_v14  ;;  %v7586_v39 = vrot.slane %v7526_v7, 4  ;;  %v9800_v14 = vld [vmem:[%s11925_s29 + $0x14] ss:$80 sps:$4 sm:$0xff]  }
 0x9f9   : > { %8264 = vmatprep.subr.bf16.mxu0 %v9788_v11  ;;  %v7423_v56 = vadd.f32 %v7422_v12, %v7421_v25  ;;  %v7431_v55 = vadd.f32 %v7430_v22, %v12188_v29  ;;  %v7596_v51 = vrot.slane %v7595_v44, 1  ;;  %v7604_v48 = vrot.slane %v7529_v46, 4 }
 0x9fa   : > { %7054 = vmatmul.mubr.bf16.vlgmr.msra.gmra.mrb[24].mxu1 %v11386_v16  ;;  %v7441_v57 = vadd.f32 %v7440_v13, %v7439_v32  ;;  %v7449_v11 = vadd.f32 %v7448_v31, %v12194_v2  ;;  %v7841_v35 = vmul.f32 %v7744_v63, %v7718_v52  ;;  %v7579_v28 = vadd.f32 %v7578_v0, %v7577_v61 }
 0x9fb   : > { %7218 = vmatmul.mubr.bf16.vlgmr.msra.gmra.mrb[36].mxu0 %v11386_v16  ;;  %8336 = vmatprep.mubr.bf16.mxu1 %v8007_v50  ;;  %v9786_v16 = vld [vmem:[%s11925_s29] ss:$80 sps:$4 sm:$0xff]   ;;  %v7867_v54 = vrot.slane %v12122_v1, %v11027_v24  ;;  %v7966_v27 = vadd.f32 %v7875_v58, %v7843_v38  ;;  %v7846_v50 = vmul.f32 %v7764_v9, %v7723_v43  ;;  %v7488_v49 = vmul.f32 0.125, %v7423_v56 }
 0x9fc   : > { %8296 = vmatprep.mubr.bf16.mxu0 %v8005_v19  ;;  %v7887_v37 = vrot.slane %v12122_v1, %v11303_v60  ;;  %v7587_v25 = vadd.f32 %v7586_v39, %v7526_v7  ;;  %v7432_v8 = vrot.slane %v7431_v55, 2  ;;  %v7291_v32 = vrot.slane %v12038_v23, %v11371_v34 }
 0x9fd   : > { %v7597_v19 = vadd.f32 %v7596_v51, %v7595_v44  ;;  %v7605_v10 = vadd.f32 %v7604_v48, %v7529_v46  ;;  %v7491_v61 = vmul.f32 0.125, %v7441_v57  ;;  %v7450_v59 = vrot.slane %v7449_v11, 2 }
 0x9fe   : > { %v7664_v12 = vmul.f32 0.125, %v7579_v28  ;;  %v7964_v22 = vadd.f32 %v7867_v54, %v7841_v35  ;;  %v7969_v13 = vadd.f32 %v7887_v37, %v7846_v50  ;;  %v12231_v7 = vsub.f32 %v12148_v53, %v7488_v49 }
 0x9ff   : > { %v12234_v52 = vmul.f32 %v7291_v32, %v12072_v47  ;;  %v7667_v23 = vmul.f32 0.125, %v7597_v19  ;;  %v7606_v44 = vrot.slane %v7605_v10, 2  ;;  %v12237_v46 = vsub.f32 %v12154_v15, %v7491_v61 }
 0xa00   : > { %8305 = vmatpush1.bf16.xpose.msra.mxu1 %v9789_v18  ;;  %v7986_v18 = vmax.f32 %v7966_v27, 0.0  ;;  %v9885_v31 = vpop.eup %9884  ;;  %v7451_v63 = vadd.f32 %v7450_v59, %v7449_v11  ;;  %v7984_v38 = vmax.f32 %v7964_v22, 0.0  ;;  %v7760_v47 = vrot.slane %v12111_v4, %v11300_v20  ;;  %v9801_v22 = vld [vmem:[%s11925_s29 + $0xb0] ss:$80 sps:$4 sm:$0xff]  }
 0xa01   : > { %8265 = vmatpush1.bf16.xpose.msra.mxu0 %v9786_v16  ;;  %8306 = vmatprep.subr.bf16.mxu1 %v9797_v36  ;;  %v7588_v16 = vrot.slane %v7587_v25, 2  ;;  %v7433_v36 = vadd.f32 %v7432_v8, %v7431_v55  ;;  %v7722_v53 = vmul.f32 %v9885_v31, %v12088_v30  ;;  %v7989_v58 = vmax.f32 %v7969_v13, 0.0  ;;  %v9798_v55 = vld [vmem:[%s11925_s29 + $0x10] ss:$80 sps:$4 sm:$0xff]   ;;  %v9803_v30 = vld [vmem:[%s11925_s29 + $0xb4] ss:$80 sps:$4 sm:$0xff]  }
 0xa02   : > { %8266 = vmatprep.subr.bf16.mxu0 %v9794_v62  ;;  %v9887_v0 = vpop.eup %9886  ;;  %v7684_v62 = vadd.f32 1e-05, %v7664_v12  ;;  %v8006_v43 = vpack.c.bf16 %v7986_v18, %v7986_v18  ;;  %v7528_v39 = vmul.f32 %v12231_v7, %v12231_v7  ;;  %v7442_v56 = vrot.slane %v12234_v52, 4 }
 0xa03   : > { %v7589_v9 = vadd.f32 %v7588_v16, %v7587_v25  ;;  %v7434_v15 = vrot.slane %v7433_v36, 1  ;;  %v7687_v51 = vadd.f32 1e-05, %v7667_v23  ;;  %v7607_v48 = vadd.f32 %v7606_v44, %v7605_v10 }
 0xa04   : > { %v7531_v57 = vmul.f32 %v12237_v46, %v12237_v46  ;;  %v7452_v11 = vrot.slane %v7451_v63, 1  ;;  %9888 = vrsqrt.f32 %v7684_v62  ;;  %v7725_v35 = vmul.f32 %v9887_v0, %v12091_v42 }
 0xa05   : > { %v8004_v28 = vpack.c.bf16 %v7984_v38, %v7984_v38  ;;  %v7772_v54 = vrot.slane %v12111_v4, %v11308_v21  ;;  %v7845_v27 = vmul.f32 %v7760_v47, %v7722_v53  ;;  %v8009_v50 = vpack.c.bf16 %v7989_v58, %v7989_v58 }
 0xa06   : > { %v7883_v37 = vrot.slane %v12122_v1, %v11300_v20  ;;  %v7590_v25 = vrot.slane %v7589_v9, 1  ;;  %v7598_v49 = vrot.slane %v7528_v39, 4  ;;  %v7435_v8 = vadd.f32 %v7434_v15, %v7433_v36  ;;  %v9806_v36 = vld [vmem:[%s11925_s29 + $0x1c] ss:$80 sps:$4 sm:$0xff]  }
 0xa07   : > { %v7443_v32 = vadd.f32 %v7442_v56, %v12234_v52  ;;  %9890 = vrsqrt.f32 %v7687_v51  ;;  %v7608_v42 = vrot.slane %v7607_v48, 1  ;;  %v7453_v19 = vadd.f32 %v7452_v11, %v7451_v63 }
 0xa08   : > { %8307 = vmatpush1.bf16.xpose.msra.mxu1 %v9795_v6  ;;  %v7616_v6 = vrot.slane %v7531_v57, 4  ;;  %v7848_v10 = vmul.f32 %v7772_v54, %v7725_v35  ;;  %v7895_v61 = vrot.slane %v12122_v1, %v11308_v21  ;;  %v7591_v59 = vadd.f32 %v7590_v25, %v7589_v9  ;;  %v12283_v25 = vld [vmem:[%s12119_s14 + $0x8] sm:$0xff] }
 0xa09   : > { %8267 = vmatpush1.bf16.xpose.msra.mxu0 %v9792_v17  ;;  %8344 = vmatprep.subr.bf16.mxu1 %v9800_v14  ;;  %v7599_v17 = vadd.f32 %v7598_v49, %v7528_v39  ;;  %v7490_v14 = vmul.f32 0.125, %v7435_v8  ;;  %v7444_v12 = vrot.slane %v7443_v32, 2  ;;  %v7609_v18 = vadd.f32 %v7608_v42, %v7607_v48 }
 0xa0a   : > { %v7617_v13 = vadd.f32 %v7616_v6, %v7531_v57  ;;  %v7493_v31 = vmul.f32 0.125, %v7453_v19  ;;  %v7968_v16 = vadd.f32 %v7883_v37, %v7845_v27  ;;  %v7971_v23 = vadd.f32 %v7895_v61, %v7848_v10  ;;  %v9804_v57 = vld [vmem:[%s11925_s29 + $0x18] ss:$80 sps:$4 sm:$0xff]  }
 0xa0b   : > { %v7666_v63 = vmul.f32 0.125, %v7591_v59  ;;  %v7600_v0 = vrot.slane %v7599_v17, 2  ;;  %v12260_v62 = vsub.f32 %v12188_v29, %v7490_v14  ;;  %v7445_v38 = vadd.f32 %v7444_v12, %v7443_v32  ;;  %v12269_v29 = vld [vmem:[%s12108_s10 + $0x8] sm:$0xff] }
 0xa0c   : > { %v7669_v53 = vmul.f32 0.125, %v7609_v18  ;;  %v7618_v47 = vrot.slane %v7617_v13, 2  ;;  %v7988_v58 = vmax.f32 %v7968_v16, 0.0  ;;  %v7991_v9 = vmax.f32 %v7971_v23, 0.0  ;;  %v9807_v59 = vld [vmem:[%s11925_s29 + $0xb8] ss:$80 sps:$4 sm:$0xff]  }
 0xa0d   : > { %v7768_v56 = vrot.slane %v12111_v4, %v11371_v34  ;;  %v7601_v51 = vadd.f32 %v7600_v0, %v7599_v17  ;;  %v7530_v48 = vmul.f32 %v12260_v62, %v12260_v62  ;;  %v7780_v27 = vrot.slane %v12269_v29, %v11030_v26 }
 0xa0e   : > { %v9889_v44 = vpop.eup %9888  ;;  %v7689_v11 = vadd.f32 1e-05, %v7669_v53  ;;  %v8011_v4 = vpack.c.bf16 %v7991_v9, %v7991_v9  ;;  %v7891_v37 = vrot.slane %v12122_v1, %v11371_v34  ;;  %v7903_v19 = vrot.slane %v12283_v25, %v11030_v26 }
 0xa0f   : > { %8337 = vmatmul.mubr.bf16.vlgmr.msra.gmra.mrb[28].mxu1 %v8006_v43  ;;  %v12263_v43 = vsub.f32 %v12194_v2, %v7493_v31  ;;  %v7724_v15 = vmul.f32 %v9889_v44, %v12144_v40  ;;  %v7446_v2 = vrot.slane %v7445_v38, 1  ;;  %v9809_v40 = vld [vmem:[%s11925_s29 + $0xbc] ss:$80 sps:$4 sm:$0xff]   ;;  %v7602_v49 = vrot.slane %v7601_v51, 1 }
 0xa10   : > { %8297 = vmatmul.mubr.bf16.vlgmr.msra.gmra.mrb[40].mxu0 %v8004_v28  ;;  %8345 = vmatpush1.bf16.xpose.msra.mxu1 %v9798_v55  ;;  %v7686_v55 = vadd.f32 1e-05, %v7666_v63  ;;  %v8008_v28 = vpack.c.bf16 %v7988_v58, %v7988_v58  ;;  %v7610_v8 = vrot.slane %v7530_v48, 4 }
 0xa11   : > { %8376 = vmatprep.mubr.bf16.mxu1 %v8009_v50  ;;  %8346 = vmatprep.subr.bf16.mxu1 %v9803_v30  ;;  %v9891_v39 = vpop.eup %9890  ;;  %v7619_v30 = vadd.f32 %v7618_v47, %v7617_v13  ;;  %v7533_v35 = vmul.f32 %v12263_v43, %v12263_v43  ;;  %v7847_v50 = vmul.f32 %v7768_v56, %v7724_v15 }
 0xa12   : > { %v7727_v54 = vmul.f32 %v9891_v39, %v12151_v5  ;;  %9892 = vrsqrt.f32 %v7686_v55  ;;  %v7447_v32 = vadd.f32 %v7446_v2, %v7445_v38  ;;  %v7603_v10 = vadd.f32 %v7602_v49, %v7601_v51  ;;  %v9810_v39 = vld [vmem:[%s11925_s29 + $0x20] ss:$80 sps:$4 sm:$0xff]   ;;  %v9815_v51 = vld [vmem:[%s11925_s29 + $0xc4] ss:$80 sps:$4 sm:$0xff]   ;;  %v9818_v49 = vld [vmem:[%s11925_s29 + $0x2c] ss:$80 sps:$4 sm:$0xff]  }
 0xa13   : > { %9894 = vrsqrt.f32 %v7689_v11  ;;  %v7620_v5 = vrot.slane %v7619_v30, 1  ;;  %v7628_v42 = vrot.slane %v7533_v35, 4  ;;  %v7611_v1 = vadd.f32 %v7610_v8, %v7530_v48 }
 0xa14   : > { %v7850_v6 = vmul.f32 %v7780_v27, %v7727_v54  ;;  %v7492_v61 = vmul.f32 0.125, %v7447_v32  ;;  %v7970_v17 = vadd.f32 %v7891_v37, %v7847_v50  ;;  %v7668_v13 = vmul.f32 0.125, %v7603_v10  ;;  %v9813_v27 = vld [vmem:[%s11925_s29 + $0xc0] ss:$80 sps:$4 sm:$0xff]  }
 0xa15   : > { %v7621_v14 = vadd.f32 %v7620_v5, %v7619_v30  ;;  %v7629_v12 = vadd.f32 %v7628_v42, %v7533_v35  ;;  %v7612_v31 = vrot.slane %v7611_v1, 2 }
 0xa16   : > { %v7973_v18 = vadd.f32 %v7903_v19, %v7850_v6  ;;  %v12290_v16 = vsub.f32 %v12234_v52, %v7492_v61  ;;  %v7688_v53 = vadd.f32 1e-05, %v7668_v13  ;;  %v7776_v52 = vrot.slane %v12269_v29, %v11027_v24  ;;  %v9821_v13 = vld [vmem:[%s11925_s29 + $0xcc] ss:$80 sps:$4 sm:$0xff]  }
 0xa17   : > { %v7671_v23 = vmul.f32 0.125, %v7621_v14  ;;  %v7630_v44 = vrot.slane %v7629_v12, 2  ;;  %v7613_v47 = vadd.f32 %v7612_v31, %v7611_v1 }
 0xa18   : > { %8347 = vmatpush1.bf16.xpose.msra.mxu1 %v9801_v22  ;;  %v9812_v22 = vld [vmem:[%s11925_s29 + $0x24] ss:$80 sps:$4 sm:$0xff]   ;;  %v7993_v0 = vmax.f32 %v7973_v18, 0.0  ;;  %v7532_v58 = vmul.f32 %v12290_v16, %v12290_v16  ;;  %9896 = vrsqrt.f32 %v7688_v53  ;;  %v9819_v53 = vld [vmem:[%s11925_s29 + $0xc8] ss:$80 sps:$4 sm:$0xff]  }
 0xa19   : > { %8384 = vmatprep.subr.bf16.mxu1 %v9806_v36  ;;  %v7990_v36 = vmax.f32 %v7970_v17, 0.0  ;;  %v7691_v56 = vadd.f32 1e-05, %v7671_v23  ;;  %v7631_v55 = vadd.f32 %v7630_v44, %v7629_v12  ;;  %v7614_v11 = vrot.slane %v7613_v47, 1  ;;  %v9816_v17 = vld [vmem:[%s11925_s29 + $0x28] ss:$80 sps:$4 sm:$0xff]  }
 0xa1a   : > { %v8013_v2 = vpack.c.bf16 %v7993_v0, %v7993_v0  ;;  %v7622_v30 = vrot.slane %v7532_v58, 4  ;;  %v7784_v12 = vrot.slane %v12269_v29, %v11091_v41  ;;  %v7796_v23 = vrot.slane %v12269_v29, %v11303_v60 }
 0xa1b   : > { %v8010_v9 = vpack.c.bf16 %v7990_v36, %v7990_v36  ;;  %9898 = vrsqrt.f32 %v7691_v56  ;;  %v7632_v35 = vrot.slane %v7631_v55, 1  ;;  %v7615_v54 = vadd.f32 %v7614_v11, %v7613_v47  ;;  %v9827_v11 = vld [vmem:[%s11925_s29 + $0xd4] ss:$80 sps:$4 sm:$0xff]  }
 0xa1c   : > { %v9893_v63 = vpop.eup %9892 }
 0xa1d   : > { %v9895_v38 = vpop.eup %9894  ;;  %v7726_v15 = vmul.f32 %v9893_v63, %v12185_v3  ;;  %v7633_v50 = vadd.f32 %v7632_v35, %v7631_v55  ;;  %v7670_v32 = vmul.f32 0.125, %v7615_v54  ;;  %v7907_v63 = vrot.slane %v12283_v25, %v11091_v41 }
 0xa1e   : > { %v7729_v48 = vmul.f32 %v9895_v38, %v12191_v33  ;;  %v7804_v35 = vrot.slane %v12269_v29, %v11308_v21 }
 0xa1f   : > { %8377 = vmatmul.mubr.bf16.vlgmr.msra.gmra.mrb[28].mxu1 %v8008_v28  ;;  %v7849_v3 = vmul.f32 %v7776_v52, %v7726_v15  ;;  %v7899_v28 = vrot.slane %v12283_v25, %v11027_v24  ;;  %v7673_v42 = vmul.f32 0.125, %v7633_v50  ;;  %v7690_v61 = vadd.f32 1e-05, %v7670_v32 }
 0xa20   : > { %8385 = vmatpush1.bf16.xpose.msra.mxu1 %v9804_v57  ;;  %8416 = vmatprep.mubr.bf16.mxu1 %v8011_v4  ;;  %v7788_v57 = vrot.slane %v12269_v29, %v11094_v45  ;;  %v7623_v4 = vadd.f32 %v7622_v30, %v7532_v58  ;;  %v9824_v58 = vld [vmem:[%s11925_s29 + $0x34] ss:$80 sps:$4 sm:$0xff]  }
 0xa21   : > { %8386 = vmatprep.subr.bf16.mxu1 %v9809_v40  ;;  %v7911_v40 = vrot.slane %v12283_v25, %v11094_v45  ;;  %v7972_v37 = vadd.f32 %v7899_v28, %v7849_v3  ;;  %9900 = vrsqrt.f32 %v7690_v61  ;;  %v9836_v61 = vld [vmem:[%s11925_s29 + $0x44] ss:$80 sps:$4 sm:$0xff]  }
 0xa22   : > { %v7852_v33 = vmul.f32 %v7788_v57, %v7729_v48  ;;  %v7624_v5 = vrot.slane %v7623_v4, 2  ;;  %v9897_v19 = vpop.eup %9896  ;;  %v9822_v48 = vld [vmem:[%s11925_s29 + $0x30] ss:$80 sps:$4 sm:$0xff]  }
 0xa23   : > { %v7992_v6 = vmax.f32 %v7972_v37, 0.0  ;;  %v7728_v14 = vmul.f32 %v9897_v19, %v12231_v7  ;;  %v7923_v19 = vrot.slane %v12283_v25, %v11371_v34 }
 0xa24   : > { %v7975_v8 = vadd.f32 %v7911_v40, %v7852_v33  ;;  %v7927_v40 = vrot.slane %v12283_v25, %v11308_v21  ;;  %v9833_v21 = vld [vmem:[%s11925_s29 + $0xdc] ss:$80 sps:$4 sm:$0xff]  }
 0xa25   : > { %v9899_v1 = vpop.eup %9898  ;;  %v8012_v18 = vpack.c.bf16 %v7992_v6, %v7992_v6  ;;  %v7851_v7 = vmul.f32 %v7784_v12, %v7728_v14  ;;  %v9839_v14 = vld [vmem:[%s11925_s29 + $0xe4] ss:$80 sps:$4 sm:$0xff]   ;;  %v9842_v12 = vld [vmem:[%s11925_s29 + $0x4c] ss:$80 sps:$4 sm:$0xff]  }
 0xa26   : > { %v7995_v10 = vmax.f32 %v7975_v8, 0.0  ;;  %v7731_v31 = vmul.f32 %v9899_v1, %v12237_v46  ;;  %v7919_v46 = vrot.slane %v12283_v25, %v11303_v60  ;;  %v7792_v60 = vrot.slane %v12269_v29, %v11300_v20  ;;  %v9828_v8 = vld [vmem:[%s11925_s29 + $0x38] ss:$80 sps:$4 sm:$0xff]  }
 0xa27   : > { %v7974_v47 = vadd.f32 %v7907_v63, %v7851_v7 }
 0xa28   : > { %8387 = vmatpush1.bf16.xpose.msra.mxu1 %v9807_v59  ;;  %v7625_v59 = vadd.f32 %v7624_v5, %v7623_v4  ;;  %v8015_v36 = vpack.c.bf16 %v7995_v10, %v7995_v10  ;;  %v7854_v0 = vmul.f32 %v7796_v23, %v7731_v31  ;;  %v9830_v4 = vld [vmem:[%s11925_s29 + $0x3c] ss:$80 sps:$4 sm:$0xff]  }
 0xa29   : > { %8424 = vmatprep.subr.bf16.mxu1 %v9812_v22  ;;  %v7693_v22 = vadd.f32 1e-05, %v7673_v42  ;;  %v7994_v15 = vmax.f32 %v7974_v47, 0.0 }
 0xa2a   : > { %v7626_v44 = vrot.slane %v7625_v59, 1 }
 0xa2b   : > { %9902 = vrsqrt.f32 %v7693_v22  ;;  %v9901_v52 = vpop.eup %9900  ;;  %v8014_v57 = vpack.c.bf16 %v7994_v15, %v7994_v15  ;;  %v7228_v22 = vld [vmem:[%s11937_s8 + $0x10] sm:$0xf] }
 0xa2c   : > { %v7627_v38 = vadd.f32 %v7626_v44, %v7625_v59  ;;  %v9834_v59 = vld [vmem:[%s11925_s29 + $0x40] ss:$80 sps:$4 sm:$0xff]  }
 0xa2f   : > { %8417 = vmatmul.mubr.bf16.vlgmr.msra.gmra.mrb[28].mxu1 %v8010_v9  ;;  %v7977_v9 = vadd.f32 %v7919_v46, %v7854_v0 }
 0xa30   : > { %8425 = vmatpush1.bf16.xpose.msra.mxu1 %v9810_v39  ;;  %8456 = vmatprep.mubr.bf16.mxu1 %v8013_v2  ;;  %v7672_v39 = vmul.f32 0.125, %v7627_v38  ;;  %v7730_v2 = vmul.f32 %v9901_v52, %v12260_v62  ;;  %v7915_v62 = vrot.slane %v12283_v25, %v11300_v20  ;;  %v7800_v20 = vrot.slane %v12269_v29, %v11371_v34 }
 0xa31   : > { %8426 = vmatprep.subr.bf16.mxu1 %v9815_v51  ;;  %v7997_v56 = vmax.f32 %v7977_v9, 0.0  ;;  %v7299_v34 = vrot.slane %v7228_v22, %v11027_v24  ;;  %v7307_v25 = vrot.slane %v7228_v22, %v11091_v41 }
 0xa32   : > { %v7692_v51 = vadd.f32 1e-05, %v7672_v39  ;;  %v7853_v28 = vmul.f32 %v7792_v60, %v7730_v2 }
 0xa33   : > { %v8017_v3 = vpack.c.bf16 %v7997_v56, %v7997_v56 }
 0xa34   : > { %9904 = vrsqrt.f32 %v7692_v51  ;;  %v7976_v54 = vadd.f32 %v7915_v62, %v7853_v28 }
 0xa35   : > { %v9903_v55 = vpop.eup %9902 }
 0xa36   : > { %v7733_v30 = vmul.f32 %v9903_v55, %v12263_v43  ;;  %v9825_v43 = vld [vmem:[%s11925_s29 + $0xd0] ss:$80 sps:$4 sm:$0xff]   ;;  %v7996_v50 = vmax.f32 %v7976_v54, 0.0 }
 0xa38   : > { %8427 = vmatpush1.bf16.xpose.msra.mxu1 %v9813_v27  ;;  %v7856_v33 = vmul.f32 %v7804_v35, %v7733_v30  ;;  %v8016_v5 = vpack.c.bf16 %v7996_v50, %v7996_v50 }
 0xa39   : > { %8464 = vmatprep.subr.bf16.mxu1 %v9818_v49 }
 0xa3a   : > { %v7979_v27 = vadd.f32 %v7927_v40, %v7856_v33 }
 0xa3c   : > { %v7999_v49 = vmax.f32 %v7979_v27, 0.0 }
 0xa3e   : > { %v9905_v37 = vpop.eup %9904  ;;  %v8019_v42 = vpack.c.bf16 %v7999_v49, %v7999_v49 }
 0xa3f   : > { %8457 = vmatmul.mubr.bf16.vlgmr.msra.gmra.mrb[28].mxu1 %v8012_v18  ;;  %v7732_v32 = vmul.f32 %v9905_v37, %v12290_v16  ;;  %v9831_v16 = vld [vmem:[%s11925_s29 + $0xd8] ss:$80 sps:$4 sm:$0xff]   ;;  %v7303_v18 = vrot.slane %v7228_v22, %v11030_v26 }
 0xa40   : > { %8465 = vmatpush1.bf16.xpose.msra.mxu1 %v9816_v17  ;;  %8496 = vmatprep.mubr.bf16.mxu1 %v8015_v36  ;;  %v9837_v17 = vld [vmem:[%s11925_s29 + $0xe0] ss:$80 sps:$4 sm:$0xff]  }
 0xa41   : > { %8466 = vmatprep.subr.bf16.mxu1 %v9821_v13  ;;  %v7855_v6 = vmul.f32 %v7800_v20, %v7732_v32  ;;  %v7311_v13 = vrot.slane %v7228_v22, %v11094_v45 }
 0xa43   : > { %v7978_v10 = vadd.f32 %v7923_v19, %v7855_v6 }
 0xa45   : > { %v7998_v29 = vmax.f32 %v7978_v10, 0.0 }
 0xa47   : > { %v8018_v1 = vpack.c.bf16 %v7998_v29, %v7998_v29 }
 0xa48   : > { %8467 = vmatpush1.bf16.xpose.msra.mxu1 %v9819_v53 }
 0xa49   : > { %8504 = vmatprep.subr.bf16.mxu1 %v9824_v58 }
 0xa4f   : > { %8497 = vmatmul.mubr.bf16.vlgmr.msra.gmra.mrb[28].mxu1 %v8014_v57 }
 0xa50   : > { %8505 = vmatpush1.bf16.xpose.msra.mxu1 %v9822_v48  ;;  %8536 = vmatprep.mubr.bf16.mxu1 %v8017_v3 }
 0xa51   : > { %8506 = vmatprep.subr.bf16.mxu1 %v9827_v11 }
 0xa58   : > { %8507 = vmatpush1.bf16.xpose.msra.mxu1 %v9825_v43 }
 0xa59   : > { %8544 = vmatprep.subr.bf16.mxu1 %v9830_v4 }
 0xa5f   : > { %8537 = vmatmul.mubr.bf16.vlgmr.msra.gmra.mrb[28].mxu1 %v8016_v5 }
 0xa60   : > { %8545 = vmatpush1.bf16.xpose.msra.mxu1 %v9828_v8  ;;  %8576 = vmatprep.mubr.bf16.mxu1 %v8019_v42 }
 0xa61   : > { %8546 = vmatprep.subr.bf16.mxu1 %v9833_v21 }
 0xa68   : > { %8547 = vmatpush1.bf16.xpose.msra.mxu1 %v9831_v16 }
 0xa69   : > { %8584 = vmatprep.subr.bf16.mxu1 %v9836_v61 }
 0xa6f   : > { %8577 = vmatmul.mubr.bf16.vlgmr.msra.gmra.mrb[28].mxu1 %v8018_v1 }
 0xa70   : > { %8585 = vmatpush1.bf16.xpose.msra.mxu1 %v9834_v59 }
 0xa71   : > { %8586 = vmatprep.subr.bf16.mxu1 %v9839_v14 }
 0xa78   : > { %8587 = vmatpush1.bf16.xpose.msra.mxu1 %v9837_v17 }
 0xa79   : > { %8624 = vmatprep.subr.bf16.mxu1 %v9842_v12 }
 0xacd   : > { %v7055_v31 = vpop.f32.mrb[24].mxu1 }
 0xace   : > { %v7348_v36 = vmul.f32 %v7299_v34, %v7055_v31  ;;  %v7219_v23 = vpop.f32.mrb[36].mxu0  ;;  %v7057_v44 = vpop.f32.mrb[25].mxu1 }
 0xacf   : > { %v7350_v7 = vmul.f32 %v7307_v25, %v7219_v23  ;;  %v7349_v63 = vmul.f32 %v7303_v18, %v7057_v44  ;;  %v7221_v0 = vpop.f32.mrb[37].mxu0  ;;  %v7059_v46 = vpop.f32.mrb[26].mxu1 }
 0xad0   : > { %v7454_v38 = vrot.slane %v7348_v36, 4  ;;  %v7351_v53 = vmul.f32 %v7311_v13, %v7221_v0  ;;  %v7223_v47 = vpop.f32.mrb[38].mxu0  ;;  %v7060_v58 = vpop.f32.mrb[27].mxu1 }
 0xad1   : > { %v7466_v9 = vrot.slane %v7350_v7, 4  ;;  %v7460_v39 = vrot.slane %v7349_v63, 4  ;;  %v7224_v15 = vpop.f32.mrb[39].mxu0 }
 0xad2   : > { %v7455_v52 = vadd.f32 %v7454_v38, %v7348_v36  ;;  %v7472_v56 = vrot.slane %v7351_v53, 4 }
 0xad3   : > { %v7467_v55 = vadd.f32 %v7466_v9, %v7350_v7  ;;  %v7461_v51 = vadd.f32 %v7460_v39, %v7349_v63 }
 0xad4   : > { %v7456_v48 = vrot.slane %v7455_v52, 2  ;;  %v7473_v2 = vadd.f32 %v7472_v56, %v7351_v53 }
 0xad5   : > { %v7468_v60 = vrot.slane %v7467_v55, 2  ;;  %v7462_v57 = vrot.slane %v7461_v51, 2 }
 0xad6   : > { %v7457_v11 = vadd.f32 %v7456_v48, %v7455_v52  ;;  %v7474_v30 = vrot.slane %v7473_v2, 2 }
 0xad7   : > { %v7469_v3 = vadd.f32 %v7468_v60, %v7467_v55  ;;  %v7463_v35 = vadd.f32 %v7462_v57, %v7461_v51 }
 0xad8   : > { %v7458_v28 = vrot.slane %v7457_v11, 1  ;;  %v7475_v62 = vadd.f32 %v7474_v30, %v7473_v2  ;;  %v7354_v30 = vld [vmem:[%s12108_s10 + $0x10] sm:$0xf] }
 0xad9   : > { %v7470_v33 = vrot.slane %v7469_v3, 1  ;;  %v7464_v40 = vrot.slane %v7463_v35, 1 }
 0xada   : > { %v7459_v43 = vadd.f32 %v7458_v28, %v7457_v11  ;;  %v7476_v54 = vrot.slane %v7475_v62, 1 }
 0xadb   : > { %v7471_v4 = vadd.f32 %v7470_v33, %v7469_v3  ;;  %v7465_v27 = vadd.f32 %v7464_v40, %v7463_v35  ;;  %v7357_v3 = vld [vmem:[%s12119_s14 + $0x10] sm:$0xf]  ;;  %v7808_v35 = vrot.slane %v7354_v30, %v11027_v24  ;;  %v7812_v33 = vrot.slane %v7354_v30, %v11030_v26 }
 0xadc   : > { %v7494_v50 = vmul.f32 0.125, %v7459_v43  ;;  %v7477_v37 = vadd.f32 %v7476_v54, %v7475_v62  ;;  %v7931_v40 = vrot.slane %v7357_v3, %v11027_v24  ;;  %v7820_v54 = vrot.slane %v7354_v30, %v11094_v45 }
 0xadd   : > { %v7496_v49 = vmul.f32 0.125, %v7471_v4  ;;  %v7495_v8 = vmul.f32 0.125, %v7465_v27 }
 0xade   : > { %v7514_v32 = vsub.f32 %v7348_v36, %v7494_v50  ;;  %v7497_v20 = vmul.f32 0.125, %v7477_v37  ;;  %v7935_v37 = vrot.slane %v7357_v3, %v11030_v26  ;;  %v7816_v26 = vrot.slane %v7354_v30, %v11091_v41 }
 0xadf   : > { %v12354_v5 = vsub.f32 %v7350_v7, %v7496_v49  ;;  %v7515_v21 = vsub.f32 %v7349_v63, %v7495_v8  ;;  %v7943_v8 = vrot.slane %v7357_v3, %v11094_v45 }
 0xae0   : > { %v7534_v42 = vmul.f32 %v7514_v32, %v7514_v32  ;;  %v7517_v6 = vsub.f32 %v7351_v53, %v7497_v20 }
 0xae1   : > { %v7536_v19 = vmul.f32 %v12354_v5, %v12354_v5  ;;  %v7535_v16 = vmul.f32 %v7515_v21, %v7515_v21 }
 0xae2   : > { %v7634_v10 = vrot.slane %v7534_v42, 4  ;;  %v7537_v29 = vmul.f32 %v7517_v6, %v7517_v6 }
 0xae3   : > { %v7646_v1 = vrot.slane %v7536_v19, 4  ;;  %v7640_v61 = vrot.slane %v7535_v16, 4  ;;  %v12358_v59 = vpop.f32.mrb[40].mxu0 }
 0xae4   : > { %v7635_v17 = vadd.f32 %v7634_v10, %v7534_v42  ;;  %v7652_v14 = vrot.slane %v7537_v29, 4  ;;  %v8300_v12 = vpop.f32.mrb[41].mxu0 }
 0xae5   : > { %v7647_v22 = vadd.f32 %v7646_v1, %v7536_v19  ;;  %v7641_v34 = vadd.f32 %v7640_v61, %v7535_v16  ;;  %v8301_v25 = vpop.f32.mrb[42].mxu0 }
 0xae6   : > { %v7636_v18 = vrot.slane %v7635_v17, 2  ;;  %v7653_v13 = vadd.f32 %v7652_v14, %v7537_v29  ;;  %v8302_v31 = vpop.f32.mrb[43].mxu0  ;;  %v9845_v14 = vld [vmem:[%s11925_s29 + $0xec] ss:$80 sps:$4 sm:$0xff]  }
 0xae7   : > { %v7648_v36 = vrot.slane %v7647_v22, 2  ;;  %v7642_v23 = vrot.slane %v7641_v34, 2 }
 0xae8   : > { %v7637_v44 = vadd.f32 %v7636_v18, %v7635_v17  ;;  %v7654_v7 = vrot.slane %v7653_v13, 2  ;;  %v9840_v17 = vld [vmem:[%s11925_s29 + $0x48] ss:$80 sps:$4 sm:$0xff]  }
 0xae9   : > { %v7649_v63 = vadd.f32 %v7648_v36, %v7647_v22  ;;  %v7643_v0 = vadd.f32 %v7642_v23, %v7641_v34  ;;  %v7939_v22 = vrot.slane %v7357_v3, %v11091_v41  ;;  %v9843_v34 = vld [vmem:[%s11925_s29 + $0xe8] ss:$80 sps:$4 sm:$0xff]  }
 0xaea   : > { %v7638_v46 = vrot.slane %v7637_v44, 1  ;;  %v7655_v38 = vadd.f32 %v7654_v7, %v7653_v13 }
 0xaeb   : > { %v7650_v53 = vrot.slane %v7649_v63, 1  ;;  %v7644_v47 = vrot.slane %v7643_v0, 1 }
 0xaec   : > { %v7639_v58 = vadd.f32 %v7638_v46, %v7637_v44  ;;  %v7656_v9 = vrot.slane %v7655_v38, 1 }
 0xaed   : > { %v7645_v39 = vadd.f32 %v7644_v47, %v7643_v0  ;;  %v7651_v56 = vadd.f32 %v7650_v53, %v7649_v63 }
 0xaee   : > { %v7674_v15 = vmul.f32 0.125, %v7639_v58  ;;  %v7657_v52 = vadd.f32 %v7656_v9, %v7655_v38 }
 0xaef   : > { %v7675_v55 = vmul.f32 0.125, %v7645_v39  ;;  %v7676_v57 = vmul.f32 0.125, %v7651_v56 }
 0xaf0   : > { %v7694_v51 = vadd.f32 1e-05, %v7674_v15  ;;  %v7677_v48 = vmul.f32 0.125, %v7657_v52 }
 0xaf1   : > { %v7695_v2 = vadd.f32 1e-05, %v7675_v55  ;;  %v7696_v11 = vadd.f32 1e-05, %v7676_v57 }
 0xaf2   : > { %9906 = vrsqrt.f32 %v7694_v51  ;;  %v7697_v60 = vadd.f32 1e-05, %v7677_v48 }
 0xaf3   : > { %9908 = vrsqrt.f32 %v7695_v2 }
 0xaf4   : > { %9910 = vrsqrt.f32 %v7697_v60 }
 0xaf5   : > { %9912 = vrsqrt.f32 %v7696_v11 }
 0xafc   : > { %v9907_v28 = vpop.eup %9906 }
 0xafd   : > { %v7734_v62 = vmul.f32 %v9907_v28, %v7514_v32  ;;  %v9909_v43 = vpop.eup %9908 }
 0xafe   : > { %v9911_v4 = vpop.eup %9910  ;;  %v7735_v50 = vmul.f32 %v9909_v43, %v7515_v21 }
 0xaff   : > { %v7857_v27 = vmul.f32 %v7808_v35, %v7734_v62  ;;  %v7737_v49 = vmul.f32 %v9911_v4, %v7517_v6  ;;  %v9913_v24 = vpop.eup %9912 }
 0xb00   : > { %v7858_v20 = vmul.f32 %v7812_v33, %v7735_v50  ;;  %v7736_v21 = vmul.f32 %v9913_v24, %v12354_v5 }
 0xb01   : > { %v7980_v42 = vadd.f32 %v7931_v40, %v7857_v27  ;;  %v7860_v32 = vmul.f32 %v7820_v54, %v7737_v49 }
 0xb02   : > { %v7981_v19 = vadd.f32 %v7935_v37, %v7858_v20  ;;  %v7859_v12 = vmul.f32 %v7816_v26, %v7736_v21 }
 0xb03   : > { %v8000_v16 = vmax.f32 %v7980_v42, 0.0  ;;  %v7983_v10 = vadd.f32 %v7943_v8, %v7860_v32 }
 0xb04   : > { %v8001_v29 = vmax.f32 %v7981_v19, 0.0  ;;  %v7982_v25 = vadd.f32 %v7939_v22, %v7859_v12 }
 0xb05   : > { %v8003_v1 = vmax.f32 %v7983_v10, 0.0  ;;  %v8020_v6 = vpack.c.bf16 %v8000_v16, %v8000_v16 }
 0xb06   : > { %v8021_v61 = vpack.c.bf16 %v8001_v29, %v8001_v29  ;;  %v8002_v5 = vmax.f32 %v7982_v25, 0.0 }
 0xb07   : > { %v8023_v45 = vpack.c.bf16 %v8003_v1, %v8003_v1 }
 0xb08   : > { %8616 = vmatprep.mubr.bf16.mxu1 %v8021_v61  ;;  %v8022_v18 = vpack.c.bf16 %v8002_v5, %v8002_v5 }
 0xb09   : > { %8617 = vmatmul.mubr.bf16.vlgmr.msra.gmra.mrb[28].mxu1 %v8020_v6 }
 0xb0a   : > { %8625 = vmatpush1.bf16.xpose.msra.mxu1 %v9840_v17  ;;  %8656 = vmatprep.mubr.bf16.mxu1 %v8023_v45 }
 0xb0b   : > { %8626 = vmatprep.subr.bf16.mxu1 %v9845_v14 }
 0xb12   : > { %8627 = vmatpush1.bf16.xpose.msra.mxu1 %v9843_v34 }
 0xb19   : > { %8657 = vmatmul.mubr.bf16.vlgmr.msra.gmra.mrb[28].mxu1 %v8022_v18 }
 0xbec   : > { %v8658_v13 = vpop.f32.mrb[28].mxu1 }
 0xbed   : > { %v9328_v31 = vadd.f32 %v8658_v13, %v12358_v59  ;;  %v8660_v36 = vpop.f32.mrb[29].mxu1 }
 0xbee   : > { %v8661_v41 = vpop.f32.mrb[30].mxu1 }
 0xbef   : > { %v8662_v23 = vpop.f32.mrb[31].mxu1  ;;  %8664 = vst.msk [vmem:[%s783_s30] sm:$0xff] %vm816_vm0, %v9328_v31 }
 0xbf0   : > { %10359 = shalt.err (!%p10356_p12)
}
 0xbf1   : > { %s10360_s25 = scalar_lea.hbm %s12380_s28, 128  ;;  %s10364_s8 = scalar_lea.hbm %s12546_s16, 256 }
 0xbf2   : > { %p10361_p11 = scmp.ne.s32.totalorder %s12380_s28, %s10360_s25  ;;  %p10365_p7 = scmp.lt.u32.totalorder %s12380_s28, %s12546_s16 }
 0xbf3   : > { %p10366_p8 = scmp.lt.u32.totalorder %s10364_s8, %s10360_s25  ;;  %p10368_p5 = scmp.lt.u32.totalorder %s10360_s25, %s12380_s28 }
 0xbf4   : > { %p10362_p6 = pnand %p10361_p11, %p12547_p2 }
 0xbf5   : > { %p10367_p4 = por %p10366_p8, %p10365_p7 }
 0xbf6   : > { %p10363_p3 = pneg %p10362_p6 }
 0xbf7   : > { %p10369_p1 = por %p10368_p5, %p10367_p4 }
 0xbf9   : > { %p10370_p13 = pnand %p10369_p1, %p10363_p3 }
 0xbfb   : > { %10373 = shalt.err (!%p10370_p13)
}
 0xbfc   : > { %9555 = dma.vmem_to_hbm [thread:$0]  (%p12547_p2), %s12382_s27, 128, %s12380_s28, %s8666_s18  }
 0xbfd PF: > { %s12548_s0 = sld [smem:[#allocation33_spill]]  ;;  %s12549_s21 = sld [smem:[#allocation43_spill]] }
 0xbfe   : > { %s12550_s30 = sld [smem:[#allocation36_spill]] }
 0xc03   : > { %s8691_s22 = sand.u32 1, %s12548_s0   ;;  %p12551_p0 = scmp.ne.s32.totalorder %s12549_s21, 0 }
 0xc04   : > { %p12552_p9 = scmp.ge.s32.totalorder %s12550_s30, 2  ;;  %s8692_s23 = scalar_lea.sflag [#allocation4], %s8691_s22 }
 0xc06   : > { %p9605_p10 = pnand %p12552_p9, %p12551_p0 }
 0xc08   : > { %10419 = dma.done.wait (!%p9605_p10), %s8692_s23, 128  }
 0xc09   : > { %10421 = vsyncadd (!%p9605_p10), %s8692_s23, 4294967168  ;;  %s12553_s21 = sld [smem:[#allocation39_spill]]  ;;  %s12554_s18 = sld [smem:[#allocation34_spill]] }
 0xc0a   : > { %s12555_s19 = sld [smem:[#allocation35_spill]]  ;;  %s12556_s20 = sld [smem:[#allocation40_spill]] }
 0xc0f   : > { %p31_p12 = scmp.ge.s32.totalorder %s12553_s21, 4  }
 0xc11   :  { %33 = sbr.rel (!%p31_p12) target bundleno = 18 (0x12), region = 208 }
 0xc18   :  { %8697 = vsyncpa [#allocation3], 1 }
 0xc19   :  { %8699 = vsyncpa [#allocation3 + $0x1], 1 }
 0xc1a   :  { %8700 = vsyncpa [#allocation6], 1 }
 0xc1b   :  { %8701 = vsyncpa [#allocation9], 1 }
 0xc1c   :  { %8702 = vsyncpa [#allocation12], 1 }
 0xc1d   :  { %8703 = vsyncpa [#allocation15], 1 }
 0xc1e   :  { %8704 = vsyncpa [#allocation18], 1 }
 0xc1f   :  { %8705 = vsyncpa [#allocation4], 1 }
 0xc20   :  { %8707 = vsyncpa [#allocation4 + $0x1], 1 }

</bundles_post_ra>
